<compile_context>
chip_gen: v7x
topology: tpu7x:2x2x1
jax: 0.10.0
libtpu: 0.0.40
codegen_flags: <defaults>
</compile_context>

<pallas_src>
import functools

import jax
import jax.numpy as jnp
from jax.experimental import pallas as pl
from jax.experimental.pallas import tpu as pltpu

BN_EPS = 1e-5
LRELU_SLOPE = 0.2
ROW_TILE = 512                       # flattened (n*ho*wo) rows per grid step
VMEM_LIMIT = 32 * 1024 * 1024        # v7x-safe scoped-VMEM budget


def _round_up(v, m):
    return (v + m - 1) // m * m


# ---------------------------------------------------------------------------
# Kernel A: row-tiled GEMM + bias (+ LeakyReLU).  Non-BN layers (d1, final).
#   x_ref: (TR, K) bf16   w_ref: (K, Cout) bf16   b_ref: (1, Cout) f32
#   o_ref: (TR, Cout)     bf16 for hidden layers, f32 for the head
# ---------------------------------------------------------------------------
def _gemm_bias_act_kernel(x_ref, w_ref, b_ref, o_ref, *, activation):
    y = jnp.dot(x_ref[...], w_ref[...], preferred_element_type=jnp.float32)
    y = y + b_ref[...]
    if activation:
        y = jnp.where(y >= 0, y, LRELU_SLOPE * y)
    o_ref[...] = y.astype(o_ref.dtype)


# ---------------------------------------------------------------------------
# Kernel B: row-tiled GEMM + per-tile BN partial statistics (BN pass 1).
#   y_ref:  (TR, Cout) f32 raw conv output (bias-less)
#   st_ref: (2, Cout)  f32 rows = (sum(y), sum(y*y)) over this tile
# Zero-padded rows contribute 0 to both sums, so no mask is needed.
# ---------------------------------------------------------------------------
def _gemm_stats_kernel(x_ref, w_ref, y_ref, st_ref):
    y = jnp.dot(x_ref[...], w_ref[...], preferred_element_type=jnp.float32)
    y_ref[...] = y
    st_ref[0:1, :] = jnp.sum(y, axis=0, keepdims=True)
    st_ref[1:2, :] = jnp.sum(y * y, axis=0, keepdims=True)


# ---------------------------------------------------------------------------
# Kernel C: row-tiled BN-apply (per-channel affine) + LeakyReLU (BN pass 2).
#   y_ref: (TR, Cout) f32   ss_ref: (2, Cout) f32 rows = (scale, shift)
#   o_ref: (TR, Cout) bf16
# ---------------------------------------------------------------------------
def _bn_act_kernel(y_ref, ss_ref, o_ref, *, activation):
    y = y_ref[...] * ss_ref[0:1, :] + ss_ref[1:2, :]
    if activation:
        y = jnp.where(y >= 0, y, LRELU_SLOPE * y)
    o_ref[...] = y.astype(o_ref.dtype)


# ---------------------------------------------------------------------------
# Layer wrapper: layout glue (pad / space-to-depth / tap fold) + kernels.
# x is NHWC (f32 or bf16), w is (KH, KW, Cin, Cout) HWIO.
# ---------------------------------------------------------------------------
def _conv_layer(x, w, b, gamma, beta, *, stride, padding, batchnorm,
                activation, out_dtype):
    N, H, W, Cin = x.shape
    KH, KW, _, Cout = w.shape
    Ho = (H + 2 * padding - KH) // stride + 1
    Wo = (W + 2 * padding - KW) // stride + 1

    xb = x.astype(jnp.bfloat16)
    wb = w.astype(jnp.bfloat16)
    if padding:
        xb = jnp.pad(xb, ((0, 0), (padding, padding), (padding, padding), (0, 0)))
    Hp, Wp = H + 2 * padding, W + 2 * padding

    if stride == 2:
        # Space-to-depth: stride-2 KHxKW conv == stride-1 (KH/2)x(KW/2) conv
        # over a (Hp/2, Wp/2, 4*Cin) input with regrouped weights.
        kbh, kbw = KH // 2, KW // 2
        H2, W2, Ce = Hp // 2, Wp // 2, 4 * Cin
        xe = xb.reshape(N, H2, 2, W2, 2, Cin).transpose(0, 1, 3, 2, 4, 5)
        xe = xe.reshape(N, H2, W2, Ce)
        we = wb.reshape(kbh, 2, kbw, 2, Cin, Cout).transpose(0, 2, 1, 3, 4, 5)
        we = we.reshape(kbh * kbw, Ce, Cout)
    else:
        kbh, kbw = KH, KW
        H2, W2, Ce = Hp, Wp, Cin
        xe = xb
        we = wb.reshape(kbh * kbw, Ce, Cout)

    # Fold all taps into the contraction dimension: kernels become plain
    # row-tiled GEMMs with no dynamic / unaligned tap slices.
    K = kbh * kbw * Ce
    patches = [xe[:, bh:bh + Ho, bw:bw + Wo, :]
               for bh in range(kbh) for bw in range(kbw)]
    R = N * Ho * Wo
    x_cols = jnp.concatenate(patches, axis=-1).reshape(R, K)
    w_mat = we.reshape(K, Cout)

    TR = min(ROW_TILE, _round_up(R, 8))
    nt = -(-R // TR)
    R_pad = nt * TR
    if R_pad != R:
        x_cols = jnp.pad(x_cols, ((0, R_pad - R), (0, 0)))

    cparams = pltpu.CompilerParams(
        dimension_semantics=("parallel",),    # independent row tiles -> both TCs on v7x
        vmem_limit_bytes=VMEM_LIMIT,
    )
    x_spec = pl.BlockSpec((TR, K), lambda i: (i, 0))
    w_spec = pl.BlockSpec((K, Cout), lambda i: (0, 0))   # grid-invariant, fetched once
    row_spec = pl.BlockSpec((TR, Cout), lambda i: (i, 0))

    if not batchnorm:
        b2 = b.astype(jnp.float32).reshape(1, Cout)
        out = pl.pallas_call(
            functools.partial(_gemm_bias_act_kernel, activation=activation),
            out_shape=jax.ShapeDtypeStruct((R_pad, Cout), out_dtype),
            grid_spec=pltpu.PrefetchScalarGridSpec(
                num_scalar_prefetch=0, grid=(nt,),
                in_specs=[x_spec, w_spec,
                          pl.BlockSpec((1, Cout), lambda i: (0, 0))],
                out_specs=row_spec),
            compiler_params=cparams,
        )(x_cols, w_mat, b2)
    else:
        # Pass 1: conv + per-tile partial stats.
        conv_out, tile_stats = pl.pallas_call(
            _gemm_stats_kernel,
            out_shape=(jax.ShapeDtypeStruct((R_pad, Cout), jnp.float32),
                       jax.ShapeDtypeStruct((nt, 2, Cout), jnp.float32)),
            grid_spec=pltpu.PrefetchScalarGridSpec(
                num_scalar_prefetch=0, grid=(nt,),
                in_specs=[x_spec, w_spec],
                out_specs=(pl.BlockSpec((TR, Cout), lambda i: (i, 0)),
                           pl.BlockSpec((None, 2, Cout), lambda i: (i, 0, 0)))),
            compiler_params=cparams,
        )(x_cols, w_mat)

        # Tiny finalize (XLA): reduce per-tile stats, fold gamma/beta into a
        # per-channel scale & shift.  Conv bias cancels under BN and is skipped.
        s = jnp.sum(tile_stats, axis=0)                       # (2, Cout)
        inv_n = 1.0 / float(R)                                # real rows only
        mean = s[0] * inv_n
        var = jnp.maximum(s[1] * inv_n - mean * mean, 0.0)
        rstd = jax.lax.rsqrt(var + BN_EPS)
        scale = gamma.astype(jnp.float32) * rstd
        shift = beta.astype(jnp.float32) - mean * scale
        ss = jnp.stack([scale, shift], axis=0)                # (2, Cout)

        # Pass 2: row-tiled affine + LeakyReLU, bf16 writeback.
        out = pl.pallas_call(
            functools.partial(_bn_act_kernel, activation=activation),
            out_shape=jax.ShapeDtypeStruct((R_pad, Cout), out_dtype),
            grid_spec=pltpu.PrefetchScalarGridSpec(
                num_scalar_prefetch=0, grid=(nt,),
                in_specs=[row_spec, pl.BlockSpec((2, Cout), lambda i: (0, 0))],
                out_specs=row_spec),
            compiler_params=cparams,
        )(conv_out, ss)

    return out[:R].reshape(N, Ho, Wo, Cout)


# ---------------------------------------------------------------------------
# PatchGAN
# ---------------------------------------------------------------------------
LAYER_CFG = [
    # (name, cin, cout, k, stride, pad, batchnorm, activation)
    ("d1", 8, 64, 4, 2, 1, False, True),
    ("d2", 64, 128, 4, 2, 1, True, True),
    ("d3", 128, 256, 4, 2, 1, True, True),
    ("d4", 256, 512, 4, 1, 1, True, True),
    ("final", 512, 1, 2, 1, 0, False, False),
]


def init_params(key):
    params = {}
    for name, cin, cout, k, *_ in LAYER_CFG:
        key, kw_, kb_, kg_, kt_ = jax.random.split(key, 5)
        params[name] = dict(
            w=0.1 * jax.random.normal(kw_, (k, k, cin, cout), jnp.float32),
            b=0.1 * jax.random.normal(kb_, (cout,), jnp.float32),
            gamma=1.0 + 0.1 * jax.random.normal(kg_, (cout,), jnp.float32),
            beta=0.1 * jax.random.normal(kt_, (cout,), jnp.float32),
        )
    return params


def patchgan_forward(params, x_nchw, y_nchw):
    # torch.cat([x, y], axis=1) on NCHW == concat on channels.
    h = jnp.concatenate([x_nchw, y_nchw], axis=1)
    h = jnp.transpose(h, (0, 2, 3, 1))                      # NCHW -> NHWC
    last = LAYER_CFG[-1][0]
    for name, _, _, _, stride, pad, bn, act in LAYER_CFG:
        p = params[name]
        out_dtype = jnp.float32 if name == last else jnp.bfloat16
        h = _conv_layer(h, p["w"], p["b"], p["gamma"], p["beta"],
                        stride=stride, padding=pad, batchnorm=bn,
                        activation=act, out_dtype=out_dtype)
    return jnp.transpose(h, (0, 3, 1, 2))                   # NHWC -> NCHW


# ---------------------------------------------------------------------------
# Pure-JAX reference with the same precision policy (bf16 conv operands,
# f32 accumulation + f32 bias/BN/LeakyReLU epilogue) for verification.
# ---------------------------------------------------------------------------
def _ref_layer(x, w, b, gamma, beta, *, stride, padding, batchnorm, activation):
    y = jax.lax.conv_general_dilated(
        x.astype(jnp.bfloat16), w.astype(jnp.bfloat16),
        window_strides=(stride, stride),
        padding=[(padding, padding), (padding, padding)],
        dimension_numbers=("NHWC", "HWIO", "NHWC"),
        preferred_element_type=jnp.float32)
    y = y + b[None, None, None, :]
    if batchnorm:
        mean = jnp.mean(y, axis=(0, 1, 2), keepdims=True)
        var = jnp.mean(jnp.square(y - mean), axis=(0, 1, 2), keepdims=True)
        y = (y - mean) * jax.lax.rsqrt(var + BN_EPS)
        y = y * gamma[None, None, None, :] + beta[None, None, None, :]
    if activation:
        y = jnp.where(y >= 0, y, LRELU_SLOPE * y)
    return y


def patchgan_ref(params, x_nchw, y_nchw):
    h = jnp.concatenate([x_nchw, y_nchw], axis=1)
    h = jnp.transpose(h, (0, 2, 3, 1))
    for name, _, _, _, stride, pad, bn, act in LAYER_CFG:
        p = params[name]
        h = _ref_layer(h, p["w"], p["b"], p["gamma"], p["beta"],
                       stride=stride, padding=pad, batchnorm=bn, activation=act)
    return jnp.transpose(h, (0, 3, 1, 2))


if __name__ == "__main__":
    key = jax.random.PRNGKey(0)
    kx, ky, kp = jax.random.split(key, 3)

    # Spatial 32 is the smallest even size for which the final 2x2 conv is
    # valid (32 -> 16 -> 8 -> 4 -> 3 -> 2).
    x = jax.random.normal(kx, (2, 4, 32, 32), jnp.float32)   # NCHW
    y = jax.random.normal(ky, (2, 4, 32, 32), jnp.float32)   # NCHW
    params = init_params(kp)

    fwd = jax.jit(patchgan_forward)
    out = jax.block_until_ready(fwd(params, x, y))
    ref = jax.block_until_ready(jax.jit(patchgan_ref)(params, x, y))

    assert out.shape == (2, 1, 2, 2), out.shape
    assert jnp.allclose(out, ref, rtol=3e-3, atol=3e-3), (
        float(jnp.max(jnp.abs(out - ref))))
    print("KERNEL_OK")
</pallas_src>

<mosaic_0001>
module attributes {stable_mosaic.version = 11 : i64} {
  func.func @_gemm_bias_act_kernel(%arg0: i32, %arg1: memref<512x128xbf16, #tpu.memory_space<vmem>>, %arg2: memref<128x64xbf16, #tpu.memory_space<vmem>>, %arg3: memref<1x64xf32, #tpu.memory_space<vmem>>, %arg4: memref<512x64xbf16, #tpu.memory_space<vmem>>) attributes {dimension_semantics = [#tpu.dimension_semantics<parallel>], iteration_bounds = array<i64: 1>, scalar_prefetch = 0 : i64, scratch_operands = 0 : i64, tpu.core_type = #tpu.core_type<tc>, window_params = [{transform_indices = @transform_0, window_bounds = array<i64: 512, 128>}, {pipeline_mode = #tpu.pipeline_mode<synchronous>, transform_indices = @transform_1, window_bounds = array<i64: 128, 64>}, {pipeline_mode = #tpu.pipeline_mode<synchronous>, transform_indices = @transform_2, window_bounds = array<i64: 1, 64>}, {transform_indices = @transform_3, window_bounds = array<i64: 512, 64>}]} {
    %c0 = arith.constant 0 : index
    %c0_0 = arith.constant 0 : index
    %0 = vector.load %arg1[%c0, %c0_0] : memref<512x128xbf16, #tpu.memory_space<vmem>>, vector<512x128xbf16>
    %c0_1 = arith.constant 0 : index
    %c0_2 = arith.constant 0 : index
    %1 = vector.load %arg2[%c0_1, %c0_2] : memref<128x64xbf16, #tpu.memory_space<vmem>>, vector<128x64xbf16>
    %cst = arith.constant dense<0.000000e+00> : vector<512x64xf32>
    %2 = tpu.matmul %0, %1, %cst {dimension_numbers = #tpu.dot_dimension_numbers<[1], [0], [0], [1], [0, 0, 1, 1], [], []>} : vector<512x128xbf16>, vector<128x64xbf16>, vector<512x64xf32> -> vector<512x64xf32>
    %c0_3 = arith.constant 0 : index
    %c0_4 = arith.constant 0 : index
    %3 = vector.load %arg3[%c0_3, %c0_4] : memref<1x64xf32, #tpu.memory_space<vmem>>, vector<1x64xf32>
    %4 = vector.broadcast %3 : vector<1x64xf32> to vector<512x64xf32>
    %5 = arith.addf %2, %4 : vector<512x64xf32>
    %cst_5 = arith.constant 0.000000e+00 : f32
    %6 = vector.broadcast %cst_5 : f32 to vector<512x64xf32>
    %7 = arith.cmpf oge, %5, %6 : vector<512x64xf32>
    %cst_6 = arith.constant 2.000000e-01 : f32
    %8 = vector.broadcast %cst_6 : f32 to vector<512x64xf32>
    %9 = arith.mulf %8, %5 : vector<512x64xf32>
    %10 = arith.select %7, %5, %9 : vector<512x64xi1>, vector<512x64xf32>
    %11 = arith.truncf %10 : vector<512x64xf32> to vector<512x64xbf16>
    %c0_7 = arith.constant 0 : index
    %c0_8 = arith.constant 0 : index
    %12 = vector.load %arg4[%c0_7, %c0_8] : memref<512x64xbf16, #tpu.memory_space<vmem>>, vector<512x64xbf16>
    tpu.vector_store %arg4[%c0_7, %c0_8], %11 {strides = array<i32>} : memref<512x64xbf16, #tpu.memory_space<vmem>>, vector<512x64xbf16>,
    return
  }
  func.func @transform_0(%arg0: i32) -> (i32, i32) {
    %c0_i32 = arith.constant 0 : i32
    %c0_i32_0 = arith.constant 0 : i32
    return %arg0, %c0_i32 : i32, i32
  }
  func.func @transform_1(%arg0: i32) -> (i32, i32) {
    %c0_i32 = arith.constant 0 : i32
    %c0_i32_0 = arith.constant 0 : i32
    %c0_i32_1 = arith.constant 0 : i32
    return %c0_i32, %c0_i32_0 : i32, i32
  }
  func.func @transform_2(%arg0: i32) -> (i32, i32) {
    %c0_i32 = arith.constant 0 : i32
    %c0_i32_0 = arith.constant 0 : i32
    %c0_i32_1 = arith.constant 0 : i32
    return %c0_i32, %c0_i32_0 : i32, i32
  }
  func.func @transform_3(%arg0: i32) -> (i32, i32) {
    %c0_i32 = arith.constant 0 : i32
    %c0_i32_0 = arith.constant 0 : i32
    return %arg0, %c0_i32 : i32, i32
  }
}

module attributes {stable_mosaic.version = 11 : i64} {
  func.func @_bn_act_kernel(%arg0: i32, %arg1: memref<128x128xf32, #tpu.memory_space<vmem>>, %arg2: memref<2x128xf32, #tpu.memory_space<vmem>>, %arg3: memref<128x128xbf16, #tpu.memory_space<vmem>>) attributes {dimension_semantics = [#tpu.dimension_semantics<parallel>], iteration_bounds = array<i64: 1>, scalar_prefetch = 0 : i64, scratch_operands = 0 : i64, tpu.core_type = #tpu.core_type<tc>, window_params = [{transform_indices = @transform_0, window_bounds = array<i64: 128, 128>}, {pipeline_mode = #tpu.pipeline_mode<synchronous>, transform_indices = @transform_1, window_bounds = array<i64: 2, 128>}, {transform_indices = @transform_2, window_bounds = array<i64: 128, 128>}]} {
    %c0 = arith.constant 0 : index
    %c0_0 = arith.constant 0 : index
    %0 = vector.load %arg1[%c0, %c0_0] : memref<128x128xf32, #tpu.memory_space<vmem>>, vector<128x128xf32>
    %c0_1 = arith.constant 0 : index
    %c0_2 = arith.constant 0 : index
    %1 = vector.load %arg2[%c0_1, %c0_2] : memref<2x128xf32, #tpu.memory_space<vmem>>, vector<1x128xf32>
    %2 = vector.broadcast %1 : vector<1x128xf32> to vector<128x128xf32>
    %3 = arith.mulf %0, %2 : vector<128x128xf32>
    %c1 = arith.constant 1 : index
    %c0_3 = arith.constant 0 : index
    %4 = vector.load %arg2[%c1, %c0_3] : memref<2x128xf32, #tpu.memory_space<vmem>>, vector<1x128xf32>
    %5 = vector.broadcast %4 : vector<1x128xf32> to vector<128x128xf32>
    %6 = arith.addf %3, %5 : vector<128x128xf32>
    %cst = arith.constant 0.000000e+00 : f32
    %7 = vector.broadcast %cst : f32 to vector<128x128xf32>
    %8 = arith.cmpf oge, %6, %7 : vector<128x128xf32>
    %cst_4 = arith.constant 2.000000e-01 : f32
    %9 = vector.broadcast %cst_4 : f32 to vector<128x128xf32>
    %10 = arith.mulf %9, %6 : vector<128x128xf32>
    %11 = arith.select %8, %6, %10 : vector<128x128xi1>, vector<128x128xf32>
    %12 = arith.truncf %11 : vector<128x128xf32> to vector<128x128xbf16>
    %c0_5 = arith.constant 0 : index
    %c0_6 = arith.constant 0 : index
    %13 = vector.load %arg3[%c0_5, %c0_6] : memref<128x128xbf16, #tpu.memory_space<vmem>>, vector<128x128xbf16>
    tpu.vector_store %arg3[%c0_5, %c0_6], %12 {strides = array<i32>} : memref<128x128xbf16, #tpu.memory_space<vmem>>, vector<128x128xbf16>,
    return
  }
  func.func @transform_0(%arg0: i32) -> (i32, i32) {
    %c0_i32 = arith.constant 0 : i32
    %c0_i32_0 = arith.constant 0 : i32
    return %arg0, %c0_i32 : i32, i32
  }
  func.func @transform_1(%arg0: i32) -> (i32, i32) {
    %c0_i32 = arith.constant 0 : i32
    %c0_i32_0 = arith.constant 0 : i32
    %c0_i32_1 = arith.constant 0 : i32
    return %c0_i32, %c0_i32_0 : i32, i32
  }
  func.func @transform_2(%arg0: i32) -> (i32, i32) {
    %c0_i32 = arith.constant 0 : i32
    %c0_i32_0 = arith.constant 0 : i32
    return %arg0, %c0_i32 : i32, i32
  }
}

module attributes {stable_mosaic.version = 11 : i64} {
  func.func @_gemm_stats_kernel(%arg0: i32, %arg1: memref<128x1024xbf16, #tpu.memory_space<vmem>>, %arg2: memref<1024x128xbf16, #tpu.memory_space<vmem>>, %arg3: memref<128x128xf32, #tpu.memory_space<vmem>>, %arg4: memref<1x2x128xf32, #tpu.memory_space<vmem>>) attributes {dimension_semantics = [#tpu.dimension_semantics<parallel>], iteration_bounds = array<i64: 1>, scalar_prefetch = 0 : i64, scratch_operands = 0 : i64, tpu.core_type = #tpu.core_type<tc>, window_params = [{transform_indices = @transform_0, window_bounds = array<i64: 128, 1024>}, {pipeline_mode = #tpu.pipeline_mode<synchronous>, transform_indices = @transform_1, window_bounds = array<i64: 1024, 128>}, {transform_indices = @transform_2, window_bounds = array<i64: 128, 128>}, {transform_indices = @transform_3, window_bounds = array<i64: 1, 2, 128>}]} {
    %c0 = arith.constant 0 : index
    %c0_0 = arith.constant 0 : index
    %0 = vector.load %arg1[%c0, %c0_0] : memref<128x1024xbf16, #tpu.memory_space<vmem>>, vector<128x1024xbf16>
    %c0_1 = arith.constant 0 : index
    %c0_2 = arith.constant 0 : index
    %1 = vector.load %arg2[%c0_1, %c0_2] : memref<1024x128xbf16, #tpu.memory_space<vmem>>, vector<1024x128xbf16>
    %cst = arith.constant dense<0.000000e+00> : vector<128x128xf32>
    %2 = tpu.matmul %0, %1, %cst {dimension_numbers = #tpu.dot_dimension_numbers<[1], [0], [0], [1], [0, 0, 1, 1], [], []>} : vector<128x1024xbf16>, vector<1024x128xbf16>, vector<128x128xf32> -> vector<128x128xf32>
    %c0_3 = arith.constant 0 : index
    %c0_4 = arith.constant 0 : index
    %3 = vector.load %arg3[%c0_3, %c0_4] : memref<128x128xf32, #tpu.memory_space<vmem>>, vector<128x128xf32>
    tpu.vector_store %arg3[%c0_3, %c0_4], %2 {strides = array<i32>} : memref<128x128xf32, #tpu.memory_space<vmem>>, vector<128x128xf32>,
    %cst_5 = arith.constant dense<0.000000e+00> : vector<128xf32>
    %4 = vector.multi_reduction <add>, %2, %cst_5 [0] : vector<128x128xf32> to vector<128xf32>
    %5 = vector.shape_cast %4 : vector<128xf32> to vector<1x128xf32>
    %c0_6 = arith.constant 0 : index
    %c0_7 = arith.constant 0 : index
    %c0_8 = arith.constant 0 : index
    %6 = vector.load %arg4[%c0_6, %c0_7, %c0_8] : memref<1x2x128xf32, #tpu.memory_space<vmem>>, vector<1x1x128xf32>
    %7 = vector.shape_cast %6 : vector<1x1x128xf32> to vector<1x128xf32>
    %8 = vector.shape_cast %5 : vector<1x128xf32> to vector<1x1x128xf32>
    tpu.vector_store %arg4[%c0_6, %c0_7, %c0_8], %8 {strides = array<i32>} : memref<1x2x128xf32, #tpu.memory_space<vmem>>, vector<1x1x128xf32>,
    %9 = arith.mulf %2, %2 : vector<128x128xf32>
    %cst_9 = arith.constant dense<0.000000e+00> : vector<128xf32>
    %10 = vector.multi_reduction <add>, %9, %cst_9 [0] : vector<128x128xf32> to vector<128xf32>
    %11 = vector.shape_cast %10 : vector<128xf32> to vector<1x128xf32>
    %c0_10 = arith.constant 0 : index
    %c1 = arith.constant 1 : index
    %c0_11 = arith.constant 0 : index
    %12 = vector.load %arg4[%c0_10, %c1, %c0_11] : memref<1x2x128xf32, #tpu.memory_space<vmem>>, vector<1x1x128xf32>
    %13 = vector.shape_cast %12 : vector<1x1x128xf32> to vector<1x128xf32>
    %14 = vector.shape_cast %11 : vector<1x128xf32> to vector<1x1x128xf32>
    tpu.vector_store %arg4[%c0_10, %c1, %c0_11], %14 {strides = array<i32>} : memref<1x2x128xf32, #tpu.memory_space<vmem>>, vector<1x1x128xf32>,
    return
  }
  func.func @transform_0(%arg0: i32) -> (i32, i32) {
    %c0_i32 = arith.constant 0 : i32
    %c0_i32_0 = arith.constant 0 : i32
    return %arg0, %c0_i32 : i32, i32
  }
  func.func @transform_1(%arg0: i32) -> (i32, i32) {
    %c0_i32 = arith.constant 0 : i32
    %c0_i32_0 = arith.constant 0 : i32
    %c0_i32_1 = arith.constant 0 : i32
    return %c0_i32, %c0_i32_0 : i32, i32
  }
  func.func @transform_2(%arg0: i32) -> (i32, i32) {
    %c0_i32 = arith.constant 0 : i32
    %c0_i32_0 = arith.constant 0 : i32
    return %arg0, %c0_i32 : i32, i32
  }
  func.func @transform_3(%arg0: i32) -> (i32, i32, i32) {
    %c0_i32 = arith.constant 0 : i32
    %c0_i32_0 = arith.constant 0 : i32
    %c0_i32_1 = arith.constant 0 : i32
    return %arg0, %c0_i32, %c0_i32_0 : i32, i32, i32
  }
}

module attributes {stable_mosaic.version = 11 : i64} {
  func.func @_gemm_stats_kernel(%arg0: i32, %arg1: memref<32x2048xbf16, #tpu.memory_space<vmem>>, %arg2: memref<2048x256xbf16, #tpu.memory_space<vmem>>, %arg3: memref<32x256xf32, #tpu.memory_space<vmem>>, %arg4: memref<1x2x256xf32, #tpu.memory_space<vmem>>) attributes {dimension_semantics = [#tpu.dimension_semantics<parallel>], iteration_bounds = array<i64: 1>, scalar_prefetch = 0 : i64, scratch_operands = 0 : i64, tpu.core_type = #tpu.core_type<tc>, window_params = [{transform_indices = @transform_0, window_bounds = array<i64: 32, 2048>}, {pipeline_mode = #tpu.pipeline_mode<synchronous>, transform_indices = @transform_1, window_bounds = array<i64: 2048, 256>}, {transform_indices = @transform_2, window_bounds = array<i64: 32, 256>}, {transform_indices = @transform_3, window_bounds = array<i64: 1, 2, 256>}]} {
    %c0 = arith.constant 0 : index
    %c0_0 = arith.constant 0 : index
    %0 = vector.load %arg1[%c0, %c0_0] : memref<32x2048xbf16, #tpu.memory_space<vmem>>, vector<32x2048xbf16>
    %c0_1 = arith.constant 0 : index
    %c0_2 = arith.constant 0 : index
    %1 = vector.load %arg2[%c0_1, %c0_2] : memref<2048x256xbf16, #tpu.memory_space<vmem>>, vector<2048x256xbf16>
    %cst = arith.constant dense<0.000000e+00> : vector<32x256xf32>
    %2 = tpu.matmul %0, %1, %cst {dimension_numbers = #tpu.dot_dimension_numbers<[1], [0], [0], [1], [0, 0, 1, 1], [], []>} : vector<32x2048xbf16>, vector<2048x256xbf16>, vector<32x256xf32> -> vector<32x256xf32>
    %c0_3 = arith.constant 0 : index
    %c0_4 = arith.constant 0 : index
    %3 = vector.load %arg3[%c0_3, %c0_4] : memref<32x256xf32, #tpu.memory_space<vmem>>, vector<32x256xf32>
    tpu.vector_store %arg3[%c0_3, %c0_4], %2 {strides = array<i32>} : memref<32x256xf32, #tpu.memory_space<vmem>>, vector<32x256xf32>,
    %cst_5 = arith.constant dense<0.000000e+00> : vector<256xf32>
    %4 = vector.multi_reduction <add>, %2, %cst_5 [0] : vector<32x256xf32> to vector<256xf32>
    %5 = vector.shape_cast %4 : vector<256xf32> to vector<1x256xf32>
    %c0_6 = arith.constant 0 : index
    %c0_7 = arith.constant 0 : index
    %c0_8 = arith.constant 0 : index
    %6 = vector.load %arg4[%c0_6, %c0_7, %c0_8] : memref<1x2x256xf32, #tpu.memory_space<vmem>>, vector<1x1x256xf32>
    %7 = vector.shape_cast %6 : vector<1x1x256xf32> to vector<1x256xf32>
    %8 = vector.shape_cast %5 : vector<1x256xf32> to vector<1x1x256xf32>
    tpu.vector_store %arg4[%c0_6, %c0_7, %c0_8], %8 {strides = array<i32>} : memref<1x2x256xf32, #tpu.memory_space<vmem>>, vector<1x1x256xf32>,
    %9 = arith.mulf %2, %2 : vector<32x256xf32>
    %cst_9 = arith.constant dense<0.000000e+00> : vector<256xf32>
    %10 = vector.multi_reduction <add>, %9, %cst_9 [0] : vector<32x256xf32> to vector<256xf32>
    %11 = vector.shape_cast %10 : vector<256xf32> to vector<1x256xf32>
    %c0_10 = arith.constant 0 : index
    %c1 = arith.constant 1 : index
    %c0_11 = arith.constant 0 : index
    %12 = vector.load %arg4[%c0_10, %c1, %c0_11] : memref<1x2x256xf32, #tpu.memory_space<vmem>>, vector<1x1x256xf32>
    %13 = vector.shape_cast %12 : vector<1x1x256xf32> to vector<1x256xf32>
    %14 = vector.shape_cast %11 : vector<1x256xf32> to vector<1x1x256xf32>
    tpu.vector_store %arg4[%c0_10, %c1, %c0_11], %14 {strides = array<i32>} : memref<1x2x256xf32, #tpu.memory_space<vmem>>, vector<1x1x256xf32>,
    return
  }
  func.func @transform_0(%arg0: i32) -> (i32, i32) {
    %c0_i32 = arith.constant 0 : i32
    %c0_i32_0 = arith.constant 0 : i32
    return %arg0, %c0_i32 : i32, i32
  }
  func.func @transform_1(%arg0: i32) -> (i32, i32) {
    %c0_i32 = arith.constant 0 : i32
    %c0_i32_0 = arith.constant 0 : i32
    %c0_i32_1 = arith.constant 0 : i32
    return %c0_i32, %c0_i32_0 : i32, i32
  }
  func.func @transform_2(%arg0: i32) -> (i32, i32) {
    %c0_i32 = arith.constant 0 : i32
    %c0_i32_0 = arith.constant 0 : i32
    return %arg0, %c0_i32 : i32, i32
  }
  func.func @transform_3(%arg0: i32) -> (i32, i32, i32) {
    %c0_i32 = arith.constant 0 : i32
    %c0_i32_0 = arith.constant 0 : i32
    %c0_i32_1 = arith.constant 0 : i32
    return %arg0, %c0_i32, %c0_i32_0 : i32, i32, i32
  }
}

module attributes {stable_mosaic.version = 11 : i64} {
  func.func @_bn_act_kernel(%arg0: i32, %arg1: memref<32x256xf32, #tpu.memory_space<vmem>>, %arg2: memref<2x256xf32, #tpu.memory_space<vmem>>, %arg3: memref<32x256xbf16, #tpu.memory_space<vmem>>) attributes {dimension_semantics = [#tpu.dimension_semantics<parallel>], iteration_bounds = array<i64: 1>, scalar_prefetch = 0 : i64, scratch_operands = 0 : i64, tpu.core_type = #tpu.core_type<tc>, window_params = [{transform_indices = @transform_0, window_bounds = array<i64: 32, 256>}, {pipeline_mode = #tpu.pipeline_mode<synchronous>, transform_indices = @transform_1, window_bounds = array<i64: 2, 256>}, {transform_indices = @transform_2, window_bounds = array<i64: 32, 256>}]} {
    %c0 = arith.constant 0 : index
    %c0_0 = arith.constant 0 : index
    %0 = vector.load %arg1[%c0, %c0_0] : memref<32x256xf32, #tpu.memory_space<vmem>>, vector<32x256xf32>
    %c0_1 = arith.constant 0 : index
    %c0_2 = arith.constant 0 : index
    %1 = vector.load %arg2[%c0_1, %c0_2] : memref<2x256xf32, #tpu.memory_space<vmem>>, vector<1x256xf32>
    %2 = vector.broadcast %1 : vector<1x256xf32> to vector<32x256xf32>
    %3 = arith.mulf %0, %2 : vector<32x256xf32>
    %c1 = arith.constant 1 : index
    %c0_3 = arith.constant 0 : index
    %4 = vector.load %arg2[%c1, %c0_3] : memref<2x256xf32, #tpu.memory_space<vmem>>, vector<1x256xf32>
    %5 = vector.broadcast %4 : vector<1x256xf32> to vector<32x256xf32>
    %6 = arith.addf %3, %5 : vector<32x256xf32>
    %cst = arith.constant 0.000000e+00 : f32
    %7 = vector.broadcast %cst : f32 to vector<32x256xf32>
    %8 = arith.cmpf oge, %6, %7 : vector<32x256xf32>
    %cst_4 = arith.constant 2.000000e-01 : f32
    %9 = vector.broadcast %cst_4 : f32 to vector<32x256xf32>
    %10 = arith.mulf %9, %6 : vector<32x256xf32>
    %11 = arith.select %8, %6, %10 : vector<32x256xi1>, vector<32x256xf32>
    %12 = arith.truncf %11 : vector<32x256xf32> to vector<32x256xbf16>
    %c0_5 = arith.constant 0 : index
    %c0_6 = arith.constant 0 : index
    %13 = vector.load %arg3[%c0_5, %c0_6] : memref<32x256xbf16, #tpu.memory_space<vmem>>, vector<32x256xbf16>
    tpu.vector_store %arg3[%c0_5, %c0_6], %12 {strides = array<i32>} : memref<32x256xbf16, #tpu.memory_space<vmem>>, vector<32x256xbf16>,
    return
  }
  func.func @transform_0(%arg0: i32) -> (i32, i32) {
    %c0_i32 = arith.constant 0 : i32
    %c0_i32_0 = arith.constant 0 : i32
    return %arg0, %c0_i32 : i32, i32
  }
  func.func @transform_1(%arg0: i32) -> (i32, i32) {
    %c0_i32 = arith.constant 0 : i32
    %c0_i32_0 = arith.constant 0 : i32
    %c0_i32_1 = arith.constant 0 : i32
    return %c0_i32, %c0_i32_0 : i32, i32
  }
  func.func @transform_2(%arg0: i32) -> (i32, i32) {
    %c0_i32 = arith.constant 0 : i32
    %c0_i32_0 = arith.constant 0 : i32
    return %arg0, %c0_i32 : i32, i32
  }
}

module attributes {stable_mosaic.version = 11 : i64} {
  func.func @_gemm_stats_kernel(%arg0: i32, %arg1: memref<24x4096xbf16, #tpu.memory_space<vmem>>, %arg2: memref<4096x512xbf16, #tpu.memory_space<vmem>>, %arg3: memref<24x512xf32, #tpu.memory_space<vmem>>, %arg4: memref<1x2x512xf32, #tpu.memory_space<vmem>>) attributes {dimension_semantics = [#tpu.dimension_semantics<parallel>], iteration_bounds = array<i64: 1>, scalar_prefetch = 0 : i64, scratch_operands = 0 : i64, tpu.core_type = #tpu.core_type<tc>, window_params = [{transform_indices = @transform_0, window_bounds = array<i64: 24, 4096>}, {pipeline_mode = #tpu.pipeline_mode<synchronous>, transform_indices = @transform_1, window_bounds = array<i64: 4096, 512>}, {transform_indices = @transform_2, window_bounds = array<i64: 24, 512>}, {transform_indices = @transform_3, window_bounds = array<i64: 1, 2, 512>}]} {
    %c0 = arith.constant 0 : index
    %c0_0 = arith.constant 0 : index
    %0 = vector.load %arg1[%c0, %c0_0] : memref<24x4096xbf16, #tpu.memory_space<vmem>>, vector<24x4096xbf16>
    %c0_1 = arith.constant 0 : index
    %c0_2 = arith.constant 0 : index
    %1 = vector.load %arg2[%c0_1, %c0_2] : memref<4096x512xbf16, #tpu.memory_space<vmem>>, vector<4096x512xbf16>
    %cst = arith.constant dense<0.000000e+00> : vector<24x512xf32>
    %2 = tpu.matmul %0, %1, %cst {dimension_numbers = #tpu.dot_dimension_numbers<[1], [0], [0], [1], [0, 0, 1, 1], [], []>} : vector<24x4096xbf16>, vector<4096x512xbf16>, vector<24x512xf32> -> vector<24x512xf32>
    %c0_3 = arith.constant 0 : index
    %c0_4 = arith.constant 0 : index
    %3 = vector.load %arg3[%c0_3, %c0_4] : memref<24x512xf32, #tpu.memory_space<vmem>>, vector<24x512xf32>
    tpu.vector_store %arg3[%c0_3, %c0_4], %2 {strides = array<i32>} : memref<24x512xf32, #tpu.memory_space<vmem>>, vector<24x512xf32>,
    %cst_5 = arith.constant dense<0.000000e+00> : vector<512xf32>
    %4 = vector.multi_reduction <add>, %2, %cst_5 [0] : vector<24x512xf32> to vector<512xf32>
    %5 = vector.shape_cast %4 : vector<512xf32> to vector<1x512xf32>
    %c0_6 = arith.constant 0 : index
    %c0_7 = arith.constant 0 : index
    %c0_8 = arith.constant 0 : index
    %6 = vector.load %arg4[%c0_6, %c0_7, %c0_8] : memref<1x2x512xf32, #tpu.memory_space<vmem>>, vector<1x1x512xf32>
    %7 = vector.shape_cast %6 : vector<1x1x512xf32> to vector<1x512xf32>
    %8 = vector.shape_cast %5 : vector<1x512xf32> to vector<1x1x512xf32>
    tpu.vector_store %arg4[%c0_6, %c0_7, %c0_8], %8 {strides = array<i32>} : memref<1x2x512xf32, #tpu.memory_space<vmem>>, vector<1x1x512xf32>,
    %9 = arith.mulf %2, %2 : vector<24x512xf32>
    %cst_9 = arith.constant dense<0.000000e+00> : vector<512xf32>
    %10 = vector.multi_reduction <add>, %9, %cst_9 [0] : vector<24x512xf32> to vector<512xf32>
    %11 = vector.shape_cast %10 : vector<512xf32> to vector<1x512xf32>
    %c0_10 = arith.constant 0 : index
    %c1 = arith.constant 1 : index
    %c0_11 = arith.constant 0 : index
    %12 = vector.load %arg4[%c0_10, %c1, %c0_11] : memref<1x2x512xf32, #tpu.memory_space<vmem>>, vector<1x1x512xf32>
    %13 = vector.shape_cast %12 : vector<1x1x512xf32> to vector<1x512xf32>
    %14 = vector.shape_cast %11 : vector<1x512xf32> to vector<1x1x512xf32>
    tpu.vector_store %arg4[%c0_10, %c1, %c0_11], %14 {strides = array<i32>} : memref<1x2x512xf32, #tpu.memory_space<vmem>>, vector<1x1x512xf32>,
    return
  }
  func.func @transform_0(%arg0: i32) -> (i32, i32) {
    %c0_i32 = arith.constant 0 : i32
    %c0_i32_0 = arith.constant 0 : i32
    return %arg0, %c0_i32 : i32, i32
  }
  func.func @transform_1(%arg0: i32) -> (i32, i32) {
    %c0_i32 = arith.constant 0 : i32
    %c0_i32_0 = arith.constant 0 : i32
    %c0_i32_1 = arith.constant 0 : i32
    return %c0_i32, %c0_i32_0 : i32, i32
  }
  func.func @transform_2(%arg0: i32) -> (i32, i32) {
    %c0_i32 = arith.constant 0 : i32
    %c0_i32_0 = arith.constant 0 : i32
    return %arg0, %c0_i32 : i32, i32
  }
  func.func @transform_3(%arg0: i32) -> (i32, i32, i32) {
    %c0_i32 = arith.constant 0 : i32
    %c0_i32_0 = arith.constant 0 : i32
    %c0_i32_1 = arith.constant 0 : i32
    return %arg0, %c0_i32, %c0_i32_0 : i32, i32, i32
  }
}

module attributes {stable_mosaic.version = 11 : i64} {
  func.func @_bn_act_kernel(%arg0: i32, %arg1: memref<24x512xf32, #tpu.memory_space<vmem>>, %arg2: memref<2x512xf32, #tpu.memory_space<vmem>>, %arg3: memref<24x512xbf16, #tpu.memory_space<vmem>>) attributes {dimension_semantics = [#tpu.dimension_semantics<parallel>], iteration_bounds = array<i64: 1>, scalar_prefetch = 0 : i64, scratch_operands = 0 : i64, tpu.core_type = #tpu.core_type<tc>, window_params = [{transform_indices = @transform_0, window_bounds = array<i64: 24, 512>}, {pipeline_mode = #tpu.pipeline_mode<synchronous>, transform_indices = @transform_1, window_bounds = array<i64: 2, 512>}, {transform_indices = @transform_2, window_bounds = array<i64: 24, 512>}]} {
    %c0 = arith.constant 0 : index
    %c0_0 = arith.constant 0 : index
    %0 = vector.load %arg1[%c0, %c0_0] : memref<24x512xf32, #tpu.memory_space<vmem>>, vector<24x512xf32>
    %c0_1 = arith.constant 0 : index
    %c0_2 = arith.constant 0 : index
    %1 = vector.load %arg2[%c0_1, %c0_2] : memref<2x512xf32, #tpu.memory_space<vmem>>, vector<1x512xf32>
    %2 = vector.broadcast %1 : vector<1x512xf32> to vector<24x512xf32>
    %3 = arith.mulf %0, %2 : vector<24x512xf32>
    %c1 = arith.constant 1 : index
    %c0_3 = arith.constant 0 : index
    %4 = vector.load %arg2[%c1, %c0_3] : memref<2x512xf32, #tpu.memory_space<vmem>>, vector<1x512xf32>
    %5 = vector.broadcast %4 : vector<1x512xf32> to vector<24x512xf32>
    %6 = arith.addf %3, %5 : vector<24x512xf32>
    %cst = arith.constant 0.000000e+00 : f32
    %7 = vector.broadcast %cst : f32 to vector<24x512xf32>
    %8 = arith.cmpf oge, %6, %7 : vector<24x512xf32>
    %cst_4 = arith.constant 2.000000e-01 : f32
    %9 = vector.broadcast %cst_4 : f32 to vector<24x512xf32>
    %10 = arith.mulf %9, %6 : vector<24x512xf32>
    %11 = arith.select %8, %6, %10 : vector<24x512xi1>, vector<24x512xf32>
    %12 = arith.truncf %11 : vector<24x512xf32> to vector<24x512xbf16>
    %c0_5 = arith.constant 0 : index
    %c0_6 = arith.constant 0 : index
    %13 = vector.load %arg3[%c0_5, %c0_6] : memref<24x512xbf16, #tpu.memory_space<vmem>>, vector<24x512xbf16>
    tpu.vector_store %arg3[%c0_5, %c0_6], %12 {strides = array<i32>} : memref<24x512xbf16, #tpu.memory_space<vmem>>, vector<24x512xbf16>,
    return
  }
  func.func @transform_0(%arg0: i32) -> (i32, i32) {
    %c0_i32 = arith.constant 0 : i32
    %c0_i32_0 = arith.constant 0 : i32
    return %arg0, %c0_i32 : i32, i32
  }
  func.func @transform_1(%arg0: i32) -> (i32, i32) {
    %c0_i32 = arith.constant 0 : i32
    %c0_i32_0 = arith.constant 0 : i32
    %c0_i32_1 = arith.constant 0 : i32
    return %c0_i32, %c0_i32_0 : i32, i32
  }
  func.func @transform_2(%arg0: i32) -> (i32, i32) {
    %c0_i32 = arith.constant 0 : i32
    %c0_i32_0 = arith.constant 0 : i32
    return %arg0, %c0_i32 : i32, i32
  }
}

module attributes {stable_mosaic.version = 11 : i64} {
  func.func @_gemm_bias_act_kernel(%arg0: i32, %arg1: memref<8x2048xbf16, #tpu.memory_space<vmem>>, %arg2: memref<2048x1xbf16, #tpu.memory_space<vmem>>, %arg3: memref<1x1xf32, #tpu.memory_space<vmem>>, %arg4: memref<8x1xf32, #tpu.memory_space<vmem>>) attributes {dimension_semantics = [#tpu.dimension_semantics<parallel>], iteration_bounds = array<i64: 1>, scalar_prefetch = 0 : i64, scratch_operands = 0 : i64, tpu.core_type = #tpu.core_type<tc>, window_params = [{transform_indices = @transform_0, window_bounds = array<i64: 8, 2048>}, {pipeline_mode = #tpu.pipeline_mode<synchronous>, transform_indices = @transform_1, window_bounds = array<i64: 2048, 1>}, {pipeline_mode = #tpu.pipeline_mode<synchronous>, transform_indices = @transform_2, window_bounds = array<i64: 1, 1>}, {transform_indices = @transform_3, window_bounds = array<i64: 8, 1>}]} {
    %c0 = arith.constant 0 : index
    %c0_0 = arith.constant 0 : index
    %0 = vector.load %arg1[%c0, %c0_0] : memref<8x2048xbf16, #tpu.memory_space<vmem>>, vector<8x2048xbf16>
    %c0_1 = arith.constant 0 : index
    %c0_2 = arith.constant 0 : index
    %1 = vector.load %arg2[%c0_1, %c0_2] : memref<2048x1xbf16, #tpu.memory_space<vmem>>, vector<2048x1xbf16>
    %cst = arith.constant dense<0.000000e+00> : vector<8x1xf32>
    %2 = tpu.matmul %0, %1, %cst {dimension_numbers = #tpu.dot_dimension_numbers<[1], [0], [0], [1], [0, 0, 1, 1], [], []>} : vector<8x2048xbf16>, vector<2048x1xbf16>, vector<8x1xf32> -> vector<8x1xf32>
    %c0_3 = arith.constant 0 : index
    %c0_4 = arith.constant 0 : index
    %3 = vector.load %arg3[%c0_3, %c0_4] : memref<1x1xf32, #tpu.memory_space<vmem>>, vector<1x1xf32>
    %4 = vector.broadcast %3 : vector<1x1xf32> to vector<8x1xf32>
    %5 = arith.addf %2, %4 : vector<8x1xf32>
    %c0_5 = arith.constant 0 : index
    %c0_6 = arith.constant 0 : index
    %6 = vector.load %arg4[%c0_5, %c0_6] : memref<8x1xf32, #tpu.memory_space<vmem>>, vector<8x1xf32>
    tpu.vector_store %arg4[%c0_5, %c0_6], %5 {strides = array<i32>} : memref<8x1xf32, #tpu.memory_space<vmem>>, vector<8x1xf32>,
    return
  }
  func.func @transform_0(%arg0: i32) -> (i32, i32) {
    %c0_i32 = arith.constant 0 : i32
    %c0_i32_0 = arith.constant 0 : i32
    return %arg0, %c0_i32 : i32, i32
  }
  func.func @transform_1(%arg0: i32) -> (i32, i32) {
    %c0_i32 = arith.constant 0 : i32
    %c0_i32_0 = arith.constant 0 : i32
    %c0_i32_1 = arith.constant 0 : i32
    return %c0_i32, %c0_i32_0 : i32, i32
  }
  func.func @transform_2(%arg0: i32) -> (i32, i32) {
    %c0_i32 = arith.constant 0 : i32
    %c0_i32_0 = arith.constant 0 : i32
    %c0_i32_1 = arith.constant 0 : i32
    return %c0_i32, %c0_i32_0 : i32, i32
  }
  func.func @transform_3(%arg0: i32) -> (i32, i32) {
    %c0_i32 = arith.constant 0 : i32
    %c0_i32_0 = arith.constant 0 : i32
    return %arg0, %c0_i32 : i32, i32
  }
}

</mosaic_0001>

<bundles_post_ra>
// kernel: patchgan_forward.8
= control target key start
LH: loop header
LB: loop body
LE: loop exit
PB: predicated region body
PF: predicated region fallthrough
CT: control target
= control target key end

     0   :  { %vm1079_vm0 = vcmask 519168   ;;  %s2037_s1 = inlined_call_operand.vmem [shape: bf16[128,64], index: 1, kind: input, shape index: {}]   ;;  %s2038_s0 = inlined_call_operand.vmem [shape: bf16[512,128], index: 0, kind: input, shape index: {}]   ;;  %s2039_s2 = inlined_call_operand.vmem [shape: f32[1,64], index: 2, kind: input, shape index: {}]   ;;  %s2040_s3 = inlined_call_operand.vmem [shape: bf16[512,64], index: 3, kind: output, shape index: {}]  }
   0x1   :  { %v1453_v0 = vld [vmem:[%s2037_s1] sm:$0xff]   ;;  %v1454_v1 = vld [vmem:[%s2037_s1 + $0x8] sm:$0xff]   ;;  %v1455_v2 = vld [vmem:[%s2037_s1 + $0x10] sm:$0xff]  }
   0x2   :  { %1357 = vmatprep.subr.bf16.mxu0 %v1453_v0  ;;  %1437 = vmatprep.subr.bf16.mxu1 %v1453_v0  ;;  %v1456_v3 = vld [vmem:[%s2037_s1 + $0x18] sm:$0xff]   ;;  %v1461_v4 = vld [vmem:[%s2038_s0] sm:$0xff]   ;;  %v1458_v7 = vld [vmem:[%s2037_s1 + $0x28] sm:$0xff]  }
   0x3   :  { %1358 = vmatpush3.bf16.msra.mxu0 %v1453_v0  ;;  %1445 = vmatpush3.bf16.msra.mxu1 %v1453_v0  ;;  %v1462_v5 = vld [vmem:[%s2038_s0 + $0x80] sm:$0xff]   ;;  %v1459_v8 = vld [vmem:[%s2037_s1 + $0x30] sm:$0xff]   ;;  %v1460_v9 = vld [vmem:[%s2037_s1 + $0x38] sm:$0xff]  }
   0x4   :  { %1359 = vmatprep.subr.bf16.mxu0 %v1454_v1  ;;  %1438 = vmatprep.subr.bf16.mxu1 %v1454_v1  ;;  %v1457_v6 = vld [vmem:[%s2037_s1 + $0x20] sm:$0xff]   ;;  %v1463_v10 = vld [vmem:[%s2038_s0 + $0x8] sm:$0xff]   ;;  %v1465_v12 = vld [vmem:[%s2038_s0 + $0x10] sm:$0xff]  }
   0x5   :  { %1373 = vmatprep.mubr.bf16.mxu0 %v1461_v4  ;;  %1405 = vmatprep.mubr.bf16.mxu1 %v1462_v5  ;;  %v1464_v11 = vld [vmem:[%s2038_s0 + $0x88] sm:$0xff]   ;;  %v1466_v13 = vld [vmem:[%s2038_s0 + $0x90] sm:$0xff]   ;;  %v1467_v14 = vld [vmem:[%s2038_s0 + $0x18] sm:$0xff]  }
   0x6   :  { %v1468_v15 = vld [vmem:[%s2038_s0 + $0x98] sm:$0xff]   ;;  %v1469_v16 = vld [vmem:[%s2038_s0 + $0x20] sm:$0xff]   ;;  %v1471_v18 = vld [vmem:[%s2038_s0 + $0x28] sm:$0xff]  }
   0x7   :  { %1360 = vmatpush3.bf16.msra.mxu0 %v1454_v1  ;;  %1446 = vmatpush3.bf16.msra.mxu1 %v1454_v1  ;;  %v1470_v17 = vld [vmem:[%s2038_s0 + $0xa0] sm:$0xff]   ;;  %v1472_v19 = vld [vmem:[%s2038_s0 + $0xa8] sm:$0xff]   ;;  %v1473_v20 = vld [vmem:[%s2038_s0 + $0x30] sm:$0xff]  }
   0x8   :  { %1361 = vmatprep.subr.bf16.mxu0 %v1455_v2  ;;  %1439 = vmatprep.subr.bf16.mxu1 %v1455_v2  ;;  %v1474_v21 = vld [vmem:[%s2038_s0 + $0xb0] sm:$0xff]   ;;  %v1475_v22 = vld [vmem:[%s2038_s0 + $0x38] sm:$0xff]   ;;  %v1477_v24 = vld [vmem:[%s2038_s0 + $0x40] sm:$0xff]  }
   0x9   :  { %v1476_v23 = vld [vmem:[%s2038_s0 + $0xb8] sm:$0xff]   ;;  %v1478_v25 = vld [vmem:[%s2038_s0 + $0xc0] sm:$0xff]   ;;  %v1479_v26 = vld [vmem:[%s2038_s0 + $0x48] sm:$0xff]  }
   0xa   :  { %v1480_v27 = vld [vmem:[%s2038_s0 + $0xc8] sm:$0xff]   ;;  %v1481_v28 = vld [vmem:[%s2038_s0 + $0x50] sm:$0xff]   ;;  %v1483_v30 = vld [vmem:[%s2038_s0 + $0x58] sm:$0xff]  }
   0xb   :  { %1362 = vmatpush3.bf16.msra.mxu0 %v1455_v2  ;;  %1447 = vmatpush3.bf16.msra.mxu1 %v1455_v2  ;;  %v1482_v29 = vld [vmem:[%s2038_s0 + $0xd0] sm:$0xff]   ;;  %v1484_v31 = vld [vmem:[%s2038_s0 + $0xd8] sm:$0xff]   ;;  %v1485_v32 = vld [vmem:[%s2038_s0 + $0x60] sm:$0xff]  }
   0xc   :  { %1363 = vmatprep.subr.bf16.mxu0 %v1456_v3  ;;  %1440 = vmatprep.subr.bf16.mxu1 %v1456_v3  ;;  %v1486_v33 = vld [vmem:[%s2038_s0 + $0xe0] sm:$0xff]   ;;  %v1487_v34 = vld [vmem:[%s2038_s0 + $0x68] sm:$0xff]   ;;  %v1489_v36 = vld [vmem:[%s2038_s0 + $0x70] sm:$0xff]  }
   0xd   :  { %v1488_v35 = vld [vmem:[%s2038_s0 + $0xe8] sm:$0xff]   ;;  %v1490_v37 = vld [vmem:[%s2038_s0 + $0xf0] sm:$0xff]   ;;  %v1491_v38 = vld [vmem:[%s2038_s0 + $0x78] sm:$0xff]  }
   0xe   :  { %v1492_v39 = vld [vmem:[%s2038_s0 + $0xf8] sm:$0xff]   ;;  %v1636_v40 = vld [vmem:[%s2039_s2] ss:$0 sm:$0xff] }
   0xf   :  { %1364 = vmatpush3.bf16.msra.mxu0 %v1456_v3  ;;  %1448 = vmatpush3.bf16.msra.mxu1 %v1456_v3 }
  0x10   :  { %1365 = vmatprep.subr.bf16.mxu0 %v1457_v6  ;;  %1441 = vmatprep.subr.bf16.mxu1 %v1457_v6 }
  0x13   :  { %1366 = vmatpush3.bf16.msra.mxu0 %v1457_v6  ;;  %1449 = vmatpush3.bf16.msra.mxu1 %v1457_v6 }
  0x14   :  { %1367 = vmatprep.subr.bf16.mxu0 %v1458_v7  ;;  %1442 = vmatprep.subr.bf16.mxu1 %v1458_v7 }
  0x17   :  { %1368 = vmatpush3.bf16.msra.mxu0 %v1458_v7  ;;  %1450 = vmatpush3.bf16.msra.mxu1 %v1458_v7 }
  0x18   :  { %1369 = vmatprep.subr.bf16.mxu0 %v1459_v8  ;;  %1443 = vmatprep.subr.bf16.mxu1 %v1459_v8 }
  0x1b   :  { %1370 = vmatpush3.bf16.msra.mxu0 %v1459_v8  ;;  %1451 = vmatpush3.bf16.msra.mxu1 %v1459_v8 }
  0x1c   :  { %1371 = vmatprep.subr.bf16.mxu0 %v1460_v9  ;;  %1444 = vmatprep.subr.bf16.mxu1 %v1460_v9 }
  0x1f   :  { %1372 = vmatpush3.bf16.msra.mxu0 %v1460_v9  ;;  %1452 = vmatpush3.bf16.msra.mxu1 %v1460_v9 }
  0x22   :  { %1374 = vmatmul.mubr.bf16.vlgmr.msra.gmra.mrb[0].mxu0 %v1463_v10  ;;  %1406 = vmatmul.mubr.bf16.vlgmr.msra.gmra.mrb[0].mxu1 %v1464_v11 }
  0x23   :  { %1377 = vmatprep.mubr.bf16.mxu0 %v1465_v12  ;;  %1409 = vmatprep.mubr.bf16.mxu1 %v1466_v13 }
  0x2a   :  { %1378 = vmatmul.mubr.bf16.gmra.mrb[4].mxu0 %v1467_v14  ;;  %1410 = vmatmul.mubr.bf16.gmra.mrb[4].mxu1 %v1468_v15 }
  0x2b   :  { %1381 = vmatprep.mubr.bf16.mxu0 %v1469_v16  ;;  %1413 = vmatprep.mubr.bf16.mxu1 %v1470_v17 }
  0x32   :  { %1382 = vmatmul.mubr.bf16.gmra.mrb[8].mxu0 %v1471_v18  ;;  %1414 = vmatmul.mubr.bf16.gmra.mrb[8].mxu1 %v1472_v19 }
  0x33   :  { %1385 = vmatprep.mubr.bf16.mxu0 %v1473_v20  ;;  %1417 = vmatprep.mubr.bf16.mxu1 %v1474_v21 }
  0x3a   :  { %1386 = vmatmul.mubr.bf16.gmra.mrb[12].mxu0 %v1475_v22  ;;  %1418 = vmatmul.mubr.bf16.gmra.mrb[12].mxu1 %v1476_v23 }
  0x3b   :  { %1389 = vmatprep.mubr.bf16.mxu0 %v1477_v24  ;;  %1421 = vmatprep.mubr.bf16.mxu1 %v1478_v25 }
  0x42   :  { %1390 = vmatmul.mubr.bf16.gmra.mrb[16].mxu0 %v1479_v26  ;;  %1422 = vmatmul.mubr.bf16.gmra.mrb[16].mxu1 %v1480_v27 }
  0x43   :  { %1393 = vmatprep.mubr.bf16.mxu0 %v1481_v28  ;;  %1425 = vmatprep.mubr.bf16.mxu1 %v1482_v29 }
  0x4a   :  { %1394 = vmatmul.mubr.bf16.gmra.mrb[20].mxu0 %v1483_v30  ;;  %1426 = vmatmul.mubr.bf16.gmra.mrb[20].mxu1 %v1484_v31 }
  0x4b   :  { %1397 = vmatprep.mubr.bf16.mxu0 %v1485_v32  ;;  %1429 = vmatprep.mubr.bf16.mxu1 %v1486_v33 }
  0x52   :  { %1398 = vmatmul.mubr.bf16.gmra.mrb[24].mxu0 %v1487_v34  ;;  %1430 = vmatmul.mubr.bf16.gmra.mrb[24].mxu1 %v1488_v35 }
  0x53   :  { %1401 = vmatprep.mubr.bf16.mxu0 %v1489_v36  ;;  %1433 = vmatprep.mubr.bf16.mxu1 %v1490_v37 }
  0x5a   :  { %1402 = vmatmul.mubr.bf16.gmra.mrb[28].mxu0 %v1491_v38  ;;  %1434 = vmatmul.mubr.bf16.gmra.mrb[28].mxu1 %v1492_v39 }
  0xf5   :  { %v1375_v41 = vpop.f32.mrb[0].mxu0  ;;  %v1407_v42 = vpop.f32.mrb[0].mxu1 }
  0xf6   :  { %v385_v43 = vadd.f32 %v1375_v41, %v1636_v40  ;;  %v513_v44 = vadd.f32 %v1407_v42, %v1636_v40  ;;  %v376_v45 = vpop.f32.mrb[1].mxu0  ;;  %v504_v46 = vpop.f32.mrb[1].mxu1 }
  0xf7   :  { %v377_v47 = vadd.f32 %v1636_v40, %v376_v45  ;;  %v505_v48 = vadd.f32 %v1636_v40, %v504_v46  ;;  %v1376_v49 = vpop.f32.mrb[2].mxu0  ;;  %v1408_v50 = vpop.f32.mrb[2].mxu1 }
  0xf8   :  { %vm633_vm1 = vcmp.ge.f32.partialorder %v385_v43, 0.0  ;;  %v697_v51 = vmul.f32 0.2, %v385_v43  ;;  %vm665_vm2 = vcmp.ge.f32.partialorder %v513_v44, 0.0  ;;  %v729_v52 = vmul.f32 0.2, %v513_v44 }
  0xf9   :  { %vm631_vm3 = vcmp.ge.f32.partialorder %v377_v47, 0.0  ;;  %v695_v53 = vmul.f32 0.2, %v377_v47  ;;  %vm663_vm4 = vcmp.ge.f32.partialorder %v505_v48, 0.0  ;;  %v727_v54 = vmul.f32 0.2, %v505_v48 }
  0xfa   :  { %v761_v55 = vsel %vm633_vm1, %v385_v43, %v697_v51  ;;  %v793_v56 = vsel %vm665_vm2, %v513_v44, %v729_v52  ;;  %v388_v57 = vadd.f32 %v1376_v49, %v1636_v40  ;;  %v516_v58 = vadd.f32 %v1408_v50, %v1636_v40  ;;  %v379_v59 = vpop.f32.mrb[3].mxu0  ;;  %v507_v60 = vpop.f32.mrb[3].mxu1 }
  0xfb   :  { %v1255_v61 = vpack.c.bf16 %v761_v55, %v761_v55  ;;  %v1287_v62 = vpack.c.bf16 %v793_v56, %v793_v56  ;;  %v759_v63 = vsel %vm631_vm3, %v377_v47, %v695_v53  ;;  %v791_v0 = vsel %vm663_vm4, %v505_v48, %v727_v54 }
  0xfc   :  { %v1253_v1 = vpack.c.bf16 %v759_v63, %v759_v63  ;;  %v1285_v2 = vpack.c.bf16 %v791_v0, %v791_v0  ;;  %vm634_vm5 = vcmp.ge.f32.partialorder %v388_v57, 0.0  ;;  %v698_v3 = vmul.f32 0.2, %v388_v57 }
  0xfd   :  { %1082 = vst.msk [vmem:[%s2040_s3 + $0x8] sm:$0xf] %vm1079_vm0, %v1255_v61  ;;  %1114 = vst.msk [vmem:[%s2040_s3 + $0x88] sm:$0xf] %vm1079_vm0, %v1287_v62  ;;  %vm666_vm6 = vcmp.ge.f32.partialorder %v516_v58, 0.0  ;;  %v380_v5 = vadd.f32 %v1636_v40, %v379_v59  ;;  %v508_v6 = vadd.f32 %v1636_v40, %v507_v60  ;;  %v1379_v7 = vpop.f32.mrb[4].mxu0 }
  0xfe   :  { %v730_v4 = vmul.f32 0.2, %v516_v58  ;;  %v1411_v8 = vpop.f32.mrb[4].mxu1  ;;  %1080 = vst.msk [vmem:[%s2040_s3] sm:$0xf] %vm1079_vm0, %v1253_v1  ;;  %v762_v9 = vsel %vm634_vm5, %v388_v57, %v698_v3  ;;  %v401_v10 = vadd.f32 %v1379_v7, %v1636_v40  ;;  %v392_v12 = vpop.f32.mrb[5].mxu0 }
  0xff   :  { %1112 = vst.msk [vmem:[%s2040_s3 + $0x80] sm:$0xf] %vm1079_vm0, %v1285_v2  ;;  %v529_v11 = vadd.f32 %v1411_v8, %v1636_v40  ;;  %v520_v13 = vpop.f32.mrb[5].mxu1  ;;  %v1256_v14 = vpack.c.bf16 %v762_v9, %v762_v9  ;;  %vm632_vm7 = vcmp.ge.f32.partialorder %v380_v5, 0.0  ;;  %v696_v16 = vmul.f32 0.2, %v380_v5 }
 0x100   :  { %v794_v15 = vsel %vm666_vm6, %v516_v58, %v730_v4  ;;  %v1380_v17 = vpop.f32.mrb[6].mxu0  ;;  %v1412_v18 = vpop.f32.mrb[6].mxu1  ;;  %vm664_vm8 = vcmp.ge.f32.partialorder %v508_v6, 0.0  ;;  %v728_v20 = vmul.f32 0.2, %v508_v6  ;;  %vm637_vm9 = vcmp.ge.f32.partialorder %v401_v10, 0.0 }
 0x101   :  { %v1288_v19 = vpack.c.bf16 %v794_v15, %v794_v15  ;;  %v395_v21 = vpop.f32.mrb[7].mxu0  ;;  %v523_v22 = vpop.f32.mrb[7].mxu1  ;;  %1083 = vst.msk [vmem:[%s2040_s3 + $0xc] sm:$0xf] %vm1079_vm0, %v1256_v14  ;;  %v760_v23 = vsel %vm632_vm7, %v380_v5, %v696_v16  ;;  %v701_v24 = vmul.f32 0.2, %v401_v10  ;;  %v393_v28 = vadd.f32 %v1636_v40, %v392_v12 }
 0x102   :  { %vm669_vm10 = vcmp.ge.f32.partialorder %v529_v11, 0.0  ;;  %v733_v25 = vmul.f32 0.2, %v529_v11  ;;  %v1254_v26 = vpack.c.bf16 %v760_v23, %v760_v23  ;;  %v792_v27 = vsel %vm664_vm8, %v508_v6, %v728_v20 }
 0x103   :  { %1115 = vst.msk [vmem:[%s2040_s3 + $0x8c] sm:$0xf] %vm1079_vm0, %v1288_v19  ;;  %v521_v29 = vadd.f32 %v1636_v40, %v520_v13  ;;  %v1286_v30 = vpack.c.bf16 %v792_v27, %v792_v27  ;;  %v765_v31 = vsel %vm637_vm9, %v401_v10, %v701_v24  ;;  %v404_v33 = vadd.f32 %v1380_v17, %v1636_v40 }
 0x104   :  { %v797_v32 = vsel %vm669_vm10, %v529_v11, %v733_v25  ;;  %1081 = vst.msk [vmem:[%s2040_s3 + $0x4] sm:$0xf] %vm1079_vm0, %v1254_v26  ;;  %v1259_v34 = vpack.c.bf16 %v765_v31, %v765_v31  ;;  %vm635_vm11 = vcmp.ge.f32.partialorder %v393_v28, 0.0  ;;  %v699_v36 = vmul.f32 0.2, %v393_v28 }
 0x105   :  { %v1291_v35 = vpack.c.bf16 %v797_v32, %v797_v32  ;;  %1113 = vst.msk [vmem:[%s2040_s3 + $0x84] sm:$0xf] %vm1079_vm0, %v1286_v30  ;;  %vm667_vm12 = vcmp.ge.f32.partialorder %v521_v29, 0.0  ;;  %v731_v37 = vmul.f32 0.2, %v521_v29  ;;  %vm638_vm13 = vcmp.ge.f32.partialorder %v404_v33, 0.0 }
 0x106   :  { %v702_v38 = vmul.f32 0.2, %v404_v33  ;;  %1086 = vst.msk [vmem:[%s2040_s3 + $0x18] sm:$0xf] %vm1079_vm0, %v1259_v34  ;;  %v763_v39 = vsel %vm635_vm11, %v393_v28, %v699_v36  ;;  %v532_v41 = vadd.f32 %v1412_v18, %v1636_v40  ;;  %v396_v42 = vadd.f32 %v1636_v40, %v395_v21  ;;  %v1383_v44 = vpop.f32.mrb[8].mxu0  ;;  %v1415_v45 = vpop.f32.mrb[8].mxu1 }
 0x107   :  { %1118 = vst.msk [vmem:[%s2040_s3 + $0x98] sm:$0xf] %vm1079_vm0, %v1291_v35  ;;  %v524_v43 = vadd.f32 %v1636_v40, %v523_v22  ;;  %v1257_v46 = vpack.c.bf16 %v763_v39, %v763_v39  ;;  %v795_v47 = vsel %vm667_vm12, %v521_v29, %v731_v37  ;;  %v417_v49 = vadd.f32 %v1383_v44, %v1636_v40  ;;  %v408_v50 = vpop.f32.mrb[9].mxu0  ;;  %v536_v51 = vpop.f32.mrb[9].mxu1 }
 0x108   :  { %v766_v48 = vsel %vm638_vm13, %v404_v33, %v702_v38  ;;  %v1289_v52 = vpack.c.bf16 %v795_v47, %v795_v47  ;;  %vm670_vm14 = vcmp.ge.f32.partialorder %v532_v41, 0.0  ;;  %v734_v54 = vmul.f32 0.2, %v532_v41  ;;  %v1384_v55 = vpop.f32.mrb[10].mxu0  ;;  %v1416_v56 = vpop.f32.mrb[10].mxu1 }
 0x109   :  { %v1260_v53 = vpack.c.bf16 %v766_v48, %v766_v48  ;;  %1084 = vst.msk [vmem:[%s2040_s3 + $0x10] sm:$0xf] %vm1079_vm0, %v1257_v46  ;;  %vm636_vm15 = vcmp.ge.f32.partialorder %v396_v42, 0.0  ;;  %v700_v57 = vmul.f32 0.2, %v396_v42  ;;  %vm668_vm1 = vcmp.ge.f32.partialorder %v524_v43, 0.0 }
 0x10a   :  { %v732_v58 = vmul.f32 0.2, %v524_v43  ;;  %1116 = vst.msk [vmem:[%s2040_s3 + $0x90] sm:$0xf] %vm1079_vm0, %v1289_v52  ;;  %v798_v59 = vsel %vm670_vm14, %v532_v41, %v734_v54  ;;  %vm641_vm2 = vcmp.ge.f32.partialorder %v417_v49, 0.0  ;;  %v545_v61 = vadd.f32 %v1415_v45, %v1636_v40  ;;  %v411_v62 = vpop.f32.mrb[11].mxu0 }
 0x10b   :  { %1087 = vst.msk [vmem:[%s2040_s3 + $0x1c] sm:$0xf] %vm1079_vm0, %v1260_v53  ;;  %v705_v60 = vmul.f32 0.2, %v417_v49  ;;  %v539_v63 = vpop.f32.mrb[11].mxu1  ;;  %v1292_v0 = vpack.c.bf16 %v798_v59, %v798_v59  ;;  %v764_v1 = vsel %vm636_vm15, %v396_v42, %v700_v57  ;;  %v409_v3 = vadd.f32 %v1636_v40, %v408_v50 }
 0x10c   :  { %v796_v2 = vsel %vm668_vm1, %v524_v43, %v732_v58  ;;  %v1258_v4 = vpack.c.bf16 %v764_v1, %v764_v1  ;;  %vm673_vm3 = vcmp.ge.f32.partialorder %v545_v61, 0.0  ;;  %v737_v8 = vmul.f32 0.2, %v545_v61 }
 0x10d   :  { %v1290_v5 = vpack.c.bf16 %v796_v2, %v796_v2  ;;  %v769_v6 = vsel %vm641_vm2, %v417_v49, %v705_v60  ;;  %1119 = vst.msk [vmem:[%s2040_s3 + $0x9c] sm:$0xf] %vm1079_vm0, %v1292_v0  ;;  %vm639_vm4 = vcmp.ge.f32.partialorder %v409_v3, 0.0  ;;  %v703_v9 = vmul.f32 0.2, %v409_v3  ;;  %v1387_v10 = vpop.f32.mrb[12].mxu0 }
 0x10e   :  { %v1263_v7 = vpack.c.bf16 %v769_v6, %v769_v6  ;;  %1085 = vst.msk [vmem:[%s2040_s3 + $0x14] sm:$0xf] %vm1079_vm0, %v1258_v4  ;;  %v537_v11 = vadd.f32 %v1636_v40, %v536_v51  ;;  %v420_v12 = vadd.f32 %v1384_v55, %v1636_v40  ;;  %v548_v13 = vadd.f32 %v1416_v56, %v1636_v40  ;;  %v1419_v15 = vpop.f32.mrb[12].mxu1  ;;  %v424_v16 = vpop.f32.mrb[13].mxu0 }
 0x10f   :  { %1117 = vst.msk [vmem:[%s2040_s3 + $0x94] sm:$0xf] %vm1079_vm0, %v1290_v5  ;;  %v412_v14 = vadd.f32 %v1636_v40, %v411_v62  ;;  %v801_v17 = vsel %vm673_vm3, %v545_v61, %v737_v8  ;;  %v767_v18 = vsel %vm639_vm4, %v409_v3, %v703_v9  ;;  %v540_v19 = vadd.f32 %v1636_v40, %v539_v63  ;;  %v552_v21 = vpop.f32.mrb[13].mxu1  ;;  %v1388_v22 = vpop.f32.mrb[14].mxu0 }
 0x110   :  { %1090 = vst.msk [vmem:[%s2040_s3 + $0x28] sm:$0xf] %vm1079_vm0, %v1263_v7  ;;  %v433_v20 = vadd.f32 %v1387_v10, %v1636_v40  ;;  %v1295_v23 = vpack.c.bf16 %v801_v17, %v801_v17  ;;  %v1261_v24 = vpack.c.bf16 %v767_v18, %v767_v18  ;;  %vm671_vm5 = vcmp.ge.f32.partialorder %v537_v11, 0.0  ;;  %v1420_v26 = vpop.f32.mrb[14].mxu1  ;;  %v427_v27 = vpop.f32.mrb[15].mxu0 }
 0x111   :  { %v735_v25 = vmul.f32 0.2, %v537_v11  ;;  %vm642_vm6 = vcmp.ge.f32.partialorder %v420_v12, 0.0  ;;  %v706_v28 = vmul.f32 0.2, %v420_v12  ;;  %vm674_vm7 = vcmp.ge.f32.partialorder %v548_v13, 0.0 }
 0x112   :  { %v738_v29 = vmul.f32 0.2, %v548_v13  ;;  %1122 = vst.msk [vmem:[%s2040_s3 + $0xa8] sm:$0xf] %vm1079_vm0, %v1295_v23  ;;  %1088 = vst.msk [vmem:[%s2040_s3 + $0x20] sm:$0xf] %vm1079_vm0, %v1261_v24  ;;  %v561_v44 = vadd.f32 %v1419_v15, %v1636_v40  ;;  %v425_v48 = vadd.f32 %v1636_v40, %v424_v16  ;;  %v553_v49 = vadd.f32 %v1636_v40, %v552_v21 }
 0x113   :  { %v799_v30 = vsel %vm671_vm5, %v537_v11, %v735_v25  ;;  %vm640_vm8 = vcmp.ge.f32.partialorder %v412_v14, 0.0  ;;  %v704_v31 = vmul.f32 0.2, %v412_v14  ;;  %vm672_vm9 = vcmp.ge.f32.partialorder %v540_v19, 0.0  ;;  %v555_v32 = vpop.f32.mrb[15].mxu1 }
 0x114   :  { %v1293_v33 = vpack.c.bf16 %v799_v30, %v799_v30  ;;  %v770_v34 = vsel %vm642_vm6, %v420_v12, %v706_v28  ;;  %v802_v35 = vsel %vm674_vm7, %v548_v13, %v738_v29  ;;  %v736_v36 = vmul.f32 0.2, %v540_v19 }
 0x115   :  { %v1264_v37 = vpack.c.bf16 %v770_v34, %v770_v34  ;;  %v1296_v38 = vpack.c.bf16 %v802_v35, %v802_v35  ;;  %v768_v39 = vsel %vm640_vm8, %v412_v14, %v704_v31  ;;  %vm645_vm10 = vcmp.ge.f32.partialorder %v433_v20, 0.0  ;;  %v1391_v45 = vpop.f32.mrb[16].mxu0  ;;  %v1423_v46 = vpop.f32.mrb[16].mxu1 }
 0x116   :  { %1120 = vst.msk [vmem:[%s2040_s3 + $0xa0] sm:$0xf] %vm1079_vm0, %v1293_v33  ;;  %v1262_v41 = vpack.c.bf16 %v768_v39, %v768_v39  ;;  %v800_v42 = vsel %vm672_vm9, %v540_v19, %v736_v36  ;;  %v709_v43 = vmul.f32 0.2, %v433_v20  ;;  %v436_v50 = vadd.f32 %v1388_v22, %v1636_v40  ;;  %v440_v51 = vpop.f32.mrb[17].mxu0  ;;  %v568_v52 = vpop.f32.mrb[17].mxu1 }
 0x117   :  { %1091 = vst.msk [vmem:[%s2040_s3 + $0x2c] sm:$0xf] %vm1079_vm0, %v1264_v37  ;;  %1123 = vst.msk [vmem:[%s2040_s3 + $0xac] sm:$0xf] %vm1079_vm0, %v1296_v38  ;;  %v1294_v47 = vpack.c.bf16 %v800_v42, %v800_v42  ;;  %vm677_vm11 = vcmp.ge.f32.partialorder %v561_v44, 0.0  ;;  %v564_v55 = vadd.f32 %v1420_v26, %v1636_v40  ;;  %v1762_v56 = vpop.f32.mrb[18].mxu0  ;;  %v428_v7 = vadd.f32 %v1636_v40, %v427_v27 }
 0x118   :  { %1089 = vst.msk [vmem:[%s2040_s3 + $0x24] sm:$0xf] %vm1079_vm0, %v1262_v41  ;;  %v773_v53 = vsel %vm645_vm10, %v433_v20, %v709_v43  ;;  %v741_v54 = vmul.f32 0.2, %v561_v44  ;;  %v1764_v57 = vpop.f32.mrb[18].mxu1  ;;  %vm643_vm12 = vcmp.ge.f32.partialorder %v425_v48, 0.0  ;;  %v556_v11 = vadd.f32 %v1636_v40, %v555_v32 }
 0x119   :  { %1121 = vst.msk [vmem:[%s2040_s3 + $0xa4] sm:$0xf] %vm1079_vm0, %v1294_v47  ;;  %v1267_v58 = vpack.c.bf16 %v773_v53, %v773_v53  ;;  %v707_v59 = vmul.f32 0.2, %v425_v48  ;;  %vm675_vm13 = vcmp.ge.f32.partialorder %v553_v49, 0.0  ;;  %v1770_v60 = vpop.f32.mrb[19].mxu0  ;;  %v449_v14 = vadd.f32 %v1391_v45, %v1636_v40 }
 0x11a   :  { %v1772_v61 = vpop.f32.mrb[19].mxu1  ;;  %v805_v62 = vsel %vm677_vm11, %v561_v44, %v741_v54  ;;  %v739_v63 = vmul.f32 0.2, %v553_v49  ;;  %vm646_vm14 = vcmp.ge.f32.partialorder %v436_v50, 0.0  ;;  %v710_v0 = vmul.f32 0.2, %v436_v50 }
 0x11b   :  { %1094 = vst.msk [vmem:[%s2040_s3 + $0x38] sm:$0xf] %vm1079_vm0, %v1267_v58  ;;  %v1299_v1 = vpack.c.bf16 %v805_v62, %v805_v62  ;;  %v771_v2 = vsel %vm643_vm12, %v425_v48, %v707_v59  ;;  %vm678_vm15 = vcmp.ge.f32.partialorder %v564_v55, 0.0  ;;  %v742_v3 = vmul.f32 0.2, %v564_v55 }
 0x11c   :  { %v1265_v4 = vpack.c.bf16 %v771_v2, %v771_v2  ;;  %v803_v5 = vsel %vm675_vm13, %v553_v49, %v739_v63  ;;  %v774_v6 = vsel %vm646_vm14, %v436_v50, %v710_v0  ;;  %vm644_vm1 = vcmp.ge.f32.partialorder %v428_v7, 0.0 }
 0x11d   :  { %1126 = vst.msk [vmem:[%s2040_s3 + $0xb8] sm:$0xf] %vm1079_vm0, %v1299_v1  ;;  %v1297_v8 = vpack.c.bf16 %v803_v5, %v803_v5  ;;  %v1268_v9 = vpack.c.bf16 %v774_v6, %v774_v6  ;;  %v806_v10 = vsel %vm678_vm15, %v564_v55, %v742_v3  ;;  %v708_v13 = vmul.f32 0.2, %v428_v7  ;;  %v1395_v15 = vpop.f32.mrb[20].mxu0  ;;  %v1427_v16 = vpop.f32.mrb[20].mxu1 }
 0x11e   :  { %1092 = vst.msk [vmem:[%s2040_s3 + $0x30] sm:$0xf] %vm1079_vm0, %v1265_v4  ;;  %v1300_v12 = vpack.c.bf16 %v806_v10, %v806_v10  ;;  %vm676_vm2 = vcmp.ge.f32.partialorder %v556_v11, 0.0  ;;  %v740_v17 = vmul.f32 0.2, %v556_v11  ;;  %v577_v18 = vadd.f32 %v1423_v46, %v1636_v40  ;;  %v456_v20 = vpop.f32.mrb[21].mxu0 }
 0x11f   :  { %1124 = vst.msk [vmem:[%s2040_s3 + $0xb0] sm:$0xf] %vm1079_vm0, %v1297_v8  ;;  %1095 = vst.msk [vmem:[%s2040_s3 + $0x3c] sm:$0xf] %vm1079_vm0, %v1268_v9  ;;  %v441_v19 = vadd.f32 %v1636_v40, %v440_v51  ;;  %v1799_v21 = vpop.f32.mrb[21].mxu1  ;;  %v772_v22 = vsel %vm644_vm1, %v428_v7, %v708_v13  ;;  %vm649_vm3 = vcmp.ge.f32.partialorder %v449_v14, 0.0  ;;  %v569_v24 = vadd.f32 %v1636_v40, %v568_v52 }
 0x120   :  { %1127 = vst.msk [vmem:[%s2040_s3 + $0xbc] sm:$0xf] %vm1079_vm0, %v1300_v12  ;;  %v713_v23 = vmul.f32 0.2, %v449_v14  ;;  %v1806_v25 = vpop.f32.mrb[22].mxu0  ;;  %v1808_v26 = vpop.f32.mrb[22].mxu1  ;;  %v1266_v27 = vpack.c.bf16 %v772_v22, %v772_v22  ;;  %v804_v28 = vsel %vm676_vm2, %v556_v11, %v740_v17  ;;  %v452_v41 = vadd.f32 %v1762_v56, %v1636_v40 }
 0x121   :  { %vm681_vm4 = vcmp.ge.f32.partialorder %v577_v18, 0.0  ;;  %v745_v29 = vmul.f32 0.2, %v577_v18  ;;  %v1810_v30 = vpop.f32.mrb[23].mxu0  ;;  %v1812_v31 = vpop.f32.mrb[23].mxu1  ;;  %v1298_v32 = vpack.c.bf16 %v804_v28, %v804_v28  ;;  %vm647_vm5 = vcmp.ge.f32.partialorder %v441_v19, 0.0 }
 0x122   :  { %v777_v33 = vsel %vm649_vm3, %v449_v14, %v713_v23  ;;  %v711_v34 = vmul.f32 0.2, %v441_v19  ;;  %1093 = vst.msk [vmem:[%s2040_s3 + $0x34] sm:$0xf] %vm1079_vm0, %v1266_v27  ;;  %vm679_vm6 = vcmp.ge.f32.partialorder %v569_v24, 0.0  ;;  %v580_v42 = vadd.f32 %v1764_v57, %v1636_v40 }
 0x123   :  { %v1271_v35 = vpack.c.bf16 %v777_v33, %v777_v33  ;;  %v809_v36 = vsel %vm681_vm4, %v577_v18, %v745_v29  ;;  %v743_v37 = vmul.f32 0.2, %v569_v24  ;;  %1125 = vst.msk [vmem:[%s2040_s3 + $0xb4] sm:$0xf] %vm1079_vm0, %v1298_v32  ;;  %v444_v45 = vadd.f32 %v1636_v40, %v1770_v60 }
 0x124   :  { %v1303_v38 = vpack.c.bf16 %v809_v36, %v809_v36  ;;  %v775_v39 = vsel %vm647_vm5, %v441_v19, %v711_v34  ;;  %v572_v46 = vadd.f32 %v1636_v40, %v1772_v61  ;;  %vm650_vm7 = vcmp.ge.f32.partialorder %v452_v41, 0.0 }
 0x125   :  { %1098 = vst.msk [vmem:[%s2040_s3 + $0x48] sm:$0xf] %vm1079_vm0, %v1271_v35  ;;  %v1269_v43 = vpack.c.bf16 %v775_v39, %v775_v39  ;;  %v807_v44 = vsel %vm679_vm6, %v569_v24, %v743_v37  ;;  %v714_v48 = vmul.f32 0.2, %v452_v41  ;;  %vm682_vm8 = vcmp.ge.f32.partialorder %v580_v42, 0.0  ;;  %v1838_v49 = vpop.f32.mrb[24].mxu0 }
 0x126   :  { %1130 = vst.msk [vmem:[%s2040_s3 + $0xc8] sm:$0xf] %vm1079_vm0, %v1303_v38  ;;  %v1301_v47 = vpack.c.bf16 %v807_v44, %v807_v44  ;;  %v1840_v50 = vpop.f32.mrb[24].mxu1  ;;  %v746_v51 = vmul.f32 0.2, %v580_v42  ;;  %vm648_vm9 = vcmp.ge.f32.partialorder %v444_v45, 0.0  ;;  %v465_v55 = vadd.f32 %v1395_v15, %v1636_v40 }
 0x127   :  { %1096 = vst.msk [vmem:[%s2040_s3 + $0x40] sm:$0xf] %vm1079_vm0, %v1269_v43  ;;  %v712_v52 = vmul.f32 0.2, %v444_v45  ;;  %vm680_vm10 = vcmp.ge.f32.partialorder %v572_v46, 0.0  ;;  %v778_v53 = vsel %vm650_vm7, %v452_v41, %v714_v48  ;;  %v593_v56 = vadd.f32 %v1427_v16, %v1636_v40  ;;  %v1852_v57 = vpop.f32.mrb[25].mxu0 }
 0x128   :  { %1128 = vst.msk [vmem:[%s2040_s3 + $0xc0] sm:$0xf] %vm1079_vm0, %v1301_v47  ;;  %v744_v54 = vmul.f32 0.2, %v572_v46  ;;  %v1854_v58 = vpop.f32.mrb[25].mxu1  ;;  %v1272_v59 = vpack.c.bf16 %v778_v53, %v778_v53  ;;  %v810_v60 = vsel %vm682_vm8, %v580_v42, %v746_v51  ;;  %v457_v62 = vadd.f32 %v1636_v40, %v456_v20  ;;  %v1858_v63 = vpop.f32.mrb[26].mxu0 }
 0x129   :  { %v776_v61 = vsel %vm648_vm9, %v444_v45, %v712_v52  ;;  %v1860_v0 = vpop.f32.mrb[26].mxu1  ;;  %v1304_v1 = vpack.c.bf16 %v810_v60, %v810_v60  ;;  %vm653_vm11 = vcmp.ge.f32.partialorder %v465_v55, 0.0  ;;  %v1863_v4 = vpop.f32.mrb[27].mxu0  ;;  %v717_v7 = vmul.f32 0.2, %v465_v55 }
 0x12a   :  { %v1270_v2 = vpack.c.bf16 %v776_v61, %v776_v61  ;;  %v808_v3 = vsel %vm680_vm10, %v572_v46, %v744_v54  ;;  %v1865_v5 = vpop.f32.mrb[27].mxu1  ;;  %1099 = vst.msk [vmem:[%s2040_s3 + $0x4c] sm:$0xf] %vm1079_vm0, %v1272_v59  ;;  %vm685_vm12 = vcmp.ge.f32.partialorder %v593_v56, 0.0  ;;  %v749_v8 = vmul.f32 0.2, %v593_v56 }
 0x12b   :  { %v1302_v6 = vpack.c.bf16 %v808_v3, %v808_v3  ;;  %1131 = vst.msk [vmem:[%s2040_s3 + $0xcc] sm:$0xf] %vm1079_vm0, %v1304_v1  ;;  %vm651_vm13 = vcmp.ge.f32.partialorder %v457_v62, 0.0  ;;  %v715_v9 = vmul.f32 0.2, %v457_v62  ;;  %v585_v10 = vadd.f32 %v1636_v40, %v1799_v21 }
 0x12c   :  { %1097 = vst.msk [vmem:[%s2040_s3 + $0x44] sm:$0xf] %vm1079_vm0, %v1270_v2  ;;  %v468_v11 = vadd.f32 %v1806_v25, %v1636_v40  ;;  %v781_v12 = vsel %vm653_vm11, %v465_v55, %v717_v7  ;;  %v813_v13 = vsel %vm685_vm12, %v593_v56, %v749_v8  ;;  %v596_v14 = vadd.f32 %v1808_v26, %v1636_v40 }
 0x12d   :  { %1129 = vst.msk [vmem:[%s2040_s3 + $0xc4] sm:$0xf] %vm1079_vm0, %v1302_v6  ;;  %v460_v15 = vadd.f32 %v1636_v40, %v1810_v30  ;;  %v1275_v16 = vpack.c.bf16 %v781_v12, %v781_v12  ;;  %v1307_v17 = vpack.c.bf16 %v813_v13, %v813_v13  ;;  %v779_v18 = vsel %vm651_vm13, %v457_v62, %v715_v9  ;;  %v1891_v19 = vpop.f32.mrb[28].mxu0  ;;  %v1893_v20 = vpop.f32.mrb[28].mxu1 }
 0x12e   :  { %vm683_vm14 = vcmp.ge.f32.partialorder %v585_v10, 0.0  ;;  %v1273_v21 = vpack.c.bf16 %v779_v18, %v779_v18  ;;  %v747_v22 = vmul.f32 0.2, %v585_v10  ;;  %vm654_vm15 = vcmp.ge.f32.partialorder %v468_v11, 0.0  ;;  %v1895_v24 = vpop.f32.mrb[29].mxu0  ;;  %v1913_v32 = vpop.f32.mrb[29].mxu1 }
 0x12f   :  { %v718_v23 = vmul.f32 0.2, %v468_v11  ;;  %1102 = vst.msk [vmem:[%s2040_s3 + $0x58] sm:$0xf] %vm1079_vm0, %v1275_v16  ;;  %1134 = vst.msk [vmem:[%s2040_s3 + $0xd8] sm:$0xf] %vm1079_vm0, %v1307_v17  ;;  %v588_v29 = vadd.f32 %v1636_v40, %v1812_v31  ;;  %v481_v30 = vadd.f32 %v1838_v49, %v1636_v40  ;;  %v609_v45 = vadd.f32 %v1840_v50, %v1636_v40 }
 0x130   :  { %vm686_vm1 = vcmp.ge.f32.partialorder %v596_v14, 0.0  ;;  %v750_v25 = vmul.f32 0.2, %v596_v14  ;;  %vm652_vm2 = vcmp.ge.f32.partialorder %v460_v15, 0.0  ;;  %v716_v26 = vmul.f32 0.2, %v460_v15 }
 0x131   :  { %1100 = vst.msk [vmem:[%s2040_s3 + $0x50] sm:$0xf] %vm1079_vm0, %v1273_v21  ;;  %v811_v27 = vsel %vm683_vm14, %v585_v10, %v747_v22  ;;  %v782_v28 = vsel %vm654_vm15, %v468_v11, %v718_v23  ;;  %v1915_v33 = vpop.f32.mrb[30].mxu0  ;;  %v1917_v38 = vpop.f32.mrb[30].mxu1  ;;  %vm684_vm3 = vcmp.ge.f32.partialorder %v588_v29, 0.0  ;;  %vm657_vm4 = vcmp.ge.f32.partialorder %v481_v30, 0.0 }
 0x132   :  { %v1305_v34 = vpack.c.bf16 %v811_v27, %v811_v27  ;;  %v1276_v35 = vpack.c.bf16 %v782_v28, %v782_v28  ;;  %v814_v36 = vsel %vm686_vm1, %v596_v14, %v750_v25  ;;  %v780_v37 = vsel %vm652_vm2, %v460_v15, %v716_v26  ;;  %v1919_v39 = vpop.f32.mrb[31].mxu0  ;;  %v1921_v31 = vpop.f32.mrb[31].mxu1 }
 0x133   :  { %v1308_v41 = vpack.c.bf16 %v814_v36, %v814_v36  ;;  %v1274_v42 = vpack.c.bf16 %v780_v37, %v780_v37  ;;  %v748_v43 = vmul.f32 0.2, %v588_v29  ;;  %v721_v44 = vmul.f32 0.2, %v481_v30 }
 0x134   :  { %1132 = vst.msk [vmem:[%s2040_s3 + $0xd0] sm:$0xf] %vm1079_vm0, %v1305_v34  ;;  %1103 = vst.msk [vmem:[%s2040_s3 + $0x5c] sm:$0xf] %vm1079_vm0, %v1276_v35  ;;  %v473_v46 = vadd.f32 %v1636_v40, %v1852_v57  ;;  %v601_v48 = vadd.f32 %v1636_v40, %v1854_v58  ;;  %v484_v49 = vadd.f32 %v1858_v63, %v1636_v40  ;;  %vm689_vm5 = vcmp.ge.f32.partialorder %v609_v45, 0.0 }
 0x135   :  { %1135 = vst.msk [vmem:[%s2040_s3 + $0xdc] sm:$0xf] %vm1079_vm0, %v1308_v41  ;;  %1101 = vst.msk [vmem:[%s2040_s3 + $0x54] sm:$0xf] %vm1079_vm0, %v1274_v42  ;;  %v812_v47 = vsel %vm684_vm3, %v588_v29, %v748_v43  ;;  %v612_v50 = vadd.f32 %v1860_v0, %v1636_v40  ;;  %v785_v52 = vsel %vm657_vm4, %v481_v30, %v721_v44  ;;  %v753_v53 = vmul.f32 0.2, %v609_v45 }
 0x136   :  { %v1306_v51 = vpack.c.bf16 %v812_v47, %v812_v47  ;;  %v1279_v54 = vpack.c.bf16 %v785_v52, %v785_v52  ;;  %vm655_vm6 = vcmp.ge.f32.partialorder %v473_v46, 0.0  ;;  %v719_v55 = vmul.f32 0.2, %v473_v46 }
 0x137   :  { %vm687_vm7 = vcmp.ge.f32.partialorder %v601_v48, 0.0  ;;  %v817_v56 = vsel %vm689_vm5, %v609_v45, %v753_v53  ;;  %v751_v57 = vmul.f32 0.2, %v601_v48  ;;  %vm658_vm8 = vcmp.ge.f32.partialorder %v484_v49, 0.0 }
 0x138   :  { %1133 = vst.msk [vmem:[%s2040_s3 + $0xd4] sm:$0xf] %vm1079_vm0, %v1306_v51  ;;  %v722_v58 = vmul.f32 0.2, %v484_v49  ;;  %1106 = vst.msk [vmem:[%s2040_s3 + $0x68] sm:$0xf] %vm1079_vm0, %v1279_v54  ;;  %v1311_v59 = vpack.c.bf16 %v817_v56, %v817_v56  ;;  %v783_v60 = vsel %vm655_vm6, %v473_v46, %v719_v55  ;;  %v476_v1 = vadd.f32 %v1636_v40, %v1863_v4 }
 0x139   :  { %vm690_vm9 = vcmp.ge.f32.partialorder %v612_v50, 0.0  ;;  %v754_v61 = vmul.f32 0.2, %v612_v50  ;;  %v1277_v62 = vpack.c.bf16 %v783_v60, %v783_v60  ;;  %v815_v63 = vsel %vm687_vm7, %v601_v48, %v751_v57 }
 0x13a   :  { %v786_v0 = vsel %vm658_vm8, %v484_v49, %v722_v58  ;;  %1138 = vst.msk [vmem:[%s2040_s3 + $0xe8] sm:$0xf] %vm1079_vm0, %v1311_v59  ;;  %v1309_v2 = vpack.c.bf16 %v815_v63, %v815_v63  ;;  %v604_v7 = vadd.f32 %v1636_v40, %v1865_v5  ;;  %vm656_vm10 = vcmp.ge.f32.partialorder %v476_v1, 0.0 }
 0x13b   :  { %v1280_v3 = vpack.c.bf16 %v786_v0, %v786_v0  ;;  %v818_v6 = vsel %vm690_vm9, %v612_v50, %v754_v61  ;;  %1104 = vst.msk [vmem:[%s2040_s3 + $0x60] sm:$0xf] %vm1079_vm0, %v1277_v62  ;;  %v720_v9 = vmul.f32 0.2, %v476_v1  ;;  %v497_v4 = vadd.f32 %v1891_v19, %v1636_v40 }
 0x13c   :  { %v1312_v8 = vpack.c.bf16 %v818_v6, %v818_v6  ;;  %1136 = vst.msk [vmem:[%s2040_s3 + $0xe0] sm:$0xf] %vm1079_vm0, %v1309_v2  ;;  %vm688_vm11 = vcmp.ge.f32.partialorder %v604_v7, 0.0  ;;  %v752_v5 = vmul.f32 0.2, %v604_v7  ;;  %v625_v10 = vadd.f32 %v1893_v20, %v1636_v40 }
 0x13d   :  { %1107 = vst.msk [vmem:[%s2040_s3 + $0x6c] sm:$0xf] %vm1079_vm0, %v1280_v3  ;;  %v489_v11 = vadd.f32 %v1636_v40, %v1895_v24  ;;  %v784_v12 = vsel %vm656_vm10, %v476_v1, %v720_v9  ;;  %vm661_vm12 = vcmp.ge.f32.partialorder %v497_v4, 0.0  ;;  %v725_v13 = vmul.f32 0.2, %v497_v4 }
 0x13e   :  { %1139 = vst.msk [vmem:[%s2040_s3 + $0xec] sm:$0xf] %vm1079_vm0, %v1312_v8  ;;  %v617_v14 = vadd.f32 %v1636_v40, %v1913_v32  ;;  %v1278_v15 = vpack.c.bf16 %v784_v12, %v784_v12  ;;  %v816_v16 = vsel %vm688_vm11, %v604_v7, %v752_v5  ;;  %vm693_vm13 = vcmp.ge.f32.partialorder %v625_v10, 0.0 }
 0x13f   :  { %v757_v17 = vmul.f32 0.2, %v625_v10  ;;  %v1310_v18 = vpack.c.bf16 %v816_v16, %v816_v16  ;;  %v789_v19 = vsel %vm661_vm12, %v497_v4, %v725_v13  ;;  %vm659_vm14 = vcmp.ge.f32.partialorder %v489_v11, 0.0 }
 0x140   :  { %v723_v20 = vmul.f32 0.2, %v489_v11  ;;  %1105 = vst.msk [vmem:[%s2040_s3 + $0x64] sm:$0xf] %vm1079_vm0, %v1278_v15  ;;  %v1283_v21 = vpack.c.bf16 %v789_v19, %v789_v19  ;;  %vm691_vm15 = vcmp.ge.f32.partialorder %v617_v14, 0.0  ;;  %v500_v26 = vadd.f32 %v1915_v33, %v1636_v40 }
 0x141   :  { %v821_v22 = vsel %vm693_vm13, %v625_v10, %v757_v17  ;;  %v755_v23 = vmul.f32 0.2, %v617_v14  ;;  %1137 = vst.msk [vmem:[%s2040_s3 + $0xe4] sm:$0xf] %vm1079_vm0, %v1310_v18  ;;  %v628_v27 = vadd.f32 %v1917_v38, %v1636_v40  ;;  %v492_v30 = vadd.f32 %v1636_v40, %v1919_v39 }
 0x142   :  { %v1315_v24 = vpack.c.bf16 %v821_v22, %v821_v22  ;;  %v787_v25 = vsel %vm659_vm14, %v489_v11, %v723_v20  ;;  %1110 = vst.msk [vmem:[%s2040_s3 + $0x78] sm:$0xf] %vm1079_vm0, %v1283_v21  ;;  %v620_v32 = vadd.f32 %v1636_v40, %v1921_v31  ;;  %vm662_vm1 = vcmp.ge.f32.partialorder %v500_v26, 0.0 }
 0x143   :  { %v1281_v28 = vpack.c.bf16 %v787_v25, %v787_v25  ;;  %v819_v29 = vsel %vm691_vm15, %v617_v14, %v755_v23  ;;  %v726_v34 = vmul.f32 0.2, %v500_v26  ;;  %vm694_vm2 = vcmp.ge.f32.partialorder %v628_v27, 0.0 }
 0x144   :  { %1142 = vst.msk [vmem:[%s2040_s3 + $0xf8] sm:$0xf] %vm1079_vm0, %v1315_v24  ;;  %v1313_v33 = vpack.c.bf16 %v819_v29, %v819_v29  ;;  %v758_v35 = vmul.f32 0.2, %v628_v27  ;;  %vm660_vm3 = vcmp.ge.f32.partialorder %v492_v30, 0.0  ;;  %vm692_vm4 = vcmp.ge.f32.partialorder %v620_v32, 0.0 }
 0x145   :  { %1108 = vst.msk [vmem:[%s2040_s3 + $0x70] sm:$0xf] %vm1079_vm0, %v1281_v28  ;;  %v724_v36 = vmul.f32 0.2, %v492_v30  ;;  %v790_v40 = vsel %vm662_vm1, %v500_v26, %v726_v34  ;;  %v756_v37 = vmul.f32 0.2, %v620_v32 }
 0x146   :  { %1140 = vst.msk [vmem:[%s2040_s3 + $0xf0] sm:$0xf] %vm1079_vm0, %v1313_v33  ;;  %v1284_v38 = vpack.c.bf16 %v790_v40, %v790_v40  ;;  %v822_v39 = vsel %vm694_vm2, %v628_v27, %v758_v35 }
 0x147   :  { %v788_v41 = vsel %vm660_vm3, %v492_v30, %v724_v36  ;;  %v1316_v42 = vpack.c.bf16 %v822_v39, %v822_v39  ;;  %v820_v31 = vsel %vm692_vm4, %v620_v32, %v756_v37 }
 0x148   :  { %v1282_v43 = vpack.c.bf16 %v788_v41, %v788_v41  ;;  %1111 = vst.msk [vmem:[%s2040_s3 + $0x7c] sm:$0xf] %vm1079_vm0, %v1284_v38  ;;  %v1314_v44 = vpack.c.bf16 %v820_v31, %v820_v31 }
 0x149   :  { %1143 = vst.msk [vmem:[%s2040_s3 + $0xfc] sm:$0xf] %vm1079_vm0, %v1316_v42 }
 0x14a   :  { %1109 = vst.msk [vmem:[%s2040_s3 + $0x74] sm:$0xf] %vm1079_vm0, %v1282_v43  ;;  %1141 = vst.msk [vmem:[%s2040_s3 + $0xf4] sm:$0xf] %vm1079_vm0, %v1314_v44 }

// kernel: patchgan_forward.10
= control target key start
LH: loop header
LB: loop body
LE: loop exit
PB: predicated region body
PF: predicated region fallthrough
CT: control target
= control target key end

     0   :  { %s411_s0 = inlined_call_operand.vmem [shape: f32[128,128], index: 0, kind: input, shape index: {}]   ;;  %s412_s1 = inlined_call_operand.vmem [shape: f32[2,128], index: 1, kind: input, shape index: {}]   ;;  %s413_s2 = inlined_call_operand.vmem [shape: bf16[128,128], index: 2, kind: output, shape index: {}]  }
   0x1   :  { %v11_v0 = vld [vmem:[%s411_s0] sm:$0xff]  ;;  %v12_v1 = vld [vmem:[%s411_s0 + $0x8] sm:$0xff]  ;;  %v13_v6 = vld [vmem:[%s411_s0 + $0x10] sm:$0xff] }
   0x2   :  { %v306_v2 = vld [vmem:[%s412_s1] ss:$0 sm:$0xff]  ;;  %v313_v5 = vld [vmem:[%s412_s1 + $0x1] ss:$0 sm:$0xff]  ;;  %v14_v7 = vld [vmem:[%s411_s0 + $0x18] sm:$0xff] }
   0x3   :  { %v32_v3 = vmul.f32 %v306_v2, %v11_v0  ;;  %v33_v4 = vmul.f32 %v306_v2, %v12_v1  ;;  %v34_v8 = vmul.f32 %v306_v2, %v13_v6  ;;  %v35_v9 = vmul.f32 %v306_v2, %v14_v7  ;;  %v15_v10 = vld [vmem:[%s411_s0 + $0x20] sm:$0xff]  ;;  %v16_v11 = vld [vmem:[%s411_s0 + $0x28] sm:$0xff]  ;;  %v17_v12 = vld [vmem:[%s411_s0 + $0x30] sm:$0xff] }
   0x4   :  { %v36_v15 = vmul.f32 %v306_v2, %v15_v10  ;;  %v37_v16 = vmul.f32 %v306_v2, %v16_v11  ;;  %v18_v17 = vld [vmem:[%s411_s0 + $0x38] sm:$0xff]  ;;  %v38_v20 = vmul.f32 %v306_v2, %v17_v12  ;;  %v19_v34 = vld [vmem:[%s411_s0 + $0x40] sm:$0xff]  ;;  %v20_v35 = vld [vmem:[%s411_s0 + $0x48] sm:$0xff] }
   0x5   :  { %v53_v13 = vadd.f32 %v313_v5, %v32_v3  ;;  %v54_v14 = vadd.f32 %v313_v5, %v33_v4  ;;  %v55_v18 = vadd.f32 %v313_v5, %v34_v8  ;;  %v56_v19 = vadd.f32 %v313_v5, %v35_v9  ;;  %v21_v36 = vld [vmem:[%s411_s0 + $0x50] sm:$0xff]  ;;  %v22_v42 = vld [vmem:[%s411_s0 + $0x58] sm:$0xff]  ;;  %v23_v47 = vld [vmem:[%s411_s0 + $0x60] sm:$0xff] }
   0x6   :  { %v39_v21 = vmul.f32 %v306_v2, %v18_v17  ;;  %v57_v28 = vadd.f32 %v313_v5, %v36_v15  ;;  %v58_v29 = vadd.f32 %v313_v5, %v37_v16  ;;  %v59_v33 = vadd.f32 %v313_v5, %v38_v20  ;;  %v24_v48 = vld [vmem:[%s411_s0 + $0x68] sm:$0xff]  ;;  %v25_v60 = vld [vmem:[%s411_s0 + $0x70] sm:$0xff]  ;;  %v26_v7 = vld [vmem:[%s411_s0 + $0x78] sm:$0xff] }
   0x7   :  { %vm69_vm0 = vcmp.ge.f32.partialorder %v53_v13, 0.0  ;;  %vm70_vm1 = vcmp.ge.f32.partialorder %v54_v14, 0.0  ;;  %v85_v22 = vmul.f32 0.2, %v53_v13  ;;  %v86_v23 = vmul.f32 0.2, %v54_v14 }
   0x8   :  { %vm71_vm2 = vcmp.ge.f32.partialorder %v55_v18, 0.0  ;;  %vm72_vm3 = vcmp.ge.f32.partialorder %v56_v19, 0.0  ;;  %v87_v24 = vmul.f32 0.2, %v55_v18  ;;  %v88_v25 = vmul.f32 0.2, %v56_v19 }
   0x9   :  { %v101_v26 = vsel %vm69_vm0, %v53_v13, %v85_v22  ;;  %v102_v27 = vsel %vm70_vm1, %v54_v14, %v86_v23  ;;  %vm73_vm4 = vcmp.ge.f32.partialorder %v57_v28, 0.0  ;;  %vm74_vm5 = vcmp.ge.f32.partialorder %v58_v29, 0.0 }
   0xa   :  { %v238_v30 = vpack.c.bf16 %v102_v27, %v101_v26  ;;  %v103_v31 = vsel %vm71_vm2, %v55_v18, %v87_v24  ;;  %v104_v32 = vsel %vm72_vm3, %v56_v19, %v88_v25  ;;  %v89_v38 = vmul.f32 0.2, %v57_v28 }
   0xb   :  { %v243_v37 = vpack.c.bf16 %v104_v32, %v103_v31  ;;  %v90_v39 = vmul.f32 0.2, %v58_v29  ;;  %v60_v40 = vadd.f32 %v313_v5, %v39_v21  ;;  %vm75_vm6 = vcmp.ge.f32.partialorder %v59_v33, 0.0 }
   0xc   :  { %239 = vst [vmem:[%s413_s2] sm:$0xff] %v238_v30   ;;  %v91_v41 = vmul.f32 0.2, %v59_v33  ;;  %v105_v43 = vsel %vm73_vm4, %v57_v28, %v89_v38  ;;  %v40_v44 = vmul.f32 %v306_v2, %v19_v34  ;;  %v41_v45 = vmul.f32 %v306_v2, %v20_v35 }
   0xd   :  { %275 = vst [vmem:[%s413_s2 + $0x8] sm:$0xff] %v243_v37   ;;  %v42_v46 = vmul.f32 %v306_v2, %v21_v36  ;;  %v106_v49 = vsel %vm74_vm5, %v58_v29, %v90_v39  ;;  %vm76_vm7 = vcmp.ge.f32.partialorder %v60_v40, 0.0  ;;  %v92_v50 = vmul.f32 0.2, %v60_v40 }
   0xe   :  { %v107_v51 = vsel %vm75_vm6, %v59_v33, %v91_v41  ;;  %v248_v52 = vpack.c.bf16 %v106_v49, %v105_v43  ;;  %v61_v53 = vadd.f32 %v313_v5, %v40_v44  ;;  %v62_v54 = vadd.f32 %v313_v5, %v41_v45 }
   0xf   :  { %v43_v55 = vmul.f32 %v306_v2, %v22_v42  ;;  %v108_v56 = vsel %vm76_vm7, %v60_v40, %v92_v50  ;;  %v63_v57 = vadd.f32 %v313_v5, %v42_v46  ;;  %v44_v58 = vmul.f32 %v306_v2, %v23_v47 }
  0x10   :  { %v45_v59 = vmul.f32 %v306_v2, %v24_v48  ;;  %276 = vst [vmem:[%s413_s2 + $0x10] sm:$0xff] %v248_v52   ;;  %v253_v61 = vpack.c.bf16 %v108_v56, %v107_v51  ;;  %vm77_vm8 = vcmp.ge.f32.partialorder %v61_v53, 0.0  ;;  %vm78_vm9 = vcmp.ge.f32.partialorder %v62_v54, 0.0 }
  0x11   :  { %v93_v62 = vmul.f32 0.2, %v61_v53  ;;  %v94_v63 = vmul.f32 0.2, %v62_v54  ;;  %v64_v0 = vadd.f32 %v313_v5, %v43_v55  ;;  %vm79_vm10 = vcmp.ge.f32.partialorder %v63_v57, 0.0 }
  0x12   :  { %v95_v1 = vmul.f32 0.2, %v63_v57  ;;  %277 = vst [vmem:[%s413_s2 + $0x18] sm:$0xff] %v253_v61   ;;  %v65_v4 = vadd.f32 %v313_v5, %v44_v58  ;;  %v66_v6 = vadd.f32 %v313_v5, %v45_v59  ;;  %v46_v8 = vmul.f32 %v306_v2, %v25_v60 }
  0x13   :  { %v109_v3 = vsel %vm77_vm8, %v61_v53, %v93_v62  ;;  %v110_v9 = vsel %vm78_vm9, %v62_v54, %v94_v63  ;;  %vm80_vm11 = vcmp.ge.f32.partialorder %v64_v0, 0.0  ;;  %v96_v10 = vmul.f32 0.2, %v64_v0 }
  0x14   :  { %v111_v11 = vsel %vm79_vm10, %v63_v57, %v95_v1  ;;  %v258_v12 = vpack.c.bf16 %v110_v9, %v109_v3  ;;  %vm81_vm12 = vcmp.ge.f32.partialorder %v65_v4, 0.0  ;;  %vm82_vm13 = vcmp.ge.f32.partialorder %v66_v6, 0.0 }
  0x15   :  { %v97_v13 = vmul.f32 0.2, %v65_v4  ;;  %v112_v14 = vsel %vm80_vm11, %v64_v0, %v96_v10  ;;  %v98_v15 = vmul.f32 0.2, %v66_v6  ;;  %v47_v16 = vmul.f32 %v306_v2, %v26_v7 }
  0x16   :  { %v67_v17 = vadd.f32 %v313_v5, %v46_v8  ;;  %278 = vst [vmem:[%s413_s2 + $0x20] sm:$0xff] %v258_v12   ;;  %v263_v18 = vpack.c.bf16 %v112_v14, %v111_v11 }
  0x17   :  { %v113_v19 = vsel %vm81_vm12, %v65_v4, %v97_v13  ;;  %v114_v20 = vsel %vm82_vm13, %v66_v6, %v98_v15  ;;  %v68_v21 = vadd.f32 %v313_v5, %v47_v16 }
  0x18   :  { %vm83_vm14 = vcmp.ge.f32.partialorder %v67_v17, 0.0  ;;  %v99_v22 = vmul.f32 0.2, %v67_v17  ;;  %279 = vst [vmem:[%s413_s2 + $0x28] sm:$0xff] %v263_v18   ;;  %v268_v23 = vpack.c.bf16 %v114_v20, %v113_v19 }
  0x19   :  { %vm84_vm15 = vcmp.ge.f32.partialorder %v68_v21, 0.0  ;;  %v100_v2 = vmul.f32 0.2, %v68_v21 }
  0x1a   :  { %v115_v24 = vsel %vm83_vm14, %v67_v17, %v99_v22  ;;  %280 = vst [vmem:[%s413_s2 + $0x30] sm:$0xff] %v268_v23  }
  0x1b   :  { %v116_v25 = vsel %vm84_vm15, %v68_v21, %v100_v2 }
  0x1c   :  { %v273_v26 = vpack.c.bf16 %v116_v25, %v115_v24 }
  0x1e   :  { %281 = vst [vmem:[%s413_s2 + $0x38] sm:$0xff] %v273_v26  }

// kernel: patchgan_forward.9
= control target key start
LH: loop header
LB: loop body
LE: loop exit
PB: predicated region body
PF: predicated region fallthrough
CT: control target
= control target key end

     0   :  { %s2336_s1 = inlined_call_operand.vmem [shape: bf16[1024,128], index: 1, kind: input, shape index: {}]   ;;  %s2337_s0 = inlined_call_operand.vmem [shape: bf16[128,1024], index: 0, kind: input, shape index: {}]   ;;  %s2338_s2 = inlined_call_operand.vmem [shape: f32[128,128], index: 2, kind: output, shape index: {0}]   ;;  %s2339_s3 = inlined_call_operand.vmem [shape: f32[1,2,128], index: 3, kind: output, shape index: {1}]  }
   0x1   :  { %v1766_v0 = vld [vmem:[%s2336_s1 + $0x40] sm:$0xff]   ;;  %v1770_v4 = vld [vmem:[%s2336_s1 + $0x48] sm:$0xff]   ;;  %v1774_v8 = vld [vmem:[%s2336_s1 + $0x50] sm:$0xff]  }
   0x2   :  { %v1767_v1 = vld [vmem:[%s2336_s1 + $0xc0] sm:$0xff]   ;;  %1510 = vmatprep.subr.bf16.mxu0 %v1766_v0  ;;  %v1771_v5 = vld [vmem:[%s2336_s1 + $0xc8] sm:$0xff]   ;;  %v1775_v9 = vld [vmem:[%s2336_s1 + $0xd0] sm:$0xff]  }
   0x3   :  { %v1768_v2 = vld [vmem:[%s2336_s1] sm:$0xff]   ;;  %1574 = vmatprep.subr.bf16.mxu1 %v1767_v1  ;;  %v1772_v6 = vld [vmem:[%s2336_s1 + $0x8] sm:$0xff]   ;;  %v1776_v10 = vld [vmem:[%s2336_s1 + $0x10] sm:$0xff]  }
   0x4   :  { %v1769_v3 = vld [vmem:[%s2336_s1 + $0x80] sm:$0xff]   ;;  %1511 = vmatpush3.bf16.msra.mxu0 %v1768_v2  ;;  %v1773_v7 = vld [vmem:[%s2336_s1 + $0x88] sm:$0xff]   ;;  %v1777_v11 = vld [vmem:[%s2336_s1 + $0x90] sm:$0xff]  }
   0x5   :  { %1575 = vmatpush3.bf16.msra.mxu1 %v1769_v3  ;;  %1512 = vmatprep.subr.bf16.mxu0 %v1770_v4  ;;  %v1778_v12 = vld [vmem:[%s2336_s1 + $0x58] sm:$0xff]   ;;  %v1782_v16 = vld [vmem:[%s2336_s1 + $0x60] sm:$0xff]   ;;  %v1786_v20 = vld [vmem:[%s2336_s1 + $0x68] sm:$0xff]  }
   0x6   :  { %1576 = vmatprep.subr.bf16.mxu1 %v1771_v5  ;;  %v1779_v13 = vld [vmem:[%s2336_s1 + $0xd8] sm:$0xff]   ;;  %v1783_v17 = vld [vmem:[%s2336_s1 + $0xe0] sm:$0xff]   ;;  %v1787_v21 = vld [vmem:[%s2336_s1 + $0xe8] sm:$0xff]  }
   0x7   :  { %v1780_v14 = vld [vmem:[%s2336_s1 + $0x18] sm:$0xff]   ;;  %v1784_v18 = vld [vmem:[%s2336_s1 + $0x20] sm:$0xff]   ;;  %v1788_v22 = vld [vmem:[%s2336_s1 + $0x28] sm:$0xff]  }
   0x8   :  { %1513 = vmatpush3.bf16.msra.mxu0 %v1772_v6  ;;  %v1781_v15 = vld [vmem:[%s2336_s1 + $0x98] sm:$0xff]   ;;  %v1785_v19 = vld [vmem:[%s2336_s1 + $0xa0] sm:$0xff]   ;;  %v1789_v23 = vld [vmem:[%s2336_s1 + $0xa8] sm:$0xff]  }
   0x9   :  { %1577 = vmatpush3.bf16.msra.mxu1 %v1773_v7  ;;  %1514 = vmatprep.subr.bf16.mxu0 %v1774_v8  ;;  %v1790_v24 = vld [vmem:[%s2336_s1 + $0x70] sm:$0xff]   ;;  %v1794_v28 = vld [vmem:[%s2336_s1 + $0x78] sm:$0xff]   ;;  %v14_v32 = vld [vmem:[%s2337_s0] sm:$0xff] }
   0xa   :  { %1578 = vmatprep.subr.bf16.mxu1 %v1775_v9  ;;  %v1791_v25 = vld [vmem:[%s2336_s1 + $0xf0] sm:$0xff]   ;;  %v1795_v29 = vld [vmem:[%s2336_s1 + $0xf8] sm:$0xff]   ;;  %v18_v33 = vld [vmem:[%s2337_s0 + $0x20] sm:$0xff] }
   0xb   :  { %v1792_v26 = vld [vmem:[%s2336_s1 + $0x30] sm:$0xff]   ;;  %v1796_v30 = vld [vmem:[%s2336_s1 + $0x38] sm:$0xff]   ;;  %v15_v34 = vld [vmem:[%s2337_s0 + $0x8] sm:$0xff]  ;;  %v1382_v35 = vcombine.low %v14_v32, %v18_v33  ;;  %v1383_v36 = vcombine.high %v14_v32, %v18_v33 }
   0xc   :  { %1515 = vmatpush3.bf16.msra.mxu0 %v1776_v10  ;;  %v1793_v27 = vld [vmem:[%s2336_s1 + $0xb0] sm:$0xff]   ;;  %v1797_v31 = vld [vmem:[%s2336_s1 + $0xb8] sm:$0xff]   ;;  %v19_v37 = vld [vmem:[%s2337_s0 + $0x28] sm:$0xff] }
   0xd   :  { %1579 = vmatpush3.bf16.msra.mxu1 %v1777_v11  ;;  %1516 = vmatprep.subr.bf16.mxu0 %v1778_v12  ;;  %v1384_v38 = vcombine.low %v15_v34, %v19_v37  ;;  %v1385_v39 = vcombine.high %v15_v34, %v19_v37  ;;  %v1798_v40 = vld [vmem:[%s2336_s1 + $0x140] sm:$0xff]   ;;  %v23_v47 = vld [vmem:[%s2337_s0 + $0x48] sm:$0xff]  ;;  %v1806_v62 = vld [vmem:[%s2336_s1 + $0x150] sm:$0xff]  }
   0xe   :  { %1580 = vmatprep.subr.bf16.mxu1 %v1779_v13  ;;  %942 = vmatprep.mubr.bf16.mxu0 %v1383_v36  ;;  %v1799_v41 = vld [vmem:[%s2336_s1 + $0x100] sm:$0xff]   ;;  %v27_v48 = vld [vmem:[%s2337_s0 + $0x68] sm:$0xff]  ;;  %v1807_v63 = vld [vmem:[%s2336_s1 + $0x110] sm:$0xff]  }
   0xf   :  { %1039 = vmatprep.mubr.bf16.mxu1 %v1385_v39  ;;  %v1800_v42 = vld [vmem:[%s2336_s1 + $0x1c0] sm:$0xff]   ;;  %v1393_v49 = vcombine.high %v23_v47, %v27_v48  ;;  %v1802_v50 = vld [vmem:[%s2336_s1 + $0x148] sm:$0xff]   ;;  %v1392_v53 = vcombine.low %v23_v47, %v27_v48  ;;  %v1808_v0 = vld [vmem:[%s2336_s1 + $0x1d0] sm:$0xff]  }
  0x10   :  { %1517 = vmatpush3.bf16.msra.mxu0 %v1780_v14  ;;  %v1801_v43 = vld [vmem:[%s2336_s1 + $0x180] sm:$0xff]   ;;  %v1803_v52 = vld [vmem:[%s2336_s1 + $0x108] sm:$0xff]   ;;  %v1809_v1 = vld [vmem:[%s2336_s1 + $0x190] sm:$0xff]  }
  0x11   :  { %1581 = vmatpush3.bf16.msra.mxu1 %v1781_v15  ;;  %1518 = vmatprep.subr.bf16.mxu0 %v1782_v16  ;;  %v22_v44 = vld [vmem:[%s2337_s0 + $0x40] sm:$0xff]  ;;  %v1804_v54 = vld [vmem:[%s2336_s1 + $0x1c8] sm:$0xff]   ;;  %v1810_v10 = vld [vmem:[%s2336_s1 + $0x158] sm:$0xff]  }
  0x12   :  { %1582 = vmatprep.subr.bf16.mxu1 %v1783_v17  ;;  %v26_v45 = vld [vmem:[%s2337_s0 + $0x60] sm:$0xff]  ;;  %v1805_v55 = vld [vmem:[%s2336_s1 + $0x188] sm:$0xff]   ;;  %v1811_v11 = vld [vmem:[%s2336_s1 + $0x118] sm:$0xff]  }
  0x13   :  { %v1391_v46 = vcombine.high %v22_v44, %v26_v45  ;;  %v1390_v51 = vcombine.low %v22_v44, %v26_v45  ;;  %v30_v56 = vld [vmem:[%s2337_s0 + $0x80] sm:$0xff]  ;;  %v31_v58 = vld [vmem:[%s2337_s0 + $0x88] sm:$0xff]  ;;  %v1812_v12 = vld [vmem:[%s2336_s1 + $0x1d8] sm:$0xff]  }
  0x14   :  { %1519 = vmatpush3.bf16.msra.mxu0 %v1784_v18  ;;  %v34_v57 = vld [vmem:[%s2337_s0 + $0xa0] sm:$0xff]  ;;  %v35_v59 = vld [vmem:[%s2337_s0 + $0xa8] sm:$0xff]  ;;  %v1813_v13 = vld [vmem:[%s2336_s1 + $0x198] sm:$0xff]  }
  0x15   :  { %1583 = vmatpush3.bf16.msra.mxu1 %v1785_v19  ;;  %1520 = vmatprep.subr.bf16.mxu0 %v1786_v20  ;;  %v1399_v60 = vcombine.high %v30_v56, %v34_v57  ;;  %v1401_v61 = vcombine.high %v31_v58, %v35_v59  ;;  %v1398_v2 = vcombine.low %v30_v56, %v34_v57  ;;  %v38_v3 = vld [vmem:[%s2337_s0 + $0xc0] sm:$0xff]  ;;  %v39_v5 = vld [vmem:[%s2337_s0 + $0xc8] sm:$0xff]  ;;  %v1823_v39 = vld [vmem:[%s2336_s1 + $0x130] sm:$0xff]  }
  0x16   :  { %1584 = vmatprep.subr.bf16.mxu1 %v1787_v21  ;;  %v42_v4 = vld [vmem:[%s2337_s0 + $0xe0] sm:$0xff]  ;;  %v1400_v6 = vcombine.low %v31_v58, %v35_v59  ;;  %v43_v8 = vld [vmem:[%s2337_s0 + $0xe8] sm:$0xff]  ;;  %v1827_v48 = vld [vmem:[%s2336_s1 + $0x138] sm:$0xff]  }
  0x17   :  { %v1407_v7 = vcombine.high %v38_v3, %v42_v4  ;;  %v1409_v9 = vcombine.high %v39_v5, %v43_v8  ;;  %v46_v14 = vld [vmem:[%s2337_s0 + $0x100] sm:$0xff]  ;;  %v47_v16 = vld [vmem:[%s2337_s0 + $0x108] sm:$0xff]  ;;  %v1406_v19 = vcombine.low %v38_v3, %v42_v4  ;;  %v1408_v21 = vcombine.low %v39_v5, %v43_v8  ;;  %v25_v8 = vld [vmem:[%s2337_s0 + $0x58] sm:$0xff] }
  0x18   :  { %1521 = vmatpush3.bf16.msra.mxu0 %v1788_v22  ;;  %v50_v15 = vld [vmem:[%s2337_s0 + $0x120] sm:$0xff]  ;;  %v51_v17 = vld [vmem:[%s2337_s0 + $0x128] sm:$0xff] }
  0x19   :  { %1585 = vmatpush3.bf16.msra.mxu1 %v1789_v23  ;;  %1522 = vmatprep.subr.bf16.mxu0 %v1790_v24  ;;  %v1814_v18 = vld [vmem:[%s2336_s1 + $0x160] sm:$0xff]   ;;  %v1415_v22 = vcombine.high %v46_v14, %v50_v15  ;;  %v1417_v24 = vcombine.high %v47_v16, %v51_v17  ;;  %v1820_v32 = vld [vmem:[%s2336_s1 + $0x1e8] sm:$0xff]   ;;  %v1414_v34 = vcombine.low %v46_v14, %v50_v15  ;;  %v32_v14 = vld [vmem:[%s2337_s0 + $0x90] sm:$0xff] }
  0x1a   :  { %1586 = vmatprep.subr.bf16.mxu1 %v1791_v25  ;;  %v1815_v20 = vld [vmem:[%s2336_s1 + $0x120] sm:$0xff]   ;;  %v1821_v33 = vld [vmem:[%s2336_s1 + $0x1a8] sm:$0xff]   ;;  %v36_v15 = vld [vmem:[%s2337_s0 + $0xb0] sm:$0xff] }
  0x1b   :  { %v1816_v23 = vld [vmem:[%s2336_s1 + $0x1e0] sm:$0xff]   ;;  %v63_v44 = vld [vmem:[%s2337_s0 + $0x188] sm:$0xff] }
  0x1c   :  { %1523 = vmatpush3.bf16.msra.mxu0 %v1792_v26  ;;  %v1817_v25 = vld [vmem:[%s2336_s1 + $0x1a0] sm:$0xff]   ;;  %v67_v45 = vld [vmem:[%s2337_s0 + $0x1a8] sm:$0xff] }
  0x1d   :  { %1587 = vmatpush3.bf16.msra.mxu1 %v1793_v27  ;;  %1524 = vmatprep.subr.bf16.mxu0 %v1794_v28  ;;  %v54_v26 = vld [vmem:[%s2337_s0 + $0x140] sm:$0xff]  ;;  %v1818_v28 = vld [vmem:[%s2336_s1 + $0x168] sm:$0xff]   ;;  %v1432_v59 = vcombine.low %v63_v44, %v67_v45 }
  0x1e   :  { %1588 = vmatprep.subr.bf16.mxu1 %v1795_v29  ;;  %v58_v27 = vld [vmem:[%s2337_s0 + $0x160] sm:$0xff]  ;;  %v55_v29 = vld [vmem:[%s2337_s0 + $0x148] sm:$0xff] }
  0x1f   :  { %v1423_v36 = vcombine.high %v54_v26, %v58_v27  ;;  %v1422_v47 = vcombine.low %v54_v26, %v58_v27  ;;  %v71_v56 = vld [vmem:[%s2337_s0 + $0x1c8] sm:$0xff]  ;;  %v1402_v26 = vcombine.low %v32_v14, %v36_v15 }
  0x20   :  { %1525 = vmatpush3.bf16.msra.mxu0 %v1796_v30  ;;  %v59_v30 = vld [vmem:[%s2337_s0 + $0x168] sm:$0xff] }
  0x21   :  { %1589 = vmatpush3.bf16.msra.mxu1 %v1797_v31  ;;  %1638 = vmatprep.subr.bf16.mxu0 %v1798_v40  ;;  %v1819_v31 = vld [vmem:[%s2336_s1 + $0x128] sm:$0xff]   ;;  %v1425_v37 = vcombine.high %v55_v29, %v59_v30  ;;  %v1824_v40 = vld [vmem:[%s2336_s1 + $0x1f0] sm:$0xff]  }
  0x22   :  { %1702 = vmatprep.subr.bf16.mxu1 %v1800_v42  ;;  %v66_v42 = vld [vmem:[%s2337_s0 + $0x1a0] sm:$0xff]  ;;  %v75_v57 = vld [vmem:[%s2337_s0 + $0x1e8] sm:$0xff] }
  0x23   :  { %943 = vmatmul.mubr.bf16.vlgmr.msra.gmra.mrb[0].mxu0 %v1382_v35  ;;  %v1416_v35 = vcombine.low %v47_v16, %v51_v17  ;;  %v1440_v3 = vcombine.low %v71_v56, %v75_v57  ;;  %v33_v16 = vld [vmem:[%s2337_s0 + $0x98] sm:$0xff] }
  0x24   :  { %1040 = vmatmul.mubr.bf16.vlgmr.msra.gmra.mrb[0].mxu1 %v1384_v38  ;;  %1639 = vmatpush3.bf16.msra.mxu0 %v1799_v41  ;;  %v1822_v38 = vld [vmem:[%s2336_s1 + $0x170] sm:$0xff]   ;;  %v62_v41 = vld [vmem:[%s2337_s0 + $0x180] sm:$0xff]  ;;  %v37_v17 = vld [vmem:[%s2337_s0 + $0xb8] sm:$0xff] }
  0x25   :  { %1703 = vmatpush3.bf16.msra.mxu1 %v1801_v43  ;;  %950 = vmatprep.mubr.bf16.mxu0 %v1391_v46  ;;  %v1825_v43 = vld [vmem:[%s2336_s1 + $0x1b0] sm:$0xff]   ;;  %v1826_v46 = vld [vmem:[%s2336_s1 + $0x178] sm:$0xff]   ;;  %v1430_v58 = vcombine.low %v62_v41, %v66_v42  ;;  %v1404_v27 = vcombine.low %v33_v16, %v37_v17 }
  0x26   :  { %1047 = vmatprep.mubr.bf16.mxu1 %v1393_v49  ;;  %1640 = vmatprep.subr.bf16.mxu0 %v1802_v50  ;;  %v1424_v49 = vcombine.low %v55_v29, %v59_v30  ;;  %v1431_v50 = vcombine.high %v62_v41, %v66_v42  ;;  %v48_v30 = vld [vmem:[%s2337_s0 + $0x110] sm:$0xff]  ;;  %v61_v41 = vld [vmem:[%s2337_s0 + $0x178] sm:$0xff] }
  0x27   :  { %1704 = vmatprep.subr.bf16.mxu1 %v1804_v54  ;;  %v70_v54 = vld [vmem:[%s2337_s0 + $0x1c0] sm:$0xff] }
  0x28   :  { %1641 = vmatpush3.bf16.msra.mxu0 %v1803_v52  ;;  %v1433_v52 = vcombine.high %v63_v44, %v67_v45 }
  0x29   :  { %1705 = vmatpush3.bf16.msra.mxu1 %v1805_v55  ;;  %1642 = vmatprep.subr.bf16.mxu0 %v1806_v62  ;;  %v74_v55 = vld [vmem:[%s2337_s0 + $0x1e0] sm:$0xff]  ;;  %v16_v62 = vld [vmem:[%s2337_s0 + $0x10] sm:$0xff] }
  0x2a   :  { %1706 = vmatprep.subr.bf16.mxu1 %v1808_v0  ;;  %v17_v0 = vld [vmem:[%s2337_s0 + $0x18] sm:$0xff] }
  0x2b   :  { %951 = vmatmul.mubr.bf16.gmra.mrb[4].mxu0 %v1390_v51  ;;  %v1828_v51 = vld [vmem:[%s2336_s1 + $0x1f8] sm:$0xff]  }
  0x2c   :  { %1048 = vmatmul.mubr.bf16.gmra.mrb[4].mxu1 %v1392_v53  ;;  %958 = vmatprep.mubr.bf16.mxu0 %v1399_v60  ;;  %v1829_v53 = vld [vmem:[%s2336_s1 + $0x1b8] sm:$0xff]   ;;  %v1439_v60 = vcombine.high %v70_v54, %v74_v55 }
  0x2d   :  { %1055 = vmatprep.mubr.bf16.mxu1 %v1401_v61  ;;  %1643 = vmatpush3.bf16.msra.mxu0 %v1807_v63  ;;  %v1441_v61 = vcombine.high %v71_v56, %v75_v57  ;;  %v20_v63 = vld [vmem:[%s2337_s0 + $0x30] sm:$0xff]  ;;  %v73_v56 = vld [vmem:[%s2337_s0 + $0x1d8] sm:$0xff] }
  0x2e   :  { %1707 = vmatpush3.bf16.msra.mxu1 %v1809_v1  ;;  %1644 = vmatprep.subr.bf16.mxu0 %v1810_v10  ;;  %v21_v1 = vld [vmem:[%s2337_s0 + $0x38] sm:$0xff]  ;;  %v1387_v4 = vcombine.high %v16_v62, %v20_v63  ;;  %v1386_v10 = vcombine.low %v16_v62, %v20_v63 }
  0x2f   :  { %1708 = vmatprep.subr.bf16.mxu1 %v1812_v12  ;;  %v1389_v5 = vcombine.high %v17_v0, %v21_v1  ;;  %v77_v57 = vld [vmem:[%s2337_s0 + $0x1f8] sm:$0xff] }
  0x30   :  { %v1444_v63 = vcombine.low %v73_v56, %v77_v57 }
  0x31   :  { %1645 = vmatpush3.bf16.msra.mxu0 %v1811_v11  ;;  %v1388_v11 = vcombine.low %v17_v0, %v21_v1 }
  0x32   :  { %1709 = vmatpush3.bf16.msra.mxu1 %v1813_v13  ;;  %1646 = vmatprep.subr.bf16.mxu0 %v1814_v18 }
  0x33   :  { %959 = vmatmul.mubr.bf16.gmra.mrb[8].mxu0 %v1398_v2  ;;  %1710 = vmatprep.subr.bf16.mxu1 %v1816_v23  ;;  %v1438_v2 = vcombine.low %v70_v54, %v74_v55  ;;  %v44_v23 = vld [vmem:[%s2337_s0 + $0xf0] sm:$0xff] }
  0x34   :  { %1056 = vmatmul.mubr.bf16.gmra.mrb[8].mxu1 %v1400_v6  ;;  %966 = vmatprep.mubr.bf16.mxu0 %v1407_v7  ;;  %v24_v6 = vld [vmem:[%s2337_s0 + $0x50] sm:$0xff] }
  0x35   :  { %1063 = vmatprep.mubr.bf16.mxu1 %v1409_v9  ;;  %1647 = vmatpush3.bf16.msra.mxu0 %v1815_v20  ;;  %v28_v7 = vld [vmem:[%s2337_s0 + $0x70] sm:$0xff]  ;;  %v29_v9 = vld [vmem:[%s2337_s0 + $0x78] sm:$0xff]  ;;  %v1403_v20 = vcombine.high %v32_v14, %v36_v15 }
  0x36   :  { %1711 = vmatpush3.bf16.msra.mxu1 %v1817_v25  ;;  %1648 = vmatprep.subr.bf16.mxu0 %v1818_v28  ;;  %v1395_v12 = vcombine.high %v24_v6, %v28_v7  ;;  %v1397_v13 = vcombine.high %v25_v8, %v29_v9  ;;  %v1394_v18 = vcombine.low %v24_v6, %v28_v7  ;;  %v45_v25 = vld [vmem:[%s2337_s0 + $0xf8] sm:$0xff]  ;;  %v72_v54 = vld [vmem:[%s2337_s0 + $0x1d0] sm:$0xff] }
  0x37   :  { %1712 = vmatprep.subr.bf16.mxu1 %v1820_v32  ;;  %v49_v32 = vld [vmem:[%s2337_s0 + $0x118] sm:$0xff]  ;;  %v76_v55 = vld [vmem:[%s2337_s0 + $0x1f0] sm:$0xff] }
  0x38   :  { %v1442_v62 = vcombine.low %v72_v54, %v76_v55 }
  0x39   :  { %1649 = vmatpush3.bf16.msra.mxu0 %v1819_v31  ;;  %v52_v31 = vld [vmem:[%s2337_s0 + $0x130] sm:$0xff] }
  0x3a   :  { %1713 = vmatpush3.bf16.msra.mxu1 %v1821_v33  ;;  %1650 = vmatprep.subr.bf16.mxu0 %v1822_v38  ;;  %v53_v33 = vld [vmem:[%s2337_s0 + $0x138] sm:$0xff]  ;;  %v56_v38 = vld [vmem:[%s2337_s0 + $0x150] sm:$0xff]  ;;  %v1418_v42 = vcombine.low %v48_v30, %v52_v31 }
  0x3b   :  { %967 = vmatmul.mubr.bf16.gmra.mrb[12].mxu0 %v1406_v19  ;;  %1714 = vmatprep.subr.bf16.mxu1 %v1824_v40  ;;  %v1396_v19 = vcombine.low %v25_v8, %v29_v9  ;;  %v57_v40 = vld [vmem:[%s2337_s0 + $0x158] sm:$0xff] }
  0x3c   :  { %1064 = vmatmul.mubr.bf16.gmra.mrb[12].mxu1 %v1408_v21  ;;  %974 = vmatprep.mubr.bf16.mxu0 %v1415_v22  ;;  %v1405_v21 = vcombine.high %v33_v16, %v37_v17  ;;  %v40_v22 = vld [vmem:[%s2337_s0 + $0xd0] sm:$0xff]  ;;  %v1429_v45 = vcombine.high %v57_v40, %v61_v41 }
  0x3d   :  { %1071 = vmatprep.mubr.bf16.mxu1 %v1417_v24  ;;  %1651 = vmatpush3.bf16.msra.mxu0 %v1823_v39  ;;  %v41_v24 = vld [vmem:[%s2337_s0 + $0xd8] sm:$0xff]  ;;  %v1411_v28 = vcombine.high %v40_v22, %v44_v23  ;;  %v60_v39 = vld [vmem:[%s2337_s0 + $0x170] sm:$0xff] }
  0x3e   :  { %1715 = vmatpush3.bf16.msra.mxu1 %v1825_v43  ;;  %1652 = vmatprep.subr.bf16.mxu0 %v1826_v46  ;;  %v1413_v29 = vcombine.high %v41_v24, %v45_v25  ;;  %v1420_v43 = vcombine.low %v49_v32, %v53_v33  ;;  %v1427_v44 = vcombine.high %v56_v38, %v60_v39  ;;  %v64_v46 = vld [vmem:[%s2337_s0 + $0x190] sm:$0xff] }
  0x3f   :  { %1716 = vmatprep.subr.bf16.mxu1 %v1828_v51  ;;  %v1428_v51 = vcombine.low %v57_v40, %v61_v41 }
  0x41   :  { %1653 = vmatpush3.bf16.msra.mxu0 %v1827_v48  ;;  %v65_v48 = vld [vmem:[%s2337_s0 + $0x198] sm:$0xff] }
  0x42   :  { %1717 = vmatpush3.bf16.msra.mxu1 %v1829_v53 }
  0x43   :  { %975 = vmatmul.mubr.bf16.gmra.mrb[16].mxu0 %v1414_v34  ;;  %v1410_v34 = vcombine.low %v40_v22, %v44_v23 }
  0x44   :  { %1072 = vmatmul.mubr.bf16.gmra.mrb[16].mxu1 %v1416_v35  ;;  %982 = vmatprep.mubr.bf16.mxu0 %v1423_v36  ;;  %v1412_v35 = vcombine.low %v41_v24, %v45_v25  ;;  %v1419_v36 = vcombine.high %v48_v30, %v52_v31 }
  0x45   :  { %1079 = vmatprep.mubr.bf16.mxu1 %v1425_v37  ;;  %v1421_v37 = vcombine.high %v49_v32, %v53_v33 }
  0x4b   :  { %983 = vmatmul.mubr.bf16.gmra.mrb[20].mxu0 %v1422_v47  ;;  %v68_v47 = vld [vmem:[%s2337_s0 + $0x1b0] sm:$0xff] }
  0x4c   :  { %1080 = vmatmul.mubr.bf16.gmra.mrb[20].mxu1 %v1424_v49  ;;  %990 = vmatprep.mubr.bf16.mxu0 %v1431_v50  ;;  %v69_v49 = vld [vmem:[%s2337_s0 + $0x1b8] sm:$0xff]  ;;  %v1426_v50 = vcombine.low %v56_v38, %v60_v39 }
  0x4d   :  { %1087 = vmatprep.mubr.bf16.mxu1 %v1433_v52  ;;  %v1435_v52 = vcombine.high %v64_v46, %v68_v47  ;;  %v1437_v53 = vcombine.high %v65_v48, %v69_v49 }
  0x53   :  { %991 = vmatmul.mubr.bf16.gmra.mrb[24].mxu0 %v1430_v58  ;;  %v1434_v58 = vcombine.low %v64_v46, %v68_v47 }
  0x54   :  { %1088 = vmatmul.mubr.bf16.gmra.mrb[24].mxu1 %v1432_v59  ;;  %998 = vmatprep.mubr.bf16.mxu0 %v1439_v60  ;;  %v1436_v59 = vcombine.low %v65_v48, %v69_v49  ;;  %v1443_v60 = vcombine.high %v72_v54, %v76_v55 }
  0x55   :  { %1095 = vmatprep.mubr.bf16.mxu1 %v1441_v61  ;;  %v1445_v61 = vcombine.high %v73_v56, %v77_v57 }
  0x5b   :  { %999 = vmatmul.mubr.bf16.gmra.mrb[28].mxu0 %v1438_v2 }
  0x5c   :  { %1096 = vmatmul.mubr.bf16.gmra.mrb[28].mxu1 %v1440_v3  ;;  %1136 = vmatprep.mubr.bf16.mxu0 %v1387_v4 }
  0x5d   :  { %1233 = vmatprep.mubr.bf16.mxu1 %v1389_v5 }
  0x63   :  { %1137 = vmatmul.mubr.bf16.vlgmr.msra.gmra.mrb[32].mxu0 %v1386_v10 }
  0x64   :  { %1234 = vmatmul.mubr.bf16.vlgmr.msra.gmra.mrb[32].mxu1 %v1388_v11  ;;  %1144 = vmatprep.mubr.bf16.mxu0 %v1395_v12 }
  0x65   :  { %1241 = vmatprep.mubr.bf16.mxu1 %v1397_v13 }
  0x6b   :  { %1145 = vmatmul.mubr.bf16.gmra.mrb[36].mxu0 %v1394_v18 }
  0x6c   :  { %1242 = vmatmul.mubr.bf16.gmra.mrb[36].mxu1 %v1396_v19  ;;  %1152 = vmatprep.mubr.bf16.mxu0 %v1403_v20 }
  0x6d   :  { %1249 = vmatprep.mubr.bf16.mxu1 %v1405_v21 }
  0x73   :  { %1153 = vmatmul.mubr.bf16.gmra.mrb[40].mxu0 %v1402_v26 }
  0x74   :  { %1250 = vmatmul.mubr.bf16.gmra.mrb[40].mxu1 %v1404_v27  ;;  %1160 = vmatprep.mubr.bf16.mxu0 %v1411_v28 }
  0x75   :  { %1257 = vmatprep.mubr.bf16.mxu1 %v1413_v29 }
  0x7b   :  { %1161 = vmatmul.mubr.bf16.gmra.mrb[44].mxu0 %v1410_v34 }
  0x7c   :  { %1258 = vmatmul.mubr.bf16.gmra.mrb[44].mxu1 %v1412_v35  ;;  %1168 = vmatprep.mubr.bf16.mxu0 %v1419_v36 }
  0x7d   :  { %1265 = vmatprep.mubr.bf16.mxu1 %v1421_v37 }
  0x83   :  { %1169 = vmatmul.mubr.bf16.gmra.mrb[48].mxu0 %v1418_v42 }
  0x84   :  { %1266 = vmatmul.mubr.bf16.gmra.mrb[48].mxu1 %v1420_v43  ;;  %1176 = vmatprep.mubr.bf16.mxu0 %v1427_v44 }
  0x85   :  { %1273 = vmatprep.mubr.bf16.mxu1 %v1429_v45 }
  0x8b   :  { %1177 = vmatmul.mubr.bf16.gmra.mrb[52].mxu0 %v1426_v50 }
  0x8c   :  { %1274 = vmatmul.mubr.bf16.gmra.mrb[52].mxu1 %v1428_v51  ;;  %1184 = vmatprep.mubr.bf16.mxu0 %v1435_v52 }
  0x8d   :  { %1281 = vmatprep.mubr.bf16.mxu1 %v1437_v53 }
  0x93   :  { %1185 = vmatmul.mubr.bf16.gmra.mrb[56].mxu0 %v1434_v58 }
  0x94   :  { %1282 = vmatmul.mubr.bf16.gmra.mrb[56].mxu1 %v1436_v59  ;;  %1192 = vmatprep.mubr.bf16.mxu0 %v1443_v60 }
  0x95   :  { %1289 = vmatprep.mubr.bf16.mxu1 %v1445_v61 }
  0x9b   :  { %1193 = vmatmul.mubr.bf16.gmra.mrb[60].mxu0 %v1442_v62 }
  0x9c   :  { %1290 = vmatmul.mubr.bf16.gmra.mrb[60].mxu1 %v1444_v63 }
  0xf6   :  { %v1526_v0 = vpop.f32.mrb[0].mxu0 }
  0xf7   :  { %v1590_v1 = vpop.f32.mrb[0].mxu1  ;;  %v1527_v2 = vpop.f32.mrb[1].mxu0 }
  0xf8   :  { %v1528_v3 = vadd.f32 %v1527_v2, %v1526_v0  ;;  %v1591_v4 = vpop.f32.mrb[1].mxu1  ;;  %v1529_v5 = vpop.f32.mrb[2].mxu0 }
  0xf9   :  { %v1592_v6 = vadd.f32 %v1591_v4, %v1590_v1  ;;  %v1593_v7 = vpop.f32.mrb[2].mxu1  ;;  %v1530_v8 = vpop.f32.mrb[3].mxu0 }
  0xfa   :  { %v1531_v9 = vadd.f32 %v1530_v8, %v1529_v5  ;;  %v1594_v10 = vpop.f32.mrb[3].mxu1 }
  0xfb   :  { %v2234_v11 = vadd.f32 %v1592_v6, %v1528_v3  ;;  %v1595_v12 = vadd.f32 %v1594_v10, %v1593_v7 }
  0xfd   :  { %v2236_v13 = vadd.f32 %v1595_v12, %v1531_v9 }
  0xfe   :  { %v1532_v14 = vpop.f32.mrb[4].mxu0 }
  0xff   :  { %v1596_v15 = vpop.f32.mrb[4].mxu1  ;;  %v1533_v16 = vpop.f32.mrb[5].mxu0 }
 0x100   :  { %v1534_v17 = vadd.f32 %v1533_v16, %v1532_v14  ;;  %v1597_v18 = vpop.f32.mrb[5].mxu1  ;;  %v1535_v19 = vpop.f32.mrb[6].mxu0 }
 0x101   :  { %v1598_v20 = vadd.f32 %v1597_v18, %v1596_v15  ;;  %v1599_v21 = vpop.f32.mrb[6].mxu1  ;;  %v1536_v22 = vpop.f32.mrb[7].mxu0 }
 0x102   :  { %v1537_v23 = vadd.f32 %v1536_v22, %v1535_v19  ;;  %v1600_v24 = vpop.f32.mrb[7].mxu1 }
 0x103   :  { %v2238_v25 = vadd.f32 %v1598_v20, %v1534_v17  ;;  %v1601_v26 = vadd.f32 %v1600_v24, %v1599_v21 }
 0x105   :  { %v2240_v27 = vadd.f32 %v1601_v26, %v1537_v23 }
 0x106   :  { %v1538_v28 = vpop.f32.mrb[8].mxu0 }
 0x107   :  { %v1602_v29 = vpop.f32.mrb[8].mxu1  ;;  %v1539_v30 = vpop.f32.mrb[9].mxu0 }
 0x108   :  { %v1540_v31 = vadd.f32 %v1539_v30, %v1538_v28  ;;  %v1603_v32 = vpop.f32.mrb[9].mxu1  ;;  %v1541_v33 = vpop.f32.mrb[10].mxu0 }
 0x109   :  { %v1604_v34 = vadd.f32 %v1603_v32, %v1602_v29  ;;  %v1605_v35 = vpop.f32.mrb[10].mxu1  ;;  %v1542_v36 = vpop.f32.mrb[11].mxu0 }
 0x10a   :  { %v1543_v37 = vadd.f32 %v1542_v36, %v1541_v33  ;;  %v1606_v38 = vpop.f32.mrb[11].mxu1 }
 0x10b   :  { %v2242_v39 = vadd.f32 %v1604_v34, %v1540_v31  ;;  %v1607_v40 = vadd.f32 %v1606_v38, %v1605_v35 }
 0x10d   :  { %v2244_v41 = vadd.f32 %v1607_v40, %v1543_v37 }
 0x10e   :  { %v1544_v42 = vpop.f32.mrb[12].mxu0 }
 0x10f   :  { %v1608_v43 = vpop.f32.mrb[12].mxu1  ;;  %v1545_v44 = vpop.f32.mrb[13].mxu0 }
 0x110   :  { %v1546_v45 = vadd.f32 %v1545_v44, %v1544_v42  ;;  %v1609_v46 = vpop.f32.mrb[13].mxu1  ;;  %v1547_v47 = vpop.f32.mrb[14].mxu0 }
 0x111   :  { %v1610_v48 = vadd.f32 %v1609_v46, %v1608_v43  ;;  %v1611_v49 = vpop.f32.mrb[14].mxu1  ;;  %v1548_v50 = vpop.f32.mrb[15].mxu0 }
 0x112   :  { %v1549_v51 = vadd.f32 %v1548_v50, %v1547_v47  ;;  %v1612_v52 = vpop.f32.mrb[15].mxu1 }
 0x113   :  { %v2246_v53 = vadd.f32 %v1610_v48, %v1546_v45  ;;  %v1613_v54 = vadd.f32 %v1612_v52, %v1611_v49 }
 0x115   :  { %v2248_v55 = vadd.f32 %v1613_v54, %v1549_v51 }
 0x116   :  { %v1550_v56 = vpop.f32.mrb[16].mxu0 }
 0x117   :  { %v1614_v57 = vpop.f32.mrb[16].mxu1  ;;  %v1551_v58 = vpop.f32.mrb[17].mxu0 }
 0x118   :  { %v1552_v59 = vadd.f32 %v1551_v58, %v1550_v56  ;;  %v1615_v60 = vpop.f32.mrb[17].mxu1  ;;  %v1553_v61 = vpop.f32.mrb[18].mxu0 }
 0x119   :  { %v1616_v62 = vadd.f32 %v1615_v60, %v1614_v57  ;;  %v1617_v63 = vpop.f32.mrb[18].mxu1  ;;  %v1554_v0 = vpop.f32.mrb[19].mxu0 }
 0x11a   :  { %v1555_v1 = vadd.f32 %v1554_v0, %v1553_v61  ;;  %v1618_v2 = vpop.f32.mrb[19].mxu1 }
 0x11b   :  { %v2250_v3 = vadd.f32 %v1616_v62, %v1552_v59  ;;  %v1619_v4 = vadd.f32 %v1618_v2, %v1617_v63 }
 0x11d   :  { %v2252_v5 = vadd.f32 %v1619_v4, %v1555_v1 }
 0x11e   :  { %v1556_v6 = vpop.f32.mrb[20].mxu0 }
 0x11f   :  { %v1620_v7 = vpop.f32.mrb[20].mxu1  ;;  %v1557_v8 = vpop.f32.mrb[21].mxu0 }
 0x120   :  { %v1558_v9 = vadd.f32 %v1557_v8, %v1556_v6  ;;  %v1621_v10 = vpop.f32.mrb[21].mxu1  ;;  %v1559_v12 = vpop.f32.mrb[22].mxu0 }
 0x121   :  { %v1622_v14 = vadd.f32 %v1621_v10, %v1620_v7  ;;  %v1623_v15 = vpop.f32.mrb[22].mxu1  ;;  %v1560_v16 = vpop.f32.mrb[23].mxu0 }
 0x122   :  { %v1561_v17 = vadd.f32 %v1560_v16, %v1559_v12  ;;  %v1624_v18 = vpop.f32.mrb[23].mxu1 }
 0x123   :  { %v2254_v19 = vadd.f32 %v1622_v14, %v1558_v9  ;;  %v1625_v20 = vadd.f32 %v1624_v18, %v1623_v15 }
 0x125   :  { %v2256_v21 = vadd.f32 %v1625_v20, %v1561_v17 }
 0x126   :  { %v1562_v22 = vpop.f32.mrb[24].mxu0 }
 0x127   :  { %v1626_v23 = vpop.f32.mrb[24].mxu1  ;;  %v1563_v24 = vpop.f32.mrb[25].mxu0 }
 0x128   :  { %v1564_v26 = vadd.f32 %v1563_v24, %v1562_v22  ;;  %v1627_v28 = vpop.f32.mrb[25].mxu1  ;;  %v1565_v29 = vpop.f32.mrb[26].mxu0 }
 0x129   :  { %v1628_v30 = vadd.f32 %v1627_v28, %v1626_v23  ;;  %v1629_v31 = vpop.f32.mrb[26].mxu1  ;;  %v1566_v32 = vpop.f32.mrb[27].mxu0 }
 0x12a   :  { %v1567_v33 = vadd.f32 %v1566_v32, %v1565_v29  ;;  %v1630_v34 = vpop.f32.mrb[27].mxu1 }
 0x12b   :  { %v2258_v35 = vadd.f32 %v1628_v30, %v1564_v26  ;;  %v1631_v36 = vadd.f32 %v1630_v34, %v1629_v31 }
 0x12d   :  { %v2260_v37 = vadd.f32 %v1631_v36, %v1567_v33 }
 0x12e   :  { %v1568_v38 = vpop.f32.mrb[28].mxu0 }
 0x12f   :  { %v1632_v40 = vpop.f32.mrb[28].mxu1  ;;  %v1569_v42 = vpop.f32.mrb[29].mxu0 }
 0x130   :  { %v1570_v43 = vadd.f32 %v1569_v42, %v1568_v38  ;;  %v1633_v44 = vpop.f32.mrb[29].mxu1  ;;  %v1571_v45 = vpop.f32.mrb[30].mxu0 }
 0x131   :  { %v1634_v46 = vadd.f32 %v1633_v44, %v1632_v40  ;;  %v1635_v47 = vpop.f32.mrb[30].mxu1  ;;  %v1572_v48 = vpop.f32.mrb[31].mxu0 }
 0x132   :  { %v1573_v49 = vadd.f32 %v1572_v48, %v1571_v45  ;;  %v1636_v50 = vpop.f32.mrb[31].mxu1 }
 0x133   :  { %v2262_v51 = vadd.f32 %v1634_v46, %v1570_v43  ;;  %v1637_v52 = vadd.f32 %v1636_v50, %v1635_v47 }
 0x135   :  { %v2264_v54 = vadd.f32 %v1637_v52, %v1573_v49 }
 0x136   :  { %v1654_v56 = vpop.f32.mrb[32].mxu0 }
 0x137   :  { %v1718_v57 = vpop.f32.mrb[32].mxu1  ;;  %v1655_v58 = vpop.f32.mrb[33].mxu0 }
 0x138   :  { %v1656_v59 = vadd.f32 %v1655_v58, %v1654_v56  ;;  %v1719_v60 = vpop.f32.mrb[33].mxu1  ;;  %v1657_v61 = vpop.f32.mrb[34].mxu0 }
 0x139   :  { %v1720_v62 = vadd.f32 %v1719_v60, %v1718_v57  ;;  %v1721_v63 = vpop.f32.mrb[34].mxu1  ;;  %v1658_v0 = vpop.f32.mrb[35].mxu0 }
 0x13a   :  { %v1139_v1 = vadd.f32 %v1656_v59, %v2234_v11  ;;  %v1659_v2 = vadd.f32 %v1658_v0, %v1657_v61  ;;  %v1722_v4 = vpop.f32.mrb[35].mxu1 }
 0x13b   :  { %v1723_v6 = vadd.f32 %v1722_v4, %v1721_v63 }
 0x13c   :  { %v1236_v7 = vadd.f32 %v1720_v62, %v1139_v1  ;;  %v1142_v8 = vadd.f32 %v1659_v2, %v2236_v13 }
 0x13e   :  { %1298 = vst [vmem:[%s2338_s2] sm:$0xff] %v1236_v7  ;;  %v1239_v9 = vadd.f32 %v1723_v6, %v1142_v8  ;;  %v1660_v10 = vpop.f32.mrb[36].mxu0  ;;  %v1336_v15 = vmul.f32 %v1236_v7, %v1236_v7 }
 0x13f   :  { %v1724_v12 = vpop.f32.mrb[36].mxu1  ;;  %v1661_v14 = vpop.f32.mrb[37].mxu0 }
 0x140   :  { %1299 = vst [vmem:[%s2338_s2 + $0x8] sm:$0xff] %v1239_v9  ;;  %v1314_v11 = vadd.f32 %v1239_v9, %v1236_v7  ;;  %v1337_v16 = vmul.f32 %v1239_v9, %v1239_v9  ;;  %v1662_v17 = vadd.f32 %v1661_v14, %v1660_v10  ;;  %v1725_v18 = vpop.f32.mrb[37].mxu1  ;;  %v1663_v20 = vpop.f32.mrb[38].mxu0 }
 0x141   :  { %v1726_v22 = vadd.f32 %v1725_v18, %v1724_v12  ;;  %v1727_v13 = vpop.f32.mrb[38].mxu1  ;;  %v1664_v23 = vpop.f32.mrb[39].mxu0 }
 0x142   :  { %v1352_v24 = vadd.f32 %v1337_v16, %v1336_v15  ;;  %v1147_v26 = vadd.f32 %v1662_v17, %v2238_v25  ;;  %v1665_v28 = vadd.f32 %v1664_v23, %v1663_v20  ;;  %v1728_v29 = vpop.f32.mrb[39].mxu1 }
 0x143   :  { %v1729_v30 = vadd.f32 %v1728_v29, %v1727_v13 }
 0x144   :  { %v1244_v31 = vadd.f32 %v1726_v22, %v1147_v26  ;;  %v1150_v32 = vadd.f32 %v1665_v28, %v2240_v27 }
 0x146   :  { %1300 = vst [vmem:[%s2338_s2 + $0x10] sm:$0xff] %v1244_v31  ;;  %v1315_v33 = vadd.f32 %v1314_v11, %v1244_v31  ;;  %v1338_v34 = vmul.f32 %v1244_v31, %v1244_v31  ;;  %v1247_v36 = vadd.f32 %v1729_v30, %v1150_v32  ;;  %v1666_v38 = vpop.f32.mrb[40].mxu0 }
 0x147   :  { %v1730_v40 = vpop.f32.mrb[40].mxu1  ;;  %v1667_v42 = vpop.f32.mrb[41].mxu0 }
 0x148   :  { %v1353_v43 = vadd.f32 %v1352_v24, %v1338_v34  ;;  %1301 = vst [vmem:[%s2338_s2 + $0x18] sm:$0xff] %v1247_v36  ;;  %v1316_v25 = vadd.f32 %v1315_v33, %v1247_v36  ;;  %v1339_v44 = vmul.f32 %v1247_v36, %v1247_v36  ;;  %v1668_v45 = vadd.f32 %v1667_v42, %v1666_v38  ;;  %v1731_v46 = vpop.f32.mrb[41].mxu1  ;;  %v1669_v27 = vpop.f32.mrb[42].mxu0 }
 0x149   :  { %v1732_v47 = vadd.f32 %v1731_v46, %v1730_v40  ;;  %v1733_v48 = vpop.f32.mrb[42].mxu1  ;;  %v1670_v49 = vpop.f32.mrb[43].mxu0 }
 0x14a   :  { %v1354_v50 = vadd.f32 %v1353_v43, %v1339_v44  ;;  %v1155_v52 = vadd.f32 %v1668_v45, %v2242_v39  ;;  %v1671_v56 = vadd.f32 %v1670_v49, %v1669_v27  ;;  %v1734_v57 = vpop.f32.mrb[43].mxu1 }
 0x14b   :  { %v1735_v58 = vadd.f32 %v1734_v57, %v1733_v48 }
 0x14c   :  { %v1252_v59 = vadd.f32 %v1732_v47, %v1155_v52  ;;  %v1158_v60 = vadd.f32 %v1671_v56, %v2244_v41 }
 0x14e   :  { %1302 = vst [vmem:[%s2338_s2 + $0x20] sm:$0xff] %v1252_v59  ;;  %v1317_v61 = vadd.f32 %v1316_v25, %v1252_v59  ;;  %v1340_v62 = vmul.f32 %v1252_v59, %v1252_v59  ;;  %v1255_v63 = vadd.f32 %v1735_v58, %v1158_v60  ;;  %v1672_v0 = vpop.f32.mrb[44].mxu0 }
 0x14f   :  { %v1736_v1 = vpop.f32.mrb[44].mxu1  ;;  %v1673_v2 = vpop.f32.mrb[45].mxu0 }
 0x150   :  { %v1355_v4 = vadd.f32 %v1354_v50, %v1340_v62  ;;  %1303 = vst [vmem:[%s2338_s2 + $0x28] sm:$0xff] %v1255_v63  ;;  %v1318_v39 = vadd.f32 %v1317_v61, %v1255_v63  ;;  %v1341_v6 = vmul.f32 %v1255_v63, %v1255_v63  ;;  %v1674_v7 = vadd.f32 %v1673_v2, %v1672_v0  ;;  %v1737_v8 = vpop.f32.mrb[45].mxu1  ;;  %v1675_v41 = vpop.f32.mrb[46].mxu0 }
 0x151   :  { %v1738_v9 = vadd.f32 %v1737_v8, %v1736_v1  ;;  %v1739_v10 = vpop.f32.mrb[46].mxu1  ;;  %v1676_v12 = vpop.f32.mrb[47].mxu0 }
 0x152   :  { %v1356_v14 = vadd.f32 %v1355_v4, %v1341_v6  ;;  %v1163_v15 = vadd.f32 %v1674_v7, %v2246_v53  ;;  %v1677_v11 = vadd.f32 %v1676_v12, %v1675_v41  ;;  %v1740_v16 = vpop.f32.mrb[47].mxu1 }
 0x153   :  { %v1741_v17 = vadd.f32 %v1740_v16, %v1739_v10 }
 0x154   :  { %v1260_v18 = vadd.f32 %v1738_v9, %v1163_v15  ;;  %v1166_v20 = vadd.f32 %v1677_v11, %v2248_v55 }
 0x156   :  { %1304 = vst [vmem:[%s2338_s2 + $0x30] sm:$0xff] %v1260_v18  ;;  %v1319_v22 = vadd.f32 %v1318_v39, %v1260_v18  ;;  %v1342_v13 = vmul.f32 %v1260_v18, %v1260_v18  ;;  %v1263_v23 = vadd.f32 %v1741_v17, %v1166_v20  ;;  %v1678_v24 = vpop.f32.mrb[48].mxu0 }
 0x157   :  { %v1742_v26 = vpop.f32.mrb[48].mxu1  ;;  %v1679_v28 = vpop.f32.mrb[49].mxu0 }
 0x158   :  { %v1357_v29 = vadd.f32 %v1356_v14, %v1342_v13  ;;  %1305 = vst [vmem:[%s2338_s2 + $0x38] sm:$0xff] %v1263_v23  ;;  %v1320_v53 = vadd.f32 %v1319_v22, %v1263_v23  ;;  %v1343_v30 = vmul.f32 %v1263_v23, %v1263_v23  ;;  %v1680_v31 = vadd.f32 %v1679_v28, %v1678_v24  ;;  %v1743_v32 = vpop.f32.mrb[49].mxu1  ;;  %v1681_v55 = vpop.f32.mrb[50].mxu0 }
 0x159   :  { %v1744_v33 = vadd.f32 %v1743_v32, %v1742_v26  ;;  %v1745_v34 = vpop.f32.mrb[50].mxu1  ;;  %v1682_v36 = vpop.f32.mrb[51].mxu0 }
 0x15a   :  { %v1358_v38 = vadd.f32 %v1357_v29, %v1343_v30  ;;  %v1171_v40 = vadd.f32 %v1680_v31, %v2250_v3  ;;  %v1683_v42 = vadd.f32 %v1682_v36, %v1681_v55  ;;  %v1746_v43 = vpop.f32.mrb[51].mxu1 }
 0x15b   :  { %v1747_v25 = vadd.f32 %v1746_v43, %v1745_v34 }
 0x15c   :  { %v1268_v44 = vadd.f32 %v1744_v33, %v1171_v40  ;;  %v1174_v45 = vadd.f32 %v1683_v42, %v2252_v5 }
 0x15e   :  { %1306 = vst [vmem:[%s2338_s2 + $0x40] sm:$0xff] %v1268_v44  ;;  %v1321_v46 = vadd.f32 %v1320_v53, %v1268_v44  ;;  %v1344_v27 = vmul.f32 %v1268_v44, %v1268_v44  ;;  %v1271_v47 = vadd.f32 %v1747_v25, %v1174_v45  ;;  %v1684_v48 = vpop.f32.mrb[52].mxu0 }
 0x15f   :  { %v1748_v49 = vpop.f32.mrb[52].mxu1  ;;  %v1685_v50 = vpop.f32.mrb[53].mxu0 }
 0x160   :  { %v1359_v52 = vadd.f32 %v1358_v38, %v1344_v27  ;;  %1307 = vst [vmem:[%s2338_s2 + $0x48] sm:$0xff] %v1271_v47  ;;  %v1322_v3 = vadd.f32 %v1321_v46, %v1271_v47  ;;  %v1345_v56 = vmul.f32 %v1271_v47, %v1271_v47  ;;  %v1686_v57 = vadd.f32 %v1685_v50, %v1684_v48  ;;  %v1749_v58 = vpop.f32.mrb[53].mxu1  ;;  %v1687_v5 = vpop.f32.mrb[54].mxu0 }
 0x161   :  { %v1750_v59 = vadd.f32 %v1749_v58, %v1748_v49  ;;  %v1751_v60 = vpop.f32.mrb[54].mxu1  ;;  %v1688_v61 = vpop.f32.mrb[55].mxu0 }
 0x162   :  { %v1360_v62 = vadd.f32 %v1359_v52, %v1345_v56  ;;  %v1179_v63 = vadd.f32 %v1686_v57, %v2254_v19  ;;  %v1689_v0 = vadd.f32 %v1688_v61, %v1687_v5  ;;  %v1752_v1 = vpop.f32.mrb[55].mxu1 }
 0x163   :  { %v1753_v2 = vadd.f32 %v1752_v1, %v1751_v60 }
 0x164   :  { %v1276_v4 = vadd.f32 %v1750_v59, %v1179_v63  ;;  %v1182_v39 = vadd.f32 %v1689_v0, %v2256_v21 }
 0x166   :  { %1308 = vst [vmem:[%s2338_s2 + $0x50] sm:$0xff] %v1276_v4  ;;  %v1323_v6 = vadd.f32 %v1322_v3, %v1276_v4  ;;  %v1346_v7 = vmul.f32 %v1276_v4, %v1276_v4  ;;  %v1279_v8 = vadd.f32 %v1753_v2, %v1182_v39  ;;  %v1690_v41 = vpop.f32.mrb[56].mxu0 }
 0x167   :  { %v1754_v9 = vpop.f32.mrb[56].mxu1  ;;  %v1691_v10 = vpop.f32.mrb[57].mxu0 }
 0x168   :  { %v1361_v12 = vadd.f32 %v1360_v62, %v1346_v7  ;;  %1309 = vst [vmem:[%s2338_s2 + $0x58] sm:$0xff] %v1279_v8  ;;  %v1324_v19 = vadd.f32 %v1323_v6, %v1279_v8  ;;  %v1347_v14 = vmul.f32 %v1279_v8, %v1279_v8  ;;  %v1692_v15 = vadd.f32 %v1691_v10, %v1690_v41  ;;  %v1755_v11 = vpop.f32.mrb[57].mxu1  ;;  %v1693_v21 = vpop.f32.mrb[58].mxu0 }
 0x169   :  { %v1756_v16 = vadd.f32 %v1755_v11, %v1754_v9  ;;  %v1757_v17 = vpop.f32.mrb[58].mxu1  ;;  %v1694_v18 = vpop.f32.mrb[59].mxu0 }
 0x16a   :  { %v1362_v20 = vadd.f32 %v1361_v12, %v1347_v14  ;;  %v1187_v22 = vadd.f32 %v1692_v15, %v2258_v35  ;;  %v1695_v13 = vadd.f32 %v1694_v18, %v1693_v21  ;;  %v1758_v23 = vpop.f32.mrb[59].mxu1 }
 0x16b   :  { %v1759_v24 = vadd.f32 %v1758_v23, %v1757_v17 }
 0x16c   :  { %v1284_v26 = vadd.f32 %v1756_v16, %v1187_v22  ;;  %v1190_v28 = vadd.f32 %v1695_v13, %v2260_v37 }
 0x16e   :  { %1310 = vst [vmem:[%s2338_s2 + $0x60] sm:$0xff] %v1284_v26  ;;  %v1325_v29 = vadd.f32 %v1324_v19, %v1284_v26  ;;  %v1348_v53 = vmul.f32 %v1284_v26, %v1284_v26  ;;  %v1287_v30 = vadd.f32 %v1759_v24, %v1190_v28  ;;  %v1696_v31 = vpop.f32.mrb[60].mxu0 }
 0x16f   :  { %v1760_v32 = vpop.f32.mrb[60].mxu1  ;;  %v1697_v55 = vpop.f32.mrb[61].mxu0 }
 0x170   :  { %v1363_v33 = vadd.f32 %v1362_v20, %v1348_v53  ;;  %1311 = vst [vmem:[%s2338_s2 + $0x68] sm:$0xff] %v1287_v30  ;;  %v1326_v35 = vadd.f32 %v1325_v29, %v1287_v30  ;;  %v1349_v34 = vmul.f32 %v1287_v30, %v1287_v30  ;;  %v1698_v36 = vadd.f32 %v1697_v55, %v1696_v31  ;;  %v1761_v38 = vpop.f32.mrb[61].mxu1  ;;  %v1699_v37 = vpop.f32.mrb[62].mxu0 }
 0x171   :  { %v1762_v40 = vadd.f32 %v1761_v38, %v1760_v32  ;;  %v1763_v42 = vpop.f32.mrb[62].mxu1  ;;  %v1700_v43 = vpop.f32.mrb[63].mxu0 }
 0x172   :  { %v1364_v25 = vadd.f32 %v1363_v33, %v1349_v34  ;;  %v1195_v44 = vadd.f32 %v1698_v36, %v2262_v51  ;;  %v1701_v45 = vadd.f32 %v1700_v43, %v1699_v37  ;;  %v1764_v46 = vpop.f32.mrb[63].mxu1 }
 0x173   :  { %v1765_v27 = vadd.f32 %v1764_v46, %v1763_v42 }
 0x174   :  { %v1292_v47 = vadd.f32 %v1762_v40, %v1195_v44  ;;  %v1198_v48 = vadd.f32 %v1701_v45, %v2264_v54 }
 0x176   :  { %1312 = vst [vmem:[%s2338_s2 + $0x70] sm:$0xff] %v1292_v47  ;;  %v1327_v49 = vadd.f32 %v1326_v35, %v1292_v47  ;;  %v1350_v50 = vmul.f32 %v1292_v47, %v1292_v47  ;;  %v1295_v52 = vadd.f32 %v1765_v27, %v1198_v48 }
 0x178   :  { %v1365_v3 = vadd.f32 %v1364_v25, %v1350_v50  ;;  %1313 = vst [vmem:[%s2338_s2 + $0x78] sm:$0xff] %v1295_v52  ;;  %v1328_v56 = vadd.f32 %v1327_v49, %v1295_v52  ;;  %v1351_v51 = vmul.f32 %v1295_v52, %v1295_v52 }
 0x17a   :  { %v1329_v57 = vrot.slane %v1328_v56, 4  ;;  %v1366_v58 = vadd.f32 %v1365_v3, %v1351_v51 }
 0x17c   :  { %v1330_v5 = vadd.f32 %v1329_v57, %v1328_v56  ;;  %v1367_v59 = vrot.slane %v1366_v58, 4 }
 0x17e   :  { %v1331_v60 = vrot.slane %v1330_v5, 2  ;;  %v1368_v54 = vadd.f32 %v1367_v59, %v1366_v58 }
 0x180   :  { %v1332_v61 = vadd.f32 %v1331_v60, %v1330_v5  ;;  %v1369_v62 = vrot.slane %v1368_v54, 2 }
 0x182   :  { %v1333_v63 = vrot.slane %v1332_v61, 1  ;;  %v1370_v0 = vadd.f32 %v1369_v62, %v1368_v54 }
 0x184   :  { %v1334_v1 = vadd.f32 %v1333_v63, %v1332_v61  ;;  %v1371_v2 = vrot.slane %v1370_v0, 1 }
 0x186   :  { %1335 = vst [vmem:[%s2339_s3] sm:$0x1] %v1334_v1  ;;  %v1372_v4 = vadd.f32 %v1371_v2, %v1370_v0 }
 0x188   :  { %1373 = vst [vmem:[%s2339_s3 + $0x1] sm:$0x1] %v1372_v4 }

// kernel: patchgan_forward.12
= control target key start
LH: loop header
LB: loop body
LE: loop exit
PB: predicated region body
PF: predicated region fallthrough
CT: control target
= control target key end

     0   :  { %v21_v0 = vlaneseq  ;;  %s182_s1 = inlined_call_operand.vmem [shape: f32[2,256], index: 1, kind: input, shape index: {}]   ;;  %s183_s0 = inlined_call_operand.vmem [shape: f32[32,256], index: 0, kind: input, shape index: {}]   ;;  %s184_s2 = inlined_call_operand.vmem [shape: bf16[32,256], index: 2, kind: output, shape index: {}]  }
   0x1   :  { %v19_v2 = vld [vmem:[%s182_s1] ss:$2 sm:$0x3]  ;;  %v116_v3 = vld [vmem:[%s182_s1 + $0x1] ss:$2 sm:$0x3] }
   0x2   :  { %v22_v1 = vshrl.u32 %v21_v0, 7  ;;  %v11_v4 = vld [vmem:[%s183_s0] sm:$0xff]  ;;  %v12_v5 = vld [vmem:[%s183_s0 + $0x8] sm:$0xff]  ;;  %v13_v8 = vld [vmem:[%s183_s0 + $0x10] sm:$0xff] }
   0x3   :  { %v14_v9 = vld [vmem:[%s183_s0 + $0x18] sm:$0xff]  ;;  %v15_v10 = vld [vmem:[%s183_s0 + $0x20] sm:$0xff]  ;;  %v16_v15 = vld [vmem:[%s183_s0 + $0x28] sm:$0xff] }
   0x4   :  { %v23_v6 = vsub.s32 0, %v22_v1  ;;  %v27_v7 = vsub.s32 1, %v22_v1  ;;  %v17_v16 = vld [vmem:[%s183_s0 + $0x30] sm:$0xff]  ;;  %v18_v17 = vld [vmem:[%s183_s0 + $0x38] sm:$0xff] }
   0x6   :  { %v24_v11 = vrot.slane %v19_v2, %v23_v6  ;;  %v28_v12 = vrot.slane %v19_v2, %v27_v7  ;;  %v45_v13 = vrot.slane %v116_v3, %v23_v6  ;;  %v49_v14 = vrot.slane %v116_v3, %v27_v7 }
   0x8   :  { %v31_v18 = vmul.f32 %v24_v11, %v11_v4  ;;  %v32_v19 = vmul.f32 %v28_v12, %v12_v5  ;;  %v33_v20 = vmul.f32 %v24_v11, %v13_v8  ;;  %v34_v21 = vmul.f32 %v28_v12, %v14_v9 }
   0x9   :  { %v35_v22 = vmul.f32 %v24_v11, %v15_v10  ;;  %v36_v23 = vmul.f32 %v28_v12, %v16_v15  ;;  %v37_v24 = vmul.f32 %v24_v11, %v17_v16  ;;  %v38_v25 = vmul.f32 %v28_v12, %v18_v17 }
   0xa   :  { %v52_v26 = vadd.f32 %v45_v13, %v31_v18  ;;  %v53_v27 = vadd.f32 %v49_v14, %v32_v19  ;;  %v54_v28 = vadd.f32 %v45_v13, %v33_v20  ;;  %v55_v29 = vadd.f32 %v49_v14, %v34_v21 }
   0xb   :  { %v56_v30 = vadd.f32 %v45_v13, %v35_v22  ;;  %v57_v31 = vadd.f32 %v49_v14, %v36_v23  ;;  %v58_v32 = vadd.f32 %v45_v13, %v37_v24  ;;  %v59_v33 = vadd.f32 %v49_v14, %v38_v25 }
   0xc   :  { %vm60_vm0 = vcmp.ge.f32.partialorder %v52_v26, 0.0  ;;  %vm61_vm1 = vcmp.ge.f32.partialorder %v53_v27, 0.0  ;;  %v68_v34 = vmul.f32 0.2, %v52_v26  ;;  %v69_v35 = vmul.f32 0.2, %v53_v27 }
   0xd   :  { %vm62_vm2 = vcmp.ge.f32.partialorder %v54_v28, 0.0  ;;  %vm63_vm3 = vcmp.ge.f32.partialorder %v55_v29, 0.0  ;;  %v70_v36 = vmul.f32 0.2, %v54_v28  ;;  %v71_v37 = vmul.f32 0.2, %v55_v29 }
   0xe   :  { %v76_v38 = vsel %vm60_vm0, %v52_v26, %v68_v34  ;;  %v77_v39 = vsel %vm61_vm1, %v53_v27, %v69_v35  ;;  %vm64_vm4 = vcmp.ge.f32.partialorder %v56_v30, 0.0  ;;  %vm65_vm5 = vcmp.ge.f32.partialorder %v57_v31, 0.0 }
   0xf   :  { %v121_v40 = vpack.c.bf16 %v77_v39, %v76_v38  ;;  %v78_v41 = vsel %vm62_vm2, %v54_v28, %v70_v36  ;;  %v79_v42 = vsel %vm63_vm3, %v55_v29, %v71_v37  ;;  %v72_v43 = vmul.f32 0.2, %v56_v30 }
  0x10   :  { %v122_v44 = vpack.c.bf16 %v79_v42, %v78_v41  ;;  %v73_v45 = vmul.f32 0.2, %v57_v31  ;;  %vm66_vm6 = vcmp.ge.f32.partialorder %v58_v32, 0.0  ;;  %vm67_vm7 = vcmp.ge.f32.partialorder %v59_v33, 0.0 }
  0x11   :  { %108 = vst [vmem:[%s184_s2] sm:$0xff] %v121_v40  ;;  %v80_v46 = vsel %vm64_vm4, %v56_v30, %v72_v43  ;;  %v74_v47 = vmul.f32 0.2, %v58_v32  ;;  %v75_v48 = vmul.f32 0.2, %v59_v33 }
  0x12   :  { %109 = vst [vmem:[%s184_s2 + $0x8] sm:$0xff] %v122_v44  ;;  %v81_v49 = vsel %vm65_vm5, %v57_v31, %v73_v45 }
  0x13   :  { %v123_v50 = vpack.c.bf16 %v81_v49, %v80_v46  ;;  %v82_v51 = vsel %vm66_vm6, %v58_v32, %v74_v47  ;;  %v83_v52 = vsel %vm67_vm7, %v59_v33, %v75_v48 }
  0x14   :  { %v124_v53 = vpack.c.bf16 %v83_v52, %v82_v51 }
  0x15   :  { %110 = vst [vmem:[%s184_s2 + $0x10] sm:$0xff] %v123_v50 }
  0x16   :  { %111 = vst [vmem:[%s184_s2 + $0x18] sm:$0xff] %v124_v53 }

// kernel: patchgan_forward.11
= control target key start
LH: loop header
LB: loop body
LE: loop exit
PB: predicated region body
PF: predicated region fallthrough
CT: control target
= control target key end

     0   :  { %s3961_s1 = inlined_call_operand.vmem [shape: bf16[2048,256], index: 1, kind: input, shape index: {}]   ;;  %s3962_s0 = inlined_call_operand.vmem [shape: bf16[32,2048], index: 0, kind: input, shape index: {}]   ;;  %s3963_s2 = inlined_call_operand.vmem [shape: f32[32,256], index: 2, kind: output, shape index: {0}]   ;;  %s3964_s3 = inlined_call_operand.vmem [shape: f32[1,2,256], index: 3, kind: output, shape index: {1}]  }
   0x1   :  { %v2614_v0 = vld [vmem:[%s3961_s1 + $0x4] ss:$8 sps:$4 sm:$0xff]   ;;  %v2618_v2 = vld [vmem:[%s3961_s1] ss:$8 sps:$4 sm:$0xff]   ;;  %v2620_v4 = vld [vmem:[%s3961_s1 + $0x14] ss:$8 sps:$4 sm:$0xff]  }
   0x2   :  { %v2616_v1 = vld [vmem:[%s3961_s1 + $0x404] ss:$8 sps:$4 sm:$0xff]   ;;  %1741 = vmatprep.subr.bf16.mxu1 %v2614_v0  ;;  %v2619_v3 = vld [vmem:[%s3961_s1 + $0x400] ss:$8 sps:$4 sm:$0xff]   ;;  %v2622_v5 = vld [vmem:[%s3961_s1 + $0x414] ss:$8 sps:$4 sm:$0xff]  }
   0x3   :  { %1953 = vmatprep.subr.bf16.mxu0 %v2616_v1  ;;  %1742 = vmatpush1.bf16.msra.mxu1 %v2618_v2  ;;  %v2624_v6 = vld [vmem:[%s3961_s1 + $0x10] ss:$8 sps:$4 sm:$0xff]   ;;  %v2626_v8 = vld [vmem:[%s3961_s1 + $0x24] ss:$8 sps:$4 sm:$0xff]   ;;  %v2630_v10 = vld [vmem:[%s3961_s1 + $0x20] ss:$8 sps:$4 sm:$0xff]  }
   0x4   :  { %1954 = vmatpush1.bf16.msra.mxu0 %v2619_v3  ;;  %1743 = vmatprep.subr.bf16.mxu1 %v2620_v4  ;;  %v2625_v7 = vld [vmem:[%s3961_s1 + $0x410] ss:$8 sps:$4 sm:$0xff]   ;;  %v2628_v9 = vld [vmem:[%s3961_s1 + $0x424] ss:$8 sps:$4 sm:$0xff]   ;;  %v2631_v11 = vld [vmem:[%s3961_s1 + $0x420] ss:$8 sps:$4 sm:$0xff]  }
   0x5   :  { %1955 = vmatprep.subr.bf16.mxu0 %v2622_v5  ;;  %v2632_v12 = vld [vmem:[%s3961_s1 + $0x34] ss:$8 sps:$4 sm:$0xff]   ;;  %v2636_v14 = vld [vmem:[%s3961_s1 + $0x30] ss:$8 sps:$4 sm:$0xff]   ;;  %v2638_v16 = vld [vmem:[%s3961_s1 + $0x44] ss:$8 sps:$4 sm:$0xff]  }
   0x6   :  { %v2634_v13 = vld [vmem:[%s3961_s1 + $0x434] ss:$8 sps:$4 sm:$0xff]   ;;  %v2637_v15 = vld [vmem:[%s3961_s1 + $0x430] ss:$8 sps:$4 sm:$0xff]   ;;  %v2640_v17 = vld [vmem:[%s3961_s1 + $0x444] ss:$8 sps:$4 sm:$0xff]  }
   0x7   :  { %1744 = vmatpush1.bf16.msra.mxu1 %v2624_v6  ;;  %v2642_v18 = vld [vmem:[%s3961_s1 + $0x40] ss:$8 sps:$4 sm:$0xff]   ;;  %v2644_v20 = vld [vmem:[%s3961_s1 + $0x54] ss:$8 sps:$4 sm:$0xff]   ;;  %v2648_v22 = vld [vmem:[%s3961_s1 + $0x50] ss:$8 sps:$4 sm:$0xff]  }
   0x8   :  { %1956 = vmatpush1.bf16.msra.mxu0 %v2625_v7  ;;  %1745 = vmatprep.subr.bf16.mxu1 %v2626_v8  ;;  %v2643_v19 = vld [vmem:[%s3961_s1 + $0x440] ss:$8 sps:$4 sm:$0xff]   ;;  %v2646_v21 = vld [vmem:[%s3961_s1 + $0x454] ss:$8 sps:$4 sm:$0xff]   ;;  %v2649_v23 = vld [vmem:[%s3961_s1 + $0x450] ss:$8 sps:$4 sm:$0xff]  }
   0x9   :  { %1957 = vmatprep.subr.bf16.mxu0 %v2628_v9  ;;  %v2650_v24 = vld [vmem:[%s3961_s1 + $0x64] ss:$8 sps:$4 sm:$0xff]   ;;  %v2654_v26 = vld [vmem:[%s3961_s1 + $0x60] ss:$8 sps:$4 sm:$0xff]   ;;  %v2656_v28 = vld [vmem:[%s3961_s1 + $0x74] ss:$8 sps:$4 sm:$0xff]  }
   0xa   :  { %v2652_v25 = vld [vmem:[%s3961_s1 + $0x464] ss:$8 sps:$4 sm:$0xff]   ;;  %v2655_v27 = vld [vmem:[%s3961_s1 + $0x460] ss:$8 sps:$4 sm:$0xff]   ;;  %v2658_v29 = vld [vmem:[%s3961_s1 + $0x474] ss:$8 sps:$4 sm:$0xff]  }
   0xb   :  { %1746 = vmatpush1.bf16.msra.mxu1 %v2630_v10  ;;  %v2660_v30 = vld [vmem:[%s3961_s1 + $0x70] ss:$8 sps:$4 sm:$0xff]   ;;  %v2662_v32 = vld [vmem:[%s3961_s1 + $0x84] ss:$8 sps:$4 sm:$0xff]   ;;  %v2666_v34 = vld [vmem:[%s3961_s1 + $0x80] ss:$8 sps:$4 sm:$0xff]  }
   0xc   :  { %1958 = vmatpush1.bf16.msra.mxu0 %v2631_v11  ;;  %1747 = vmatprep.subr.bf16.mxu1 %v2632_v12  ;;  %v2661_v31 = vld [vmem:[%s3961_s1 + $0x470] ss:$8 sps:$4 sm:$0xff]   ;;  %v2664_v33 = vld [vmem:[%s3961_s1 + $0x484] ss:$8 sps:$4 sm:$0xff]   ;;  %v2667_v35 = vld [vmem:[%s3961_s1 + $0x480] ss:$8 sps:$4 sm:$0xff]  }
   0xd   :  { %1959 = vmatprep.subr.bf16.mxu0 %v2634_v13  ;;  %v2668_v36 = vld [vmem:[%s3961_s1 + $0x94] ss:$8 sps:$4 sm:$0xff]   ;;  %v2672_v38 = vld [vmem:[%s3961_s1 + $0x90] ss:$8 sps:$4 sm:$0xff]   ;;  %v2674_v40 = vld [vmem:[%s3961_s1 + $0xa4] ss:$8 sps:$4 sm:$0xff]  }
   0xe   :  { %v2670_v37 = vld [vmem:[%s3961_s1 + $0x494] ss:$8 sps:$4 sm:$0xff]   ;;  %v2673_v39 = vld [vmem:[%s3961_s1 + $0x490] ss:$8 sps:$4 sm:$0xff]   ;;  %v2676_v41 = vld [vmem:[%s3961_s1 + $0x4a4] ss:$8 sps:$4 sm:$0xff]  }
   0xf   :  { %1748 = vmatpush1.bf16.msra.mxu1 %v2636_v14  ;;  %v2678_v42 = vld [vmem:[%s3961_s1 + $0xa0] ss:$8 sps:$4 sm:$0xff]   ;;  %v2680_v44 = vld [vmem:[%s3961_s1 + $0xb4] ss:$8 sps:$4 sm:$0xff]   ;;  %v2684_v46 = vld [vmem:[%s3961_s1 + $0xb0] ss:$8 sps:$4 sm:$0xff]  }
  0x10   :  { %1960 = vmatpush1.bf16.msra.mxu0 %v2637_v15  ;;  %1749 = vmatprep.subr.bf16.mxu1 %v2638_v16  ;;  %v2679_v43 = vld [vmem:[%s3961_s1 + $0x4a0] ss:$8 sps:$4 sm:$0xff]   ;;  %v2682_v45 = vld [vmem:[%s3961_s1 + $0x4b4] ss:$8 sps:$4 sm:$0xff]   ;;  %v2685_v47 = vld [vmem:[%s3961_s1 + $0x4b0] ss:$8 sps:$4 sm:$0xff]  }
  0x11   :  { %1961 = vmatprep.subr.bf16.mxu0 %v2640_v17  ;;  %v13_v48 = vld [vmem:[%s3962_s0] sm:$0xff]  ;;  %v2692_v58 = vld [vmem:[%s3961_s1 + $0xd4] ss:$8 sps:$4 sm:$0xff]   ;;  %v2696_v60 = vld [vmem:[%s3961_s1 + $0xd0] ss:$8 sps:$4 sm:$0xff]  }
  0x12   :  { %v21_v49 = vld [vmem:[%s3962_s0 + $0x40] sm:$0xff]  ;;  %v2694_v59 = vld [vmem:[%s3961_s1 + $0x4d4] ss:$8 sps:$4 sm:$0xff]   ;;  %v2697_v61 = vld [vmem:[%s3961_s1 + $0x4d0] ss:$8 sps:$4 sm:$0xff]  }
  0x13   :  { %1750 = vmatpush1.bf16.msra.mxu1 %v2642_v18  ;;  %v2686_v50 = vld [vmem:[%s3961_s1 + $0xc4] ss:$8 sps:$4 sm:$0xff]   ;;  %v2269_v52 = vcombine.high %v13_v48, %v21_v49  ;;  %v2690_v56 = vld [vmem:[%s3961_s1 + $0xc0] ss:$8 sps:$4 sm:$0xff]   ;;  %v2704_v2 = vld [vmem:[%s3961_s1 + $0xf4] ss:$8 sps:$4 sm:$0xff]   ;;  %v2268_v8 = vcombine.low %v13_v48, %v21_v49 }
  0x14   :  { %1962 = vmatpush1.bf16.msra.mxu0 %v2643_v19  ;;  %1751 = vmatprep.subr.bf16.mxu1 %v2644_v20  ;;  %v2688_v51 = vld [vmem:[%s3961_s1 + $0x4c4] ss:$8 sps:$4 sm:$0xff]   ;;  %v2691_v57 = vld [vmem:[%s3961_s1 + $0x4c0] ss:$8 sps:$4 sm:$0xff]   ;;  %v2706_v3 = vld [vmem:[%s3961_s1 + $0x4f4] ss:$8 sps:$4 sm:$0xff]  }
  0x15   :  { %1963 = vmatprep.subr.bf16.mxu0 %v2646_v21  ;;  %v17_v53 = vld [vmem:[%s3962_s0 + $0x20] sm:$0xff]  ;;  %1773 = vmatprep.mubr.bf16.mxu1 %v2269_v52  ;;  %v2708_v4 = vld [vmem:[%s3961_s1 + $0xf0] ss:$8 sps:$4 sm:$0xff]   ;;  %v2718_v12 = vld [vmem:[%s3961_s1 + $0x114] ss:$8 sps:$4 sm:$0xff]  }
  0x16   :  { %v25_v54 = vld [vmem:[%s3962_s0 + $0x60] sm:$0xff]  ;;  %v2709_v5 = vld [vmem:[%s3961_s1 + $0x4f0] ss:$8 sps:$4 sm:$0xff]   ;;  %v2721_v13 = vld [vmem:[%s3961_s1 + $0x514] ss:$8 sps:$4 sm:$0xff]  }
  0x17   :  { %1752 = vmatpush1.bf16.msra.mxu1 %v2648_v22  ;;  %v2277_v55 = vcombine.high %v17_v53, %v25_v54  ;;  %v2698_v62 = vld [vmem:[%s3961_s1 + $0xe4] ss:$8 sps:$4 sm:$0xff]   ;;  %v2702_v0 = vld [vmem:[%s3961_s1 + $0xe0] ss:$8 sps:$4 sm:$0xff]   ;;  %v2276_v10 = vcombine.low %v17_v53, %v25_v54  ;;  %v2716_v14 = vld [vmem:[%s3961_s1 + $0x110] ss:$8 sps:$4 sm:$0xff]  }
  0x18   :  { %1964 = vmatpush1.bf16.msra.mxu0 %v2649_v23  ;;  %1753 = vmatprep.subr.bf16.mxu1 %v2650_v24  ;;  %v2700_v63 = vld [vmem:[%s3961_s1 + $0x4e4] ss:$8 sps:$4 sm:$0xff]   ;;  %v2703_v1 = vld [vmem:[%s3961_s1 + $0x4e0] ss:$8 sps:$4 sm:$0xff]   ;;  %v2719_v15 = vld [vmem:[%s3961_s1 + $0x510] ss:$8 sps:$4 sm:$0xff]  }
  0x19   :  { %1965 = vmatprep.subr.bf16.mxu0 %v2652_v25  ;;  %1985 = vmatprep.mubr.bf16.mxu0 %v2277_v55  ;;  %v2712_v6 = vld [vmem:[%s3961_s1 + $0x104] ss:$8 sps:$4 sm:$0xff]   ;;  %v2710_v9 = vld [vmem:[%s3961_s1 + $0x100] ss:$8 sps:$4 sm:$0xff]   ;;  %v2730_v20 = vld [vmem:[%s3961_s1 + $0x134] ss:$8 sps:$4 sm:$0xff]  }
  0x1a   :  { %v2715_v7 = vld [vmem:[%s3961_s1 + $0x504] ss:$8 sps:$4 sm:$0xff]   ;;  %v2713_v11 = vld [vmem:[%s3961_s1 + $0x500] ss:$8 sps:$4 sm:$0xff]   ;;  %v2733_v21 = vld [vmem:[%s3961_s1 + $0x534] ss:$8 sps:$4 sm:$0xff]  }
  0x1b   :  { %1754 = vmatpush1.bf16.msra.mxu1 %v2654_v26  ;;  %v2724_v16 = vld [vmem:[%s3961_s1 + $0x124] ss:$8 sps:$4 sm:$0xff]   ;;  %v2722_v18 = vld [vmem:[%s3961_s1 + $0x120] ss:$8 sps:$4 sm:$0xff]   ;;  %v2728_v22 = vld [vmem:[%s3961_s1 + $0x130] ss:$8 sps:$4 sm:$0xff]  }
  0x1c   :  { %1966 = vmatpush1.bf16.msra.mxu0 %v2655_v27  ;;  %1755 = vmatprep.subr.bf16.mxu1 %v2656_v28  ;;  %v2727_v17 = vld [vmem:[%s3961_s1 + $0x524] ss:$8 sps:$4 sm:$0xff]   ;;  %v2725_v19 = vld [vmem:[%s3961_s1 + $0x520] ss:$8 sps:$4 sm:$0xff]   ;;  %v2731_v23 = vld [vmem:[%s3961_s1 + $0x530] ss:$8 sps:$4 sm:$0xff]  }
  0x1d   :  { %1967 = vmatprep.subr.bf16.mxu0 %v2658_v29  ;;  %v2736_v24 = vld [vmem:[%s3961_s1 + $0x144] ss:$8 sps:$4 sm:$0xff]   ;;  %v2734_v26 = vld [vmem:[%s3961_s1 + $0x140] ss:$8 sps:$4 sm:$0xff]   ;;  %v2742_v28 = vld [vmem:[%s3961_s1 + $0x154] ss:$8 sps:$4 sm:$0xff]  }
  0x1e   :  { %v2739_v25 = vld [vmem:[%s3961_s1 + $0x544] ss:$8 sps:$4 sm:$0xff]   ;;  %v2737_v27 = vld [vmem:[%s3961_s1 + $0x540] ss:$8 sps:$4 sm:$0xff]   ;;  %v2745_v29 = vld [vmem:[%s3961_s1 + $0x554] ss:$8 sps:$4 sm:$0xff]  }
  0x1f   :  { %1756 = vmatpush1.bf16.msra.mxu1 %v2660_v30  ;;  %v29_v30 = vld [vmem:[%s3962_s0 + $0x80] sm:$0xff]  ;;  %v3340_v49 = vld [vmem:[%s3962_s0 + $0x28] sm:$0xff]  ;;  %v2755_v52 = vld [vmem:[%s3961_s1 + $0x570] ss:$8 sps:$4 sm:$0xff]  }
  0x20   :  { %1968 = vmatpush1.bf16.msra.mxu0 %v2661_v31  ;;  %1757 = vmatprep.subr.bf16.mxu1 %v2662_v32  ;;  %v37_v31 = vld [vmem:[%s3962_s0 + $0xc0] sm:$0xff]  ;;  %v2740_v32 = vld [vmem:[%s3961_s1 + $0x150] ss:$8 sps:$4 sm:$0xff]  }
  0x21   :  { %1969 = vmatprep.subr.bf16.mxu0 %v2664_v33  ;;  %v2285_v33 = vcombine.high %v29_v30, %v37_v31  ;;  %v2760_v54 = vld [vmem:[%s3961_s1 + $0x184] ss:$8 sps:$4 sm:$0xff]  }
  0x22   :  { %v2763_v55 = vld [vmem:[%s3961_s1 + $0x584] ss:$8 sps:$4 sm:$0xff]  }
  0x23   :  { %1758 = vmatpush1.bf16.msra.mxu1 %v2666_v34  ;;  %v2743_v34 = vld [vmem:[%s3961_s1 + $0x550] ss:$8 sps:$4 sm:$0xff]  }
  0x24   :  { %1970 = vmatpush1.bf16.msra.mxu0 %v2667_v35  ;;  %1759 = vmatprep.subr.bf16.mxu1 %v2668_v36  ;;  %v33_v35 = vld [vmem:[%s3962_s0 + $0xa0] sm:$0xff] }
  0x25   :  { %1971 = vmatprep.subr.bf16.mxu0 %v2670_v37  ;;  %v41_v36 = vld [vmem:[%s3962_s0 + $0xe0] sm:$0xff]  ;;  %v2284_v37 = vcombine.low %v29_v30, %v37_v31  ;;  %v2814_v30 = vld [vmem:[%s3961_s1 + $0x214] ss:$8 sps:$4 sm:$0xff]  }
  0x26   :  { %v2817_v31 = vld [vmem:[%s3961_s1 + $0x614] ss:$8 sps:$4 sm:$0xff]  }
  0x27   :  { %1760 = vmatpush1.bf16.msra.mxu1 %v2672_v38  ;;  %v2748_v38 = vld [vmem:[%s3961_s1 + $0x164] ss:$8 sps:$4 sm:$0xff]  }
  0x28   :  { %1972 = vmatpush1.bf16.msra.mxu0 %v2673_v39  ;;  %1761 = vmatprep.subr.bf16.mxu1 %v2674_v40  ;;  %v2293_v39 = vcombine.high %v33_v35, %v41_v36  ;;  %v2292_v40 = vcombine.low %v33_v35, %v41_v36  ;;  %v2812_v36 = vld [vmem:[%s3961_s1 + $0x210] ss:$8 sps:$4 sm:$0xff]  }
  0x29   :  { %1973 = vmatprep.subr.bf16.mxu0 %v2676_v41  ;;  %v2751_v41 = vld [vmem:[%s3961_s1 + $0x564] ss:$8 sps:$4 sm:$0xff]  }
  0x2b   :  { %1762 = vmatpush1.bf16.msra.mxu1 %v2678_v42  ;;  %v2746_v42 = vld [vmem:[%s3961_s1 + $0x160] ss:$8 sps:$4 sm:$0xff]  }
  0x2c   :  { %1974 = vmatpush1.bf16.msra.mxu0 %v2679_v43  ;;  %1763 = vmatprep.subr.bf16.mxu1 %v2680_v44  ;;  %v2749_v43 = vld [vmem:[%s3961_s1 + $0x560] ss:$8 sps:$4 sm:$0xff]  }
  0x2d   :  { %1975 = vmatprep.subr.bf16.mxu0 %v2682_v45  ;;  %v3322_v44 = vld [vmem:[%s3962_s0 + $0x8] sm:$0xff] }
  0x2e   :  { %v3327_v45 = vld [vmem:[%s3962_s0 + $0x48] sm:$0xff] }
  0x2f   :  { %1764 = vmatpush1.bf16.msra.mxu1 %v2684_v46  ;;  %v2754_v46 = vld [vmem:[%s3961_s1 + $0x174] ss:$8 sps:$4 sm:$0xff]   ;;  %v2271_v48 = vcombine.high %v3322_v44, %v3327_v45 }
  0x30   :  { %1976 = vmatpush1.bf16.msra.mxu0 %v2685_v47  ;;  %1765 = vmatprep.subr.bf16.mxu1 %v2686_v50  ;;  %v2757_v47 = vld [vmem:[%s3961_s1 + $0x574] ss:$8 sps:$4 sm:$0xff]   ;;  %v3345_v50 = vld [vmem:[%s3962_s0 + $0x68] sm:$0xff] }
  0x31   :  { %1977 = vmatprep.subr.bf16.mxu0 %v2688_v51  ;;  %v2752_v51 = vld [vmem:[%s3961_s1 + $0x170] ss:$8 sps:$4 sm:$0xff]   ;;  %v2279_v53 = vcombine.high %v3340_v49, %v3345_v50 }
  0x33   :  { %1766 = vmatpush1.bf16.msra.mxu1 %v2690_v56  ;;  %v2758_v56 = vld [vmem:[%s3961_s1 + $0x180] ss:$8 sps:$4 sm:$0xff]  }
  0x34   :  { %1978 = vmatpush1.bf16.msra.mxu0 %v2691_v57  ;;  %1767 = vmatprep.subr.bf16.mxu1 %v2692_v58  ;;  %v2761_v57 = vld [vmem:[%s3961_s1 + $0x580] ss:$8 sps:$4 sm:$0xff]   ;;  %v2766_v58 = vld [vmem:[%s3961_s1 + $0x194] ss:$8 sps:$4 sm:$0xff]  }
  0x35   :  { %1979 = vmatprep.subr.bf16.mxu0 %v2694_v59  ;;  %v2769_v59 = vld [vmem:[%s3961_s1 + $0x594] ss:$8 sps:$4 sm:$0xff]  }
  0x37   :  { %1768 = vmatpush1.bf16.msra.mxu1 %v2696_v60  ;;  %v2764_v60 = vld [vmem:[%s3961_s1 + $0x190] ss:$8 sps:$4 sm:$0xff]  }
  0x38   :  { %1980 = vmatpush1.bf16.msra.mxu0 %v2697_v61  ;;  %1769 = vmatprep.subr.bf16.mxu1 %v2698_v62  ;;  %v2767_v61 = vld [vmem:[%s3961_s1 + $0x590] ss:$8 sps:$4 sm:$0xff]   ;;  %v2772_v62 = vld [vmem:[%s3961_s1 + $0x1a4] ss:$8 sps:$4 sm:$0xff]  }
  0x39   :  { %1981 = vmatprep.subr.bf16.mxu0 %v2700_v63  ;;  %v2775_v63 = vld [vmem:[%s3961_s1 + $0x5a4] ss:$8 sps:$4 sm:$0xff]  }
  0x3b   :  { %1770 = vmatpush1.bf16.msra.mxu1 %v2702_v0  ;;  %v2770_v0 = vld [vmem:[%s3961_s1 + $0x1a0] ss:$8 sps:$4 sm:$0xff]  }
  0x3c   :  { %1982 = vmatpush1.bf16.msra.mxu0 %v2703_v1  ;;  %1771 = vmatprep.subr.bf16.mxu1 %v2704_v2  ;;  %v2773_v1 = vld [vmem:[%s3961_s1 + $0x5a0] ss:$8 sps:$4 sm:$0xff]   ;;  %v2778_v2 = vld [vmem:[%s3961_s1 + $0x1b4] ss:$8 sps:$4 sm:$0xff]  }
  0x3d   :  { %1983 = vmatprep.subr.bf16.mxu0 %v2706_v3  ;;  %v2781_v3 = vld [vmem:[%s3961_s1 + $0x5b4] ss:$8 sps:$4 sm:$0xff]  }
  0x3f   :  { %1772 = vmatpush1.bf16.msra.mxu1 %v2708_v4  ;;  %v2776_v4 = vld [vmem:[%s3961_s1 + $0x1b0] ss:$8 sps:$4 sm:$0xff]  }
  0x40   :  { %1984 = vmatpush1.bf16.msra.mxu0 %v2709_v5  ;;  %1794 = vmatprep.subr.bf16.mxu1 %v2712_v6  ;;  %v2779_v5 = vld [vmem:[%s3961_s1 + $0x5b0] ss:$8 sps:$4 sm:$0xff]   ;;  %v2784_v6 = vld [vmem:[%s3961_s1 + $0x1c4] ss:$8 sps:$4 sm:$0xff]  }
  0x41   :  { %2006 = vmatprep.subr.bf16.mxu0 %v2715_v7  ;;  %v2787_v7 = vld [vmem:[%s3961_s1 + $0x5c4] ss:$8 sps:$4 sm:$0xff]  }
  0x42   :  { %1774 = vmatmul.mubr.bf16.vlgmr.msra.gmra.mrb[0].mxu1 %v2268_v8  ;;  %v2782_v8 = vld [vmem:[%s3961_s1 + $0x1c0] ss:$8 sps:$4 sm:$0xff]  }
  0x43   :  { %1986 = vmatmul.mubr.bf16.vlgmr.msra.gmra.mrb[0].mxu0 %v2276_v10  ;;  %1795 = vmatpush1.bf16.msra.mxu1 %v2710_v9  ;;  %v2785_v9 = vld [vmem:[%s3961_s1 + $0x5c0] ss:$8 sps:$4 sm:$0xff]   ;;  %v2790_v10 = vld [vmem:[%s3961_s1 + $0x1d4] ss:$8 sps:$4 sm:$0xff]  }
  0x44   :  { %2007 = vmatpush1.bf16.msra.mxu0 %v2713_v11  ;;  %1796 = vmatprep.subr.bf16.mxu1 %v2718_v12  ;;  %v2793_v11 = vld [vmem:[%s3961_s1 + $0x5d4] ss:$8 sps:$4 sm:$0xff]   ;;  %v2788_v12 = vld [vmem:[%s3961_s1 + $0x1d0] ss:$8 sps:$4 sm:$0xff]  }
  0x45   :  { %2008 = vmatprep.subr.bf16.mxu0 %v2721_v13  ;;  %1783 = vmatprep.mubr.bf16.mxu1 %v2285_v33  ;;  %v2791_v13 = vld [vmem:[%s3961_s1 + $0x5d0] ss:$8 sps:$4 sm:$0xff]   ;;  %v42_v33 = vld [vmem:[%s3962_s0 + $0xe8] sm:$0xff] }
  0x46   :  { %1995 = vmatprep.mubr.bf16.mxu0 %v2293_v39  ;;  %v2823_v39 = vld [vmem:[%s3961_s1 + $0x624] ss:$8 sps:$4 sm:$0xff]  }
  0x47   :  { %1797 = vmatpush1.bf16.msra.mxu1 %v2716_v14  ;;  %v2796_v14 = vld [vmem:[%s3961_s1 + $0x1e4] ss:$8 sps:$4 sm:$0xff]  }
  0x48   :  { %2009 = vmatpush1.bf16.msra.mxu0 %v2719_v15  ;;  %1798 = vmatprep.subr.bf16.mxu1 %v2724_v16  ;;  %v2799_v15 = vld [vmem:[%s3961_s1 + $0x5e4] ss:$8 sps:$4 sm:$0xff]   ;;  %v2794_v16 = vld [vmem:[%s3961_s1 + $0x1e0] ss:$8 sps:$4 sm:$0xff]  }
  0x49   :  { %2010 = vmatprep.subr.bf16.mxu0 %v2727_v17  ;;  %v2797_v17 = vld [vmem:[%s3961_s1 + $0x5e0] ss:$8 sps:$4 sm:$0xff]  }
  0x4a   :  { %1784 = vmatmul.mubr.bf16.gmra.mrb[4].mxu1 %v2284_v37  ;;  %v2815_v37 = vld [vmem:[%s3961_s1 + $0x610] ss:$8 sps:$4 sm:$0xff]  }
  0x4b   :  { %1799 = vmatpush1.bf16.msra.mxu1 %v2722_v18  ;;  %1996 = vmatmul.mubr.bf16.gmra.mrb[4].mxu0 %v2292_v40  ;;  %v2802_v18 = vld [vmem:[%s3961_s1 + $0x1f4] ss:$8 sps:$4 sm:$0xff]   ;;  %v2818_v40 = vld [vmem:[%s3961_s1 + $0x220] ss:$8 sps:$4 sm:$0xff]  }
  0x4c   :  { %2011 = vmatpush1.bf16.msra.mxu0 %v2725_v19  ;;  %1800 = vmatprep.subr.bf16.mxu1 %v2730_v20  ;;  %v2805_v19 = vld [vmem:[%s3961_s1 + $0x5f4] ss:$8 sps:$4 sm:$0xff]   ;;  %v2800_v20 = vld [vmem:[%s3961_s1 + $0x1f0] ss:$8 sps:$4 sm:$0xff]  }
  0x4d   :  { %2012 = vmatprep.subr.bf16.mxu0 %v2733_v21  ;;  %1826 = vmatprep.mubr.bf16.mxu1 %v2271_v48  ;;  %v2803_v21 = vld [vmem:[%s3961_s1 + $0x5f0] ss:$8 sps:$4 sm:$0xff]   ;;  %v2826_v48 = vld [vmem:[%s3961_s1 + $0x234] ss:$8 sps:$4 sm:$0xff]  }
  0x4e   :  { %2038 = vmatprep.mubr.bf16.mxu0 %v2279_v53  ;;  %v2827_v53 = vld [vmem:[%s3961_s1 + $0x630] ss:$8 sps:$4 sm:$0xff]  }
  0x4f   :  { %1801 = vmatpush1.bf16.msra.mxu1 %v2728_v22  ;;  %v2808_v22 = vld [vmem:[%s3961_s1 + $0x204] ss:$8 sps:$4 sm:$0xff]  }
  0x50   :  { %2013 = vmatpush1.bf16.msra.mxu0 %v2731_v23  ;;  %1802 = vmatprep.subr.bf16.mxu1 %v2736_v24  ;;  %v2811_v23 = vld [vmem:[%s3961_s1 + $0x604] ss:$8 sps:$4 sm:$0xff]   ;;  %v2806_v24 = vld [vmem:[%s3961_s1 + $0x200] ss:$8 sps:$4 sm:$0xff]  }
  0x51   :  { %2014 = vmatprep.subr.bf16.mxu0 %v2739_v25  ;;  %v2809_v25 = vld [vmem:[%s3961_s1 + $0x600] ss:$8 sps:$4 sm:$0xff]  }
  0x53   :  { %1803 = vmatpush1.bf16.msra.mxu1 %v2734_v26  ;;  %v30_v26 = vld [vmem:[%s3962_s0 + $0x88] sm:$0xff] }
  0x54   :  { %2015 = vmatpush1.bf16.msra.mxu0 %v2737_v27  ;;  %1804 = vmatprep.subr.bf16.mxu1 %v2742_v28  ;;  %v2270_v27 = vcombine.low %v3322_v44, %v3327_v45  ;;  %v2278_v28 = vcombine.low %v3340_v49, %v3345_v50  ;;  %v3511_v45 = vld [vmem:[%s3962_s0 + $0x50] sm:$0xff] }
  0x55   :  { %2016 = vmatprep.subr.bf16.mxu0 %v2745_v29  ;;  %v38_v29 = vld [vmem:[%s3962_s0 + $0xc8] sm:$0xff]  ;;  %v2829_v49 = vld [vmem:[%s3961_s1 + $0x634] ss:$8 sps:$4 sm:$0xff]  }
  0x57   :  { %1805 = vmatpush1.bf16.msra.mxu1 %v2740_v32  ;;  %v34_v32 = vld [vmem:[%s3962_s0 + $0xa8] sm:$0xff] }
  0x58   :  { %2017 = vmatpush1.bf16.msra.mxu0 %v2743_v34  ;;  %1806 = vmatprep.subr.bf16.mxu1 %v2748_v38  ;;  %v2287_v34 = vcombine.high %v30_v26, %v38_v29  ;;  %v2295_v35 = vcombine.high %v34_v32, %v42_v33  ;;  %v2820_v38 = vld [vmem:[%s3961_s1 + $0x224] ss:$8 sps:$4 sm:$0xff]   ;;  %v2294_v44 = vcombine.low %v34_v32, %v42_v33  ;;  %v2890_v32 = vld [vmem:[%s3961_s1 + $0x2e0] ss:$8 sps:$4 sm:$0xff]  }
  0x59   :  { %2018 = vmatprep.subr.bf16.mxu0 %v2751_v41  ;;  %v2821_v41 = vld [vmem:[%s3961_s1 + $0x620] ss:$8 sps:$4 sm:$0xff]  }
  0x5a   :  { %v2893_v33 = vld [vmem:[%s3961_s1 + $0x6e0] ss:$8 sps:$4 sm:$0xff]  }
  0x5b   :  { %1807 = vmatpush1.bf16.msra.mxu1 %v2746_v42  ;;  %v3506_v42 = vld [vmem:[%s3962_s0 + $0x10] sm:$0xff] }
  0x5c   :  { %2019 = vmatpush1.bf16.msra.mxu0 %v2749_v43  ;;  %1808 = vmatprep.subr.bf16.mxu1 %v2754_v46  ;;  %v2286_v43 = vcombine.low %v30_v26, %v38_v29  ;;  %v3516_v46 = vld [vmem:[%s3962_s0 + $0x30] sm:$0xff]  ;;  %v2273_v50 = vcombine.high %v3506_v42, %v3511_v45 }
  0x5d   :  { %2020 = vmatprep.subr.bf16.mxu0 %v2757_v47  ;;  %v3521_v47 = vld [vmem:[%s3962_s0 + $0x70] sm:$0xff] }
  0x5e   :  { %v2886_v26 = vld [vmem:[%s3961_s1 + $0x2d4] ss:$8 sps:$4 sm:$0xff]   ;;  %v2887_v29 = vld [vmem:[%s3961_s1 + $0x6d0] ss:$8 sps:$4 sm:$0xff]  }
  0x5f   :  { %1809 = vmatpush1.bf16.msra.mxu1 %v2752_v51  ;;  %v2281_v51 = vcombine.high %v3516_v46, %v3521_v47 }
  0x60   :  { %2021 = vmatpush1.bf16.msra.mxu0 %v2755_v52  ;;  %1810 = vmatprep.subr.bf16.mxu1 %v2760_v54  ;;  %v2824_v52 = vld [vmem:[%s3961_s1 + $0x230] ss:$8 sps:$4 sm:$0xff]   ;;  %v2832_v54 = vld [vmem:[%s3961_s1 + $0x244] ss:$8 sps:$4 sm:$0xff]  }
  0x61   :  { %2022 = vmatprep.subr.bf16.mxu0 %v2763_v55  ;;  %v2835_v55 = vld [vmem:[%s3961_s1 + $0x644] ss:$8 sps:$4 sm:$0xff]  }
  0x63   :  { %1811 = vmatpush1.bf16.msra.mxu1 %v2758_v56  ;;  %v2830_v56 = vld [vmem:[%s3961_s1 + $0x240] ss:$8 sps:$4 sm:$0xff]  }
  0x64   :  { %2023 = vmatpush1.bf16.msra.mxu0 %v2761_v57  ;;  %1812 = vmatprep.subr.bf16.mxu1 %v2766_v58  ;;  %v2833_v57 = vld [vmem:[%s3961_s1 + $0x640] ss:$8 sps:$4 sm:$0xff]   ;;  %v2838_v58 = vld [vmem:[%s3961_s1 + $0x254] ss:$8 sps:$4 sm:$0xff]  }
  0x65   :  { %2024 = vmatprep.subr.bf16.mxu0 %v2769_v59  ;;  %v2841_v59 = vld [vmem:[%s3961_s1 + $0x654] ss:$8 sps:$4 sm:$0xff]  }
  0x67   :  { %1813 = vmatpush1.bf16.msra.mxu1 %v2764_v60  ;;  %v2836_v60 = vld [vmem:[%s3961_s1 + $0x250] ss:$8 sps:$4 sm:$0xff]  }
  0x68   :  { %2025 = vmatpush1.bf16.msra.mxu0 %v2767_v61  ;;  %1814 = vmatprep.subr.bf16.mxu1 %v2772_v62  ;;  %v2839_v61 = vld [vmem:[%s3961_s1 + $0x650] ss:$8 sps:$4 sm:$0xff]   ;;  %v2844_v62 = vld [vmem:[%s3961_s1 + $0x264] ss:$8 sps:$4 sm:$0xff]  }
  0x69   :  { %2026 = vmatprep.subr.bf16.mxu0 %v2775_v63  ;;  %v2847_v63 = vld [vmem:[%s3961_s1 + $0x664] ss:$8 sps:$4 sm:$0xff]  }
  0x6b   :  { %1815 = vmatpush1.bf16.msra.mxu1 %v2770_v0  ;;  %v2842_v0 = vld [vmem:[%s3961_s1 + $0x260] ss:$8 sps:$4 sm:$0xff]  }
  0x6c   :  { %2027 = vmatpush1.bf16.msra.mxu0 %v2773_v1  ;;  %1816 = vmatprep.subr.bf16.mxu1 %v2778_v2  ;;  %v2845_v1 = vld [vmem:[%s3961_s1 + $0x660] ss:$8 sps:$4 sm:$0xff]   ;;  %v2850_v2 = vld [vmem:[%s3961_s1 + $0x274] ss:$8 sps:$4 sm:$0xff]  }
  0x6d   :  { %2028 = vmatprep.subr.bf16.mxu0 %v2781_v3  ;;  %v2853_v3 = vld [vmem:[%s3961_s1 + $0x674] ss:$8 sps:$4 sm:$0xff]  }
  0x6f   :  { %1817 = vmatpush1.bf16.msra.mxu1 %v2776_v4  ;;  %v2848_v4 = vld [vmem:[%s3961_s1 + $0x270] ss:$8 sps:$4 sm:$0xff]  }
  0x70   :  { %2029 = vmatpush1.bf16.msra.mxu0 %v2779_v5  ;;  %1818 = vmatprep.subr.bf16.mxu1 %v2784_v6  ;;  %v2851_v5 = vld [vmem:[%s3961_s1 + $0x670] ss:$8 sps:$4 sm:$0xff]   ;;  %v2856_v6 = vld [vmem:[%s3961_s1 + $0x284] ss:$8 sps:$4 sm:$0xff]  }
  0x71   :  { %2030 = vmatprep.subr.bf16.mxu0 %v2787_v7  ;;  %v2859_v7 = vld [vmem:[%s3961_s1 + $0x684] ss:$8 sps:$4 sm:$0xff]  }
  0x73   :  { %1819 = vmatpush1.bf16.msra.mxu1 %v2782_v8  ;;  %v2854_v8 = vld [vmem:[%s3961_s1 + $0x280] ss:$8 sps:$4 sm:$0xff]  }
  0x74   :  { %2031 = vmatpush1.bf16.msra.mxu0 %v2785_v9  ;;  %1820 = vmatprep.subr.bf16.mxu1 %v2790_v10  ;;  %v2857_v9 = vld [vmem:[%s3961_s1 + $0x680] ss:$8 sps:$4 sm:$0xff]   ;;  %v2862_v10 = vld [vmem:[%s3961_s1 + $0x294] ss:$8 sps:$4 sm:$0xff]  }
  0x75   :  { %2032 = vmatprep.subr.bf16.mxu0 %v2793_v11  ;;  %v2865_v11 = vld [vmem:[%s3961_s1 + $0x694] ss:$8 sps:$4 sm:$0xff]  }
  0x77   :  { %1821 = vmatpush1.bf16.msra.mxu1 %v2788_v12  ;;  %v2860_v12 = vld [vmem:[%s3961_s1 + $0x290] ss:$8 sps:$4 sm:$0xff]  }
  0x78   :  { %2033 = vmatpush1.bf16.msra.mxu0 %v2791_v13  ;;  %1822 = vmatprep.subr.bf16.mxu1 %v2796_v14  ;;  %v2863_v13 = vld [vmem:[%s3961_s1 + $0x690] ss:$8 sps:$4 sm:$0xff]   ;;  %v2868_v14 = vld [vmem:[%s3961_s1 + $0x2a4] ss:$8 sps:$4 sm:$0xff]  }
  0x79   :  { %2034 = vmatprep.subr.bf16.mxu0 %v2799_v15  ;;  %v2871_v15 = vld [vmem:[%s3961_s1 + $0x6a4] ss:$8 sps:$4 sm:$0xff]  }
  0x7b   :  { %1823 = vmatpush1.bf16.msra.mxu1 %v2794_v16  ;;  %v2866_v16 = vld [vmem:[%s3961_s1 + $0x2a0] ss:$8 sps:$4 sm:$0xff]  }
  0x7c   :  { %2035 = vmatpush1.bf16.msra.mxu0 %v2797_v17  ;;  %1824 = vmatprep.subr.bf16.mxu1 %v2802_v18  ;;  %v2869_v17 = vld [vmem:[%s3961_s1 + $0x6a0] ss:$8 sps:$4 sm:$0xff]   ;;  %v2874_v18 = vld [vmem:[%s3961_s1 + $0x2b4] ss:$8 sps:$4 sm:$0xff]  }
  0x7d   :  { %2036 = vmatprep.subr.bf16.mxu0 %v2805_v19  ;;  %v2877_v19 = vld [vmem:[%s3961_s1 + $0x6b4] ss:$8 sps:$4 sm:$0xff]  }
  0x7f   :  { %1825 = vmatpush1.bf16.msra.mxu1 %v2800_v20  ;;  %v2872_v20 = vld [vmem:[%s3961_s1 + $0x2b0] ss:$8 sps:$4 sm:$0xff]  }
  0x80   :  { %2037 = vmatpush1.bf16.msra.mxu0 %v2803_v21  ;;  %1847 = vmatprep.subr.bf16.mxu1 %v2808_v22  ;;  %v2875_v21 = vld [vmem:[%s3961_s1 + $0x6b0] ss:$8 sps:$4 sm:$0xff]   ;;  %v2880_v22 = vld [vmem:[%s3961_s1 + $0x2c4] ss:$8 sps:$4 sm:$0xff]  }
  0x81   :  { %2059 = vmatprep.subr.bf16.mxu0 %v2811_v23  ;;  %v2883_v23 = vld [vmem:[%s3961_s1 + $0x6c4] ss:$8 sps:$4 sm:$0xff]  }
  0x82   :  { %1827 = vmatmul.mubr.bf16.vlgmr.msra.gmra.mrb[0].mxu1 %v2270_v27  ;;  %v2889_v27 = vld [vmem:[%s3961_s1 + $0x6d4] ss:$8 sps:$4 sm:$0xff]  }
  0x83   :  { %2039 = vmatmul.mubr.bf16.vlgmr.msra.gmra.mrb[0].mxu0 %v2278_v28  ;;  %1848 = vmatpush1.bf16.msra.mxu1 %v2806_v24  ;;  %v2878_v24 = vld [vmem:[%s3961_s1 + $0x2c0] ss:$8 sps:$4 sm:$0xff]   ;;  %v2884_v28 = vld [vmem:[%s3961_s1 + $0x2d0] ss:$8 sps:$4 sm:$0xff]  }
  0x84   :  { %2060 = vmatpush1.bf16.msra.mxu0 %v2809_v25  ;;  %1849 = vmatprep.subr.bf16.mxu1 %v2814_v30  ;;  %v2881_v25 = vld [vmem:[%s3961_s1 + $0x6c0] ss:$8 sps:$4 sm:$0xff]   ;;  %v2892_v30 = vld [vmem:[%s3961_s1 + $0x2e4] ss:$8 sps:$4 sm:$0xff]  }
  0x85   :  { %2061 = vmatprep.subr.bf16.mxu0 %v2817_v31  ;;  %1836 = vmatprep.mubr.bf16.mxu1 %v2287_v34  ;;  %v2895_v31 = vld [vmem:[%s3961_s1 + $0x6e4] ss:$8 sps:$4 sm:$0xff]   ;;  %v2898_v34 = vld [vmem:[%s3961_s1 + $0x2f4] ss:$8 sps:$4 sm:$0xff]  }
  0x86   :  { %2048 = vmatprep.mubr.bf16.mxu0 %v2295_v35  ;;  %v2901_v35 = vld [vmem:[%s3961_s1 + $0x6f4] ss:$8 sps:$4 sm:$0xff]  }
  0x87   :  { %1850 = vmatpush1.bf16.msra.mxu1 %v2812_v36  ;;  %v2896_v36 = vld [vmem:[%s3961_s1 + $0x2f0] ss:$8 sps:$4 sm:$0xff]  }
  0x88   :  { %2062 = vmatpush1.bf16.msra.mxu0 %v2815_v37  ;;  %1851 = vmatprep.subr.bf16.mxu1 %v2820_v38  ;;  %v2899_v37 = vld [vmem:[%s3961_s1 + $0x6f0] ss:$8 sps:$4 sm:$0xff]   ;;  %v2904_v38 = vld [vmem:[%s3961_s1 + $0x304] ss:$8 sps:$4 sm:$0xff]  }
  0x89   :  { %2063 = vmatprep.subr.bf16.mxu0 %v2823_v39  ;;  %v2907_v39 = vld [vmem:[%s3961_s1 + $0x704] ss:$8 sps:$4 sm:$0xff]  }
  0x8a   :  { %1837 = vmatmul.mubr.bf16.gmra.mrb[4].mxu1 %v2286_v43  ;;  %v2280_v43 = vcombine.low %v3516_v46, %v3521_v47  ;;  %v2910_v46 = vld [vmem:[%s3961_s1 + $0x314] ss:$8 sps:$4 sm:$0xff]  }
  0x8b   :  { %2049 = vmatmul.mubr.bf16.gmra.mrb[4].mxu0 %v2294_v44  ;;  %1852 = vmatpush1.bf16.msra.mxu1 %v2818_v40  ;;  %v31_v40 = vld [vmem:[%s3962_s0 + $0x90] sm:$0xff] }
  0x8c   :  { %2064 = vmatpush1.bf16.msra.mxu0 %v2821_v41  ;;  %1853 = vmatprep.subr.bf16.mxu1 %v2826_v48  ;;  %v2272_v41 = vcombine.low %v3506_v42, %v3511_v45  ;;  %v39_v44 = vld [vmem:[%s3962_s0 + $0xd0] sm:$0xff]  ;;  %v2902_v42 = vld [vmem:[%s3961_s1 + $0x300] ss:$8 sps:$4 sm:$0xff]  }
  0x8d   :  { %2065 = vmatprep.subr.bf16.mxu0 %v2829_v49  ;;  %1879 = vmatprep.mubr.bf16.mxu1 %v2273_v50  ;;  %v35_v48 = vld [vmem:[%s3962_s0 + $0xb0] sm:$0xff]  ;;  %v2905_v45 = vld [vmem:[%s3961_s1 + $0x700] ss:$8 sps:$4 sm:$0xff]   ;;  %v2289_v50 = vcombine.high %v31_v40, %v39_v44 }
  0x8e   :  { %2091 = vmatprep.mubr.bf16.mxu0 %v2281_v51  ;;  %v43_v49 = vld [vmem:[%s3962_s0 + $0xf0] sm:$0xff] }
  0x8f   :  { %1854 = vmatpush1.bf16.msra.mxu1 %v2824_v52  ;;  %v2913_v47 = vld [vmem:[%s3961_s1 + $0x714] ss:$8 sps:$4 sm:$0xff]   ;;  %v2297_v51 = vcombine.high %v35_v48, %v43_v49  ;;  %v2908_v52 = vld [vmem:[%s3961_s1 + $0x310] ss:$8 sps:$4 sm:$0xff]  }
  0x90   :  { %2066 = vmatpush1.bf16.msra.mxu0 %v2827_v53  ;;  %1855 = vmatprep.subr.bf16.mxu1 %v2832_v54  ;;  %v2911_v53 = vld [vmem:[%s3961_s1 + $0x710] ss:$8 sps:$4 sm:$0xff]   ;;  %v2916_v54 = vld [vmem:[%s3961_s1 + $0x324] ss:$8 sps:$4 sm:$0xff]  }
  0x91   :  { %2067 = vmatprep.subr.bf16.mxu0 %v2835_v55  ;;  %v2919_v55 = vld [vmem:[%s3961_s1 + $0x724] ss:$8 sps:$4 sm:$0xff]  }
  0x93   :  { %1856 = vmatpush1.bf16.msra.mxu1 %v2830_v56  ;;  %v3732_v56 = vld [vmem:[%s3962_s0 + $0x18] sm:$0xff] }
  0x94   :  { %2068 = vmatpush1.bf16.msra.mxu0 %v2833_v57  ;;  %1857 = vmatprep.subr.bf16.mxu1 %v2838_v58  ;;  %v2288_v57 = vcombine.low %v31_v40, %v39_v44  ;;  %v2296_v58 = vcombine.low %v35_v48, %v43_v49  ;;  %v2974_v40 = vld [vmem:[%s3961_s1 + $0x3c0] ss:$8 sps:$4 sm:$0xff]   ;;  %v2985_v44 = vld [vmem:[%s3961_s1 + $0x7d4] ss:$8 sps:$4 sm:$0xff]   ;;  %v2980_v48 = vld [vmem:[%s3961_s1 + $0x3d0] ss:$8 sps:$4 sm:$0xff]  }
  0x95   :  { %2069 = vmatprep.subr.bf16.mxu0 %v2841_v59  ;;  %v3737_v59 = vld [vmem:[%s3962_s0 + $0x58] sm:$0xff] }
  0x96   :  { %v2983_v49 = vld [vmem:[%s3961_s1 + $0x7d0] ss:$8 sps:$4 sm:$0xff]  }
  0x97   :  { %1858 = vmatpush1.bf16.msra.mxu1 %v2836_v60  ;;  %v3742_v60 = vld [vmem:[%s3962_s0 + $0x38] sm:$0xff] }
  0x98   :  { %2070 = vmatpush1.bf16.msra.mxu0 %v2839_v61  ;;  %1859 = vmatprep.subr.bf16.mxu1 %v2844_v62  ;;  %v3747_v61 = vld [vmem:[%s3962_s0 + $0x78] sm:$0xff]  ;;  %v2914_v62 = vld [vmem:[%s3961_s1 + $0x320] ss:$8 sps:$4 sm:$0xff]  }
  0x99   :  { %2071 = vmatprep.subr.bf16.mxu0 %v2847_v63  ;;  %v2917_v63 = vld [vmem:[%s3961_s1 + $0x720] ss:$8 sps:$4 sm:$0xff]  }
  0x9b   :  { %1860 = vmatpush1.bf16.msra.mxu1 %v2842_v0  ;;  %v2922_v0 = vld [vmem:[%s3961_s1 + $0x334] ss:$8 sps:$4 sm:$0xff]  }
  0x9c   :  { %2072 = vmatpush1.bf16.msra.mxu0 %v2845_v1  ;;  %1861 = vmatprep.subr.bf16.mxu1 %v2850_v2  ;;  %v2925_v1 = vld [vmem:[%s3961_s1 + $0x734] ss:$8 sps:$4 sm:$0xff]   ;;  %v2275_v2 = vcombine.high %v3732_v56, %v3737_v59 }
  0x9d   :  { %2073 = vmatprep.subr.bf16.mxu0 %v2853_v3  ;;  %v2283_v3 = vcombine.high %v3742_v60, %v3747_v61 }
  0x9f   :  { %1862 = vmatpush1.bf16.msra.mxu1 %v2848_v4  ;;  %v2920_v4 = vld [vmem:[%s3961_s1 + $0x330] ss:$8 sps:$4 sm:$0xff]  }
  0xa0   :  { %2074 = vmatpush1.bf16.msra.mxu0 %v2851_v5  ;;  %1863 = vmatprep.subr.bf16.mxu1 %v2856_v6  ;;  %v2923_v5 = vld [vmem:[%s3961_s1 + $0x730] ss:$8 sps:$4 sm:$0xff]   ;;  %v2928_v6 = vld [vmem:[%s3961_s1 + $0x344] ss:$8 sps:$4 sm:$0xff]  }
  0xa1   :  { %2075 = vmatprep.subr.bf16.mxu0 %v2859_v7  ;;  %v2931_v7 = vld [vmem:[%s3961_s1 + $0x744] ss:$8 sps:$4 sm:$0xff]  }
  0xa3   :  { %1864 = vmatpush1.bf16.msra.mxu1 %v2854_v8  ;;  %v2926_v8 = vld [vmem:[%s3961_s1 + $0x340] ss:$8 sps:$4 sm:$0xff]  }
  0xa4   :  { %2076 = vmatpush1.bf16.msra.mxu0 %v2857_v9  ;;  %1865 = vmatprep.subr.bf16.mxu1 %v2862_v10  ;;  %v2929_v9 = vld [vmem:[%s3961_s1 + $0x740] ss:$8 sps:$4 sm:$0xff]   ;;  %v2934_v10 = vld [vmem:[%s3961_s1 + $0x354] ss:$8 sps:$4 sm:$0xff]  }
  0xa5   :  { %2077 = vmatprep.subr.bf16.mxu0 %v2865_v11  ;;  %v2937_v11 = vld [vmem:[%s3961_s1 + $0x754] ss:$8 sps:$4 sm:$0xff]  }
  0xa7   :  { %1866 = vmatpush1.bf16.msra.mxu1 %v2860_v12  ;;  %v2932_v12 = vld [vmem:[%s3961_s1 + $0x350] ss:$8 sps:$4 sm:$0xff]  }
  0xa8   :  { %2078 = vmatpush1.bf16.msra.mxu0 %v2863_v13  ;;  %1867 = vmatprep.subr.bf16.mxu1 %v2868_v14  ;;  %v2935_v13 = vld [vmem:[%s3961_s1 + $0x750] ss:$8 sps:$4 sm:$0xff]   ;;  %v2940_v14 = vld [vmem:[%s3961_s1 + $0x364] ss:$8 sps:$4 sm:$0xff]  }
  0xa9   :  { %2079 = vmatprep.subr.bf16.mxu0 %v2871_v15  ;;  %v2943_v15 = vld [vmem:[%s3961_s1 + $0x764] ss:$8 sps:$4 sm:$0xff]  }
  0xab   :  { %1868 = vmatpush1.bf16.msra.mxu1 %v2866_v16  ;;  %v2938_v16 = vld [vmem:[%s3961_s1 + $0x360] ss:$8 sps:$4 sm:$0xff]  }
  0xac   :  { %2080 = vmatpush1.bf16.msra.mxu0 %v2869_v17  ;;  %1869 = vmatprep.subr.bf16.mxu1 %v2874_v18  ;;  %v2941_v17 = vld [vmem:[%s3961_s1 + $0x760] ss:$8 sps:$4 sm:$0xff]   ;;  %v2946_v18 = vld [vmem:[%s3961_s1 + $0x374] ss:$8 sps:$4 sm:$0xff]  }
  0xad   :  { %2081 = vmatprep.subr.bf16.mxu0 %v2877_v19  ;;  %v2949_v19 = vld [vmem:[%s3961_s1 + $0x774] ss:$8 sps:$4 sm:$0xff]  }
  0xaf   :  { %1870 = vmatpush1.bf16.msra.mxu1 %v2872_v20  ;;  %v2944_v20 = vld [vmem:[%s3961_s1 + $0x370] ss:$8 sps:$4 sm:$0xff]  }
  0xb0   :  { %2082 = vmatpush1.bf16.msra.mxu0 %v2875_v21  ;;  %1871 = vmatprep.subr.bf16.mxu1 %v2880_v22  ;;  %v2947_v21 = vld [vmem:[%s3961_s1 + $0x770] ss:$8 sps:$4 sm:$0xff]   ;;  %v2952_v22 = vld [vmem:[%s3961_s1 + $0x384] ss:$8 sps:$4 sm:$0xff]  }
  0xb1   :  { %2083 = vmatprep.subr.bf16.mxu0 %v2883_v23  ;;  %v2955_v23 = vld [vmem:[%s3961_s1 + $0x784] ss:$8 sps:$4 sm:$0xff]  }
  0xb3   :  { %1872 = vmatpush1.bf16.msra.mxu1 %v2878_v24  ;;  %v2950_v24 = vld [vmem:[%s3961_s1 + $0x380] ss:$8 sps:$4 sm:$0xff]  }
  0xb4   :  { %2084 = vmatpush1.bf16.msra.mxu0 %v2881_v25  ;;  %1873 = vmatprep.subr.bf16.mxu1 %v2886_v26  ;;  %v2953_v25 = vld [vmem:[%s3961_s1 + $0x780] ss:$8 sps:$4 sm:$0xff]   ;;  %v2958_v26 = vld [vmem:[%s3961_s1 + $0x394] ss:$8 sps:$4 sm:$0xff]  }
  0xb5   :  { %2085 = vmatprep.subr.bf16.mxu0 %v2889_v27  ;;  %v2961_v27 = vld [vmem:[%s3961_s1 + $0x794] ss:$8 sps:$4 sm:$0xff]  }
  0xb7   :  { %1874 = vmatpush1.bf16.msra.mxu1 %v2884_v28  ;;  %v2956_v28 = vld [vmem:[%s3961_s1 + $0x390] ss:$8 sps:$4 sm:$0xff]  }
  0xb8   :  { %2086 = vmatpush1.bf16.msra.mxu0 %v2887_v29  ;;  %1875 = vmatprep.subr.bf16.mxu1 %v2892_v30  ;;  %v2959_v29 = vld [vmem:[%s3961_s1 + $0x790] ss:$8 sps:$4 sm:$0xff]   ;;  %v2964_v30 = vld [vmem:[%s3961_s1 + $0x3a4] ss:$8 sps:$4 sm:$0xff]  }
  0xb9   :  { %2087 = vmatprep.subr.bf16.mxu0 %v2895_v31  ;;  %v2967_v31 = vld [vmem:[%s3961_s1 + $0x7a4] ss:$8 sps:$4 sm:$0xff]  }
  0xbb   :  { %1876 = vmatpush1.bf16.msra.mxu1 %v2890_v32  ;;  %v2962_v32 = vld [vmem:[%s3961_s1 + $0x3a0] ss:$8 sps:$4 sm:$0xff]  }
  0xbc   :  { %2088 = vmatpush1.bf16.msra.mxu0 %v2893_v33  ;;  %1877 = vmatprep.subr.bf16.mxu1 %v2898_v34  ;;  %v2965_v33 = vld [vmem:[%s3961_s1 + $0x7a0] ss:$8 sps:$4 sm:$0xff]   ;;  %v2970_v34 = vld [vmem:[%s3961_s1 + $0x3b4] ss:$8 sps:$4 sm:$0xff]  }
  0xbd   :  { %2089 = vmatprep.subr.bf16.mxu0 %v2901_v35  ;;  %v2973_v35 = vld [vmem:[%s3961_s1 + $0x7b4] ss:$8 sps:$4 sm:$0xff]  }
  0xbf   :  { %1878 = vmatpush1.bf16.msra.mxu1 %v2896_v36  ;;  %v2968_v36 = vld [vmem:[%s3961_s1 + $0x3b0] ss:$8 sps:$4 sm:$0xff]  }
  0xc0   :  { %2090 = vmatpush1.bf16.msra.mxu0 %v2899_v37  ;;  %1900 = vmatprep.subr.bf16.mxu1 %v2904_v38  ;;  %v2971_v37 = vld [vmem:[%s3961_s1 + $0x7b0] ss:$8 sps:$4 sm:$0xff]   ;;  %v2976_v38 = vld [vmem:[%s3961_s1 + $0x3c4] ss:$8 sps:$4 sm:$0xff]  }
  0xc1   :  { %2112 = vmatprep.subr.bf16.mxu0 %v2907_v39  ;;  %v2979_v39 = vld [vmem:[%s3961_s1 + $0x7c4] ss:$8 sps:$4 sm:$0xff]  }
  0xc2   :  { %1880 = vmatmul.mubr.bf16.vlgmr.msra.gmra.mrb[0].mxu1 %v2272_v41  ;;  %v2977_v41 = vld [vmem:[%s3961_s1 + $0x7c0] ss:$8 sps:$4 sm:$0xff]  }
  0xc3   :  { %2092 = vmatmul.mubr.bf16.vlgmr.msra.gmra.mrb[0].mxu0 %v2280_v43  ;;  %1901 = vmatpush1.bf16.msra.mxu1 %v2902_v42  ;;  %v2982_v43 = vld [vmem:[%s3961_s1 + $0x3d4] ss:$8 sps:$4 sm:$0xff]   ;;  %v2988_v42 = vld [vmem:[%s3961_s1 + $0x3e4] ss:$8 sps:$4 sm:$0xff]  }
  0xc4   :  { %2113 = vmatpush1.bf16.msra.mxu0 %v2905_v45  ;;  %1902 = vmatprep.subr.bf16.mxu1 %v2910_v46  ;;  %v2991_v45 = vld [vmem:[%s3961_s1 + $0x7e4] ss:$8 sps:$4 sm:$0xff]   ;;  %v2986_v46 = vld [vmem:[%s3961_s1 + $0x3e0] ss:$8 sps:$4 sm:$0xff]  }
  0xc5   :  { %2114 = vmatprep.subr.bf16.mxu0 %v2913_v47  ;;  %1889 = vmatprep.mubr.bf16.mxu1 %v2289_v50  ;;  %v2989_v47 = vld [vmem:[%s3961_s1 + $0x7e0] ss:$8 sps:$4 sm:$0xff]   ;;  %v2994_v50 = vld [vmem:[%s3961_s1 + $0x3f4] ss:$8 sps:$4 sm:$0xff]  }
  0xc6   :  { %2101 = vmatprep.mubr.bf16.mxu0 %v2297_v51  ;;  %v2997_v51 = vld [vmem:[%s3961_s1 + $0x7f4] ss:$8 sps:$4 sm:$0xff]  }
  0xc7   :  { %1903 = vmatpush1.bf16.msra.mxu1 %v2908_v52  ;;  %v2992_v52 = vld [vmem:[%s3961_s1 + $0x3f0] ss:$8 sps:$4 sm:$0xff]  }
  0xc8   :  { %2115 = vmatpush1.bf16.msra.mxu0 %v2911_v53  ;;  %1904 = vmatprep.subr.bf16.mxu1 %v2916_v54  ;;  %v2995_v53 = vld [vmem:[%s3961_s1 + $0x7f0] ss:$8 sps:$4 sm:$0xff]  }
  0xc9   :  { %2116 = vmatprep.subr.bf16.mxu0 %v2919_v55  ;;  %v32_v54 = vld [vmem:[%s3962_s0 + $0x98] sm:$0xff] }
  0xca   :  { %1890 = vmatmul.mubr.bf16.gmra.mrb[4].mxu1 %v2288_v57  ;;  %v40_v55 = vld [vmem:[%s3962_s0 + $0xd8] sm:$0xff] }
  0xcb   :  { %2102 = vmatmul.mubr.bf16.gmra.mrb[4].mxu0 %v2296_v58  ;;  %1905 = vmatpush1.bf16.msra.mxu1 %v2914_v62  ;;  %v36_v57 = vld [vmem:[%s3962_s0 + $0xb8] sm:$0xff]  ;;  %v2274_v62 = vcombine.low %v3732_v56, %v3737_v59 }
  0xcc   :  { %2117 = vmatpush1.bf16.msra.mxu0 %v2917_v63  ;;  %1906 = vmatprep.subr.bf16.mxu1 %v2922_v0  ;;  %v44_v58 = vld [vmem:[%s3962_s0 + $0xf8] sm:$0xff]  ;;  %v2282_v63 = vcombine.low %v3742_v60, %v3747_v61  ;;  %v2291_v0 = vcombine.high %v32_v54, %v40_v55 }
  0xcd   :  { %2118 = vmatprep.subr.bf16.mxu0 %v2925_v1  ;;  %1932 = vmatprep.mubr.bf16.mxu1 %v2275_v2  ;;  %v2299_v1 = vcombine.high %v36_v57, %v44_v58  ;;  %v2290_v2 = vcombine.low %v32_v54, %v40_v55 }
  0xce   :  { %2144 = vmatprep.mubr.bf16.mxu0 %v2283_v3  ;;  %v2298_v3 = vcombine.low %v36_v57, %v44_v58 }
  0xcf   :  { %1907 = vmatpush1.bf16.msra.mxu1 %v2920_v4 }
  0xd0   :  { %2119 = vmatpush1.bf16.msra.mxu0 %v2923_v5  ;;  %1908 = vmatprep.subr.bf16.mxu1 %v2928_v6 }
  0xd1   :  { %2120 = vmatprep.subr.bf16.mxu0 %v2931_v7 }
  0xd3   :  { %1909 = vmatpush1.bf16.msra.mxu1 %v2926_v8 }
  0xd4   :  { %2121 = vmatpush1.bf16.msra.mxu0 %v2929_v9  ;;  %1910 = vmatprep.subr.bf16.mxu1 %v2934_v10 }
  0xd5   :  { %2122 = vmatprep.subr.bf16.mxu0 %v2937_v11 }
  0xd7   :  { %1911 = vmatpush1.bf16.msra.mxu1 %v2932_v12 }
  0xd8   :  { %2123 = vmatpush1.bf16.msra.mxu0 %v2935_v13  ;;  %1912 = vmatprep.subr.bf16.mxu1 %v2940_v14 }
  0xd9   :  { %2124 = vmatprep.subr.bf16.mxu0 %v2943_v15 }
  0xdb   :  { %1913 = vmatpush1.bf16.msra.mxu1 %v2938_v16 }
  0xdc   :  { %2125 = vmatpush1.bf16.msra.mxu0 %v2941_v17  ;;  %1914 = vmatprep.subr.bf16.mxu1 %v2946_v18 }
  0xdd   :  { %2126 = vmatprep.subr.bf16.mxu0 %v2949_v19 }
  0xdf   :  { %1915 = vmatpush1.bf16.msra.mxu1 %v2944_v20 }
  0xe0   :  { %2127 = vmatpush1.bf16.msra.mxu0 %v2947_v21  ;;  %1916 = vmatprep.subr.bf16.mxu1 %v2952_v22 }
  0xe1   :  { %2128 = vmatprep.subr.bf16.mxu0 %v2955_v23 }
  0xe3   :  { %1917 = vmatpush1.bf16.msra.mxu1 %v2950_v24 }
  0xe4   :  { %2129 = vmatpush1.bf16.msra.mxu0 %v2953_v25  ;;  %1918 = vmatprep.subr.bf16.mxu1 %v2958_v26 }
  0xe5   :  { %2130 = vmatprep.subr.bf16.mxu0 %v2961_v27 }
  0xe7   :  { %1919 = vmatpush1.bf16.msra.mxu1 %v2956_v28 }
  0xe8   :  { %2131 = vmatpush1.bf16.msra.mxu0 %v2959_v29  ;;  %1920 = vmatprep.subr.bf16.mxu1 %v2964_v30 }
  0xe9   :  { %2132 = vmatprep.subr.bf16.mxu0 %v2967_v31 }
  0xeb   :  { %1921 = vmatpush1.bf16.msra.mxu1 %v2962_v32 }
  0xec   :  { %2133 = vmatpush1.bf16.msra.mxu0 %v2965_v33  ;;  %1922 = vmatprep.subr.bf16.mxu1 %v2970_v34 }
  0xed   :  { %2134 = vmatprep.subr.bf16.mxu0 %v2973_v35 }
  0xef   :  { %1923 = vmatpush1.bf16.msra.mxu1 %v2968_v36 }
  0xf0   :  { %2135 = vmatpush1.bf16.msra.mxu0 %v2971_v37  ;;  %1924 = vmatprep.subr.bf16.mxu1 %v2976_v38 }
  0xf1   :  { %2136 = vmatprep.subr.bf16.mxu0 %v2979_v39 }
  0xf3   :  { %1925 = vmatpush1.bf16.msra.mxu1 %v2974_v40 }
  0xf4   :  { %2137 = vmatpush1.bf16.msra.mxu0 %v2977_v41  ;;  %1926 = vmatprep.subr.bf16.mxu1 %v2982_v43 }
  0xf5   :  { %2138 = vmatprep.subr.bf16.mxu0 %v2985_v44 }
  0xf7   :  { %1927 = vmatpush1.bf16.msra.mxu1 %v2980_v48 }
  0xf8   :  { %2139 = vmatpush1.bf16.msra.mxu0 %v2983_v49  ;;  %1928 = vmatprep.subr.bf16.mxu1 %v2988_v42 }
  0xf9   :  { %2140 = vmatprep.subr.bf16.mxu0 %v2991_v45 }
  0xfb   :  { %1929 = vmatpush1.bf16.msra.mxu1 %v2986_v46 }
  0xfc   :  { %2141 = vmatpush1.bf16.msra.mxu0 %v2989_v47  ;;  %1930 = vmatprep.subr.bf16.mxu1 %v2994_v50  ;;  %v2998_v47 = vmov 1966171168  }
  0xfd   :  { %2142 = vmatprep.subr.bf16.mxu0 %v2997_v51  ;;  %v2195_v50 = vunpack.c.l.s4 %v2998_v47  ;;  %v2197_v51 = vlaneseq }
  0xff   :  { %1931 = vmatpush1.bf16.msra.mxu1 %v2992_v52  ;;  %vm2211_vm0 = vcmp.lt.s32.totalorder %v2197_v51, 256 }
 0x100   :  { %2143 = vmatpush1.bf16.msra.mxu0 %v2995_v53 }
 0x102   :  { %1933 = vmatmul.mubr.bf16.vlgmr.msra.gmra.mrb[0].mxu1 %v2274_v62 }
 0x103   :  { %2145 = vmatmul.mubr.bf16.vlgmr.msra.gmra.mrb[0].mxu0 %v2282_v63  ;;  %1942 = vmatprep.mubr.bf16.mxu1 %v2291_v0  ;;  %v2196_v0 = vunpack.c.0.s8 %v2195_v50 }
 0x104   :  { %2154 = vmatprep.mubr.bf16.mxu0 %v2299_v1  ;;  %v2198_v1 = vshrl.u32 %v2197_v51, 7 }
 0x10a   :  { %1943 = vmatmul.mubr.bf16.gmra.mrb[4].mxu1 %v2290_v2 }
 0x10b   :  { %2155 = vmatmul.mubr.bf16.gmra.mrb[4].mxu0 %v2298_v3 }
 0x1d5   :  { %v1934_v4 = vpop.f32.mrb[0].mxu1 }
 0x1d6   :  { %v2146_v5 = vpop.f32.mrb[0].mxu0  ;;  %v1936_v7 = vpop.f32.mrb[1].mxu1 }
 0x1d7   :  { %v2557_v6 = vadd.f32 %v2146_v5, %v1934_v4  ;;  %v2148_v56 = vpop.f32.mrb[1].mxu0  ;;  %v1938_v8 = vpop.f32.mrb[2].mxu1 }
 0x1d8   :  { %v2558_v59 = vadd.f32 %v2148_v56, %v1936_v7  ;;  %v2150_v60 = vpop.f32.mrb[2].mxu0  ;;  %v1940_v9 = vpop.f32.mrb[3].mxu1 }
 0x1d9   :  { %2165 = vst [vmem:[%s3963_s2] sm:$0xff] %v2557_v6  ;;  %v2559_v61 = vadd.f32 %v2150_v60, %v1938_v8  ;;  %v2152_v10 = vpop.f32.mrb[3].mxu0  ;;  %v2214_v12 = vmul.f32 %v2557_v6, %v2557_v6  ;;  %v2199_v8 = vsub.s32 %v2196_v0, %v2198_v1 }
 0x1da   :  { %2166 = vst [vmem:[%s3963_s2 + $0x8] sm:$0xff] %v2558_v59  ;;  %v2560_v11 = vadd.f32 %v2152_v10, %v1940_v9  ;;  %v2215_v15 = vmul.f32 %v2558_v59, %v2558_v59 }
 0x1db   :  { %2167 = vst [vmem:[%s3963_s2 + $0x10] sm:$0xff] %v2559_v61  ;;  %v2173_v13 = vadd.f32 %v2559_v61, %v2557_v6  ;;  %v2216_v14 = vmul.f32 %v2559_v61, %v2559_v61 }
 0x1dc   :  { %2168 = vst [vmem:[%s3963_s2 + $0x18] sm:$0xff] %v2560_v11  ;;  %v2182_v16 = vadd.f32 %v2560_v11, %v2558_v59  ;;  %v2217_v17 = vmul.f32 %v2560_v11, %v2560_v11 }
 0x1dd   :  { %v2222_v18 = vadd.f32 %v2216_v14, %v2214_v12  ;;  %v1944_v20 = vpop.f32.mrb[4].mxu1 }
 0x1de   :  { %v2231_v19 = vadd.f32 %v2217_v17, %v2215_v15  ;;  %v2156_v21 = vpop.f32.mrb[4].mxu0  ;;  %v1946_v23 = vpop.f32.mrb[5].mxu1 }
 0x1df   :  { %v2561_v22 = vadd.f32 %v2156_v21, %v1944_v20  ;;  %v2158_v24 = vpop.f32.mrb[5].mxu0  ;;  %v1948_v26 = vpop.f32.mrb[6].mxu1 }
 0x1e0   :  { %v2562_v25 = vadd.f32 %v2158_v24, %v1946_v23  ;;  %v2160_v27 = vpop.f32.mrb[6].mxu0  ;;  %v1950_v31 = vpop.f32.mrb[7].mxu1 }
 0x1e1   :  { %2169 = vst [vmem:[%s3963_s2 + $0x20] sm:$0xff] %v2561_v22  ;;  %v2174_v28 = vadd.f32 %v2561_v22, %v2173_v13  ;;  %v2218_v29 = vmul.f32 %v2561_v22, %v2561_v22  ;;  %v2563_v30 = vadd.f32 %v2160_v27, %v1948_v26  ;;  %v2162_v32 = vpop.f32.mrb[7].mxu0 }
 0x1e2   :  { %2170 = vst [vmem:[%s3963_s2 + $0x28] sm:$0xff] %v2562_v25  ;;  %v2183_v33 = vadd.f32 %v2562_v25, %v2182_v16  ;;  %v2219_v34 = vmul.f32 %v2562_v25, %v2562_v25  ;;  %v2564_v35 = vadd.f32 %v2162_v32, %v1950_v31 }
 0x1e3   :  { %v2223_v36 = vadd.f32 %v2222_v18, %v2218_v29  ;;  %2171 = vst [vmem:[%s3963_s2 + $0x30] sm:$0xff] %v2563_v30  ;;  %v2175_v37 = vadd.f32 %v2563_v30, %v2174_v28  ;;  %v2220_v38 = vmul.f32 %v2563_v30, %v2563_v30 }
 0x1e4   :  { %v2232_v39 = vadd.f32 %v2231_v19, %v2219_v34  ;;  %2172 = vst [vmem:[%s3963_s2 + $0x38] sm:$0xff] %v2564_v35  ;;  %v2184_v40 = vadd.f32 %v2564_v35, %v2183_v33  ;;  %v2221_v41 = vmul.f32 %v2564_v35, %v2564_v35 }
 0x1e5   :  { %v2176_v43 = vrot.slane %v2175_v37, 4  ;;  %v2224_v44 = vadd.f32 %v2223_v36, %v2220_v38 }
 0x1e6   :  { %v2185_v48 = vrot.slane %v2184_v40, 4  ;;  %v2233_v49 = vadd.f32 %v2232_v39, %v2221_v41 }
 0x1e7   :  { %v2177_v42 = vadd.f32 %v2176_v43, %v2175_v37  ;;  %v2225_v45 = vrot.slane %v2224_v44, 4 }
 0x1e8   :  { %v2186_v46 = vadd.f32 %v2185_v48, %v2184_v40  ;;  %v2234_v52 = vrot.slane %v2233_v49, 4 }
 0x1e9   :  { %v2178_v53 = vrot.slane %v2177_v42, 2  ;;  %v2226_v54 = vadd.f32 %v2225_v45, %v2224_v44 }
 0x1ea   :  { %v2187_v55 = vrot.slane %v2186_v46, 2  ;;  %v2235_v57 = vadd.f32 %v2234_v52, %v2233_v49 }
 0x1eb   :  { %v2179_v58 = vadd.f32 %v2178_v53, %v2177_v42  ;;  %v2227_v62 = vrot.slane %v2226_v54, 2 }
 0x1ec   :  { %v2188_v63 = vadd.f32 %v2187_v55, %v2186_v46  ;;  %v2236_v2 = vrot.slane %v2235_v57, 2 }
 0x1ed   :  { %v2180_v3 = vrot.slane %v2179_v58, 1  ;;  %v2228_v4 = vadd.f32 %v2227_v62, %v2226_v54 }
 0x1ee   :  { %v2189_v5 = vrot.slane %v2188_v63, 1  ;;  %v2237_v6 = vadd.f32 %v2236_v2, %v2235_v57 }
 0x1ef   :  { %v2181_v7 = vadd.f32 %v2180_v3, %v2179_v58  ;;  %v2229_v56 = vrot.slane %v2228_v4, 1 }
 0x1f0   :  { %v2190_v59 = vadd.f32 %v2189_v5, %v2188_v63  ;;  %v2238_v60 = vrot.slane %v2237_v6, 1 }
 0x1f1   :  { %v2230_v61 = vadd.f32 %v2229_v56, %v2228_v4 }
 0x1f2   :  { %v2193_v9 = vcombine.low %v2181_v7, %v2190_v59  ;;  %v2239_v10 = vadd.f32 %v2238_v60, %v2237_v6 }
 0x1f4   :  { %v2200_v11 = vrot.slane %v2193_v9, %v2199_v8  ;;  %v2242_v12 = vcombine.low %v2230_v61, %v2239_v10 }
 0x1f6   :  { %v2207_v13 = vrot.slane %v2200_v11, %v2199_v8  ;;  %v2249_v14 = vrot.slane %v2242_v12, %v2199_v8 }
 0x1f8   :  { %2213 = vst.msk [vmem:[%s3964_s3] ss:$2 sm:$0x3] %vm2211_vm0, %v2207_v13  ;;  %v2256_v15 = vrot.slane %v2249_v14, %v2199_v8 }
 0x1fa   :  { %2556 = vst.msk [vmem:[%s3964_s3 + $0x1] ss:$2 sm:$0x3] %vm2211_vm0, %v2256_v15 }

// kernel: patchgan_forward.14
= control target key start
LH: loop header
LB: loop body
LE: loop exit
PB: predicated region body
PF: predicated region fallthrough
CT: control target
= control target key end

     0   :  { %v25_v0 = vlaneseq  ;;  %s277_s1 = inlined_call_operand.vmem [shape: f32[2,512], index: 1, kind: input, shape index: {}]   ;;  %s278_s0 = inlined_call_operand.vmem [shape: f32[24,512], index: 0, kind: input, shape index: {}]   ;;  %s279_s2 = inlined_call_operand.vmem [shape: bf16[24,512], index: 2, kind: output, shape index: {}]  }
   0x1   :  { %v23_v2 = vld [vmem:[%s277_s1] ss:$2 sm:$0xf]  ;;  %v178_v3 = vld [vmem:[%s277_s1 + $0x1] ss:$2 sm:$0xf] }
   0x2   :  { %v26_v1 = vshrl.u32 %v25_v0, 7  ;;  %v11_v4 = vld [vmem:[%s278_s0] sm:$0xff]  ;;  %v12_v5 = vld [vmem:[%s278_s0 + $0x8] sm:$0xff]  ;;  %v13_v10 = vld [vmem:[%s278_s0 + $0x10] sm:$0xff] }
   0x3   :  { %v15_v11 = vld [vmem:[%s278_s0 + $0x20] sm:$0xff]  ;;  %v16_v12 = vld [vmem:[%s278_s0 + $0x28] sm:$0xff]  ;;  %v14_v17 = vld [vmem:[%s278_s0 + $0x18] sm:$0xff] }
   0x4   :  { %v27_v6 = vsub.s32 0, %v26_v1  ;;  %v31_v7 = vsub.s32 1, %v26_v1  ;;  %v35_v8 = vsub.s32 2, %v26_v1  ;;  %v39_v9 = vsub.s32 3, %v26_v1  ;;  %v17_v18 = vld [vmem:[%s278_s0 + $0x30] sm:$0xff]  ;;  %v18_v19 = vld [vmem:[%s278_s0 + $0x38] sm:$0xff] }
   0x5   :  { %v19_v46 = vld [vmem:[%s278_s0 + $0x40] sm:$0xff]  ;;  %v20_v51 = vld [vmem:[%s278_s0 + $0x48] sm:$0xff]  ;;  %v21_v52 = vld [vmem:[%s278_s0 + $0x50] sm:$0xff] }
   0x6   :  { %v28_v13 = vrot.slane %v23_v2, %v27_v6  ;;  %v32_v14 = vrot.slane %v23_v2, %v31_v7  ;;  %v227_v15 = vrot.slane %v178_v3, %v27_v6  ;;  %v229_v16 = vrot.slane %v178_v3, %v31_v7  ;;  %v22_v53 = vld [vmem:[%s278_s0 + $0x58] sm:$0xff] }
   0x7   :  { %v36_v20 = vrot.slane %v23_v2, %v35_v8  ;;  %v40_v21 = vrot.slane %v23_v2, %v39_v9  ;;  %v71_v22 = vrot.slane %v178_v3, %v35_v8  ;;  %v75_v23 = vrot.slane %v178_v3, %v39_v9 }
   0x8   :  { %v45_v24 = vmul.f32 %v28_v13, %v11_v4  ;;  %v46_v25 = vmul.f32 %v32_v14, %v12_v5  ;;  %v49_v26 = vmul.f32 %v28_v13, %v15_v11  ;;  %v50_v27 = vmul.f32 %v32_v14, %v16_v12 }
   0x9   :  { %v47_v28 = vmul.f32 %v36_v20, %v13_v10  ;;  %v48_v29 = vmul.f32 %v40_v21, %v14_v17  ;;  %v51_v30 = vmul.f32 %v36_v20, %v17_v18  ;;  %v52_v31 = vmul.f32 %v40_v21, %v18_v19 }
   0xa   :  { %v80_v32 = vadd.f32 %v227_v15, %v45_v24  ;;  %v81_v33 = vadd.f32 %v229_v16, %v46_v25  ;;  %v84_v34 = vadd.f32 %v227_v15, %v49_v26  ;;  %v85_v35 = vadd.f32 %v229_v16, %v50_v27 }
   0xb   :  { %v82_v36 = vadd.f32 %v71_v22, %v47_v28  ;;  %v83_v37 = vadd.f32 %v75_v23, %v48_v29  ;;  %v86_v38 = vadd.f32 %v71_v22, %v51_v30  ;;  %v87_v39 = vadd.f32 %v75_v23, %v52_v31 }
   0xc   :  { %vm92_vm0 = vcmp.ge.f32.partialorder %v80_v32, 0.0  ;;  %vm93_vm1 = vcmp.ge.f32.partialorder %v81_v33, 0.0  ;;  %v104_v40 = vmul.f32 0.2, %v80_v32  ;;  %v105_v41 = vmul.f32 0.2, %v81_v33 }
   0xd   :  { %vm94_vm2 = vcmp.ge.f32.partialorder %v82_v36, 0.0  ;;  %vm95_vm3 = vcmp.ge.f32.partialorder %v83_v37, 0.0  ;;  %v106_v42 = vmul.f32 0.2, %v82_v36  ;;  %v107_v43 = vmul.f32 0.2, %v83_v37 }
   0xe   :  { %v116_v44 = vsel %vm92_vm0, %v80_v32, %v104_v40  ;;  %v117_v45 = vsel %vm93_vm1, %v81_v33, %v105_v41  ;;  %vm96_vm4 = vcmp.ge.f32.partialorder %v84_v34, 0.0  ;;  %vm97_vm5 = vcmp.ge.f32.partialorder %v85_v35, 0.0 }
   0xf   :  { %v185_v47 = vpack.c.bf16 %v117_v45, %v116_v44  ;;  %v118_v48 = vsel %vm94_vm2, %v82_v36, %v106_v42  ;;  %v119_v49 = vsel %vm95_vm3, %v83_v37, %v107_v43  ;;  %v108_v50 = vmul.f32 0.2, %v84_v34 }
  0x10   :  { %v186_v54 = vpack.c.bf16 %v119_v49, %v118_v48  ;;  %v109_v55 = vmul.f32 0.2, %v85_v35  ;;  %vm98_vm6 = vcmp.ge.f32.partialorder %v86_v38, 0.0  ;;  %vm99_vm7 = vcmp.ge.f32.partialorder %v87_v39, 0.0 }
  0x11   :  { %168 = vst [vmem:[%s279_s2] sm:$0xff] %v185_v47  ;;  %v120_v56 = vsel %vm96_vm4, %v84_v34, %v108_v50  ;;  %v110_v57 = vmul.f32 0.2, %v86_v38  ;;  %v111_v58 = vmul.f32 0.2, %v87_v39  ;;  %v53_v59 = vmul.f32 %v28_v13, %v19_v46 }
  0x12   :  { %169 = vst [vmem:[%s279_s2 + $0x8] sm:$0xff] %v186_v54  ;;  %v121_v60 = vsel %vm97_vm5, %v85_v35, %v109_v55  ;;  %v54_v61 = vmul.f32 %v32_v14, %v20_v51  ;;  %v55_v62 = vmul.f32 %v36_v20, %v21_v52  ;;  %v56_v63 = vmul.f32 %v40_v21, %v22_v53 }
  0x13   :  { %v187_v0 = vpack.c.bf16 %v121_v60, %v120_v56  ;;  %v122_v1 = vsel %vm98_vm6, %v86_v38, %v110_v57  ;;  %v123_v2 = vsel %vm99_vm7, %v87_v39, %v111_v58  ;;  %v88_v3 = vadd.f32 %v227_v15, %v53_v59 }
  0x14   :  { %v188_v4 = vpack.c.bf16 %v123_v2, %v122_v1  ;;  %v89_v5 = vadd.f32 %v229_v16, %v54_v61  ;;  %v90_v6 = vadd.f32 %v71_v22, %v55_v62  ;;  %v91_v7 = vadd.f32 %v75_v23, %v56_v63 }
  0x15   :  { %170 = vst [vmem:[%s279_s2 + $0x10] sm:$0xff] %v187_v0  ;;  %vm100_vm8 = vcmp.ge.f32.partialorder %v88_v3, 0.0  ;;  %v112_v8 = vmul.f32 0.2, %v88_v3 }
  0x16   :  { %171 = vst [vmem:[%s279_s2 + $0x18] sm:$0xff] %v188_v4  ;;  %vm101_vm9 = vcmp.ge.f32.partialorder %v89_v5, 0.0  ;;  %v113_v9 = vmul.f32 0.2, %v89_v5  ;;  %vm102_vm10 = vcmp.ge.f32.partialorder %v90_v6, 0.0  ;;  %vm103_vm11 = vcmp.ge.f32.partialorder %v91_v7, 0.0 }
  0x17   :  { %v124_v10 = vsel %vm100_vm8, %v88_v3, %v112_v8  ;;  %v114_v11 = vmul.f32 0.2, %v90_v6  ;;  %v115_v12 = vmul.f32 0.2, %v91_v7 }
  0x18   :  { %v125_v13 = vsel %vm101_vm9, %v89_v5, %v113_v9 }
  0x19   :  { %v189_v14 = vpack.c.bf16 %v125_v13, %v124_v10  ;;  %v126_v15 = vsel %vm102_vm10, %v90_v6, %v114_v11  ;;  %v127_v16 = vsel %vm103_vm11, %v91_v7, %v115_v12 }
  0x1a   :  { %v190_v17 = vpack.c.bf16 %v127_v16, %v126_v15 }
  0x1b   :  { %172 = vst [vmem:[%s279_s2 + $0x20] sm:$0xff] %v189_v14 }
  0x1c   :  { %173 = vst [vmem:[%s279_s2 + $0x28] sm:$0xff] %v190_v17 }

// kernel: patchgan_forward.15
= control target key start
LH: loop header
LB: loop body
LE: loop exit
PB: predicated region body
PF: predicated region fallthrough
CT: control target
= control target key end

     0   :  { %vm1432_vm0 = vcmask 7168   ;;  %s2337_s1 = inlined_call_operand.vmem [shape: bf16[2048,1], index: 1, kind: input, shape index: {}]   ;;  %s2338_s0 = inlined_call_operand.vmem [shape: bf16[8,2048], index: 0, kind: input, shape index: {}]   ;;  %s2339_s2 = inlined_call_operand.<no memory space> [shape: f32[1,1], index: 2, kind: input, shape index: {}]   ;;  %s2340_s3 = inlined_call_operand.vmem [shape: f32[8,1], index: 3, kind: output, shape index: {}]  }
   0x1   :  { %v1759_v0 = vld [vmem:[%s2337_s1 + $0x40] sm:$0xff]   ;;  %v1763_v4 = vld [vmem:[%s2337_s1 + $0x48] sm:$0xff]   ;;  %v1767_v8 = vld [vmem:[%s2337_s1 + $0x50] sm:$0xff]  }
   0x2   :  { %v1760_v1 = vld [vmem:[%s2337_s1 + $0xc0] sm:$0xff]   ;;  %1583 = vmatprep.subr.bf16.mxu0 %v1759_v0  ;;  %v1764_v5 = vld [vmem:[%s2337_s1 + $0xc8] sm:$0xff]   ;;  %v1768_v9 = vld [vmem:[%s2337_s1 + $0xd0] sm:$0xff]  }
   0x3   :  { %v1761_v2 = vld [vmem:[%s2337_s1] sm:$0xff]   ;;  %1605 = vmatprep.subr.bf16.mxu1 %v1760_v1  ;;  %v1765_v6 = vld [vmem:[%s2337_s1 + $0x8] sm:$0xff]   ;;  %v1769_v10 = vld [vmem:[%s2337_s1 + $0x10] sm:$0xff]  }
   0x4   :  { %v1762_v3 = vld [vmem:[%s2337_s1 + $0x80] sm:$0xff]   ;;  %1584 = vmatpush3.bf16.msra.mxu0 %v1761_v2  ;;  %v1766_v7 = vld [vmem:[%s2337_s1 + $0x88] sm:$0xff]   ;;  %v1770_v11 = vld [vmem:[%s2337_s1 + $0x90] sm:$0xff]  }
   0x5   :  { %1606 = vmatpush3.bf16.msra.mxu1 %v1762_v3  ;;  %1585 = vmatprep.subr.bf16.mxu0 %v1763_v4  ;;  %v1771_v12 = vld [vmem:[%s2337_s1 + $0x58] sm:$0xff]   ;;  %v1775_v16 = vld [vmem:[%s2337_s1 + $0x60] sm:$0xff]   ;;  %v1779_v20 = vld [vmem:[%s2337_s1 + $0x68] sm:$0xff]  }
   0x6   :  { %1607 = vmatprep.subr.bf16.mxu1 %v1764_v5  ;;  %v1772_v13 = vld [vmem:[%s2337_s1 + $0xd8] sm:$0xff]   ;;  %v1776_v17 = vld [vmem:[%s2337_s1 + $0xe0] sm:$0xff]   ;;  %v1780_v21 = vld [vmem:[%s2337_s1 + $0xe8] sm:$0xff]  }
   0x7   :  { %v1773_v14 = vld [vmem:[%s2337_s1 + $0x18] sm:$0xff]   ;;  %v1777_v18 = vld [vmem:[%s2337_s1 + $0x20] sm:$0xff]   ;;  %v1781_v22 = vld [vmem:[%s2337_s1 + $0x28] sm:$0xff]  }
   0x8   :  { %1586 = vmatpush3.bf16.msra.mxu0 %v1765_v6  ;;  %v1774_v15 = vld [vmem:[%s2337_s1 + $0x98] sm:$0xff]   ;;  %v1778_v19 = vld [vmem:[%s2337_s1 + $0xa0] sm:$0xff]   ;;  %v1782_v23 = vld [vmem:[%s2337_s1 + $0xa8] sm:$0xff]  }
   0x9   :  { %1608 = vmatpush3.bf16.msra.mxu1 %v1766_v7  ;;  %1587 = vmatprep.subr.bf16.mxu0 %v1767_v8  ;;  %v1783_v24 = vld [vmem:[%s2337_s1 + $0x70] sm:$0xff]   ;;  %v1787_v28 = vld [vmem:[%s2337_s1 + $0x78] sm:$0xff]   ;;  %v17_v32 = vld [vmem:[%s2338_s0] sm:$0xff] }
   0xa   :  { %1609 = vmatprep.subr.bf16.mxu1 %v1768_v9  ;;  %v1784_v25 = vld [vmem:[%s2337_s1 + $0xf0] sm:$0xff]   ;;  %v1788_v29 = vld [vmem:[%s2337_s1 + $0xf8] sm:$0xff]   ;;  %v18_v33 = vld [vmem:[%s2338_s0 + $0x8] sm:$0xff]  ;;  %v1439_v34 = vcombine.low %v17_v32, %v17_v32  ;;  %v1440_v35 = vcombine.high %v17_v32, %v17_v32 }
   0xb   :  { %v1785_v26 = vld [vmem:[%s2337_s1 + $0x30] sm:$0xff]   ;;  %v1789_v30 = vld [vmem:[%s2337_s1 + $0x38] sm:$0xff]   ;;  %v1441_v36 = vcombine.low %v18_v33, %v18_v33  ;;  %v1442_v37 = vcombine.high %v18_v33, %v18_v33  ;;  %v1795_v38 = vld [vmem:[%s2337_s1 + $0x140] sm:$0xff]  }
   0xc   :  { %1588 = vmatpush3.bf16.msra.mxu0 %v1769_v10  ;;  %v1786_v27 = vld [vmem:[%s2337_s1 + $0xb0] sm:$0xff]   ;;  %v1790_v31 = vld [vmem:[%s2337_s1 + $0xb8] sm:$0xff]   ;;  %v1796_v39 = vld [vmem:[%s2337_s1 + $0x1c0] sm:$0xff]   ;;  %1144 = vmatprep.mubr.bf16.mxu0 %v1440_v35 }
   0xd   :  { %1610 = vmatpush3.bf16.msra.mxu1 %v1770_v11  ;;  %1589 = vmatprep.subr.bf16.mxu0 %v1771_v12  ;;  %v1797_v40 = vld [vmem:[%s2337_s1 + $0x100] sm:$0xff]   ;;  %v1799_v42 = vld [vmem:[%s2337_s1 + $0x148] sm:$0xff]   ;;  %v1803_v46 = vld [vmem:[%s2337_s1 + $0x150] sm:$0xff]  }
   0xe   :  { %1611 = vmatprep.subr.bf16.mxu1 %v1772_v13  ;;  %1184 = vmatprep.mubr.bf16.mxu1 %v1442_v37  ;;  %v1798_v41 = vld [vmem:[%s2337_s1 + $0x180] sm:$0xff]   ;;  %v1800_v43 = vld [vmem:[%s2337_s1 + $0x1c8] sm:$0xff]   ;;  %v1804_v47 = vld [vmem:[%s2337_s1 + $0x1d0] sm:$0xff]  }
   0xf   :  { %v1801_v44 = vld [vmem:[%s2337_s1 + $0x108] sm:$0xff]   ;;  %v1805_v48 = vld [vmem:[%s2337_s1 + $0x110] sm:$0xff]   ;;  %v1807_v50 = vld [vmem:[%s2337_s1 + $0x158] sm:$0xff]  }
  0x10   :  { %1590 = vmatpush3.bf16.msra.mxu0 %v1773_v14  ;;  %v1802_v45 = vld [vmem:[%s2337_s1 + $0x188] sm:$0xff]   ;;  %v1806_v49 = vld [vmem:[%s2337_s1 + $0x190] sm:$0xff]   ;;  %v1808_v51 = vld [vmem:[%s2337_s1 + $0x1d8] sm:$0xff]  }
  0x11   :  { %1612 = vmatpush3.bf16.msra.mxu1 %v1774_v15  ;;  %1591 = vmatprep.subr.bf16.mxu0 %v1775_v16  ;;  %v1809_v52 = vld [vmem:[%s2337_s1 + $0x118] sm:$0xff]   ;;  %v1811_v54 = vld [vmem:[%s2337_s1 + $0x160] sm:$0xff]   ;;  %v1815_v58 = vld [vmem:[%s2337_s1 + $0x168] sm:$0xff]  }
  0x12   :  { %1613 = vmatprep.subr.bf16.mxu1 %v1776_v17  ;;  %v1810_v53 = vld [vmem:[%s2337_s1 + $0x198] sm:$0xff]   ;;  %v1812_v55 = vld [vmem:[%s2337_s1 + $0x1e0] sm:$0xff]   ;;  %v1816_v59 = vld [vmem:[%s2337_s1 + $0x1e8] sm:$0xff]  }
  0x13   :  { %v1813_v56 = vld [vmem:[%s2337_s1 + $0x120] sm:$0xff]   ;;  %v1817_v60 = vld [vmem:[%s2337_s1 + $0x128] sm:$0xff]   ;;  %v1819_v62 = vld [vmem:[%s2337_s1 + $0x170] sm:$0xff]  }
  0x14   :  { %1592 = vmatpush3.bf16.msra.mxu0 %v1777_v18  ;;  %v1814_v57 = vld [vmem:[%s2337_s1 + $0x1a0] sm:$0xff]   ;;  %v1818_v61 = vld [vmem:[%s2337_s1 + $0x1a8] sm:$0xff]   ;;  %v1820_v63 = vld [vmem:[%s2337_s1 + $0x1f0] sm:$0xff]  }
  0x15   :  { %1614 = vmatpush3.bf16.msra.mxu1 %v1778_v19  ;;  %1593 = vmatprep.subr.bf16.mxu0 %v1779_v20  ;;  %v1821_v0 = vld [vmem:[%s2337_s1 + $0x130] sm:$0xff]   ;;  %v1823_v2 = vld [vmem:[%s2337_s1 + $0x178] sm:$0xff]   ;;  %v1831_v12 = vld [vmem:[%s2337_s1 + $0x240] sm:$0xff]  }
  0x16   :  { %1615 = vmatprep.subr.bf16.mxu1 %v1780_v21  ;;  %v1822_v1 = vld [vmem:[%s2337_s1 + $0x1b0] sm:$0xff]   ;;  %v1824_v3 = vld [vmem:[%s2337_s1 + $0x1f8] sm:$0xff]   ;;  %v1832_v13 = vld [vmem:[%s2337_s1 + $0x2c0] sm:$0xff]  }
  0x17   :  { %v1825_v4 = vld [vmem:[%s2337_s1 + $0x138] sm:$0xff]   ;;  %v19_v6 = vld [vmem:[%s2338_s0 + $0x10] sm:$0xff]  ;;  %v1833_v14 = vld [vmem:[%s2337_s1 + $0x200] sm:$0xff]  }
  0x18   :  { %1594 = vmatpush3.bf16.msra.mxu0 %v1781_v22  ;;  %v1826_v5 = vld [vmem:[%s2337_s1 + $0x1b8] sm:$0xff]   ;;  %v1443_v7 = vcombine.low %v19_v6, %v19_v6  ;;  %v1444_v8 = vcombine.high %v19_v6, %v19_v6  ;;  %v1834_v15 = vld [vmem:[%s2337_s1 + $0x280] sm:$0xff]   ;;  %v1835_v16 = vld [vmem:[%s2337_s1 + $0x248] sm:$0xff]   ;;  %v8_v6 = vstv %s2339_s2 }
  0x19   :  { %1616 = vmatpush3.bf16.msra.mxu1 %v1782_v23  ;;  %1595 = vmatprep.subr.bf16.mxu0 %v1783_v24  ;;  %v20_v9 = vld [vmem:[%s2338_s0 + $0x18] sm:$0xff]  ;;  %v1836_v17 = vld [vmem:[%s2337_s1 + $0x2c8] sm:$0xff]   ;;  %v1839_v20 = vld [vmem:[%s2337_s1 + $0x250] sm:$0xff]   ;;  %9 = vst [vmem:[#allocation2] sm:$0x1] %v8_v6 }
  0x1a   :  { %1617 = vmatprep.subr.bf16.mxu1 %v1784_v25  ;;  %v1445_v10 = vcombine.low %v20_v9, %v20_v9  ;;  %v1446_v11 = vcombine.high %v20_v9, %v20_v9  ;;  %v1837_v18 = vld [vmem:[%s2337_s1 + $0x208] sm:$0xff]   ;;  %v1840_v21 = vld [vmem:[%s2337_s1 + $0x2d0] sm:$0xff]   ;;  %v1843_v24 = vld [vmem:[%s2337_s1 + $0x258] sm:$0xff]  }
  0x1b   :  { %v1838_v19 = vld [vmem:[%s2337_s1 + $0x288] sm:$0xff]   ;;  %v1841_v22 = vld [vmem:[%s2337_s1 + $0x210] sm:$0xff]   ;;  %v1844_v25 = vld [vmem:[%s2337_s1 + $0x2d8] sm:$0xff]  }
  0x1c   :  { %1596 = vmatpush3.bf16.msra.mxu0 %v1785_v26  ;;  %v1842_v23 = vld [vmem:[%s2337_s1 + $0x290] sm:$0xff]   ;;  %v1845_v26 = vld [vmem:[%s2337_s1 + $0x218] sm:$0xff]   ;;  %v1851_v32 = vld [vmem:[%s2337_s1 + $0x268] sm:$0xff]  }
  0x1d   :  { %1618 = vmatpush3.bf16.msra.mxu1 %v1786_v27  ;;  %1597 = vmatprep.subr.bf16.mxu0 %v1787_v28  ;;  %v1846_v27 = vld [vmem:[%s2337_s1 + $0x298] sm:$0xff]   ;;  %v1847_v28 = vld [vmem:[%s2337_s1 + $0x260] sm:$0xff]   ;;  %v1852_v33 = vld [vmem:[%s2337_s1 + $0x2e8] sm:$0xff]  }
  0x1e   :  { %1619 = vmatprep.subr.bf16.mxu1 %v1788_v29  ;;  %v1848_v29 = vld [vmem:[%s2337_s1 + $0x2e0] sm:$0xff]   ;;  %v1854_v35 = vld [vmem:[%s2337_s1 + $0x2a8] sm:$0xff]   ;;  %v1856_v37 = vld [vmem:[%s2337_s1 + $0x2f0] sm:$0xff]  }
  0x1f   :  { %v1889_v9 = vld [vmem:[%s2337_s1 + $0x328] sm:$0xff]  }
  0x20   :  { %1598 = vmatpush3.bf16.msra.mxu0 %v1789_v30  ;;  %v1849_v30 = vld [vmem:[%s2337_s1 + $0x220] sm:$0xff]  }
  0x21   :  { %1620 = vmatpush3.bf16.msra.mxu1 %v1790_v31  ;;  %1627 = vmatprep.subr.bf16.mxu0 %v1795_v38  ;;  %v1850_v31 = vld [vmem:[%s2337_s1 + $0x2a0] sm:$0xff]   ;;  %v1857_v38 = vld [vmem:[%s2337_s1 + $0x230] sm:$0xff]  }
  0x22   :  { %1649 = vmatprep.subr.bf16.mxu1 %v1796_v39  ;;  %v1858_v39 = vld [vmem:[%s2337_s1 + $0x2b0] sm:$0xff]  }
  0x23   :  { %1145 = vmatmul.mubr.bf16.vlgmr.msra.gmra.mrb[0].mxu0 %v1439_v34  ;;  %v1853_v34 = vld [vmem:[%s2337_s1 + $0x228] sm:$0xff]  }
  0x24   :  { %1185 = vmatmul.mubr.bf16.vlgmr.msra.gmra.mrb[0].mxu1 %v1441_v36  ;;  %1628 = vmatpush3.bf16.msra.mxu0 %v1797_v40  ;;  %v1855_v36 = vld [vmem:[%s2337_s1 + $0x270] sm:$0xff]   ;;  %v1859_v40 = vld [vmem:[%s2337_s1 + $0x278] sm:$0xff]  }
  0x25   :  { %1650 = vmatpush3.bf16.msra.mxu1 %v1798_v41  ;;  %1629 = vmatprep.subr.bf16.mxu0 %v1799_v42  ;;  %v1860_v41 = vld [vmem:[%s2337_s1 + $0x2f8] sm:$0xff]  }
  0x26   :  { %1651 = vmatprep.subr.bf16.mxu1 %v1800_v43  ;;  %1224 = vmatprep.mubr.bf16.mxu0 %v1444_v8  ;;  %v1861_v42 = vld [vmem:[%s2337_s1 + $0x238] sm:$0xff]   ;;  %v1888_v8 = vld [vmem:[%s2337_s1 + $0x3e8] sm:$0xff]  }
  0x27   :  { %1264 = vmatprep.mubr.bf16.mxu1 %v1446_v11  ;;  %v1862_v43 = vld [vmem:[%s2337_s1 + $0x2b8] sm:$0xff]   ;;  %v1891_v11 = vld [vmem:[%s2337_s1 + $0x370] sm:$0xff]  }
  0x28   :  { %1630 = vmatpush3.bf16.msra.mxu0 %v1801_v44  ;;  %v21_v44 = vld [vmem:[%s2338_s0 + $0x20] sm:$0xff] }
  0x29   :  { %1652 = vmatpush3.bf16.msra.mxu1 %v1802_v45  ;;  %1631 = vmatprep.subr.bf16.mxu0 %v1803_v46  ;;  %v22_v45 = vld [vmem:[%s2338_s0 + $0x28] sm:$0xff]  ;;  %v1447_v46 = vcombine.low %v21_v44, %v21_v44 }
  0x2a   :  { %1653 = vmatprep.subr.bf16.mxu1 %v1804_v47  ;;  %v1448_v47 = vcombine.high %v21_v44, %v21_v44 }
  0x2c   :  { %1632 = vmatpush3.bf16.msra.mxu0 %v1805_v48  ;;  %v1449_v48 = vcombine.low %v22_v45, %v22_v45 }
  0x2d   :  { %1654 = vmatpush3.bf16.msra.mxu1 %v1806_v49  ;;  %1633 = vmatprep.subr.bf16.mxu0 %v1807_v50  ;;  %v1450_v49 = vcombine.high %v22_v45, %v22_v45  ;;  %v1867_v50 = vld [vmem:[%s2337_s1 + $0x340] sm:$0xff]  }
  0x2e   :  { %1655 = vmatprep.subr.bf16.mxu1 %v1808_v51  ;;  %v1868_v51 = vld [vmem:[%s2337_s1 + $0x3c0] sm:$0xff]  }
  0x30   :  { %1634 = vmatpush3.bf16.msra.mxu0 %v1809_v52  ;;  %v1869_v52 = vld [vmem:[%s2337_s1 + $0x300] sm:$0xff]  }
  0x31   :  { %1656 = vmatpush3.bf16.msra.mxu1 %v1810_v53  ;;  %1635 = vmatprep.subr.bf16.mxu0 %v1811_v54  ;;  %v1870_v53 = vld [vmem:[%s2337_s1 + $0x380] sm:$0xff]   ;;  %v1871_v54 = vld [vmem:[%s2337_s1 + $0x348] sm:$0xff]  }
  0x32   :  { %1657 = vmatprep.subr.bf16.mxu1 %v1812_v55  ;;  %v1872_v55 = vld [vmem:[%s2337_s1 + $0x3c8] sm:$0xff]  }
  0x34   :  { %1636 = vmatpush3.bf16.msra.mxu0 %v1813_v56  ;;  %v1873_v56 = vld [vmem:[%s2337_s1 + $0x308] sm:$0xff]  }
  0x35   :  { %1658 = vmatpush3.bf16.msra.mxu1 %v1814_v57  ;;  %1637 = vmatprep.subr.bf16.mxu0 %v1815_v58  ;;  %v1874_v57 = vld [vmem:[%s2337_s1 + $0x388] sm:$0xff]   ;;  %v1875_v58 = vld [vmem:[%s2337_s1 + $0x350] sm:$0xff]  }
  0x36   :  { %1659 = vmatprep.subr.bf16.mxu1 %v1816_v59  ;;  %v1876_v59 = vld [vmem:[%s2337_s1 + $0x3d0] sm:$0xff]  }
  0x38   :  { %1638 = vmatpush3.bf16.msra.mxu0 %v1817_v60  ;;  %v1877_v60 = vld [vmem:[%s2337_s1 + $0x310] sm:$0xff]  }
  0x39   :  { %1660 = vmatpush3.bf16.msra.mxu1 %v1818_v61  ;;  %1639 = vmatprep.subr.bf16.mxu0 %v1819_v62  ;;  %v1878_v61 = vld [vmem:[%s2337_s1 + $0x390] sm:$0xff]   ;;  %v1879_v62 = vld [vmem:[%s2337_s1 + $0x358] sm:$0xff]  }
  0x3a   :  { %1661 = vmatprep.subr.bf16.mxu1 %v1820_v63  ;;  %v1880_v63 = vld [vmem:[%s2337_s1 + $0x3d8] sm:$0xff]  }
  0x3c   :  { %1640 = vmatpush3.bf16.msra.mxu0 %v1821_v0  ;;  %v1881_v0 = vld [vmem:[%s2337_s1 + $0x318] sm:$0xff]  }
  0x3d   :  { %1662 = vmatpush3.bf16.msra.mxu1 %v1822_v1  ;;  %1641 = vmatprep.subr.bf16.mxu0 %v1823_v2  ;;  %v1882_v1 = vld [vmem:[%s2337_s1 + $0x398] sm:$0xff]   ;;  %v1883_v2 = vld [vmem:[%s2337_s1 + $0x360] sm:$0xff]  }
  0x3e   :  { %1663 = vmatprep.subr.bf16.mxu1 %v1824_v3  ;;  %v1884_v3 = vld [vmem:[%s2337_s1 + $0x3e0] sm:$0xff]  }
  0x40   :  { %1642 = vmatpush3.bf16.msra.mxu0 %v1825_v4  ;;  %v1885_v4 = vld [vmem:[%s2337_s1 + $0x320] sm:$0xff]  }
  0x41   :  { %1664 = vmatpush3.bf16.msra.mxu1 %v1826_v5  ;;  %1671 = vmatprep.subr.bf16.mxu0 %v1831_v12  ;;  %v1886_v5 = vld [vmem:[%s2337_s1 + $0x3a0] sm:$0xff]   ;;  %v1892_v12 = vld [vmem:[%s2337_s1 + $0x3f0] sm:$0xff]  }
  0x42   :  { %1693 = vmatprep.subr.bf16.mxu1 %v1832_v13  ;;  %v1893_v13 = vld [vmem:[%s2337_s1 + $0x330] sm:$0xff]  }
  0x43   :  { %1225 = vmatmul.mubr.bf16.vlgmr.msra.gmra.mrb[4].mxu0 %v1443_v7  ;;  %v1887_v7 = vld [vmem:[%s2337_s1 + $0x368] sm:$0xff]  }
  0x44   :  { %1265 = vmatmul.mubr.bf16.vlgmr.msra.gmra.mrb[4].mxu1 %v1445_v10  ;;  %1672 = vmatpush3.bf16.msra.mxu0 %v1833_v14  ;;  %v1890_v10 = vld [vmem:[%s2337_s1 + $0x3a8] sm:$0xff]   ;;  %v1894_v14 = vld [vmem:[%s2337_s1 + $0x3b0] sm:$0xff]  }
  0x45   :  { %1694 = vmatpush3.bf16.msra.mxu1 %v1834_v15  ;;  %1673 = vmatprep.subr.bf16.mxu0 %v1835_v16  ;;  %v1895_v15 = vld [vmem:[%s2337_s1 + $0x378] sm:$0xff]  }
  0x46   :  { %1695 = vmatprep.subr.bf16.mxu1 %v1836_v17  ;;  %1304 = vmatprep.mubr.bf16.mxu0 %v1448_v47  ;;  %v1896_v16 = vld [vmem:[%s2337_s1 + $0x3f8] sm:$0xff]  }
  0x47   :  { %1344 = vmatprep.mubr.bf16.mxu1 %v1450_v49  ;;  %v1897_v17 = vld [vmem:[%s2337_s1 + $0x338] sm:$0xff]  }
  0x48   :  { %1674 = vmatpush3.bf16.msra.mxu0 %v1837_v18  ;;  %v1898_v18 = vld [vmem:[%s2337_s1 + $0x3b8] sm:$0xff]  }
  0x49   :  { %1696 = vmatpush3.bf16.msra.mxu1 %v1838_v19  ;;  %1675 = vmatprep.subr.bf16.mxu0 %v1839_v20  ;;  %v23_v19 = vld [vmem:[%s2338_s0 + $0x30] sm:$0xff]  ;;  %v24_v20 = vld [vmem:[%s2338_s0 + $0x38] sm:$0xff] }
  0x4a   :  { %1697 = vmatprep.subr.bf16.mxu1 %v1840_v21  ;;  %v1451_v21 = vcombine.low %v23_v19, %v23_v19 }
  0x4c   :  { %1676 = vmatpush3.bf16.msra.mxu0 %v1841_v22  ;;  %v1452_v22 = vcombine.high %v23_v19, %v23_v19 }
  0x4d   :  { %1698 = vmatpush3.bf16.msra.mxu1 %v1842_v23  ;;  %1677 = vmatprep.subr.bf16.mxu0 %v1843_v24  ;;  %v1453_v23 = vcombine.low %v24_v20, %v24_v20  ;;  %v1454_v24 = vcombine.high %v24_v20, %v24_v20 }
  0x4e   :  { %1699 = vmatprep.subr.bf16.mxu1 %v1844_v25 }
  0x50   :  { %1678 = vmatpush3.bf16.msra.mxu0 %v1845_v26 }
  0x51   :  { %1700 = vmatpush3.bf16.msra.mxu1 %v1846_v27  ;;  %1679 = vmatprep.subr.bf16.mxu0 %v1847_v28  ;;  %v1438_v27 = vld [vmem:[#allocation2] ss:$0 sm:$0xff] }
  0x52   :  { %1701 = vmatprep.subr.bf16.mxu1 %v1848_v29 }
  0x54   :  { %1680 = vmatpush3.bf16.msra.mxu0 %v1849_v30 }
  0x55   :  { %1702 = vmatpush3.bf16.msra.mxu1 %v1850_v31  ;;  %1681 = vmatprep.subr.bf16.mxu0 %v1851_v32 }
  0x56   :  { %1703 = vmatprep.subr.bf16.mxu1 %v1852_v33 }
  0x58   :  { %1682 = vmatpush3.bf16.msra.mxu0 %v1853_v34 }
  0x59   :  { %1704 = vmatpush3.bf16.msra.mxu1 %v1854_v35  ;;  %1683 = vmatprep.subr.bf16.mxu0 %v1855_v36 }
  0x5a   :  { %1705 = vmatprep.subr.bf16.mxu1 %v1856_v37 }
  0x5c   :  { %1684 = vmatpush3.bf16.msra.mxu0 %v1857_v38 }
  0x5d   :  { %1706 = vmatpush3.bf16.msra.mxu1 %v1858_v39  ;;  %1685 = vmatprep.subr.bf16.mxu0 %v1859_v40 }
  0x5e   :  { %1707 = vmatprep.subr.bf16.mxu1 %v1860_v41 }
  0x60   :  { %1686 = vmatpush3.bf16.msra.mxu0 %v1861_v42 }
  0x61   :  { %1708 = vmatpush3.bf16.msra.mxu1 %v1862_v43  ;;  %1715 = vmatprep.subr.bf16.mxu0 %v1867_v50 }
  0x62   :  { %1737 = vmatprep.subr.bf16.mxu1 %v1868_v51 }
  0x63   :  { %1305 = vmatmul.mubr.bf16.vlgmr.msra.gmra.mrb[8].mxu0 %v1447_v46 }
  0x64   :  { %1345 = vmatmul.mubr.bf16.vlgmr.msra.gmra.mrb[8].mxu1 %v1449_v48  ;;  %1716 = vmatpush3.bf16.msra.mxu0 %v1869_v52 }
  0x65   :  { %1738 = vmatpush3.bf16.msra.mxu1 %v1870_v53  ;;  %1717 = vmatprep.subr.bf16.mxu0 %v1871_v54 }
  0x66   :  { %1739 = vmatprep.subr.bf16.mxu1 %v1872_v55  ;;  %1384 = vmatprep.mubr.bf16.mxu0 %v1452_v22 }
  0x67   :  { %1424 = vmatprep.mubr.bf16.mxu1 %v1454_v24 }
  0x68   :  { %1718 = vmatpush3.bf16.msra.mxu0 %v1873_v56 }
  0x69   :  { %1740 = vmatpush3.bf16.msra.mxu1 %v1874_v57  ;;  %1719 = vmatprep.subr.bf16.mxu0 %v1875_v58 }
  0x6a   :  { %1741 = vmatprep.subr.bf16.mxu1 %v1876_v59 }
  0x6c   :  { %1720 = vmatpush3.bf16.msra.mxu0 %v1877_v60 }
  0x6d   :  { %1742 = vmatpush3.bf16.msra.mxu1 %v1878_v61  ;;  %1721 = vmatprep.subr.bf16.mxu0 %v1879_v62 }
  0x6e   :  { %1743 = vmatprep.subr.bf16.mxu1 %v1880_v63 }
  0x70   :  { %1722 = vmatpush3.bf16.msra.mxu0 %v1881_v0 }
  0x71   :  { %1744 = vmatpush3.bf16.msra.mxu1 %v1882_v1  ;;  %1723 = vmatprep.subr.bf16.mxu0 %v1883_v2 }
  0x72   :  { %1745 = vmatprep.subr.bf16.mxu1 %v1884_v3 }
  0x74   :  { %1724 = vmatpush3.bf16.msra.mxu0 %v1885_v4 }
  0x75   :  { %1746 = vmatpush3.bf16.msra.mxu1 %v1886_v5  ;;  %1725 = vmatprep.subr.bf16.mxu0 %v1887_v7 }
  0x76   :  { %1747 = vmatprep.subr.bf16.mxu1 %v1888_v8 }
  0x78   :  { %1726 = vmatpush3.bf16.msra.mxu0 %v1889_v9 }
  0x79   :  { %1748 = vmatpush3.bf16.msra.mxu1 %v1890_v10  ;;  %1727 = vmatprep.subr.bf16.mxu0 %v1891_v11 }
  0x7a   :  { %1749 = vmatprep.subr.bf16.mxu1 %v1892_v12 }
  0x7c   :  { %1728 = vmatpush3.bf16.msra.mxu0 %v1893_v13 }
  0x7d   :  { %1750 = vmatpush3.bf16.msra.mxu1 %v1894_v14  ;;  %1729 = vmatprep.subr.bf16.mxu0 %v1895_v15 }
  0x7e   :  { %1751 = vmatprep.subr.bf16.mxu1 %v1896_v16 }
  0x80   :  { %1730 = vmatpush3.bf16.msra.mxu0 %v1897_v17 }
  0x81   :  { %1752 = vmatpush3.bf16.msra.mxu1 %v1898_v18 }
  0x83   :  { %1385 = vmatmul.mubr.bf16.vlgmr.msra.gmra.mrb[12].mxu0 %v1451_v21 }
  0x84   :  { %1425 = vmatmul.mubr.bf16.vlgmr.msra.gmra.mrb[12].mxu1 %v1453_v23 }
  0xf6   :  { %v1599_v25 = vpop.f32.mrb[0].mxu0 }
  0xf7   :  { %v1621_v26 = vpop.f32.mrb[0].mxu1  ;;  %v1600_v28 = vpop.f32.mrb[1].mxu0 }
  0xf8   :  { %v1622_v29 = vpop.f32.mrb[1].mxu1  ;;  %v1601_v30 = vadd.f32 %v1600_v28, %v1599_v25  ;;  %v1602_v32 = vpop.f32.mrb[2].mxu0 }
  0xf9   :  { %v1623_v31 = vadd.f32 %v1622_v29, %v1621_v26  ;;  %v1624_v33 = vpop.f32.mrb[2].mxu1  ;;  %v1603_v34 = vpop.f32.mrb[3].mxu0 }
  0xfa   :  { %v1625_v35 = vpop.f32.mrb[3].mxu1  ;;  %v1147_v36 = vadd.f32 %v1601_v30, %v1438_v27 }
  0xfc   :  { %v1187_v37 = vadd.f32 %v1623_v31, %v1147_v36 }
 0x116   :  { %v1643_v38 = vpop.f32.mrb[4].mxu0 }
 0x117   :  { %v1665_v39 = vpop.f32.mrb[4].mxu1  ;;  %v1644_v40 = vpop.f32.mrb[5].mxu0 }
 0x118   :  { %v1666_v41 = vpop.f32.mrb[5].mxu1  ;;  %v1645_v42 = vadd.f32 %v1644_v40, %v1643_v38  ;;  %v1646_v44 = vpop.f32.mrb[6].mxu0 }
 0x119   :  { %v1667_v43 = vadd.f32 %v1666_v41, %v1665_v39  ;;  %v1668_v45 = vpop.f32.mrb[6].mxu1  ;;  %v1647_v46 = vpop.f32.mrb[7].mxu0 }
 0x11a   :  { %v1669_v47 = vpop.f32.mrb[7].mxu1  ;;  %v1227_v48 = vadd.f32 %v1645_v42, %v1187_v37 }
 0x11c   :  { %v1267_v49 = vadd.f32 %v1667_v43, %v1227_v48 }
 0x136   :  { %v1687_v50 = vpop.f32.mrb[8].mxu0 }
 0x137   :  { %v1709_v51 = vpop.f32.mrb[8].mxu1  ;;  %v1688_v52 = vpop.f32.mrb[9].mxu0 }
 0x138   :  { %v1689_v53 = vadd.f32 %v1688_v52, %v1687_v50  ;;  %v1710_v54 = vpop.f32.mrb[9].mxu1  ;;  %v1690_v55 = vpop.f32.mrb[10].mxu0 }
 0x139   :  { %v1711_v56 = vadd.f32 %v1710_v54, %v1709_v51  ;;  %v1712_v57 = vpop.f32.mrb[10].mxu1  ;;  %v1691_v58 = vpop.f32.mrb[11].mxu0 }
 0x13a   :  { %v1307_v59 = vadd.f32 %v1689_v53, %v1267_v49  ;;  %v1713_v60 = vpop.f32.mrb[11].mxu1 }
 0x13c   :  { %v1347_v61 = vadd.f32 %v1711_v56, %v1307_v59 }
 0x156   :  { %v1731_v62 = vpop.f32.mrb[12].mxu0 }
 0x157   :  { %v1753_v63 = vpop.f32.mrb[12].mxu1  ;;  %v1732_v0 = vpop.f32.mrb[13].mxu0 }
 0x158   :  { %v1733_v1 = vadd.f32 %v1732_v0, %v1731_v62  ;;  %v1754_v2 = vpop.f32.mrb[13].mxu1  ;;  %v1734_v3 = vpop.f32.mrb[14].mxu0 }
 0x159   :  { %v1755_v4 = vadd.f32 %v1754_v2, %v1753_v63  ;;  %v1756_v5 = vpop.f32.mrb[14].mxu1  ;;  %v1735_v6 = vpop.f32.mrb[15].mxu0 }
 0x15a   :  { %v1387_v7 = vadd.f32 %v1733_v1, %v1347_v61  ;;  %v1757_v8 = vpop.f32.mrb[15].mxu1 }
 0x15c   :  { %v1427_v9 = vadd.f32 %v1755_v4, %v1387_v7 }
 0x15e   :  { %1433 = vst.msk [vmem:[%s2340_s3] sm:$0xff] %vm1432_vm0, %v1427_v9 }

// kernel: patchgan_forward.13
= control target key start
LH: loop header
LB: loop body
LE: loop exit
PB: predicated region body
PF: predicated region fallthrough
CT: control target
= control target key end

     0   :  { %s14577_s1 = inlined_call_operand.vmem [shape: bf16[4096,512], index: 1, kind: input, shape index: {}]   ;;  %s14578_s0 = inlined_call_operand.vmem [shape: bf16[24,4096], index: 0, kind: input, shape index: {}]   ;;  %s14579_s2 = inlined_call_operand.vmem [shape: f32[24,512], index: 2, kind: output, shape index: {0}]   ;;  %s14580_s3 = inlined_call_operand.vmem [shape: f32[1,2,512], index: 3, kind: output, shape index: {1}]  }
   0x1   :  { %v9600_v0 = vld [vmem:[%s14577_s1 + $0x4] ss:$16 sps:$4 sm:$0xff]   ;;  %v9602_v1 = vld [vmem:[%s14577_s1 + $0xc] ss:$16 sps:$4 sm:$0xff]   ;;  %v9604_v2 = vld [vmem:[%s14577_s1] ss:$16 sps:$4 sm:$0xff]  }
   0x2   :  { %6477 = vmatprep.subr.bf16.mxu0 %v9600_v0  ;;  %v9605_v3 = vld [vmem:[%s14577_s1 + $0x8] ss:$16 sps:$4 sm:$0xff]   ;;  %7293 = vmatprep.subr.bf16.mxu1 %v9602_v1  ;;  %v9606_v4 = vld [vmem:[%s14577_s1 + $0x24] ss:$16 sps:$4 sm:$0xff]   ;;  %v9608_v5 = vld [vmem:[%s14577_s1 + $0x2c] ss:$16 sps:$4 sm:$0xff]  }
   0x3   :  { %6478 = vmatpush1.bf16.msra.mxu0 %v9604_v2  ;;  %7294 = vmatpush1.bf16.msra.mxu1 %v9605_v3  ;;  %v9610_v6 = vld [vmem:[%s14577_s1 + $0x20] ss:$16 sps:$4 sm:$0xff]   ;;  %v9611_v7 = vld [vmem:[%s14577_s1 + $0x28] ss:$16 sps:$4 sm:$0xff]   ;;  %v9612_v8 = vld [vmem:[%s14577_s1 + $0x44] ss:$16 sps:$4 sm:$0xff]  }
   0x4   :  { %6479 = vmatprep.subr.bf16.mxu0 %v9606_v4  ;;  %7295 = vmatprep.subr.bf16.mxu1 %v9608_v5  ;;  %v9614_v9 = vld [vmem:[%s14577_s1 + $0x4c] ss:$16 sps:$4 sm:$0xff]   ;;  %v9616_v10 = vld [vmem:[%s14577_s1 + $0x40] ss:$16 sps:$4 sm:$0xff]   ;;  %v9617_v11 = vld [vmem:[%s14577_s1 + $0x48] ss:$16 sps:$4 sm:$0xff]  }
   0x5   :  { %v9618_v12 = vld [vmem:[%s14577_s1 + $0x64] ss:$16 sps:$4 sm:$0xff]   ;;  %v9620_v13 = vld [vmem:[%s14577_s1 + $0x6c] ss:$16 sps:$4 sm:$0xff]   ;;  %v9622_v14 = vld [vmem:[%s14577_s1 + $0x60] ss:$16 sps:$4 sm:$0xff]  }
   0x6   :  { %v9623_v15 = vld [vmem:[%s14577_s1 + $0x68] ss:$16 sps:$4 sm:$0xff]   ;;  %v9624_v16 = vld [vmem:[%s14577_s1 + $0x84] ss:$16 sps:$4 sm:$0xff]   ;;  %v9626_v17 = vld [vmem:[%s14577_s1 + $0x8c] ss:$16 sps:$4 sm:$0xff]  }
   0x7   :  { %6480 = vmatpush1.bf16.msra.mxu0 %v9610_v6  ;;  %7296 = vmatpush1.bf16.msra.mxu1 %v9611_v7  ;;  %v9628_v18 = vld [vmem:[%s14577_s1 + $0x80] ss:$16 sps:$4 sm:$0xff]   ;;  %v9629_v19 = vld [vmem:[%s14577_s1 + $0x88] ss:$16 sps:$4 sm:$0xff]   ;;  %v9630_v20 = vld [vmem:[%s14577_s1 + $0xa4] ss:$16 sps:$4 sm:$0xff]  }
   0x8   :  { %6481 = vmatprep.subr.bf16.mxu0 %v9612_v8  ;;  %7297 = vmatprep.subr.bf16.mxu1 %v9614_v9  ;;  %v9632_v21 = vld [vmem:[%s14577_s1 + $0xac] ss:$16 sps:$4 sm:$0xff]   ;;  %v9634_v22 = vld [vmem:[%s14577_s1 + $0xa0] ss:$16 sps:$4 sm:$0xff]   ;;  %v9635_v23 = vld [vmem:[%s14577_s1 + $0xa8] ss:$16 sps:$4 sm:$0xff]  }
   0x9   :  { %v9636_v24 = vld [vmem:[%s14577_s1 + $0xc4] ss:$16 sps:$4 sm:$0xff]   ;;  %v9638_v25 = vld [vmem:[%s14577_s1 + $0xcc] ss:$16 sps:$4 sm:$0xff]   ;;  %v9640_v26 = vld [vmem:[%s14577_s1 + $0xc0] ss:$16 sps:$4 sm:$0xff]  }
   0xa   :  { %v9641_v27 = vld [vmem:[%s14577_s1 + $0xc8] ss:$16 sps:$4 sm:$0xff]   ;;  %v9642_v28 = vld [vmem:[%s14577_s1 + $0xe4] ss:$16 sps:$4 sm:$0xff]   ;;  %v9644_v29 = vld [vmem:[%s14577_s1 + $0xec] ss:$16 sps:$4 sm:$0xff]  }
   0xb   :  { %6482 = vmatpush1.bf16.msra.mxu0 %v9616_v10  ;;  %7298 = vmatpush1.bf16.msra.mxu1 %v9617_v11  ;;  %v9646_v30 = vld [vmem:[%s14577_s1 + $0xe0] ss:$16 sps:$4 sm:$0xff]   ;;  %v9647_v31 = vld [vmem:[%s14577_s1 + $0xe8] ss:$16 sps:$4 sm:$0xff]   ;;  %v9648_v32 = vld [vmem:[%s14577_s1 + $0x104] ss:$16 sps:$4 sm:$0xff]  }
   0xc   :  { %6483 = vmatprep.subr.bf16.mxu0 %v9618_v12  ;;  %7299 = vmatprep.subr.bf16.mxu1 %v9620_v13  ;;  %v9650_v33 = vld [vmem:[%s14577_s1 + $0x10c] ss:$16 sps:$4 sm:$0xff]   ;;  %v9652_v34 = vld [vmem:[%s14577_s1 + $0x100] ss:$16 sps:$4 sm:$0xff]   ;;  %v9653_v35 = vld [vmem:[%s14577_s1 + $0x108] ss:$16 sps:$4 sm:$0xff]  }
   0xd   :  { %v9654_v36 = vld [vmem:[%s14577_s1 + $0x124] ss:$16 sps:$4 sm:$0xff]   ;;  %v9656_v37 = vld [vmem:[%s14577_s1 + $0x12c] ss:$16 sps:$4 sm:$0xff]   ;;  %v9658_v38 = vld [vmem:[%s14577_s1 + $0x120] ss:$16 sps:$4 sm:$0xff]  }
   0xe   :  { %v9659_v39 = vld [vmem:[%s14577_s1 + $0x128] ss:$16 sps:$4 sm:$0xff]   ;;  %v9660_v40 = vld [vmem:[%s14577_s1 + $0x144] ss:$16 sps:$4 sm:$0xff]   ;;  %v9662_v41 = vld [vmem:[%s14577_s1 + $0x14c] ss:$16 sps:$4 sm:$0xff]  }
   0xf   :  { %6484 = vmatpush1.bf16.msra.mxu0 %v9622_v14  ;;  %7300 = vmatpush1.bf16.msra.mxu1 %v9623_v15  ;;  %v9664_v42 = vld [vmem:[%s14577_s1 + $0x140] ss:$16 sps:$4 sm:$0xff]   ;;  %v9665_v43 = vld [vmem:[%s14577_s1 + $0x148] ss:$16 sps:$4 sm:$0xff]   ;;  %v9666_v44 = vld [vmem:[%s14577_s1 + $0x164] ss:$16 sps:$4 sm:$0xff]  }
  0x10   :  { %6485 = vmatprep.subr.bf16.mxu0 %v9624_v16  ;;  %7301 = vmatprep.subr.bf16.mxu1 %v9626_v17  ;;  %v9668_v45 = vld [vmem:[%s14577_s1 + $0x16c] ss:$16 sps:$4 sm:$0xff]   ;;  %v13_v46 = vld [vmem:[%s14578_s0] sm:$0xff]  ;;  %v9671_v49 = vld [vmem:[%s14577_s1 + $0x168] ss:$16 sps:$4 sm:$0xff]  }
  0x11   :  { %v29_v47 = vld [vmem:[%s14578_s0 + $0x80] sm:$0xff]  ;;  %v9674_v52 = vld [vmem:[%s14577_s1 + $0x18c] ss:$16 sps:$4 sm:$0xff]   ;;  %v9677_v54 = vld [vmem:[%s14577_s1 + $0x188] ss:$16 sps:$4 sm:$0xff]  }
  0x12   :  { %v9670_v48 = vld [vmem:[%s14577_s1 + $0x160] ss:$16 sps:$4 sm:$0xff]   ;;  %v8271_v50 = vcombine.high %v13_v46, %v29_v47  ;;  %v9672_v51 = vld [vmem:[%s14577_s1 + $0x184] ss:$16 sps:$4 sm:$0xff]   ;;  %v9680_v56 = vld [vmem:[%s14577_s1 + $0x1ac] ss:$16 sps:$4 sm:$0xff]   ;;  %v8270_v5 = vcombine.low %v13_v46, %v29_v47 }
  0x13   :  { %6486 = vmatpush1.bf16.msra.mxu0 %v9628_v18  ;;  %7302 = vmatpush1.bf16.msra.mxu1 %v9629_v19  ;;  %v9676_v53 = vld [vmem:[%s14577_s1 + $0x180] ss:$16 sps:$4 sm:$0xff]   ;;  %v9678_v55 = vld [vmem:[%s14577_s1 + $0x1a4] ss:$16 sps:$4 sm:$0xff]   ;;  %v9683_v58 = vld [vmem:[%s14577_s1 + $0x1a8] ss:$16 sps:$4 sm:$0xff]  }
  0x14   :  { %6487 = vmatprep.subr.bf16.mxu0 %v9630_v20  ;;  %7303 = vmatprep.subr.bf16.mxu1 %v9632_v21  ;;  %v9682_v57 = vld [vmem:[%s14577_s1 + $0x1a0] ss:$16 sps:$4 sm:$0xff]   ;;  %v9684_v59 = vld [vmem:[%s14577_s1 + $0x1c4] ss:$16 sps:$4 sm:$0xff]   ;;  %v9686_v60 = vld [vmem:[%s14577_s1 + $0x1cc] ss:$16 sps:$4 sm:$0xff]  }
  0x15   :  { %6509 = vmatprep.mubr.bf16.mxu0 %v8271_v50  ;;  %7325 = vmatprep.mubr.bf16.mxu1 %v8271_v50  ;;  %v9688_v61 = vld [vmem:[%s14577_s1 + $0x1c0] ss:$16 sps:$4 sm:$0xff]   ;;  %v9689_v62 = vld [vmem:[%s14577_s1 + $0x1c8] ss:$16 sps:$4 sm:$0xff]   ;;  %v9690_v63 = vld [vmem:[%s14577_s1 + $0x1e4] ss:$16 sps:$4 sm:$0xff]  }
  0x16   :  { %v9692_v0 = vld [vmem:[%s14577_s1 + $0x1ec] ss:$16 sps:$4 sm:$0xff]   ;;  %v9694_v1 = vld [vmem:[%s14577_s1 + $0x1e0] ss:$16 sps:$4 sm:$0xff]   ;;  %v9695_v2 = vld [vmem:[%s14577_s1 + $0x1e8] ss:$16 sps:$4 sm:$0xff]  }
  0x17   :  { %6488 = vmatpush1.bf16.msra.mxu0 %v9634_v22  ;;  %7304 = vmatpush1.bf16.msra.mxu1 %v9635_v23  ;;  %v9698_v3 = vld [vmem:[%s14577_s1 + $0x204] ss:$16 sps:$4 sm:$0xff]   ;;  %v9701_v4 = vld [vmem:[%s14577_s1 + $0x20c] ss:$16 sps:$4 sm:$0xff]   ;;  %v9696_v6 = vld [vmem:[%s14577_s1 + $0x200] ss:$16 sps:$4 sm:$0xff]  }
  0x18   :  { %6489 = vmatprep.subr.bf16.mxu0 %v9636_v24  ;;  %7305 = vmatprep.subr.bf16.mxu1 %v9638_v25  ;;  %v9699_v7 = vld [vmem:[%s14577_s1 + $0x208] ss:$16 sps:$4 sm:$0xff]   ;;  %v9704_v8 = vld [vmem:[%s14577_s1 + $0x224] ss:$16 sps:$4 sm:$0xff]   ;;  %v9707_v9 = vld [vmem:[%s14577_s1 + $0x22c] ss:$16 sps:$4 sm:$0xff]  }
  0x19   :  { %v9702_v10 = vld [vmem:[%s14577_s1 + $0x220] ss:$16 sps:$4 sm:$0xff]   ;;  %v9705_v11 = vld [vmem:[%s14577_s1 + $0x228] ss:$16 sps:$4 sm:$0xff]   ;;  %v9710_v12 = vld [vmem:[%s14577_s1 + $0x244] ss:$16 sps:$4 sm:$0xff]  }
  0x1a   :  { %v9713_v13 = vld [vmem:[%s14577_s1 + $0x24c] ss:$16 sps:$4 sm:$0xff]   ;;  %v9708_v14 = vld [vmem:[%s14577_s1 + $0x240] ss:$16 sps:$4 sm:$0xff]   ;;  %v9711_v15 = vld [vmem:[%s14577_s1 + $0x248] ss:$16 sps:$4 sm:$0xff]  }
  0x1b   :  { %6490 = vmatpush1.bf16.msra.mxu0 %v9640_v26  ;;  %7306 = vmatpush1.bf16.msra.mxu1 %v9641_v27  ;;  %v9716_v16 = vld [vmem:[%s14577_s1 + $0x264] ss:$16 sps:$4 sm:$0xff]   ;;  %v9719_v17 = vld [vmem:[%s14577_s1 + $0x26c] ss:$16 sps:$4 sm:$0xff]   ;;  %v9714_v18 = vld [vmem:[%s14577_s1 + $0x260] ss:$16 sps:$4 sm:$0xff]  }
  0x1c   :  { %6491 = vmatprep.subr.bf16.mxu0 %v9642_v28  ;;  %7307 = vmatprep.subr.bf16.mxu1 %v9644_v29  ;;  %v9717_v19 = vld [vmem:[%s14577_s1 + $0x268] ss:$16 sps:$4 sm:$0xff]   ;;  %v9722_v20 = vld [vmem:[%s14577_s1 + $0x284] ss:$16 sps:$4 sm:$0xff]   ;;  %v9725_v21 = vld [vmem:[%s14577_s1 + $0x28c] ss:$16 sps:$4 sm:$0xff]  }
  0x1d   :  { %v9720_v22 = vld [vmem:[%s14577_s1 + $0x280] ss:$16 sps:$4 sm:$0xff]   ;;  %v9723_v23 = vld [vmem:[%s14577_s1 + $0x288] ss:$16 sps:$4 sm:$0xff]   ;;  %v9728_v24 = vld [vmem:[%s14577_s1 + $0x2a4] ss:$16 sps:$4 sm:$0xff]  }
  0x1e   :  { %v45_v25 = vld [vmem:[%s14578_s0 + $0x100] sm:$0xff]  ;;  %v9731_v26 = vld [vmem:[%s14577_s1 + $0x2ac] ss:$16 sps:$4 sm:$0xff]  }
  0x1f   :  { %6492 = vmatpush1.bf16.msra.mxu0 %v9646_v30  ;;  %7308 = vmatpush1.bf16.msra.mxu1 %v9647_v31  ;;  %v8303_v27 = vcombine.high %v45_v25, %v45_v25  ;;  %v8302_v28 = vcombine.low %v45_v25, %v45_v25  ;;  %v9726_v29 = vld [vmem:[%s14577_s1 + $0x2a0] ss:$16 sps:$4 sm:$0xff]   ;;  %v9729_v30 = vld [vmem:[%s14577_s1 + $0x2a8] ss:$16 sps:$4 sm:$0xff]   ;;  %v9734_v31 = vld [vmem:[%s14577_s1 + $0x2c4] ss:$16 sps:$4 sm:$0xff]  }
  0x20   :  { %6493 = vmatprep.subr.bf16.mxu0 %v9648_v32  ;;  %7309 = vmatprep.subr.bf16.mxu1 %v9650_v33  ;;  %v9737_v32 = vld [vmem:[%s14577_s1 + $0x2cc] ss:$16 sps:$4 sm:$0xff]   ;;  %v9752_v46 = vld [vmem:[%s14577_s1 + $0x324] ss:$16 sps:$4 sm:$0xff]  }
  0x21   :  { %v11471_v33 = vld [vmem:[%s14578_s0 + $0x8] sm:$0xff]  ;;  %v9758_v50 = vld [vmem:[%s14577_s1 + $0x344] ss:$16 sps:$4 sm:$0xff]  }
  0x22   :  { %v9755_v47 = vld [vmem:[%s14577_s1 + $0x32c] ss:$16 sps:$4 sm:$0xff]  }
  0x23   :  { %6494 = vmatpush1.bf16.msra.mxu0 %v9652_v34  ;;  %7310 = vmatpush1.bf16.msra.mxu1 %v9653_v35  ;;  %v11476_v34 = vld [vmem:[%s14578_s0 + $0x88] sm:$0xff]  ;;  %v9732_v35 = vld [vmem:[%s14577_s1 + $0x2c0] ss:$16 sps:$4 sm:$0xff]  }
  0x24   :  { %6495 = vmatprep.subr.bf16.mxu0 %v9654_v36  ;;  %7311 = vmatprep.subr.bf16.mxu1 %v9656_v37  ;;  %v8273_v36 = vcombine.high %v11471_v33, %v11476_v34  ;;  %v9735_v37 = vld [vmem:[%s14577_s1 + $0x2c8] ss:$16 sps:$4 sm:$0xff]  }
  0x27   :  { %6496 = vmatpush1.bf16.msra.mxu0 %v9658_v38  ;;  %7312 = vmatpush1.bf16.msra.mxu1 %v9659_v39  ;;  %v9740_v38 = vld [vmem:[%s14577_s1 + $0x2e4] ss:$16 sps:$4 sm:$0xff]   ;;  %v9743_v39 = vld [vmem:[%s14577_s1 + $0x2ec] ss:$16 sps:$4 sm:$0xff]  }
  0x28   :  { %6497 = vmatprep.subr.bf16.mxu0 %v9660_v40  ;;  %7313 = vmatprep.subr.bf16.mxu1 %v9662_v41  ;;  %v9738_v40 = vld [vmem:[%s14577_s1 + $0x2e0] ss:$16 sps:$4 sm:$0xff]   ;;  %v9741_v41 = vld [vmem:[%s14577_s1 + $0x2e8] ss:$16 sps:$4 sm:$0xff]  }
  0x2b   :  { %6498 = vmatpush1.bf16.msra.mxu0 %v9664_v42  ;;  %7314 = vmatpush1.bf16.msra.mxu1 %v9665_v43  ;;  %v9746_v42 = vld [vmem:[%s14577_s1 + $0x304] ss:$16 sps:$4 sm:$0xff]   ;;  %v9749_v43 = vld [vmem:[%s14577_s1 + $0x30c] ss:$16 sps:$4 sm:$0xff]  }
  0x2c   :  { %6499 = vmatprep.subr.bf16.mxu0 %v9666_v44  ;;  %7315 = vmatprep.subr.bf16.mxu1 %v9668_v45  ;;  %v9744_v44 = vld [vmem:[%s14577_s1 + $0x300] ss:$16 sps:$4 sm:$0xff]   ;;  %v9747_v45 = vld [vmem:[%s14577_s1 + $0x308] ss:$16 sps:$4 sm:$0xff]  }
  0x2f   :  { %6500 = vmatpush1.bf16.msra.mxu0 %v9670_v48  ;;  %7316 = vmatpush1.bf16.msra.mxu1 %v9671_v49  ;;  %v9750_v48 = vld [vmem:[%s14577_s1 + $0x320] ss:$16 sps:$4 sm:$0xff]   ;;  %v9753_v49 = vld [vmem:[%s14577_s1 + $0x328] ss:$16 sps:$4 sm:$0xff]  }
  0x30   :  { %6501 = vmatprep.subr.bf16.mxu0 %v9672_v51  ;;  %7317 = vmatprep.subr.bf16.mxu1 %v9674_v52  ;;  %v9761_v51 = vld [vmem:[%s14577_s1 + $0x34c] ss:$16 sps:$4 sm:$0xff]   ;;  %v9756_v52 = vld [vmem:[%s14577_s1 + $0x340] ss:$16 sps:$4 sm:$0xff]  }
  0x33   :  { %6502 = vmatpush1.bf16.msra.mxu0 %v9676_v53  ;;  %7318 = vmatpush1.bf16.msra.mxu1 %v9677_v54  ;;  %v9759_v53 = vld [vmem:[%s14577_s1 + $0x348] ss:$16 sps:$4 sm:$0xff]   ;;  %v9764_v54 = vld [vmem:[%s14577_s1 + $0x364] ss:$16 sps:$4 sm:$0xff]  }
  0x34   :  { %6503 = vmatprep.subr.bf16.mxu0 %v9678_v55  ;;  %7319 = vmatprep.subr.bf16.mxu1 %v9680_v56  ;;  %v9767_v55 = vld [vmem:[%s14577_s1 + $0x36c] ss:$16 sps:$4 sm:$0xff]   ;;  %v9762_v56 = vld [vmem:[%s14577_s1 + $0x360] ss:$16 sps:$4 sm:$0xff]  }
  0x37   :  { %6504 = vmatpush1.bf16.msra.mxu0 %v9682_v57  ;;  %7320 = vmatpush1.bf16.msra.mxu1 %v9683_v58  ;;  %v9765_v57 = vld [vmem:[%s14577_s1 + $0x368] ss:$16 sps:$4 sm:$0xff]   ;;  %v9770_v58 = vld [vmem:[%s14577_s1 + $0x384] ss:$16 sps:$4 sm:$0xff]  }
  0x38   :  { %6505 = vmatprep.subr.bf16.mxu0 %v9684_v59  ;;  %7321 = vmatprep.subr.bf16.mxu1 %v9686_v60  ;;  %v9773_v59 = vld [vmem:[%s14577_s1 + $0x38c] ss:$16 sps:$4 sm:$0xff]   ;;  %v9768_v60 = vld [vmem:[%s14577_s1 + $0x380] ss:$16 sps:$4 sm:$0xff]  }
  0x3b   :  { %6506 = vmatpush1.bf16.msra.mxu0 %v9688_v61  ;;  %7322 = vmatpush1.bf16.msra.mxu1 %v9689_v62  ;;  %v9771_v61 = vld [vmem:[%s14577_s1 + $0x388] ss:$16 sps:$4 sm:$0xff]   ;;  %v9776_v62 = vld [vmem:[%s14577_s1 + $0x3a4] ss:$16 sps:$4 sm:$0xff]  }
  0x3c   :  { %6507 = vmatprep.subr.bf16.mxu0 %v9690_v63  ;;  %7323 = vmatprep.subr.bf16.mxu1 %v9692_v0  ;;  %v9779_v63 = vld [vmem:[%s14577_s1 + $0x3ac] ss:$16 sps:$4 sm:$0xff]   ;;  %v9774_v0 = vld [vmem:[%s14577_s1 + $0x3a0] ss:$16 sps:$4 sm:$0xff]  }
  0x3f   :  { %6508 = vmatpush1.bf16.msra.mxu0 %v9694_v1  ;;  %7324 = vmatpush1.bf16.msra.mxu1 %v9695_v2  ;;  %v9777_v1 = vld [vmem:[%s14577_s1 + $0x3a8] ss:$16 sps:$4 sm:$0xff]   ;;  %v9783_v2 = vld [vmem:[%s14577_s1 + $0x3c4] ss:$16 sps:$4 sm:$0xff]  }
  0x40   :  { %6528 = vmatprep.subr.bf16.mxu0 %v9698_v3  ;;  %7344 = vmatprep.subr.bf16.mxu1 %v9701_v4  ;;  %v9786_v3 = vld [vmem:[%s14577_s1 + $0x3cc] ss:$16 sps:$4 sm:$0xff]   ;;  %v9781_v4 = vld [vmem:[%s14577_s1 + $0x3c0] ss:$16 sps:$4 sm:$0xff]  }
  0x42   :  { %6510 = vmatmul.mubr.bf16.vlgmr.msra.gmra.mrb[0].mxu0 %v8270_v5  ;;  %7326 = vmatmul.mubr.bf16.vlgmr.msra.gmra.mrb[0].mxu1 %v8270_v5  ;;  %v9784_v5 = vld [vmem:[%s14577_s1 + $0x3c8] ss:$16 sps:$4 sm:$0xff]  }
  0x43   :  { %6529 = vmatpush1.bf16.msra.mxu0 %v9696_v6  ;;  %7345 = vmatpush1.bf16.msra.mxu1 %v9699_v7  ;;  %v9790_v6 = vld [vmem:[%s14577_s1 + $0x3e4] ss:$16 sps:$4 sm:$0xff]   ;;  %v9793_v7 = vld [vmem:[%s14577_s1 + $0x3ec] ss:$16 sps:$4 sm:$0xff]  }
  0x44   :  { %6530 = vmatprep.subr.bf16.mxu0 %v9704_v8  ;;  %7346 = vmatprep.subr.bf16.mxu1 %v9707_v9  ;;  %v9788_v8 = vld [vmem:[%s14577_s1 + $0x3e0] ss:$16 sps:$4 sm:$0xff]   ;;  %v9791_v9 = vld [vmem:[%s14577_s1 + $0x3e8] ss:$16 sps:$4 sm:$0xff]  }
  0x45   :  { %6519 = vmatprep.mubr.bf16.mxu0 %v8303_v27  ;;  %7335 = vmatprep.mubr.bf16.mxu1 %v8303_v27  ;;  %v11643_v27 = vld [vmem:[%s14578_s0 + $0x90] sm:$0xff] }
  0x47   :  { %6531 = vmatpush1.bf16.msra.mxu0 %v9702_v10  ;;  %7347 = vmatpush1.bf16.msra.mxu1 %v9705_v11  ;;  %v9796_v10 = vld [vmem:[%s14577_s1 + $0x404] ss:$16 sps:$4 sm:$0xff]   ;;  %v9799_v11 = vld [vmem:[%s14577_s1 + $0x40c] ss:$16 sps:$4 sm:$0xff]  }
  0x48   :  { %6532 = vmatprep.subr.bf16.mxu0 %v9710_v12  ;;  %7348 = vmatprep.subr.bf16.mxu1 %v9713_v13  ;;  %v8272_v12 = vcombine.low %v11471_v33, %v11476_v34  ;;  %v46_v13 = vld [vmem:[%s14578_s0 + $0x108] sm:$0xff]  ;;  %v9820_v33 = vld [vmem:[%s14577_s1 + $0x484] ss:$16 sps:$4 sm:$0xff]  }
  0x49   :  { %v8304_v25 = vcombine.low %v46_v13, %v46_v13  ;;  %v9823_v34 = vld [vmem:[%s14577_s1 + $0x48c] ss:$16 sps:$4 sm:$0xff]  }
  0x4a   :  { %6520 = vmatmul.mubr.bf16.gmra.mrb[4].mxu0 %v8302_v28  ;;  %7336 = vmatmul.mubr.bf16.gmra.mrb[4].mxu1 %v8302_v28  ;;  %v9814_v28 = vld [vmem:[%s14577_s1 + $0x464] ss:$16 sps:$4 sm:$0xff]  }
  0x4b   :  { %6533 = vmatpush1.bf16.msra.mxu0 %v9708_v14  ;;  %7349 = vmatpush1.bf16.msra.mxu1 %v9711_v15  ;;  %v9794_v14 = vld [vmem:[%s14577_s1 + $0x400] ss:$16 sps:$4 sm:$0xff]   ;;  %v9797_v15 = vld [vmem:[%s14577_s1 + $0x408] ss:$16 sps:$4 sm:$0xff]  }
  0x4c   :  { %6534 = vmatprep.subr.bf16.mxu0 %v9716_v16  ;;  %7350 = vmatprep.subr.bf16.mxu1 %v9719_v17  ;;  %v9802_v16 = vld [vmem:[%s14577_s1 + $0x424] ss:$16 sps:$4 sm:$0xff]   ;;  %v9805_v17 = vld [vmem:[%s14577_s1 + $0x42c] ss:$16 sps:$4 sm:$0xff]  }
  0x4d   :  { %6560 = vmatprep.mubr.bf16.mxu0 %v8273_v36  ;;  %7376 = vmatprep.mubr.bf16.mxu1 %v8273_v36  ;;  %v9821_v36 = vld [vmem:[%s14577_s1 + $0x488] ss:$16 sps:$4 sm:$0xff]  }
  0x4f   :  { %6535 = vmatpush1.bf16.msra.mxu0 %v9714_v18  ;;  %7351 = vmatpush1.bf16.msra.mxu1 %v9717_v19  ;;  %v8305_v18 = vcombine.high %v46_v13, %v46_v13  ;;  %v9800_v19 = vld [vmem:[%s14577_s1 + $0x420] ss:$16 sps:$4 sm:$0xff]   ;;  %v9888_v13 = vld [vmem:[%s14577_s1 + $0x5e4] ss:$16 sps:$4 sm:$0xff]  }
  0x50   :  { %6536 = vmatprep.subr.bf16.mxu0 %v9722_v20  ;;  %7352 = vmatprep.subr.bf16.mxu1 %v9725_v21  ;;  %v9803_v20 = vld [vmem:[%s14577_s1 + $0x428] ss:$16 sps:$4 sm:$0xff]   ;;  %v9808_v21 = vld [vmem:[%s14577_s1 + $0x444] ss:$16 sps:$4 sm:$0xff]  }
  0x53   :  { %6537 = vmatpush1.bf16.msra.mxu0 %v9720_v22  ;;  %7353 = vmatpush1.bf16.msra.mxu1 %v9723_v23  ;;  %v9811_v22 = vld [vmem:[%s14577_s1 + $0x44c] ss:$16 sps:$4 sm:$0xff]   ;;  %v9806_v23 = vld [vmem:[%s14577_s1 + $0x440] ss:$16 sps:$4 sm:$0xff]  }
  0x54   :  { %6538 = vmatprep.subr.bf16.mxu0 %v9728_v24  ;;  %7354 = vmatprep.subr.bf16.mxu1 %v9731_v26  ;;  %v9809_v24 = vld [vmem:[%s14577_s1 + $0x448] ss:$16 sps:$4 sm:$0xff]   ;;  %v11638_v26 = vld [vmem:[%s14578_s0 + $0x10] sm:$0xff] }
  0x57   :  { %6539 = vmatpush1.bf16.msra.mxu0 %v9726_v29  ;;  %7355 = vmatpush1.bf16.msra.mxu1 %v9729_v30  ;;  %v9817_v29 = vld [vmem:[%s14577_s1 + $0x46c] ss:$16 sps:$4 sm:$0xff]   ;;  %v8275_v30 = vcombine.high %v11638_v26, %v11643_v27 }
  0x58   :  { %6540 = vmatprep.subr.bf16.mxu0 %v9734_v31  ;;  %7356 = vmatprep.subr.bf16.mxu1 %v9737_v32  ;;  %v9812_v31 = vld [vmem:[%s14577_s1 + $0x460] ss:$16 sps:$4 sm:$0xff]   ;;  %v9815_v32 = vld [vmem:[%s14577_s1 + $0x468] ss:$16 sps:$4 sm:$0xff]  }
  0x5b   :  { %6541 = vmatpush1.bf16.msra.mxu0 %v9732_v35  ;;  %7357 = vmatpush1.bf16.msra.mxu1 %v9735_v37  ;;  %v9818_v35 = vld [vmem:[%s14577_s1 + $0x480] ss:$16 sps:$4 sm:$0xff]   ;;  %v9826_v37 = vld [vmem:[%s14577_s1 + $0x4a4] ss:$16 sps:$4 sm:$0xff]  }
  0x5c   :  { %6542 = vmatprep.subr.bf16.mxu0 %v9740_v38  ;;  %7358 = vmatprep.subr.bf16.mxu1 %v9743_v39  ;;  %v9829_v38 = vld [vmem:[%s14577_s1 + $0x4ac] ss:$16 sps:$4 sm:$0xff]   ;;  %v9824_v39 = vld [vmem:[%s14577_s1 + $0x4a0] ss:$16 sps:$4 sm:$0xff]  }
  0x5f   :  { %6543 = vmatpush1.bf16.msra.mxu0 %v9738_v40  ;;  %7359 = vmatpush1.bf16.msra.mxu1 %v9741_v41  ;;  %v9827_v40 = vld [vmem:[%s14577_s1 + $0x4a8] ss:$16 sps:$4 sm:$0xff]   ;;  %v9832_v41 = vld [vmem:[%s14577_s1 + $0x4c4] ss:$16 sps:$4 sm:$0xff]  }
  0x60   :  { %6544 = vmatprep.subr.bf16.mxu0 %v9746_v42  ;;  %7360 = vmatprep.subr.bf16.mxu1 %v9749_v43  ;;  %v9835_v42 = vld [vmem:[%s14577_s1 + $0x4cc] ss:$16 sps:$4 sm:$0xff]   ;;  %v9830_v43 = vld [vmem:[%s14577_s1 + $0x4c0] ss:$16 sps:$4 sm:$0xff]  }
  0x63   :  { %6545 = vmatpush1.bf16.msra.mxu0 %v9744_v44  ;;  %7361 = vmatpush1.bf16.msra.mxu1 %v9747_v45  ;;  %v9833_v44 = vld [vmem:[%s14577_s1 + $0x4c8] ss:$16 sps:$4 sm:$0xff]   ;;  %v9838_v45 = vld [vmem:[%s14577_s1 + $0x4e4] ss:$16 sps:$4 sm:$0xff]  }
  0x64   :  { %6546 = vmatprep.subr.bf16.mxu0 %v9752_v46  ;;  %7362 = vmatprep.subr.bf16.mxu1 %v9755_v47  ;;  %v9841_v46 = vld [vmem:[%s14577_s1 + $0x4ec] ss:$16 sps:$4 sm:$0xff]   ;;  %v9836_v47 = vld [vmem:[%s14577_s1 + $0x4e0] ss:$16 sps:$4 sm:$0xff]  }
  0x67   :  { %6547 = vmatpush1.bf16.msra.mxu0 %v9750_v48  ;;  %7363 = vmatpush1.bf16.msra.mxu1 %v9753_v49  ;;  %v9839_v48 = vld [vmem:[%s14577_s1 + $0x4e8] ss:$16 sps:$4 sm:$0xff]   ;;  %v9844_v49 = vld [vmem:[%s14577_s1 + $0x504] ss:$16 sps:$4 sm:$0xff]  }
  0x68   :  { %6548 = vmatprep.subr.bf16.mxu0 %v9758_v50  ;;  %7364 = vmatprep.subr.bf16.mxu1 %v9761_v51  ;;  %v9847_v50 = vld [vmem:[%s14577_s1 + $0x50c] ss:$16 sps:$4 sm:$0xff]   ;;  %v9842_v51 = vld [vmem:[%s14577_s1 + $0x500] ss:$16 sps:$4 sm:$0xff]  }
  0x6b   :  { %6549 = vmatpush1.bf16.msra.mxu0 %v9756_v52  ;;  %7365 = vmatpush1.bf16.msra.mxu1 %v9759_v53  ;;  %v9845_v52 = vld [vmem:[%s14577_s1 + $0x508] ss:$16 sps:$4 sm:$0xff]   ;;  %v9850_v53 = vld [vmem:[%s14577_s1 + $0x524] ss:$16 sps:$4 sm:$0xff]  }
  0x6c   :  { %6550 = vmatprep.subr.bf16.mxu0 %v9764_v54  ;;  %7366 = vmatprep.subr.bf16.mxu1 %v9767_v55  ;;  %v9853_v54 = vld [vmem:[%s14577_s1 + $0x52c] ss:$16 sps:$4 sm:$0xff]   ;;  %v9848_v55 = vld [vmem:[%s14577_s1 + $0x520] ss:$16 sps:$4 sm:$0xff]  }
  0x6f   :  { %6551 = vmatpush1.bf16.msra.mxu0 %v9762_v56  ;;  %7367 = vmatpush1.bf16.msra.mxu1 %v9765_v57  ;;  %v9851_v56 = vld [vmem:[%s14577_s1 + $0x528] ss:$16 sps:$4 sm:$0xff]   ;;  %v9856_v57 = vld [vmem:[%s14577_s1 + $0x544] ss:$16 sps:$4 sm:$0xff]  }
  0x70   :  { %6552 = vmatprep.subr.bf16.mxu0 %v9770_v58  ;;  %7368 = vmatprep.subr.bf16.mxu1 %v9773_v59  ;;  %v9859_v58 = vld [vmem:[%s14577_s1 + $0x54c] ss:$16 sps:$4 sm:$0xff]   ;;  %v9854_v59 = vld [vmem:[%s14577_s1 + $0x540] ss:$16 sps:$4 sm:$0xff]  }
  0x73   :  { %6553 = vmatpush1.bf16.msra.mxu0 %v9768_v60  ;;  %7369 = vmatpush1.bf16.msra.mxu1 %v9771_v61  ;;  %v9857_v60 = vld [vmem:[%s14577_s1 + $0x548] ss:$16 sps:$4 sm:$0xff]   ;;  %v9862_v61 = vld [vmem:[%s14577_s1 + $0x564] ss:$16 sps:$4 sm:$0xff]  }
  0x74   :  { %6554 = vmatprep.subr.bf16.mxu0 %v9776_v62  ;;  %7370 = vmatprep.subr.bf16.mxu1 %v9779_v63  ;;  %v9865_v62 = vld [vmem:[%s14577_s1 + $0x56c] ss:$16 sps:$4 sm:$0xff]   ;;  %v9860_v63 = vld [vmem:[%s14577_s1 + $0x560] ss:$16 sps:$4 sm:$0xff]  }
  0x77   :  { %6555 = vmatpush1.bf16.msra.mxu0 %v9774_v0  ;;  %7371 = vmatpush1.bf16.msra.mxu1 %v9777_v1  ;;  %v9863_v0 = vld [vmem:[%s14577_s1 + $0x568] ss:$16 sps:$4 sm:$0xff]   ;;  %v9868_v1 = vld [vmem:[%s14577_s1 + $0x584] ss:$16 sps:$4 sm:$0xff]  }
  0x78   :  { %6556 = vmatprep.subr.bf16.mxu0 %v9783_v2  ;;  %7372 = vmatprep.subr.bf16.mxu1 %v9786_v3  ;;  %v9871_v2 = vld [vmem:[%s14577_s1 + $0x58c] ss:$16 sps:$4 sm:$0xff]   ;;  %v9866_v3 = vld [vmem:[%s14577_s1 + $0x580] ss:$16 sps:$4 sm:$0xff]  }
  0x7b   :  { %6557 = vmatpush1.bf16.msra.mxu0 %v9781_v4  ;;  %7373 = vmatpush1.bf16.msra.mxu1 %v9784_v5  ;;  %v9869_v4 = vld [vmem:[%s14577_s1 + $0x588] ss:$16 sps:$4 sm:$0xff]   ;;  %v9874_v5 = vld [vmem:[%s14577_s1 + $0x5a4] ss:$16 sps:$4 sm:$0xff]  }
  0x7c   :  { %6558 = vmatprep.subr.bf16.mxu0 %v9790_v6  ;;  %7374 = vmatprep.subr.bf16.mxu1 %v9793_v7  ;;  %v9877_v6 = vld [vmem:[%s14577_s1 + $0x5ac] ss:$16 sps:$4 sm:$0xff]   ;;  %v9872_v7 = vld [vmem:[%s14577_s1 + $0x5a0] ss:$16 sps:$4 sm:$0xff]  }
  0x7f   :  { %6559 = vmatpush1.bf16.msra.mxu0 %v9788_v8  ;;  %7375 = vmatpush1.bf16.msra.mxu1 %v9791_v9  ;;  %v9875_v8 = vld [vmem:[%s14577_s1 + $0x5a8] ss:$16 sps:$4 sm:$0xff]   ;;  %v9881_v9 = vld [vmem:[%s14577_s1 + $0x5c4] ss:$16 sps:$4 sm:$0xff]  }
  0x80   :  { %6579 = vmatprep.subr.bf16.mxu0 %v9796_v10  ;;  %7395 = vmatprep.subr.bf16.mxu1 %v9799_v11  ;;  %v9884_v10 = vld [vmem:[%s14577_s1 + $0x5cc] ss:$16 sps:$4 sm:$0xff]   ;;  %v9879_v11 = vld [vmem:[%s14577_s1 + $0x5c0] ss:$16 sps:$4 sm:$0xff]  }
  0x82   :  { %6561 = vmatmul.mubr.bf16.vlgmr.msra.gmra.mrb[0].mxu0 %v8272_v12  ;;  %7377 = vmatmul.mubr.bf16.vlgmr.msra.gmra.mrb[0].mxu1 %v8272_v12  ;;  %v9882_v12 = vld [vmem:[%s14577_s1 + $0x5c8] ss:$16 sps:$4 sm:$0xff]  }
  0x83   :  { %6580 = vmatpush1.bf16.msra.mxu0 %v9794_v14  ;;  %7396 = vmatpush1.bf16.msra.mxu1 %v9797_v15  ;;  %v9891_v14 = vld [vmem:[%s14577_s1 + $0x5ec] ss:$16 sps:$4 sm:$0xff]   ;;  %v9886_v15 = vld [vmem:[%s14577_s1 + $0x5e0] ss:$16 sps:$4 sm:$0xff]  }
  0x84   :  { %6581 = vmatprep.subr.bf16.mxu0 %v9802_v16  ;;  %7397 = vmatprep.subr.bf16.mxu1 %v9805_v17  ;;  %v9889_v16 = vld [vmem:[%s14577_s1 + $0x5e8] ss:$16 sps:$4 sm:$0xff]   ;;  %v9894_v17 = vld [vmem:[%s14577_s1 + $0x604] ss:$16 sps:$4 sm:$0xff]  }
  0x85   :  { %6570 = vmatprep.mubr.bf16.mxu0 %v8305_v18  ;;  %7386 = vmatprep.mubr.bf16.mxu1 %v8305_v18  ;;  %v9897_v18 = vld [vmem:[%s14577_s1 + $0x60c] ss:$16 sps:$4 sm:$0xff]  }
  0x87   :  { %6582 = vmatpush1.bf16.msra.mxu0 %v9800_v19  ;;  %7398 = vmatpush1.bf16.msra.mxu1 %v9803_v20  ;;  %v8274_v19 = vcombine.low %v11638_v26, %v11643_v27  ;;  %v9892_v20 = vld [vmem:[%s14577_s1 + $0x600] ss:$16 sps:$4 sm:$0xff]   ;;  %v9901_v27 = vld [vmem:[%s14577_s1 + $0x628] ss:$16 sps:$4 sm:$0xff]  }
  0x88   :  { %6583 = vmatprep.subr.bf16.mxu0 %v9808_v21  ;;  %7399 = vmatprep.subr.bf16.mxu1 %v9811_v22  ;;  %v47_v21 = vld [vmem:[%s14578_s0 + $0x110] sm:$0xff]  ;;  %v9895_v22 = vld [vmem:[%s14577_s1 + $0x608] ss:$16 sps:$4 sm:$0xff]  }
  0x89   :  { %v9898_v26 = vld [vmem:[%s14577_s1 + $0x620] ss:$16 sps:$4 sm:$0xff]  }
  0x8a   :  { %6571 = vmatmul.mubr.bf16.gmra.mrb[4].mxu0 %v8304_v25  ;;  %7387 = vmatmul.mubr.bf16.gmra.mrb[4].mxu1 %v8304_v25  ;;  %v8307_v25 = vcombine.high %v47_v21, %v47_v21 }
  0x8b   :  { %6584 = vmatpush1.bf16.msra.mxu0 %v9806_v23  ;;  %7400 = vmatpush1.bf16.msra.mxu1 %v9809_v24  ;;  %v9900_v23 = vld [vmem:[%s14577_s1 + $0x624] ss:$16 sps:$4 sm:$0xff]   ;;  %v9903_v24 = vld [vmem:[%s14577_s1 + $0x62c] ss:$16 sps:$4 sm:$0xff]  }
  0x8c   :  { %6585 = vmatprep.subr.bf16.mxu0 %v9814_v28  ;;  %7401 = vmatprep.subr.bf16.mxu1 %v9817_v29  ;;  %v9906_v28 = vld [vmem:[%s14577_s1 + $0x644] ss:$16 sps:$4 sm:$0xff]   ;;  %v9909_v29 = vld [vmem:[%s14577_s1 + $0x64c] ss:$16 sps:$4 sm:$0xff]  }
  0x8d   :  { %6611 = vmatprep.mubr.bf16.mxu0 %v8275_v30  ;;  %7427 = vmatprep.mubr.bf16.mxu1 %v8275_v30  ;;  %v9904_v30 = vld [vmem:[%s14577_s1 + $0x640] ss:$16 sps:$4 sm:$0xff]  }
  0x8f   :  { %6586 = vmatpush1.bf16.msra.mxu0 %v9812_v31  ;;  %7402 = vmatpush1.bf16.msra.mxu1 %v9815_v32  ;;  %v8306_v31 = vcombine.low %v47_v21, %v47_v21  ;;  %v11844_v32 = vld [vmem:[%s14578_s0 + $0x18] sm:$0xff] }
  0x90   :  { %6587 = vmatprep.subr.bf16.mxu0 %v9820_v33  ;;  %7403 = vmatprep.subr.bf16.mxu1 %v9823_v34  ;;  %v11849_v33 = vld [vmem:[%s14578_s0 + $0x98] sm:$0xff] }
  0x91   :  { %v9907_v34 = vld [vmem:[%s14577_s1 + $0x648] ss:$16 sps:$4 sm:$0xff]   ;;  %v9989_v21 = vld [vmem:[%s14577_s1 + $0x7ec] ss:$16 sps:$4 sm:$0xff]  }
  0x93   :  { %6588 = vmatpush1.bf16.msra.mxu0 %v9818_v35  ;;  %7404 = vmatpush1.bf16.msra.mxu1 %v9821_v36  ;;  %v9912_v35 = vld [vmem:[%s14577_s1 + $0x664] ss:$16 sps:$4 sm:$0xff]   ;;  %v9915_v36 = vld [vmem:[%s14577_s1 + $0x66c] ss:$16 sps:$4 sm:$0xff]  }
  0x94   :  { %6589 = vmatprep.subr.bf16.mxu0 %v9826_v37  ;;  %7405 = vmatprep.subr.bf16.mxu1 %v9829_v38  ;;  %v8277_v37 = vcombine.high %v11844_v32, %v11849_v33  ;;  %v9910_v38 = vld [vmem:[%s14577_s1 + $0x660] ss:$16 sps:$4 sm:$0xff]  }
  0x97   :  { %6590 = vmatpush1.bf16.msra.mxu0 %v9824_v39  ;;  %7406 = vmatpush1.bf16.msra.mxu1 %v9827_v40  ;;  %v9913_v39 = vld [vmem:[%s14577_s1 + $0x668] ss:$16 sps:$4 sm:$0xff]   ;;  %v9918_v40 = vld [vmem:[%s14577_s1 + $0x684] ss:$16 sps:$4 sm:$0xff]  }
  0x98   :  { %6591 = vmatprep.subr.bf16.mxu0 %v9832_v41  ;;  %7407 = vmatprep.subr.bf16.mxu1 %v9835_v42  ;;  %v9921_v41 = vld [vmem:[%s14577_s1 + $0x68c] ss:$16 sps:$4 sm:$0xff]   ;;  %v9916_v42 = vld [vmem:[%s14577_s1 + $0x680] ss:$16 sps:$4 sm:$0xff]  }
  0x9b   :  { %6592 = vmatpush1.bf16.msra.mxu0 %v9830_v43  ;;  %7408 = vmatpush1.bf16.msra.mxu1 %v9833_v44  ;;  %v9919_v43 = vld [vmem:[%s14577_s1 + $0x688] ss:$16 sps:$4 sm:$0xff]   ;;  %v9924_v44 = vld [vmem:[%s14577_s1 + $0x6a4] ss:$16 sps:$4 sm:$0xff]  }
  0x9c   :  { %6593 = vmatprep.subr.bf16.mxu0 %v9838_v45  ;;  %7409 = vmatprep.subr.bf16.mxu1 %v9841_v46  ;;  %v9927_v45 = vld [vmem:[%s14577_s1 + $0x6ac] ss:$16 sps:$4 sm:$0xff]   ;;  %v9922_v46 = vld [vmem:[%s14577_s1 + $0x6a0] ss:$16 sps:$4 sm:$0xff]  }
  0x9f   :  { %6594 = vmatpush1.bf16.msra.mxu0 %v9836_v47  ;;  %7410 = vmatpush1.bf16.msra.mxu1 %v9839_v48  ;;  %v9925_v47 = vld [vmem:[%s14577_s1 + $0x6a8] ss:$16 sps:$4 sm:$0xff]   ;;  %v9930_v48 = vld [vmem:[%s14577_s1 + $0x6c4] ss:$16 sps:$4 sm:$0xff]  }
  0xa0   :  { %6595 = vmatprep.subr.bf16.mxu0 %v9844_v49  ;;  %7411 = vmatprep.subr.bf16.mxu1 %v9847_v50  ;;  %v9933_v49 = vld [vmem:[%s14577_s1 + $0x6cc] ss:$16 sps:$4 sm:$0xff]   ;;  %v9928_v50 = vld [vmem:[%s14577_s1 + $0x6c0] ss:$16 sps:$4 sm:$0xff]  }
  0xa3   :  { %6596 = vmatpush1.bf16.msra.mxu0 %v9842_v51  ;;  %7412 = vmatpush1.bf16.msra.mxu1 %v9845_v52  ;;  %v9931_v51 = vld [vmem:[%s14577_s1 + $0x6c8] ss:$16 sps:$4 sm:$0xff]   ;;  %v9936_v52 = vld [vmem:[%s14577_s1 + $0x6e4] ss:$16 sps:$4 sm:$0xff]  }
  0xa4   :  { %6597 = vmatprep.subr.bf16.mxu0 %v9850_v53  ;;  %7413 = vmatprep.subr.bf16.mxu1 %v9853_v54  ;;  %v9939_v53 = vld [vmem:[%s14577_s1 + $0x6ec] ss:$16 sps:$4 sm:$0xff]   ;;  %v9934_v54 = vld [vmem:[%s14577_s1 + $0x6e0] ss:$16 sps:$4 sm:$0xff]  }
  0xa7   :  { %6598 = vmatpush1.bf16.msra.mxu0 %v9848_v55  ;;  %7414 = vmatpush1.bf16.msra.mxu1 %v9851_v56  ;;  %v9937_v55 = vld [vmem:[%s14577_s1 + $0x6e8] ss:$16 sps:$4 sm:$0xff]   ;;  %v9942_v56 = vld [vmem:[%s14577_s1 + $0x704] ss:$16 sps:$4 sm:$0xff]  }
  0xa8   :  { %6599 = vmatprep.subr.bf16.mxu0 %v9856_v57  ;;  %7415 = vmatprep.subr.bf16.mxu1 %v9859_v58  ;;  %v9945_v57 = vld [vmem:[%s14577_s1 + $0x70c] ss:$16 sps:$4 sm:$0xff]   ;;  %v9940_v58 = vld [vmem:[%s14577_s1 + $0x700] ss:$16 sps:$4 sm:$0xff]  }
  0xab   :  { %6600 = vmatpush1.bf16.msra.mxu0 %v9854_v59  ;;  %7416 = vmatpush1.bf16.msra.mxu1 %v9857_v60  ;;  %v9943_v59 = vld [vmem:[%s14577_s1 + $0x708] ss:$16 sps:$4 sm:$0xff]   ;;  %v9948_v60 = vld [vmem:[%s14577_s1 + $0x724] ss:$16 sps:$4 sm:$0xff]  }
  0xac   :  { %6601 = vmatprep.subr.bf16.mxu0 %v9862_v61  ;;  %7417 = vmatprep.subr.bf16.mxu1 %v9865_v62  ;;  %v9951_v61 = vld [vmem:[%s14577_s1 + $0x72c] ss:$16 sps:$4 sm:$0xff]   ;;  %v9946_v62 = vld [vmem:[%s14577_s1 + $0x720] ss:$16 sps:$4 sm:$0xff]  }
  0xaf   :  { %6602 = vmatpush1.bf16.msra.mxu0 %v9860_v63  ;;  %7418 = vmatpush1.bf16.msra.mxu1 %v9863_v0  ;;  %v9949_v63 = vld [vmem:[%s14577_s1 + $0x728] ss:$16 sps:$4 sm:$0xff]   ;;  %v9954_v0 = vld [vmem:[%s14577_s1 + $0x744] ss:$16 sps:$4 sm:$0xff]  }
  0xb0   :  { %6603 = vmatprep.subr.bf16.mxu0 %v9868_v1  ;;  %7419 = vmatprep.subr.bf16.mxu1 %v9871_v2  ;;  %v9957_v1 = vld [vmem:[%s14577_s1 + $0x74c] ss:$16 sps:$4 sm:$0xff]   ;;  %v9952_v2 = vld [vmem:[%s14577_s1 + $0x740] ss:$16 sps:$4 sm:$0xff]  }
  0xb3   :  { %6604 = vmatpush1.bf16.msra.mxu0 %v9866_v3  ;;  %7420 = vmatpush1.bf16.msra.mxu1 %v9869_v4  ;;  %v9955_v3 = vld [vmem:[%s14577_s1 + $0x748] ss:$16 sps:$4 sm:$0xff]   ;;  %v9960_v4 = vld [vmem:[%s14577_s1 + $0x764] ss:$16 sps:$4 sm:$0xff]  }
  0xb4   :  { %6605 = vmatprep.subr.bf16.mxu0 %v9874_v5  ;;  %7421 = vmatprep.subr.bf16.mxu1 %v9877_v6  ;;  %v9963_v5 = vld [vmem:[%s14577_s1 + $0x76c] ss:$16 sps:$4 sm:$0xff]   ;;  %v9958_v6 = vld [vmem:[%s14577_s1 + $0x760] ss:$16 sps:$4 sm:$0xff]  }
  0xb7   :  { %6606 = vmatpush1.bf16.msra.mxu0 %v9872_v7  ;;  %7422 = vmatpush1.bf16.msra.mxu1 %v9875_v8  ;;  %v9961_v7 = vld [vmem:[%s14577_s1 + $0x768] ss:$16 sps:$4 sm:$0xff]   ;;  %v9966_v8 = vld [vmem:[%s14577_s1 + $0x784] ss:$16 sps:$4 sm:$0xff]  }
  0xb8   :  { %6607 = vmatprep.subr.bf16.mxu0 %v9881_v9  ;;  %7423 = vmatprep.subr.bf16.mxu1 %v9884_v10  ;;  %v9969_v9 = vld [vmem:[%s14577_s1 + $0x78c] ss:$16 sps:$4 sm:$0xff]   ;;  %v9964_v10 = vld [vmem:[%s14577_s1 + $0x780] ss:$16 sps:$4 sm:$0xff]  }
  0xbb   :  { %6608 = vmatpush1.bf16.msra.mxu0 %v9879_v11  ;;  %7424 = vmatpush1.bf16.msra.mxu1 %v9882_v12  ;;  %v9967_v11 = vld [vmem:[%s14577_s1 + $0x788] ss:$16 sps:$4 sm:$0xff]   ;;  %v9972_v12 = vld [vmem:[%s14577_s1 + $0x7a4] ss:$16 sps:$4 sm:$0xff]  }
  0xbc   :  { %6609 = vmatprep.subr.bf16.mxu0 %v9888_v13  ;;  %7425 = vmatprep.subr.bf16.mxu1 %v9891_v14  ;;  %v9975_v13 = vld [vmem:[%s14577_s1 + $0x7ac] ss:$16 sps:$4 sm:$0xff]   ;;  %v9970_v14 = vld [vmem:[%s14577_s1 + $0x7a0] ss:$16 sps:$4 sm:$0xff]  }
  0xbf   :  { %6610 = vmatpush1.bf16.msra.mxu0 %v9886_v15  ;;  %7426 = vmatpush1.bf16.msra.mxu1 %v9889_v16  ;;  %v9973_v15 = vld [vmem:[%s14577_s1 + $0x7a8] ss:$16 sps:$4 sm:$0xff]   ;;  %v9979_v16 = vld [vmem:[%s14577_s1 + $0x7c4] ss:$16 sps:$4 sm:$0xff]  }
  0xc0   :  { %6630 = vmatprep.subr.bf16.mxu0 %v9894_v17  ;;  %7446 = vmatprep.subr.bf16.mxu1 %v9897_v18  ;;  %v9982_v17 = vld [vmem:[%s14577_s1 + $0x7cc] ss:$16 sps:$4 sm:$0xff]   ;;  %v9977_v18 = vld [vmem:[%s14577_s1 + $0x7c0] ss:$16 sps:$4 sm:$0xff]  }
  0xc2   :  { %6612 = vmatmul.mubr.bf16.vlgmr.msra.gmra.mrb[0].mxu0 %v8274_v19  ;;  %7428 = vmatmul.mubr.bf16.vlgmr.msra.gmra.mrb[0].mxu1 %v8274_v19  ;;  %v9980_v19 = vld [vmem:[%s14577_s1 + $0x7c8] ss:$16 sps:$4 sm:$0xff]  }
  0xc3   :  { %6631 = vmatpush1.bf16.msra.mxu0 %v9892_v20  ;;  %7447 = vmatpush1.bf16.msra.mxu1 %v9895_v22  ;;  %v9986_v20 = vld [vmem:[%s14577_s1 + $0x7e4] ss:$16 sps:$4 sm:$0xff]   ;;  %v9984_v22 = vld [vmem:[%s14577_s1 + $0x7e0] ss:$16 sps:$4 sm:$0xff]  }
  0xc4   :  { %6632 = vmatprep.subr.bf16.mxu0 %v9900_v23  ;;  %7448 = vmatprep.subr.bf16.mxu1 %v9903_v24  ;;  %v9987_v23 = vld [vmem:[%s14577_s1 + $0x7e8] ss:$16 sps:$4 sm:$0xff]   ;;  %v9992_v24 = vld [vmem:[%s14577_s1 + $0x804] ss:$16 sps:$4 sm:$0xff]  }
  0xc5   :  { %6621 = vmatprep.mubr.bf16.mxu0 %v8307_v25  ;;  %7437 = vmatprep.mubr.bf16.mxu1 %v8307_v25  ;;  %v9995_v25 = vld [vmem:[%s14577_s1 + $0x80c] ss:$16 sps:$4 sm:$0xff]  }
  0xc7   :  { %6633 = vmatpush1.bf16.msra.mxu0 %v9898_v26  ;;  %7449 = vmatpush1.bf16.msra.mxu1 %v9901_v27  ;;  %v8276_v26 = vcombine.low %v11844_v32, %v11849_v33  ;;  %v9990_v27 = vld [vmem:[%s14577_s1 + $0x800] ss:$16 sps:$4 sm:$0xff]  }
  0xc8   :  { %6634 = vmatprep.subr.bf16.mxu0 %v9906_v28  ;;  %7450 = vmatprep.subr.bf16.mxu1 %v9909_v29  ;;  %v48_v28 = vld [vmem:[%s14578_s0 + $0x118] sm:$0xff]  ;;  %v9996_v33 = vld [vmem:[%s14577_s1 + $0x820] ss:$16 sps:$4 sm:$0xff]  }
  0xc9   :  { %v9993_v29 = vld [vmem:[%s14577_s1 + $0x808] ss:$16 sps:$4 sm:$0xff]   ;;  %v8309_v32 = vcombine.high %v48_v28, %v48_v28 }
  0xca   :  { %6622 = vmatmul.mubr.bf16.gmra.mrb[4].mxu0 %v8306_v31  ;;  %7438 = vmatmul.mubr.bf16.gmra.mrb[4].mxu1 %v8306_v31  ;;  %v10001_v31 = vld [vmem:[%s14577_s1 + $0x82c] ss:$16 sps:$4 sm:$0xff]  }
  0xcb   :  { %6635 = vmatpush1.bf16.msra.mxu0 %v9904_v30  ;;  %7451 = vmatpush1.bf16.msra.mxu1 %v9907_v34  ;;  %v9998_v30 = vld [vmem:[%s14577_s1 + $0x824] ss:$16 sps:$4 sm:$0xff]   ;;  %v9999_v34 = vld [vmem:[%s14577_s1 + $0x828] ss:$16 sps:$4 sm:$0xff]  }
  0xcc   :  { %6636 = vmatprep.subr.bf16.mxu0 %v9912_v35  ;;  %7452 = vmatprep.subr.bf16.mxu1 %v9915_v36  ;;  %v10004_v35 = vld [vmem:[%s14577_s1 + $0x844] ss:$16 sps:$4 sm:$0xff]   ;;  %v10007_v36 = vld [vmem:[%s14577_s1 + $0x84c] ss:$16 sps:$4 sm:$0xff]  }
  0xcd   :  { %6662 = vmatprep.mubr.bf16.mxu0 %v8277_v37  ;;  %7478 = vmatprep.mubr.bf16.mxu1 %v8277_v37  ;;  %v10002_v37 = vld [vmem:[%s14577_s1 + $0x840] ss:$16 sps:$4 sm:$0xff]  }
  0xcf   :  { %6637 = vmatpush1.bf16.msra.mxu0 %v9910_v38  ;;  %7453 = vmatpush1.bf16.msra.mxu1 %v9913_v39  ;;  %v12053_v38 = vld [vmem:[%s14578_s0 + $0x20] sm:$0xff]  ;;  %v8308_v39 = vcombine.low %v48_v28, %v48_v28  ;;  %v10087_v28 = vld [vmem:[%s14577_s1 + $0x9ec] ss:$16 sps:$4 sm:$0xff]  }
  0xd0   :  { %6638 = vmatprep.subr.bf16.mxu0 %v9918_v40  ;;  %7454 = vmatprep.subr.bf16.mxu1 %v9921_v41  ;;  %v12058_v40 = vld [vmem:[%s14578_s0 + $0xa0] sm:$0xff]  ;;  %v10005_v41 = vld [vmem:[%s14577_s1 + $0x848] ss:$16 sps:$4 sm:$0xff]  }
  0xd3   :  { %6639 = vmatpush1.bf16.msra.mxu0 %v9916_v42  ;;  %7455 = vmatpush1.bf16.msra.mxu1 %v9919_v43  ;;  %v10010_v42 = vld [vmem:[%s14577_s1 + $0x864] ss:$16 sps:$4 sm:$0xff]   ;;  %v10013_v43 = vld [vmem:[%s14577_s1 + $0x86c] ss:$16 sps:$4 sm:$0xff]  }
  0xd4   :  { %6640 = vmatprep.subr.bf16.mxu0 %v9924_v44  ;;  %7456 = vmatprep.subr.bf16.mxu1 %v9927_v45  ;;  %v8279_v44 = vcombine.high %v12053_v38, %v12058_v40  ;;  %v10008_v45 = vld [vmem:[%s14577_s1 + $0x860] ss:$16 sps:$4 sm:$0xff]  }
  0xd7   :  { %6641 = vmatpush1.bf16.msra.mxu0 %v9922_v46  ;;  %7457 = vmatpush1.bf16.msra.mxu1 %v9925_v47  ;;  %v10011_v46 = vld [vmem:[%s14577_s1 + $0x868] ss:$16 sps:$4 sm:$0xff]   ;;  %v10016_v47 = vld [vmem:[%s14577_s1 + $0x884] ss:$16 sps:$4 sm:$0xff]  }
  0xd8   :  { %6642 = vmatprep.subr.bf16.mxu0 %v9930_v48  ;;  %7458 = vmatprep.subr.bf16.mxu1 %v9933_v49  ;;  %v10019_v48 = vld [vmem:[%s14577_s1 + $0x88c] ss:$16 sps:$4 sm:$0xff]   ;;  %v10014_v49 = vld [vmem:[%s14577_s1 + $0x880] ss:$16 sps:$4 sm:$0xff]  }
  0xdb   :  { %6643 = vmatpush1.bf16.msra.mxu0 %v9928_v50  ;;  %7459 = vmatpush1.bf16.msra.mxu1 %v9931_v51  ;;  %v10017_v50 = vld [vmem:[%s14577_s1 + $0x888] ss:$16 sps:$4 sm:$0xff]   ;;  %v10022_v51 = vld [vmem:[%s14577_s1 + $0x8a4] ss:$16 sps:$4 sm:$0xff]  }
  0xdc   :  { %6644 = vmatprep.subr.bf16.mxu0 %v9936_v52  ;;  %7460 = vmatprep.subr.bf16.mxu1 %v9939_v53  ;;  %v10025_v52 = vld [vmem:[%s14577_s1 + $0x8ac] ss:$16 sps:$4 sm:$0xff]   ;;  %v10020_v53 = vld [vmem:[%s14577_s1 + $0x8a0] ss:$16 sps:$4 sm:$0xff]  }
  0xdf   :  { %6645 = vmatpush1.bf16.msra.mxu0 %v9934_v54  ;;  %7461 = vmatpush1.bf16.msra.mxu1 %v9937_v55  ;;  %v10023_v54 = vld [vmem:[%s14577_s1 + $0x8a8] ss:$16 sps:$4 sm:$0xff]   ;;  %v10028_v55 = vld [vmem:[%s14577_s1 + $0x8c4] ss:$16 sps:$4 sm:$0xff]  }
  0xe0   :  { %6646 = vmatprep.subr.bf16.mxu0 %v9942_v56  ;;  %7462 = vmatprep.subr.bf16.mxu1 %v9945_v57  ;;  %v10031_v56 = vld [vmem:[%s14577_s1 + $0x8cc] ss:$16 sps:$4 sm:$0xff]   ;;  %v10026_v57 = vld [vmem:[%s14577_s1 + $0x8c0] ss:$16 sps:$4 sm:$0xff]  }
  0xe3   :  { %6647 = vmatpush1.bf16.msra.mxu0 %v9940_v58  ;;  %7463 = vmatpush1.bf16.msra.mxu1 %v9943_v59  ;;  %v10029_v58 = vld [vmem:[%s14577_s1 + $0x8c8] ss:$16 sps:$4 sm:$0xff]   ;;  %v10034_v59 = vld [vmem:[%s14577_s1 + $0x8e4] ss:$16 sps:$4 sm:$0xff]  }
  0xe4   :  { %6648 = vmatprep.subr.bf16.mxu0 %v9948_v60  ;;  %7464 = vmatprep.subr.bf16.mxu1 %v9951_v61  ;;  %v10037_v60 = vld [vmem:[%s14577_s1 + $0x8ec] ss:$16 sps:$4 sm:$0xff]   ;;  %v10032_v61 = vld [vmem:[%s14577_s1 + $0x8e0] ss:$16 sps:$4 sm:$0xff]  }
  0xe7   :  { %6649 = vmatpush1.bf16.msra.mxu0 %v9946_v62  ;;  %7465 = vmatpush1.bf16.msra.mxu1 %v9949_v63  ;;  %v10035_v62 = vld [vmem:[%s14577_s1 + $0x8e8] ss:$16 sps:$4 sm:$0xff]   ;;  %v10040_v63 = vld [vmem:[%s14577_s1 + $0x904] ss:$16 sps:$4 sm:$0xff]  }
  0xe8   :  { %6650 = vmatprep.subr.bf16.mxu0 %v9954_v0  ;;  %7466 = vmatprep.subr.bf16.mxu1 %v9957_v1  ;;  %v10043_v0 = vld [vmem:[%s14577_s1 + $0x90c] ss:$16 sps:$4 sm:$0xff]   ;;  %v10038_v1 = vld [vmem:[%s14577_s1 + $0x900] ss:$16 sps:$4 sm:$0xff]  }
  0xeb   :  { %6651 = vmatpush1.bf16.msra.mxu0 %v9952_v2  ;;  %7467 = vmatpush1.bf16.msra.mxu1 %v9955_v3  ;;  %v10041_v2 = vld [vmem:[%s14577_s1 + $0x908] ss:$16 sps:$4 sm:$0xff]   ;;  %v10046_v3 = vld [vmem:[%s14577_s1 + $0x924] ss:$16 sps:$4 sm:$0xff]  }
  0xec   :  { %6652 = vmatprep.subr.bf16.mxu0 %v9960_v4  ;;  %7468 = vmatprep.subr.bf16.mxu1 %v9963_v5  ;;  %v10049_v4 = vld [vmem:[%s14577_s1 + $0x92c] ss:$16 sps:$4 sm:$0xff]   ;;  %v10044_v5 = vld [vmem:[%s14577_s1 + $0x920] ss:$16 sps:$4 sm:$0xff]  }
  0xef   :  { %6653 = vmatpush1.bf16.msra.mxu0 %v9958_v6  ;;  %7469 = vmatpush1.bf16.msra.mxu1 %v9961_v7  ;;  %v10047_v6 = vld [vmem:[%s14577_s1 + $0x928] ss:$16 sps:$4 sm:$0xff]   ;;  %v10052_v7 = vld [vmem:[%s14577_s1 + $0x944] ss:$16 sps:$4 sm:$0xff]  }
  0xf0   :  { %6654 = vmatprep.subr.bf16.mxu0 %v9966_v8  ;;  %7470 = vmatprep.subr.bf16.mxu1 %v9969_v9  ;;  %v10055_v8 = vld [vmem:[%s14577_s1 + $0x94c] ss:$16 sps:$4 sm:$0xff]   ;;  %v10050_v9 = vld [vmem:[%s14577_s1 + $0x940] ss:$16 sps:$4 sm:$0xff]  }
  0xf3   :  { %6655 = vmatpush1.bf16.msra.mxu0 %v9964_v10  ;;  %7471 = vmatpush1.bf16.msra.mxu1 %v9967_v11  ;;  %v10053_v10 = vld [vmem:[%s14577_s1 + $0x948] ss:$16 sps:$4 sm:$0xff]   ;;  %v10058_v11 = vld [vmem:[%s14577_s1 + $0x964] ss:$16 sps:$4 sm:$0xff]  }
  0xf4   :  { %6656 = vmatprep.subr.bf16.mxu0 %v9972_v12  ;;  %7472 = vmatprep.subr.bf16.mxu1 %v9975_v13  ;;  %v10061_v12 = vld [vmem:[%s14577_s1 + $0x96c] ss:$16 sps:$4 sm:$0xff]   ;;  %v10056_v13 = vld [vmem:[%s14577_s1 + $0x960] ss:$16 sps:$4 sm:$0xff]  }
  0xf7   :  { %6657 = vmatpush1.bf16.msra.mxu0 %v9970_v14  ;;  %7473 = vmatpush1.bf16.msra.mxu1 %v9973_v15  ;;  %v10059_v14 = vld [vmem:[%s14577_s1 + $0x968] ss:$16 sps:$4 sm:$0xff]   ;;  %v10064_v15 = vld [vmem:[%s14577_s1 + $0x984] ss:$16 sps:$4 sm:$0xff]  }
  0xf8   :  { %6658 = vmatprep.subr.bf16.mxu0 %v9979_v16  ;;  %7474 = vmatprep.subr.bf16.mxu1 %v9982_v17  ;;  %v10067_v16 = vld [vmem:[%s14577_s1 + $0x98c] ss:$16 sps:$4 sm:$0xff]   ;;  %v10062_v17 = vld [vmem:[%s14577_s1 + $0x980] ss:$16 sps:$4 sm:$0xff]  }
  0xfb   :  { %6659 = vmatpush1.bf16.msra.mxu0 %v9977_v18  ;;  %7475 = vmatpush1.bf16.msra.mxu1 %v9980_v19  ;;  %v10065_v18 = vld [vmem:[%s14577_s1 + $0x988] ss:$16 sps:$4 sm:$0xff]   ;;  %v10070_v19 = vld [vmem:[%s14577_s1 + $0x9a4] ss:$16 sps:$4 sm:$0xff]  }
  0xfc   :  { %6660 = vmatprep.subr.bf16.mxu0 %v9986_v20  ;;  %7476 = vmatprep.subr.bf16.mxu1 %v9989_v21  ;;  %v10073_v20 = vld [vmem:[%s14577_s1 + $0x9ac] ss:$16 sps:$4 sm:$0xff]   ;;  %v10068_v21 = vld [vmem:[%s14577_s1 + $0x9a0] ss:$16 sps:$4 sm:$0xff]  }
  0xff   :  { %6661 = vmatpush1.bf16.msra.mxu0 %v9984_v22  ;;  %7477 = vmatpush1.bf16.msra.mxu1 %v9987_v23  ;;  %v10071_v22 = vld [vmem:[%s14577_s1 + $0x9a8] ss:$16 sps:$4 sm:$0xff]   ;;  %v10077_v23 = vld [vmem:[%s14577_s1 + $0x9c4] ss:$16 sps:$4 sm:$0xff]  }
 0x100   :  { %6681 = vmatprep.subr.bf16.mxu0 %v9992_v24  ;;  %7497 = vmatprep.subr.bf16.mxu1 %v9995_v25  ;;  %v10080_v24 = vld [vmem:[%s14577_s1 + $0x9cc] ss:$16 sps:$4 sm:$0xff]   ;;  %v10075_v25 = vld [vmem:[%s14577_s1 + $0x9c0] ss:$16 sps:$4 sm:$0xff]  }
 0x102   :  { %6663 = vmatmul.mubr.bf16.vlgmr.msra.gmra.mrb[0].mxu0 %v8276_v26  ;;  %7479 = vmatmul.mubr.bf16.vlgmr.msra.gmra.mrb[0].mxu1 %v8276_v26  ;;  %v10078_v26 = vld [vmem:[%s14577_s1 + $0x9c8] ss:$16 sps:$4 sm:$0xff]  }
 0x103   :  { %6682 = vmatpush1.bf16.msra.mxu0 %v9990_v27  ;;  %7498 = vmatpush1.bf16.msra.mxu1 %v9993_v29  ;;  %v10084_v27 = vld [vmem:[%s14577_s1 + $0x9e4] ss:$16 sps:$4 sm:$0xff]   ;;  %v10082_v29 = vld [vmem:[%s14577_s1 + $0x9e0] ss:$16 sps:$4 sm:$0xff]  }
 0x104   :  { %6683 = vmatprep.subr.bf16.mxu0 %v9998_v30  ;;  %7499 = vmatprep.subr.bf16.mxu1 %v10001_v31  ;;  %v10085_v30 = vld [vmem:[%s14577_s1 + $0x9e8] ss:$16 sps:$4 sm:$0xff]   ;;  %v10090_v31 = vld [vmem:[%s14577_s1 + $0xa04] ss:$16 sps:$4 sm:$0xff]  }
 0x105   :  { %6672 = vmatprep.mubr.bf16.mxu0 %v8309_v32  ;;  %7488 = vmatprep.mubr.bf16.mxu1 %v8309_v32  ;;  %v10093_v32 = vld [vmem:[%s14577_s1 + $0xa0c] ss:$16 sps:$4 sm:$0xff]  }
 0x107   :  { %6684 = vmatpush1.bf16.msra.mxu0 %v9996_v33  ;;  %7500 = vmatpush1.bf16.msra.mxu1 %v9999_v34  ;;  %v49_v33 = vld [vmem:[%s14578_s0 + $0x120] sm:$0xff]  ;;  %v8278_v34 = vcombine.low %v12053_v38, %v12058_v40  ;;  %v10099_v38 = vld [vmem:[%s14577_s1 + $0xa2c] ss:$16 sps:$4 sm:$0xff]   ;;  %v10097_v40 = vld [vmem:[%s14577_s1 + $0xa28] ss:$16 sps:$4 sm:$0xff]  }
 0x108   :  { %6685 = vmatprep.subr.bf16.mxu0 %v10004_v35  ;;  %7501 = vmatprep.subr.bf16.mxu1 %v10007_v36  ;;  %v10088_v35 = vld [vmem:[%s14577_s1 + $0xa00] ss:$16 sps:$4 sm:$0xff]   ;;  %v10091_v36 = vld [vmem:[%s14577_s1 + $0xa08] ss:$16 sps:$4 sm:$0xff]  }
 0x10a   :  { %6673 = vmatmul.mubr.bf16.gmra.mrb[4].mxu0 %v8308_v39  ;;  %7489 = vmatmul.mubr.bf16.gmra.mrb[4].mxu1 %v8308_v39  ;;  %v10094_v39 = vld [vmem:[%s14577_s1 + $0xa20] ss:$16 sps:$4 sm:$0xff]  }
 0x10b   :  { %6686 = vmatpush1.bf16.msra.mxu0 %v10002_v37  ;;  %7502 = vmatpush1.bf16.msra.mxu1 %v10005_v41  ;;  %v10096_v37 = vld [vmem:[%s14577_s1 + $0xa24] ss:$16 sps:$4 sm:$0xff]   ;;  %v8311_v41 = vcombine.high %v49_v33, %v49_v33 }
 0x10c   :  { %6687 = vmatprep.subr.bf16.mxu0 %v10010_v42  ;;  %7503 = vmatprep.subr.bf16.mxu1 %v10013_v43  ;;  %v10102_v42 = vld [vmem:[%s14577_s1 + $0xa44] ss:$16 sps:$4 sm:$0xff]   ;;  %v10105_v43 = vld [vmem:[%s14577_s1 + $0xa4c] ss:$16 sps:$4 sm:$0xff]  }
 0x10d   :  { %6713 = vmatprep.mubr.bf16.mxu0 %v8279_v44  ;;  %7529 = vmatprep.mubr.bf16.mxu1 %v8279_v44  ;;  %v12259_v44 = vld [vmem:[%s14578_s0 + $0x28] sm:$0xff] }
 0x10f   :  { %6688 = vmatpush1.bf16.msra.mxu0 %v10008_v45  ;;  %7504 = vmatpush1.bf16.msra.mxu1 %v10011_v46  ;;  %v12264_v45 = vld [vmem:[%s14578_s0 + $0xa8] sm:$0xff]  ;;  %v8310_v46 = vcombine.low %v49_v33, %v49_v33 }
 0x110   :  { %6689 = vmatprep.subr.bf16.mxu0 %v10016_v47  ;;  %7505 = vmatprep.subr.bf16.mxu1 %v10019_v48  ;;  %v10100_v47 = vld [vmem:[%s14577_s1 + $0xa40] ss:$16 sps:$4 sm:$0xff]   ;;  %v10103_v48 = vld [vmem:[%s14577_s1 + $0xa48] ss:$16 sps:$4 sm:$0xff]  }
 0x111   :  { %v10176_v33 = vld [vmem:[%s14577_s1 + $0xbc8] ss:$16 sps:$4 sm:$0xff]  }
 0x113   :  { %6690 = vmatpush1.bf16.msra.mxu0 %v10014_v49  ;;  %7506 = vmatpush1.bf16.msra.mxu1 %v10017_v50  ;;  %v10108_v49 = vld [vmem:[%s14577_s1 + $0xa64] ss:$16 sps:$4 sm:$0xff]   ;;  %v10111_v50 = vld [vmem:[%s14577_s1 + $0xa6c] ss:$16 sps:$4 sm:$0xff]  }
 0x114   :  { %6691 = vmatprep.subr.bf16.mxu0 %v10022_v51  ;;  %7507 = vmatprep.subr.bf16.mxu1 %v10025_v52  ;;  %v8281_v51 = vcombine.high %v12259_v44, %v12264_v45  ;;  %v10106_v52 = vld [vmem:[%s14577_s1 + $0xa60] ss:$16 sps:$4 sm:$0xff]  }
 0x117   :  { %6692 = vmatpush1.bf16.msra.mxu0 %v10020_v53  ;;  %7508 = vmatpush1.bf16.msra.mxu1 %v10023_v54  ;;  %v10109_v53 = vld [vmem:[%s14577_s1 + $0xa68] ss:$16 sps:$4 sm:$0xff]   ;;  %v10114_v54 = vld [vmem:[%s14577_s1 + $0xa84] ss:$16 sps:$4 sm:$0xff]  }
 0x118   :  { %6693 = vmatprep.subr.bf16.mxu0 %v10028_v55  ;;  %7509 = vmatprep.subr.bf16.mxu1 %v10031_v56  ;;  %v10117_v55 = vld [vmem:[%s14577_s1 + $0xa8c] ss:$16 sps:$4 sm:$0xff]   ;;  %v10112_v56 = vld [vmem:[%s14577_s1 + $0xa80] ss:$16 sps:$4 sm:$0xff]  }
 0x11b   :  { %6694 = vmatpush1.bf16.msra.mxu0 %v10026_v57  ;;  %7510 = vmatpush1.bf16.msra.mxu1 %v10029_v58  ;;  %v10115_v57 = vld [vmem:[%s14577_s1 + $0xa88] ss:$16 sps:$4 sm:$0xff]   ;;  %v10120_v58 = vld [vmem:[%s14577_s1 + $0xaa4] ss:$16 sps:$4 sm:$0xff]  }
 0x11c   :  { %6695 = vmatprep.subr.bf16.mxu0 %v10034_v59  ;;  %7511 = vmatprep.subr.bf16.mxu1 %v10037_v60  ;;  %v10123_v59 = vld [vmem:[%s14577_s1 + $0xaac] ss:$16 sps:$4 sm:$0xff]   ;;  %v10118_v60 = vld [vmem:[%s14577_s1 + $0xaa0] ss:$16 sps:$4 sm:$0xff]  }
 0x11f   :  { %6696 = vmatpush1.bf16.msra.mxu0 %v10032_v61  ;;  %7512 = vmatpush1.bf16.msra.mxu1 %v10035_v62  ;;  %v10121_v61 = vld [vmem:[%s14577_s1 + $0xaa8] ss:$16 sps:$4 sm:$0xff]   ;;  %v10126_v62 = vld [vmem:[%s14577_s1 + $0xac4] ss:$16 sps:$4 sm:$0xff]  }
 0x120   :  { %6697 = vmatprep.subr.bf16.mxu0 %v10040_v63  ;;  %7513 = vmatprep.subr.bf16.mxu1 %v10043_v0  ;;  %v10129_v63 = vld [vmem:[%s14577_s1 + $0xacc] ss:$16 sps:$4 sm:$0xff]   ;;  %v10124_v0 = vld [vmem:[%s14577_s1 + $0xac0] ss:$16 sps:$4 sm:$0xff]  }
 0x123   :  { %6698 = vmatpush1.bf16.msra.mxu0 %v10038_v1  ;;  %7514 = vmatpush1.bf16.msra.mxu1 %v10041_v2  ;;  %v10127_v1 = vld [vmem:[%s14577_s1 + $0xac8] ss:$16 sps:$4 sm:$0xff]   ;;  %v10132_v2 = vld [vmem:[%s14577_s1 + $0xae4] ss:$16 sps:$4 sm:$0xff]  }
 0x124   :  { %6699 = vmatprep.subr.bf16.mxu0 %v10046_v3  ;;  %7515 = vmatprep.subr.bf16.mxu1 %v10049_v4  ;;  %v10135_v3 = vld [vmem:[%s14577_s1 + $0xaec] ss:$16 sps:$4 sm:$0xff]   ;;  %v10130_v4 = vld [vmem:[%s14577_s1 + $0xae0] ss:$16 sps:$4 sm:$0xff]  }
 0x127   :  { %6700 = vmatpush1.bf16.msra.mxu0 %v10044_v5  ;;  %7516 = vmatpush1.bf16.msra.mxu1 %v10047_v6  ;;  %v10133_v5 = vld [vmem:[%s14577_s1 + $0xae8] ss:$16 sps:$4 sm:$0xff]   ;;  %v10138_v6 = vld [vmem:[%s14577_s1 + $0xb04] ss:$16 sps:$4 sm:$0xff]  }
 0x128   :  { %6701 = vmatprep.subr.bf16.mxu0 %v10052_v7  ;;  %7517 = vmatprep.subr.bf16.mxu1 %v10055_v8  ;;  %v10141_v7 = vld [vmem:[%s14577_s1 + $0xb0c] ss:$16 sps:$4 sm:$0xff]   ;;  %v10136_v8 = vld [vmem:[%s14577_s1 + $0xb00] ss:$16 sps:$4 sm:$0xff]  }
 0x12b   :  { %6702 = vmatpush1.bf16.msra.mxu0 %v10050_v9  ;;  %7518 = vmatpush1.bf16.msra.mxu1 %v10053_v10  ;;  %v10139_v9 = vld [vmem:[%s14577_s1 + $0xb08] ss:$16 sps:$4 sm:$0xff]   ;;  %v10144_v10 = vld [vmem:[%s14577_s1 + $0xb24] ss:$16 sps:$4 sm:$0xff]  }
 0x12c   :  { %6703 = vmatprep.subr.bf16.mxu0 %v10058_v11  ;;  %7519 = vmatprep.subr.bf16.mxu1 %v10061_v12  ;;  %v10147_v11 = vld [vmem:[%s14577_s1 + $0xb2c] ss:$16 sps:$4 sm:$0xff]   ;;  %v10142_v12 = vld [vmem:[%s14577_s1 + $0xb20] ss:$16 sps:$4 sm:$0xff]  }
 0x12f   :  { %6704 = vmatpush1.bf16.msra.mxu0 %v10056_v13  ;;  %7520 = vmatpush1.bf16.msra.mxu1 %v10059_v14  ;;  %v10145_v13 = vld [vmem:[%s14577_s1 + $0xb28] ss:$16 sps:$4 sm:$0xff]   ;;  %v10150_v14 = vld [vmem:[%s14577_s1 + $0xb44] ss:$16 sps:$4 sm:$0xff]  }
 0x130   :  { %6705 = vmatprep.subr.bf16.mxu0 %v10064_v15  ;;  %7521 = vmatprep.subr.bf16.mxu1 %v10067_v16  ;;  %v10153_v15 = vld [vmem:[%s14577_s1 + $0xb4c] ss:$16 sps:$4 sm:$0xff]   ;;  %v10148_v16 = vld [vmem:[%s14577_s1 + $0xb40] ss:$16 sps:$4 sm:$0xff]  }
 0x133   :  { %6706 = vmatpush1.bf16.msra.mxu0 %v10062_v17  ;;  %7522 = vmatpush1.bf16.msra.mxu1 %v10065_v18  ;;  %v10151_v17 = vld [vmem:[%s14577_s1 + $0xb48] ss:$16 sps:$4 sm:$0xff]   ;;  %v10156_v18 = vld [vmem:[%s14577_s1 + $0xb64] ss:$16 sps:$4 sm:$0xff]  }
 0x134   :  { %6707 = vmatprep.subr.bf16.mxu0 %v10070_v19  ;;  %7523 = vmatprep.subr.bf16.mxu1 %v10073_v20  ;;  %v10159_v19 = vld [vmem:[%s14577_s1 + $0xb6c] ss:$16 sps:$4 sm:$0xff]   ;;  %v10154_v20 = vld [vmem:[%s14577_s1 + $0xb60] ss:$16 sps:$4 sm:$0xff]  }
 0x137   :  { %6708 = vmatpush1.bf16.msra.mxu0 %v10068_v21  ;;  %7524 = vmatpush1.bf16.msra.mxu1 %v10071_v22  ;;  %v10157_v21 = vld [vmem:[%s14577_s1 + $0xb68] ss:$16 sps:$4 sm:$0xff]   ;;  %v10162_v22 = vld [vmem:[%s14577_s1 + $0xb84] ss:$16 sps:$4 sm:$0xff]  }
 0x138   :  { %6709 = vmatprep.subr.bf16.mxu0 %v10077_v23  ;;  %7525 = vmatprep.subr.bf16.mxu1 %v10080_v24  ;;  %v10165_v23 = vld [vmem:[%s14577_s1 + $0xb8c] ss:$16 sps:$4 sm:$0xff]   ;;  %v10160_v24 = vld [vmem:[%s14577_s1 + $0xb80] ss:$16 sps:$4 sm:$0xff]  }
 0x13b   :  { %6710 = vmatpush1.bf16.msra.mxu0 %v10075_v25  ;;  %7526 = vmatpush1.bf16.msra.mxu1 %v10078_v26  ;;  %v10163_v25 = vld [vmem:[%s14577_s1 + $0xb88] ss:$16 sps:$4 sm:$0xff]   ;;  %v10168_v26 = vld [vmem:[%s14577_s1 + $0xba4] ss:$16 sps:$4 sm:$0xff]  }
 0x13c   :  { %6711 = vmatprep.subr.bf16.mxu0 %v10084_v27  ;;  %7527 = vmatprep.subr.bf16.mxu1 %v10087_v28  ;;  %v10171_v27 = vld [vmem:[%s14577_s1 + $0xbac] ss:$16 sps:$4 sm:$0xff]   ;;  %v10166_v28 = vld [vmem:[%s14577_s1 + $0xba0] ss:$16 sps:$4 sm:$0xff]  }
 0x13f   :  { %6712 = vmatpush1.bf16.msra.mxu0 %v10082_v29  ;;  %7528 = vmatpush1.bf16.msra.mxu1 %v10085_v30  ;;  %v10169_v29 = vld [vmem:[%s14577_s1 + $0xba8] ss:$16 sps:$4 sm:$0xff]   ;;  %v10175_v30 = vld [vmem:[%s14577_s1 + $0xbc4] ss:$16 sps:$4 sm:$0xff]  }
 0x140   :  { %6732 = vmatprep.subr.bf16.mxu0 %v10090_v31  ;;  %7548 = vmatprep.subr.bf16.mxu1 %v10093_v32  ;;  %v10178_v31 = vld [vmem:[%s14577_s1 + $0xbcc] ss:$16 sps:$4 sm:$0xff]   ;;  %v10173_v32 = vld [vmem:[%s14577_s1 + $0xbc0] ss:$16 sps:$4 sm:$0xff]  }
 0x142   :  { %6714 = vmatmul.mubr.bf16.vlgmr.msra.gmra.mrb[0].mxu0 %v8278_v34  ;;  %7530 = vmatmul.mubr.bf16.vlgmr.msra.gmra.mrb[0].mxu1 %v8278_v34  ;;  %v10182_v34 = vld [vmem:[%s14577_s1 + $0xbe4] ss:$16 sps:$4 sm:$0xff]  }
 0x143   :  { %6733 = vmatpush1.bf16.msra.mxu0 %v10088_v35  ;;  %7549 = vmatpush1.bf16.msra.mxu1 %v10091_v36  ;;  %v10185_v35 = vld [vmem:[%s14577_s1 + $0xbec] ss:$16 sps:$4 sm:$0xff]   ;;  %v10180_v36 = vld [vmem:[%s14577_s1 + $0xbe0] ss:$16 sps:$4 sm:$0xff]  }
 0x144   :  { %6734 = vmatprep.subr.bf16.mxu0 %v10096_v37  ;;  %7550 = vmatprep.subr.bf16.mxu1 %v10099_v38  ;;  %v10183_v37 = vld [vmem:[%s14577_s1 + $0xbe8] ss:$16 sps:$4 sm:$0xff]   ;;  %v10188_v38 = vld [vmem:[%s14577_s1 + $0xc04] ss:$16 sps:$4 sm:$0xff]  }
 0x145   :  { %6723 = vmatprep.mubr.bf16.mxu0 %v8311_v41  ;;  %7539 = vmatprep.mubr.bf16.mxu1 %v8311_v41  ;;  %v8280_v41 = vcombine.low %v12259_v44, %v12264_v45  ;;  %v10197_v44 = vld [vmem:[%s14577_s1 + $0xc2c] ss:$16 sps:$4 sm:$0xff]   ;;  %v10192_v45 = vld [vmem:[%s14577_s1 + $0xc20] ss:$16 sps:$4 sm:$0xff]  }
 0x147   :  { %6735 = vmatpush1.bf16.msra.mxu0 %v10094_v39  ;;  %7551 = vmatpush1.bf16.msra.mxu1 %v10097_v40  ;;  %v10191_v39 = vld [vmem:[%s14577_s1 + $0xc0c] ss:$16 sps:$4 sm:$0xff]  }
 0x148   :  { %6736 = vmatprep.subr.bf16.mxu0 %v10102_v42  ;;  %7552 = vmatprep.subr.bf16.mxu1 %v10105_v43  ;;  %v50_v40 = vld [vmem:[%s14578_s0 + $0x128] sm:$0xff]  ;;  %v10186_v42 = vld [vmem:[%s14577_s1 + $0xc00] ss:$16 sps:$4 sm:$0xff]  }
 0x149   :  { %v10189_v43 = vld [vmem:[%s14577_s1 + $0xc08] ss:$16 sps:$4 sm:$0xff]  }
 0x14a   :  { %6724 = vmatmul.mubr.bf16.gmra.mrb[4].mxu0 %v8310_v46  ;;  %7540 = vmatmul.mubr.bf16.gmra.mrb[4].mxu1 %v8310_v46  ;;  %v10194_v46 = vld [vmem:[%s14577_s1 + $0xc24] ss:$16 sps:$4 sm:$0xff]  }
 0x14b   :  { %6737 = vmatpush1.bf16.msra.mxu0 %v10100_v47  ;;  %7553 = vmatpush1.bf16.msra.mxu1 %v10103_v48  ;;  %v10195_v47 = vld [vmem:[%s14577_s1 + $0xc28] ss:$16 sps:$4 sm:$0xff]   ;;  %v8313_v48 = vcombine.high %v50_v40, %v50_v40 }
 0x14c   :  { %6738 = vmatprep.subr.bf16.mxu0 %v10108_v49  ;;  %7554 = vmatprep.subr.bf16.mxu1 %v10111_v50  ;;  %v10200_v49 = vld [vmem:[%s14577_s1 + $0xc44] ss:$16 sps:$4 sm:$0xff]   ;;  %v10203_v50 = vld [vmem:[%s14577_s1 + $0xc4c] ss:$16 sps:$4 sm:$0xff]  }
 0x14d   :  { %6764 = vmatprep.mubr.bf16.mxu0 %v8281_v51  ;;  %7580 = vmatprep.mubr.bf16.mxu1 %v8281_v51  ;;  %v12468_v51 = vld [vmem:[%s14578_s0 + $0x30] sm:$0xff] }
 0x14f   :  { %6739 = vmatpush1.bf16.msra.mxu0 %v10106_v52  ;;  %7555 = vmatpush1.bf16.msra.mxu1 %v10109_v53  ;;  %v12473_v52 = vld [vmem:[%s14578_s0 + $0xb0] sm:$0xff]  ;;  %v8312_v53 = vcombine.low %v50_v40, %v50_v40  ;;  %v10274_v40 = vld [vmem:[%s14577_s1 + $0xdc8] ss:$16 sps:$4 sm:$0xff]  }
 0x150   :  { %6740 = vmatprep.subr.bf16.mxu0 %v10114_v54  ;;  %7556 = vmatprep.subr.bf16.mxu1 %v10117_v55  ;;  %v10198_v54 = vld [vmem:[%s14577_s1 + $0xc40] ss:$16 sps:$4 sm:$0xff]   ;;  %v10201_v55 = vld [vmem:[%s14577_s1 + $0xc48] ss:$16 sps:$4 sm:$0xff]  }
 0x153   :  { %6741 = vmatpush1.bf16.msra.mxu0 %v10112_v56  ;;  %7557 = vmatpush1.bf16.msra.mxu1 %v10115_v57  ;;  %v10206_v56 = vld [vmem:[%s14577_s1 + $0xc64] ss:$16 sps:$4 sm:$0xff]   ;;  %v10209_v57 = vld [vmem:[%s14577_s1 + $0xc6c] ss:$16 sps:$4 sm:$0xff]  }
 0x154   :  { %6742 = vmatprep.subr.bf16.mxu0 %v10120_v58  ;;  %7558 = vmatprep.subr.bf16.mxu1 %v10123_v59  ;;  %v8283_v58 = vcombine.high %v12468_v51, %v12473_v52  ;;  %v10204_v59 = vld [vmem:[%s14577_s1 + $0xc60] ss:$16 sps:$4 sm:$0xff]  }
 0x157   :  { %6743 = vmatpush1.bf16.msra.mxu0 %v10118_v60  ;;  %7559 = vmatpush1.bf16.msra.mxu1 %v10121_v61  ;;  %v10207_v60 = vld [vmem:[%s14577_s1 + $0xc68] ss:$16 sps:$4 sm:$0xff]   ;;  %v10212_v61 = vld [vmem:[%s14577_s1 + $0xc84] ss:$16 sps:$4 sm:$0xff]  }
 0x158   :  { %6744 = vmatprep.subr.bf16.mxu0 %v10126_v62  ;;  %7560 = vmatprep.subr.bf16.mxu1 %v10129_v63  ;;  %v10215_v62 = vld [vmem:[%s14577_s1 + $0xc8c] ss:$16 sps:$4 sm:$0xff]   ;;  %v10210_v63 = vld [vmem:[%s14577_s1 + $0xc80] ss:$16 sps:$4 sm:$0xff]  }
 0x15b   :  { %6745 = vmatpush1.bf16.msra.mxu0 %v10124_v0  ;;  %7561 = vmatpush1.bf16.msra.mxu1 %v10127_v1  ;;  %v10213_v0 = vld [vmem:[%s14577_s1 + $0xc88] ss:$16 sps:$4 sm:$0xff]   ;;  %v10218_v1 = vld [vmem:[%s14577_s1 + $0xca4] ss:$16 sps:$4 sm:$0xff]  }
 0x15c   :  { %6746 = vmatprep.subr.bf16.mxu0 %v10132_v2  ;;  %7562 = vmatprep.subr.bf16.mxu1 %v10135_v3  ;;  %v10221_v2 = vld [vmem:[%s14577_s1 + $0xcac] ss:$16 sps:$4 sm:$0xff]   ;;  %v10216_v3 = vld [vmem:[%s14577_s1 + $0xca0] ss:$16 sps:$4 sm:$0xff]  }
 0x15f   :  { %6747 = vmatpush1.bf16.msra.mxu0 %v10130_v4  ;;  %7563 = vmatpush1.bf16.msra.mxu1 %v10133_v5  ;;  %v10219_v4 = vld [vmem:[%s14577_s1 + $0xca8] ss:$16 sps:$4 sm:$0xff]   ;;  %v10224_v5 = vld [vmem:[%s14577_s1 + $0xcc4] ss:$16 sps:$4 sm:$0xff]  }
 0x160   :  { %6748 = vmatprep.subr.bf16.mxu0 %v10138_v6  ;;  %7564 = vmatprep.subr.bf16.mxu1 %v10141_v7  ;;  %v10227_v6 = vld [vmem:[%s14577_s1 + $0xccc] ss:$16 sps:$4 sm:$0xff]   ;;  %v10222_v7 = vld [vmem:[%s14577_s1 + $0xcc0] ss:$16 sps:$4 sm:$0xff]  }
 0x163   :  { %6749 = vmatpush1.bf16.msra.mxu0 %v10136_v8  ;;  %7565 = vmatpush1.bf16.msra.mxu1 %v10139_v9  ;;  %v10225_v8 = vld [vmem:[%s14577_s1 + $0xcc8] ss:$16 sps:$4 sm:$0xff]   ;;  %v10230_v9 = vld [vmem:[%s14577_s1 + $0xce4] ss:$16 sps:$4 sm:$0xff]  }
 0x164   :  { %6750 = vmatprep.subr.bf16.mxu0 %v10144_v10  ;;  %7566 = vmatprep.subr.bf16.mxu1 %v10147_v11  ;;  %v10233_v10 = vld [vmem:[%s14577_s1 + $0xcec] ss:$16 sps:$4 sm:$0xff]   ;;  %v10228_v11 = vld [vmem:[%s14577_s1 + $0xce0] ss:$16 sps:$4 sm:$0xff]  }
 0x167   :  { %6751 = vmatpush1.bf16.msra.mxu0 %v10142_v12  ;;  %7567 = vmatpush1.bf16.msra.mxu1 %v10145_v13  ;;  %v10231_v12 = vld [vmem:[%s14577_s1 + $0xce8] ss:$16 sps:$4 sm:$0xff]   ;;  %v10236_v13 = vld [vmem:[%s14577_s1 + $0xd04] ss:$16 sps:$4 sm:$0xff]  }
 0x168   :  { %6752 = vmatprep.subr.bf16.mxu0 %v10150_v14  ;;  %7568 = vmatprep.subr.bf16.mxu1 %v10153_v15  ;;  %v10239_v14 = vld [vmem:[%s14577_s1 + $0xd0c] ss:$16 sps:$4 sm:$0xff]   ;;  %v10234_v15 = vld [vmem:[%s14577_s1 + $0xd00] ss:$16 sps:$4 sm:$0xff]  }
 0x16b   :  { %6753 = vmatpush1.bf16.msra.mxu0 %v10148_v16  ;;  %7569 = vmatpush1.bf16.msra.mxu1 %v10151_v17  ;;  %v10237_v16 = vld [vmem:[%s14577_s1 + $0xd08] ss:$16 sps:$4 sm:$0xff]   ;;  %v10242_v17 = vld [vmem:[%s14577_s1 + $0xd24] ss:$16 sps:$4 sm:$0xff]  }
 0x16c   :  { %6754 = vmatprep.subr.bf16.mxu0 %v10156_v18  ;;  %7570 = vmatprep.subr.bf16.mxu1 %v10159_v19  ;;  %v10245_v18 = vld [vmem:[%s14577_s1 + $0xd2c] ss:$16 sps:$4 sm:$0xff]   ;;  %v10240_v19 = vld [vmem:[%s14577_s1 + $0xd20] ss:$16 sps:$4 sm:$0xff]  }
 0x16f   :  { %6755 = vmatpush1.bf16.msra.mxu0 %v10154_v20  ;;  %7571 = vmatpush1.bf16.msra.mxu1 %v10157_v21  ;;  %v10243_v20 = vld [vmem:[%s14577_s1 + $0xd28] ss:$16 sps:$4 sm:$0xff]   ;;  %v10248_v21 = vld [vmem:[%s14577_s1 + $0xd44] ss:$16 sps:$4 sm:$0xff]  }
 0x170   :  { %6756 = vmatprep.subr.bf16.mxu0 %v10162_v22  ;;  %7572 = vmatprep.subr.bf16.mxu1 %v10165_v23  ;;  %v10251_v22 = vld [vmem:[%s14577_s1 + $0xd4c] ss:$16 sps:$4 sm:$0xff]   ;;  %v10246_v23 = vld [vmem:[%s14577_s1 + $0xd40] ss:$16 sps:$4 sm:$0xff]  }
 0x173   :  { %6757 = vmatpush1.bf16.msra.mxu0 %v10160_v24  ;;  %7573 = vmatpush1.bf16.msra.mxu1 %v10163_v25  ;;  %v10249_v24 = vld [vmem:[%s14577_s1 + $0xd48] ss:$16 sps:$4 sm:$0xff]   ;;  %v10254_v25 = vld [vmem:[%s14577_s1 + $0xd64] ss:$16 sps:$4 sm:$0xff]  }
 0x174   :  { %6758 = vmatprep.subr.bf16.mxu0 %v10168_v26  ;;  %7574 = vmatprep.subr.bf16.mxu1 %v10171_v27  ;;  %v10257_v26 = vld [vmem:[%s14577_s1 + $0xd6c] ss:$16 sps:$4 sm:$0xff]   ;;  %v10252_v27 = vld [vmem:[%s14577_s1 + $0xd60] ss:$16 sps:$4 sm:$0xff]  }
 0x177   :  { %6759 = vmatpush1.bf16.msra.mxu0 %v10166_v28  ;;  %7575 = vmatpush1.bf16.msra.mxu1 %v10169_v29  ;;  %v10255_v28 = vld [vmem:[%s14577_s1 + $0xd68] ss:$16 sps:$4 sm:$0xff]   ;;  %v10260_v29 = vld [vmem:[%s14577_s1 + $0xd84] ss:$16 sps:$4 sm:$0xff]  }
 0x178   :  { %6760 = vmatprep.subr.bf16.mxu0 %v10175_v30  ;;  %7576 = vmatprep.subr.bf16.mxu1 %v10178_v31  ;;  %v10263_v30 = vld [vmem:[%s14577_s1 + $0xd8c] ss:$16 sps:$4 sm:$0xff]   ;;  %v10258_v31 = vld [vmem:[%s14577_s1 + $0xd80] ss:$16 sps:$4 sm:$0xff]  }
 0x17b   :  { %6761 = vmatpush1.bf16.msra.mxu0 %v10173_v32  ;;  %7577 = vmatpush1.bf16.msra.mxu1 %v10176_v33  ;;  %v10261_v32 = vld [vmem:[%s14577_s1 + $0xd88] ss:$16 sps:$4 sm:$0xff]   ;;  %v10266_v33 = vld [vmem:[%s14577_s1 + $0xda4] ss:$16 sps:$4 sm:$0xff]  }
 0x17c   :  { %6762 = vmatprep.subr.bf16.mxu0 %v10182_v34  ;;  %7578 = vmatprep.subr.bf16.mxu1 %v10185_v35  ;;  %v10269_v34 = vld [vmem:[%s14577_s1 + $0xdac] ss:$16 sps:$4 sm:$0xff]   ;;  %v10264_v35 = vld [vmem:[%s14577_s1 + $0xda0] ss:$16 sps:$4 sm:$0xff]  }
 0x17f   :  { %6763 = vmatpush1.bf16.msra.mxu0 %v10180_v36  ;;  %7579 = vmatpush1.bf16.msra.mxu1 %v10183_v37  ;;  %v10267_v36 = vld [vmem:[%s14577_s1 + $0xda8] ss:$16 sps:$4 sm:$0xff]   ;;  %v10273_v37 = vld [vmem:[%s14577_s1 + $0xdc4] ss:$16 sps:$4 sm:$0xff]  }
 0x180   :  { %6783 = vmatprep.subr.bf16.mxu0 %v10188_v38  ;;  %7599 = vmatprep.subr.bf16.mxu1 %v10191_v39  ;;  %v10276_v38 = vld [vmem:[%s14577_s1 + $0xdcc] ss:$16 sps:$4 sm:$0xff]   ;;  %v10271_v39 = vld [vmem:[%s14577_s1 + $0xdc0] ss:$16 sps:$4 sm:$0xff]  }
 0x182   :  { %6765 = vmatmul.mubr.bf16.vlgmr.msra.gmra.mrb[0].mxu0 %v8280_v41  ;;  %7581 = vmatmul.mubr.bf16.vlgmr.msra.gmra.mrb[0].mxu1 %v8280_v41  ;;  %v10280_v41 = vld [vmem:[%s14577_s1 + $0xde4] ss:$16 sps:$4 sm:$0xff]  }
 0x183   :  { %6784 = vmatpush1.bf16.msra.mxu0 %v10186_v42  ;;  %7600 = vmatpush1.bf16.msra.mxu1 %v10189_v43  ;;  %v10283_v42 = vld [vmem:[%s14577_s1 + $0xdec] ss:$16 sps:$4 sm:$0xff]   ;;  %v10278_v43 = vld [vmem:[%s14577_s1 + $0xde0] ss:$16 sps:$4 sm:$0xff]  }
 0x184   :  { %6785 = vmatprep.subr.bf16.mxu0 %v10194_v46  ;;  %7601 = vmatprep.subr.bf16.mxu1 %v10197_v44  ;;  %v10281_v46 = vld [vmem:[%s14577_s1 + $0xde8] ss:$16 sps:$4 sm:$0xff]   ;;  %v10286_v44 = vld [vmem:[%s14577_s1 + $0xe04] ss:$16 sps:$4 sm:$0xff]  }
 0x185   :  { %6774 = vmatprep.mubr.bf16.mxu0 %v8313_v48  ;;  %7590 = vmatprep.mubr.bf16.mxu1 %v8313_v48  ;;  %v8282_v48 = vcombine.low %v12468_v51, %v12473_v52  ;;  %v10295_v51 = vld [vmem:[%s14577_s1 + $0xe2c] ss:$16 sps:$4 sm:$0xff]   ;;  %v10290_v52 = vld [vmem:[%s14577_s1 + $0xe20] ss:$16 sps:$4 sm:$0xff]  }
 0x187   :  { %6786 = vmatpush1.bf16.msra.mxu0 %v10192_v45  ;;  %7602 = vmatpush1.bf16.msra.mxu1 %v10195_v47  ;;  %v10289_v45 = vld [vmem:[%s14577_s1 + $0xe0c] ss:$16 sps:$4 sm:$0xff]   ;;  %v51_v47 = vld [vmem:[%s14578_s0 + $0x130] sm:$0xff] }
 0x188   :  { %6787 = vmatprep.subr.bf16.mxu0 %v10200_v49  ;;  %7603 = vmatprep.subr.bf16.mxu1 %v10203_v50  ;;  %v10284_v49 = vld [vmem:[%s14577_s1 + $0xe00] ss:$16 sps:$4 sm:$0xff]   ;;  %v10287_v50 = vld [vmem:[%s14577_s1 + $0xe08] ss:$16 sps:$4 sm:$0xff]  }
 0x18a   :  { %6775 = vmatmul.mubr.bf16.gmra.mrb[4].mxu0 %v8312_v53  ;;  %7591 = vmatmul.mubr.bf16.gmra.mrb[4].mxu1 %v8312_v53  ;;  %v10292_v53 = vld [vmem:[%s14577_s1 + $0xe24] ss:$16 sps:$4 sm:$0xff]  }
 0x18b   :  { %6788 = vmatpush1.bf16.msra.mxu0 %v10198_v54  ;;  %7604 = vmatpush1.bf16.msra.mxu1 %v10201_v55  ;;  %v10293_v54 = vld [vmem:[%s14577_s1 + $0xe28] ss:$16 sps:$4 sm:$0xff]   ;;  %v8315_v55 = vcombine.high %v51_v47, %v51_v47 }
 0x18c   :  { %6789 = vmatprep.subr.bf16.mxu0 %v10206_v56  ;;  %7605 = vmatprep.subr.bf16.mxu1 %v10209_v57  ;;  %v10298_v56 = vld [vmem:[%s14577_s1 + $0xe44] ss:$16 sps:$4 sm:$0xff]   ;;  %v10301_v57 = vld [vmem:[%s14577_s1 + $0xe4c] ss:$16 sps:$4 sm:$0xff]  }
 0x18d   :  { %6815 = vmatprep.mubr.bf16.mxu0 %v8283_v58  ;;  %7631 = vmatprep.mubr.bf16.mxu1 %v8283_v58  ;;  %v12677_v58 = vld [vmem:[%s14578_s0 + $0x38] sm:$0xff] }
 0x18f   :  { %6790 = vmatpush1.bf16.msra.mxu0 %v10204_v59  ;;  %7606 = vmatpush1.bf16.msra.mxu1 %v10207_v60  ;;  %v12682_v59 = vld [vmem:[%s14578_s0 + $0xb8] sm:$0xff]  ;;  %v8314_v60 = vcombine.low %v51_v47, %v51_v47 }
 0x190   :  { %6791 = vmatprep.subr.bf16.mxu0 %v10212_v61  ;;  %7607 = vmatprep.subr.bf16.mxu1 %v10215_v62  ;;  %v10296_v61 = vld [vmem:[%s14577_s1 + $0xe40] ss:$16 sps:$4 sm:$0xff]   ;;  %v10299_v62 = vld [vmem:[%s14577_s1 + $0xe48] ss:$16 sps:$4 sm:$0xff]  }
 0x191   :  { %v10372_v47 = vld [vmem:[%s14577_s1 + $0xfc8] ss:$16 sps:$4 sm:$0xff]  }
 0x193   :  { %6792 = vmatpush1.bf16.msra.mxu0 %v10210_v63  ;;  %7608 = vmatpush1.bf16.msra.mxu1 %v10213_v0  ;;  %v10304_v63 = vld [vmem:[%s14577_s1 + $0xe64] ss:$16 sps:$4 sm:$0xff]   ;;  %v10307_v0 = vld [vmem:[%s14577_s1 + $0xe6c] ss:$16 sps:$4 sm:$0xff]  }
 0x194   :  { %6793 = vmatprep.subr.bf16.mxu0 %v10218_v1  ;;  %7609 = vmatprep.subr.bf16.mxu1 %v10221_v2  ;;  %v8285_v1 = vcombine.high %v12677_v58, %v12682_v59  ;;  %v10302_v2 = vld [vmem:[%s14577_s1 + $0xe60] ss:$16 sps:$4 sm:$0xff]  }
 0x197   :  { %6794 = vmatpush1.bf16.msra.mxu0 %v10216_v3  ;;  %7610 = vmatpush1.bf16.msra.mxu1 %v10219_v4  ;;  %v10305_v3 = vld [vmem:[%s14577_s1 + $0xe68] ss:$16 sps:$4 sm:$0xff]   ;;  %v10310_v4 = vld [vmem:[%s14577_s1 + $0xe84] ss:$16 sps:$4 sm:$0xff]  }
 0x198   :  { %6795 = vmatprep.subr.bf16.mxu0 %v10224_v5  ;;  %7611 = vmatprep.subr.bf16.mxu1 %v10227_v6  ;;  %v10313_v5 = vld [vmem:[%s14577_s1 + $0xe8c] ss:$16 sps:$4 sm:$0xff]   ;;  %v10308_v6 = vld [vmem:[%s14577_s1 + $0xe80] ss:$16 sps:$4 sm:$0xff]  }
 0x19b   :  { %6796 = vmatpush1.bf16.msra.mxu0 %v10222_v7  ;;  %7612 = vmatpush1.bf16.msra.mxu1 %v10225_v8  ;;  %v10311_v7 = vld [vmem:[%s14577_s1 + $0xe88] ss:$16 sps:$4 sm:$0xff]   ;;  %v10316_v8 = vld [vmem:[%s14577_s1 + $0xea4] ss:$16 sps:$4 sm:$0xff]  }
 0x19c   :  { %6797 = vmatprep.subr.bf16.mxu0 %v10230_v9  ;;  %7613 = vmatprep.subr.bf16.mxu1 %v10233_v10  ;;  %v10319_v9 = vld [vmem:[%s14577_s1 + $0xeac] ss:$16 sps:$4 sm:$0xff]   ;;  %v10314_v10 = vld [vmem:[%s14577_s1 + $0xea0] ss:$16 sps:$4 sm:$0xff]  }
 0x19f   :  { %6798 = vmatpush1.bf16.msra.mxu0 %v10228_v11  ;;  %7614 = vmatpush1.bf16.msra.mxu1 %v10231_v12  ;;  %v10317_v11 = vld [vmem:[%s14577_s1 + $0xea8] ss:$16 sps:$4 sm:$0xff]   ;;  %v10322_v12 = vld [vmem:[%s14577_s1 + $0xec4] ss:$16 sps:$4 sm:$0xff]  }
 0x1a0   :  { %6799 = vmatprep.subr.bf16.mxu0 %v10236_v13  ;;  %7615 = vmatprep.subr.bf16.mxu1 %v10239_v14  ;;  %v10325_v13 = vld [vmem:[%s14577_s1 + $0xecc] ss:$16 sps:$4 sm:$0xff]   ;;  %v10320_v14 = vld [vmem:[%s14577_s1 + $0xec0] ss:$16 sps:$4 sm:$0xff]  }
 0x1a3   :  { %6800 = vmatpush1.bf16.msra.mxu0 %v10234_v15  ;;  %7616 = vmatpush1.bf16.msra.mxu1 %v10237_v16  ;;  %v10323_v15 = vld [vmem:[%s14577_s1 + $0xec8] ss:$16 sps:$4 sm:$0xff]   ;;  %v10328_v16 = vld [vmem:[%s14577_s1 + $0xee4] ss:$16 sps:$4 sm:$0xff]  }
 0x1a4   :  { %6801 = vmatprep.subr.bf16.mxu0 %v10242_v17  ;;  %7617 = vmatprep.subr.bf16.mxu1 %v10245_v18  ;;  %v10331_v17 = vld [vmem:[%s14577_s1 + $0xeec] ss:$16 sps:$4 sm:$0xff]   ;;  %v10326_v18 = vld [vmem:[%s14577_s1 + $0xee0] ss:$16 sps:$4 sm:$0xff]  }
 0x1a7   :  { %6802 = vmatpush1.bf16.msra.mxu0 %v10240_v19  ;;  %7618 = vmatpush1.bf16.msra.mxu1 %v10243_v20  ;;  %v10329_v19 = vld [vmem:[%s14577_s1 + $0xee8] ss:$16 sps:$4 sm:$0xff]   ;;  %v10334_v20 = vld [vmem:[%s14577_s1 + $0xf04] ss:$16 sps:$4 sm:$0xff]  }
 0x1a8   :  { %6803 = vmatprep.subr.bf16.mxu0 %v10248_v21  ;;  %7619 = vmatprep.subr.bf16.mxu1 %v10251_v22  ;;  %v10337_v21 = vld [vmem:[%s14577_s1 + $0xf0c] ss:$16 sps:$4 sm:$0xff]   ;;  %v10332_v22 = vld [vmem:[%s14577_s1 + $0xf00] ss:$16 sps:$4 sm:$0xff]  }
 0x1ab   :  { %6804 = vmatpush1.bf16.msra.mxu0 %v10246_v23  ;;  %7620 = vmatpush1.bf16.msra.mxu1 %v10249_v24  ;;  %v10335_v23 = vld [vmem:[%s14577_s1 + $0xf08] ss:$16 sps:$4 sm:$0xff]   ;;  %v10340_v24 = vld [vmem:[%s14577_s1 + $0xf24] ss:$16 sps:$4 sm:$0xff]  }
 0x1ac   :  { %6805 = vmatprep.subr.bf16.mxu0 %v10254_v25  ;;  %7621 = vmatprep.subr.bf16.mxu1 %v10257_v26  ;;  %v10343_v25 = vld [vmem:[%s14577_s1 + $0xf2c] ss:$16 sps:$4 sm:$0xff]   ;;  %v10338_v26 = vld [vmem:[%s14577_s1 + $0xf20] ss:$16 sps:$4 sm:$0xff]  }
 0x1af   :  { %6806 = vmatpush1.bf16.msra.mxu0 %v10252_v27  ;;  %7622 = vmatpush1.bf16.msra.mxu1 %v10255_v28  ;;  %v10341_v27 = vld [vmem:[%s14577_s1 + $0xf28] ss:$16 sps:$4 sm:$0xff]   ;;  %v10346_v28 = vld [vmem:[%s14577_s1 + $0xf44] ss:$16 sps:$4 sm:$0xff]  }
 0x1b0   :  { %6807 = vmatprep.subr.bf16.mxu0 %v10260_v29  ;;  %7623 = vmatprep.subr.bf16.mxu1 %v10263_v30  ;;  %v10349_v29 = vld [vmem:[%s14577_s1 + $0xf4c] ss:$16 sps:$4 sm:$0xff]   ;;  %v10344_v30 = vld [vmem:[%s14577_s1 + $0xf40] ss:$16 sps:$4 sm:$0xff]  }
 0x1b3   :  { %6808 = vmatpush1.bf16.msra.mxu0 %v10258_v31  ;;  %7624 = vmatpush1.bf16.msra.mxu1 %v10261_v32  ;;  %v10347_v31 = vld [vmem:[%s14577_s1 + $0xf48] ss:$16 sps:$4 sm:$0xff]   ;;  %v10352_v32 = vld [vmem:[%s14577_s1 + $0xf64] ss:$16 sps:$4 sm:$0xff]  }
 0x1b4   :  { %6809 = vmatprep.subr.bf16.mxu0 %v10266_v33  ;;  %7625 = vmatprep.subr.bf16.mxu1 %v10269_v34  ;;  %v10355_v33 = vld [vmem:[%s14577_s1 + $0xf6c] ss:$16 sps:$4 sm:$0xff]   ;;  %v10350_v34 = vld [vmem:[%s14577_s1 + $0xf60] ss:$16 sps:$4 sm:$0xff]  }
 0x1b7   :  { %6810 = vmatpush1.bf16.msra.mxu0 %v10264_v35  ;;  %7626 = vmatpush1.bf16.msra.mxu1 %v10267_v36  ;;  %v10353_v35 = vld [vmem:[%s14577_s1 + $0xf68] ss:$16 sps:$4 sm:$0xff]   ;;  %v10358_v36 = vld [vmem:[%s14577_s1 + $0xf84] ss:$16 sps:$4 sm:$0xff]  }
 0x1b8   :  { %6811 = vmatprep.subr.bf16.mxu0 %v10273_v37  ;;  %7627 = vmatprep.subr.bf16.mxu1 %v10276_v38  ;;  %v10361_v37 = vld [vmem:[%s14577_s1 + $0xf8c] ss:$16 sps:$4 sm:$0xff]   ;;  %v10356_v38 = vld [vmem:[%s14577_s1 + $0xf80] ss:$16 sps:$4 sm:$0xff]  }
 0x1bb   :  { %6812 = vmatpush1.bf16.msra.mxu0 %v10271_v39  ;;  %7628 = vmatpush1.bf16.msra.mxu1 %v10274_v40  ;;  %v10359_v39 = vld [vmem:[%s14577_s1 + $0xf88] ss:$16 sps:$4 sm:$0xff]   ;;  %v10364_v40 = vld [vmem:[%s14577_s1 + $0xfa4] ss:$16 sps:$4 sm:$0xff]  }
 0x1bc   :  { %6813 = vmatprep.subr.bf16.mxu0 %v10280_v41  ;;  %7629 = vmatprep.subr.bf16.mxu1 %v10283_v42  ;;  %v10367_v41 = vld [vmem:[%s14577_s1 + $0xfac] ss:$16 sps:$4 sm:$0xff]   ;;  %v10362_v42 = vld [vmem:[%s14577_s1 + $0xfa0] ss:$16 sps:$4 sm:$0xff]  }
 0x1bf   :  { %6814 = vmatpush1.bf16.msra.mxu0 %v10278_v43  ;;  %7630 = vmatpush1.bf16.msra.mxu1 %v10281_v46  ;;  %v10365_v43 = vld [vmem:[%s14577_s1 + $0xfa8] ss:$16 sps:$4 sm:$0xff]   ;;  %v10371_v46 = vld [vmem:[%s14577_s1 + $0xfc4] ss:$16 sps:$4 sm:$0xff]  }
 0x1c0   :  { %6834 = vmatprep.subr.bf16.mxu0 %v10286_v44  ;;  %7650 = vmatprep.subr.bf16.mxu1 %v10289_v45  ;;  %v10374_v44 = vld [vmem:[%s14577_s1 + $0xfcc] ss:$16 sps:$4 sm:$0xff]   ;;  %v10369_v45 = vld [vmem:[%s14577_s1 + $0xfc0] ss:$16 sps:$4 sm:$0xff]  }
 0x1c2   :  { %6816 = vmatmul.mubr.bf16.vlgmr.msra.gmra.mrb[0].mxu0 %v8282_v48  ;;  %7632 = vmatmul.mubr.bf16.vlgmr.msra.gmra.mrb[0].mxu1 %v8282_v48  ;;  %v10378_v48 = vld [vmem:[%s14577_s1 + $0xfe4] ss:$16 sps:$4 sm:$0xff]  }
 0x1c3   :  { %6835 = vmatpush1.bf16.msra.mxu0 %v10284_v49  ;;  %7651 = vmatpush1.bf16.msra.mxu1 %v10287_v50  ;;  %v10381_v49 = vld [vmem:[%s14577_s1 + $0xfec] ss:$16 sps:$4 sm:$0xff]   ;;  %v10376_v50 = vld [vmem:[%s14577_s1 + $0xfe0] ss:$16 sps:$4 sm:$0xff]  }
 0x1c4   :  { %6836 = vmatprep.subr.bf16.mxu0 %v10292_v53  ;;  %7652 = vmatprep.subr.bf16.mxu1 %v10295_v51  ;;  %v10379_v53 = vld [vmem:[%s14577_s1 + $0xfe8] ss:$16 sps:$4 sm:$0xff]   ;;  %v10384_v51 = vld [vmem:[%s14577_s1 + $0x1004] ss:$16 sps:$4 sm:$0xff]  }
 0x1c5   :  { %6825 = vmatprep.mubr.bf16.mxu0 %v8315_v55  ;;  %7641 = vmatprep.mubr.bf16.mxu1 %v8315_v55  ;;  %v8284_v55 = vcombine.low %v12677_v58, %v12682_v59  ;;  %v10393_v58 = vld [vmem:[%s14577_s1 + $0x102c] ss:$16 sps:$4 sm:$0xff]   ;;  %v10388_v59 = vld [vmem:[%s14577_s1 + $0x1020] ss:$16 sps:$4 sm:$0xff]  }
 0x1c7   :  { %6837 = vmatpush1.bf16.msra.mxu0 %v10290_v52  ;;  %7653 = vmatpush1.bf16.msra.mxu1 %v10293_v54  ;;  %v10387_v52 = vld [vmem:[%s14577_s1 + $0x100c] ss:$16 sps:$4 sm:$0xff]  }
 0x1c8   :  { %6838 = vmatprep.subr.bf16.mxu0 %v10298_v56  ;;  %7654 = vmatprep.subr.bf16.mxu1 %v10301_v57  ;;  %v52_v54 = vld [vmem:[%s14578_s0 + $0x138] sm:$0xff]  ;;  %v10382_v56 = vld [vmem:[%s14577_s1 + $0x1000] ss:$16 sps:$4 sm:$0xff]  }
 0x1c9   :  { %v10385_v57 = vld [vmem:[%s14577_s1 + $0x1008] ss:$16 sps:$4 sm:$0xff]  }
 0x1ca   :  { %6826 = vmatmul.mubr.bf16.gmra.mrb[4].mxu0 %v8314_v60  ;;  %7642 = vmatmul.mubr.bf16.gmra.mrb[4].mxu1 %v8314_v60  ;;  %v10390_v60 = vld [vmem:[%s14577_s1 + $0x1024] ss:$16 sps:$4 sm:$0xff]  }
 0x1cb   :  { %6839 = vmatpush1.bf16.msra.mxu0 %v10296_v61  ;;  %7655 = vmatpush1.bf16.msra.mxu1 %v10299_v62  ;;  %v10391_v61 = vld [vmem:[%s14577_s1 + $0x1028] ss:$16 sps:$4 sm:$0xff]   ;;  %v8317_v62 = vcombine.high %v52_v54, %v52_v54 }
 0x1cc   :  { %6840 = vmatprep.subr.bf16.mxu0 %v10304_v63  ;;  %7656 = vmatprep.subr.bf16.mxu1 %v10307_v0  ;;  %v10396_v63 = vld [vmem:[%s14577_s1 + $0x1044] ss:$16 sps:$4 sm:$0xff]   ;;  %v10399_v0 = vld [vmem:[%s14577_s1 + $0x104c] ss:$16 sps:$4 sm:$0xff]  }
 0x1cd   :  { %6866 = vmatprep.mubr.bf16.mxu0 %v8285_v1  ;;  %7682 = vmatprep.mubr.bf16.mxu1 %v8285_v1  ;;  %v12886_v1 = vld [vmem:[%s14578_s0 + $0x40] sm:$0xff] }
 0x1cf   :  { %6841 = vmatpush1.bf16.msra.mxu0 %v10302_v2  ;;  %7657 = vmatpush1.bf16.msra.mxu1 %v10305_v3  ;;  %v12891_v2 = vld [vmem:[%s14578_s0 + $0xc0] sm:$0xff]  ;;  %v8316_v3 = vcombine.low %v52_v54, %v52_v54  ;;  %v10470_v54 = vld [vmem:[%s14577_s1 + $0x11c8] ss:$16 sps:$4 sm:$0xff]  }
 0x1d0   :  { %6842 = vmatprep.subr.bf16.mxu0 %v10310_v4  ;;  %7658 = vmatprep.subr.bf16.mxu1 %v10313_v5  ;;  %v10394_v4 = vld [vmem:[%s14577_s1 + $0x1040] ss:$16 sps:$4 sm:$0xff]   ;;  %v10397_v5 = vld [vmem:[%s14577_s1 + $0x1048] ss:$16 sps:$4 sm:$0xff]  }
 0x1d3   :  { %6843 = vmatpush1.bf16.msra.mxu0 %v10308_v6  ;;  %7659 = vmatpush1.bf16.msra.mxu1 %v10311_v7  ;;  %v10402_v6 = vld [vmem:[%s14577_s1 + $0x1064] ss:$16 sps:$4 sm:$0xff]   ;;  %v10405_v7 = vld [vmem:[%s14577_s1 + $0x106c] ss:$16 sps:$4 sm:$0xff]  }
 0x1d4   :  { %6844 = vmatprep.subr.bf16.mxu0 %v10316_v8  ;;  %7660 = vmatprep.subr.bf16.mxu1 %v10319_v9  ;;  %v8287_v8 = vcombine.high %v12886_v1, %v12891_v2  ;;  %v10400_v9 = vld [vmem:[%s14577_s1 + $0x1060] ss:$16 sps:$4 sm:$0xff]  }
 0x1d7   :  { %6845 = vmatpush1.bf16.msra.mxu0 %v10314_v10  ;;  %7661 = vmatpush1.bf16.msra.mxu1 %v10317_v11  ;;  %v10403_v10 = vld [vmem:[%s14577_s1 + $0x1068] ss:$16 sps:$4 sm:$0xff]   ;;  %v10408_v11 = vld [vmem:[%s14577_s1 + $0x1084] ss:$16 sps:$4 sm:$0xff]  }
 0x1d8   :  { %6846 = vmatprep.subr.bf16.mxu0 %v10322_v12  ;;  %7662 = vmatprep.subr.bf16.mxu1 %v10325_v13  ;;  %v10411_v12 = vld [vmem:[%s14577_s1 + $0x108c] ss:$16 sps:$4 sm:$0xff]   ;;  %v10406_v13 = vld [vmem:[%s14577_s1 + $0x1080] ss:$16 sps:$4 sm:$0xff]  }
 0x1db   :  { %6847 = vmatpush1.bf16.msra.mxu0 %v10320_v14  ;;  %7663 = vmatpush1.bf16.msra.mxu1 %v10323_v15  ;;  %v10409_v14 = vld [vmem:[%s14577_s1 + $0x1088] ss:$16 sps:$4 sm:$0xff]   ;;  %v10414_v15 = vld [vmem:[%s14577_s1 + $0x10a4] ss:$16 sps:$4 sm:$0xff]  }
 0x1dc   :  { %6848 = vmatprep.subr.bf16.mxu0 %v10328_v16  ;;  %7664 = vmatprep.subr.bf16.mxu1 %v10331_v17  ;;  %v10417_v16 = vld [vmem:[%s14577_s1 + $0x10ac] ss:$16 sps:$4 sm:$0xff]   ;;  %v10412_v17 = vld [vmem:[%s14577_s1 + $0x10a0] ss:$16 sps:$4 sm:$0xff]  }
 0x1df   :  { %6849 = vmatpush1.bf16.msra.mxu0 %v10326_v18  ;;  %7665 = vmatpush1.bf16.msra.mxu1 %v10329_v19  ;;  %v10415_v18 = vld [vmem:[%s14577_s1 + $0x10a8] ss:$16 sps:$4 sm:$0xff]   ;;  %v10420_v19 = vld [vmem:[%s14577_s1 + $0x10c4] ss:$16 sps:$4 sm:$0xff]  }
 0x1e0   :  { %6850 = vmatprep.subr.bf16.mxu0 %v10334_v20  ;;  %7666 = vmatprep.subr.bf16.mxu1 %v10337_v21  ;;  %v10423_v20 = vld [vmem:[%s14577_s1 + $0x10cc] ss:$16 sps:$4 sm:$0xff]   ;;  %v10418_v21 = vld [vmem:[%s14577_s1 + $0x10c0] ss:$16 sps:$4 sm:$0xff]  }
 0x1e3   :  { %6851 = vmatpush1.bf16.msra.mxu0 %v10332_v22  ;;  %7667 = vmatpush1.bf16.msra.mxu1 %v10335_v23  ;;  %v10421_v22 = vld [vmem:[%s14577_s1 + $0x10c8] ss:$16 sps:$4 sm:$0xff]   ;;  %v10426_v23 = vld [vmem:[%s14577_s1 + $0x10e4] ss:$16 sps:$4 sm:$0xff]  }
 0x1e4   :  { %6852 = vmatprep.subr.bf16.mxu0 %v10340_v24  ;;  %7668 = vmatprep.subr.bf16.mxu1 %v10343_v25  ;;  %v10429_v24 = vld [vmem:[%s14577_s1 + $0x10ec] ss:$16 sps:$4 sm:$0xff]   ;;  %v10424_v25 = vld [vmem:[%s14577_s1 + $0x10e0] ss:$16 sps:$4 sm:$0xff]  }
 0x1e7   :  { %6853 = vmatpush1.bf16.msra.mxu0 %v10338_v26  ;;  %7669 = vmatpush1.bf16.msra.mxu1 %v10341_v27  ;;  %v10427_v26 = vld [vmem:[%s14577_s1 + $0x10e8] ss:$16 sps:$4 sm:$0xff]   ;;  %v10432_v27 = vld [vmem:[%s14577_s1 + $0x1104] ss:$16 sps:$4 sm:$0xff]  }
 0x1e8   :  { %6854 = vmatprep.subr.bf16.mxu0 %v10346_v28  ;;  %7670 = vmatprep.subr.bf16.mxu1 %v10349_v29  ;;  %v10435_v28 = vld [vmem:[%s14577_s1 + $0x110c] ss:$16 sps:$4 sm:$0xff]   ;;  %v10430_v29 = vld [vmem:[%s14577_s1 + $0x1100] ss:$16 sps:$4 sm:$0xff]  }
 0x1eb   :  { %6855 = vmatpush1.bf16.msra.mxu0 %v10344_v30  ;;  %7671 = vmatpush1.bf16.msra.mxu1 %v10347_v31  ;;  %v10433_v30 = vld [vmem:[%s14577_s1 + $0x1108] ss:$16 sps:$4 sm:$0xff]   ;;  %v10438_v31 = vld [vmem:[%s14577_s1 + $0x1124] ss:$16 sps:$4 sm:$0xff]  }
 0x1ec   :  { %6856 = vmatprep.subr.bf16.mxu0 %v10352_v32  ;;  %7672 = vmatprep.subr.bf16.mxu1 %v10355_v33  ;;  %v10441_v32 = vld [vmem:[%s14577_s1 + $0x112c] ss:$16 sps:$4 sm:$0xff]   ;;  %v10436_v33 = vld [vmem:[%s14577_s1 + $0x1120] ss:$16 sps:$4 sm:$0xff]  }
 0x1ef   :  { %6857 = vmatpush1.bf16.msra.mxu0 %v10350_v34  ;;  %7673 = vmatpush1.bf16.msra.mxu1 %v10353_v35  ;;  %v10439_v34 = vld [vmem:[%s14577_s1 + $0x1128] ss:$16 sps:$4 sm:$0xff]   ;;  %v10444_v35 = vld [vmem:[%s14577_s1 + $0x1144] ss:$16 sps:$4 sm:$0xff]  }
 0x1f0   :  { %6858 = vmatprep.subr.bf16.mxu0 %v10358_v36  ;;  %7674 = vmatprep.subr.bf16.mxu1 %v10361_v37  ;;  %v10447_v36 = vld [vmem:[%s14577_s1 + $0x114c] ss:$16 sps:$4 sm:$0xff]   ;;  %v10442_v37 = vld [vmem:[%s14577_s1 + $0x1140] ss:$16 sps:$4 sm:$0xff]  }
 0x1f3   :  { %6859 = vmatpush1.bf16.msra.mxu0 %v10356_v38  ;;  %7675 = vmatpush1.bf16.msra.mxu1 %v10359_v39  ;;  %v10445_v38 = vld [vmem:[%s14577_s1 + $0x1148] ss:$16 sps:$4 sm:$0xff]   ;;  %v10450_v39 = vld [vmem:[%s14577_s1 + $0x1164] ss:$16 sps:$4 sm:$0xff]  }
 0x1f4   :  { %6860 = vmatprep.subr.bf16.mxu0 %v10364_v40  ;;  %7676 = vmatprep.subr.bf16.mxu1 %v10367_v41  ;;  %v10453_v40 = vld [vmem:[%s14577_s1 + $0x116c] ss:$16 sps:$4 sm:$0xff]   ;;  %v10448_v41 = vld [vmem:[%s14577_s1 + $0x1160] ss:$16 sps:$4 sm:$0xff]  }
 0x1f7   :  { %6861 = vmatpush1.bf16.msra.mxu0 %v10362_v42  ;;  %7677 = vmatpush1.bf16.msra.mxu1 %v10365_v43  ;;  %v10451_v42 = vld [vmem:[%s14577_s1 + $0x1168] ss:$16 sps:$4 sm:$0xff]   ;;  %v10456_v43 = vld [vmem:[%s14577_s1 + $0x1184] ss:$16 sps:$4 sm:$0xff]  }
 0x1f8   :  { %6862 = vmatprep.subr.bf16.mxu0 %v10371_v46  ;;  %7678 = vmatprep.subr.bf16.mxu1 %v10374_v44  ;;  %v10459_v46 = vld [vmem:[%s14577_s1 + $0x118c] ss:$16 sps:$4 sm:$0xff]   ;;  %v10454_v44 = vld [vmem:[%s14577_s1 + $0x1180] ss:$16 sps:$4 sm:$0xff]  }
 0x1fb   :  { %6863 = vmatpush1.bf16.msra.mxu0 %v10369_v45  ;;  %7679 = vmatpush1.bf16.msra.mxu1 %v10372_v47  ;;  %v10457_v45 = vld [vmem:[%s14577_s1 + $0x1188] ss:$16 sps:$4 sm:$0xff]   ;;  %v10462_v47 = vld [vmem:[%s14577_s1 + $0x11a4] ss:$16 sps:$4 sm:$0xff]  }
 0x1fc   :  { %6864 = vmatprep.subr.bf16.mxu0 %v10378_v48  ;;  %7680 = vmatprep.subr.bf16.mxu1 %v10381_v49  ;;  %v10465_v48 = vld [vmem:[%s14577_s1 + $0x11ac] ss:$16 sps:$4 sm:$0xff]   ;;  %v10460_v49 = vld [vmem:[%s14577_s1 + $0x11a0] ss:$16 sps:$4 sm:$0xff]  }
 0x1ff   :  { %6865 = vmatpush1.bf16.msra.mxu0 %v10376_v50  ;;  %7681 = vmatpush1.bf16.msra.mxu1 %v10379_v53  ;;  %v10463_v50 = vld [vmem:[%s14577_s1 + $0x11a8] ss:$16 sps:$4 sm:$0xff]   ;;  %v10469_v53 = vld [vmem:[%s14577_s1 + $0x11c4] ss:$16 sps:$4 sm:$0xff]  }
 0x200   :  { %6885 = vmatprep.subr.bf16.mxu0 %v10384_v51  ;;  %7701 = vmatprep.subr.bf16.mxu1 %v10387_v52  ;;  %v10472_v51 = vld [vmem:[%s14577_s1 + $0x11cc] ss:$16 sps:$4 sm:$0xff]   ;;  %v10467_v52 = vld [vmem:[%s14577_s1 + $0x11c0] ss:$16 sps:$4 sm:$0xff]  }
 0x202   :  { %6867 = vmatmul.mubr.bf16.vlgmr.msra.gmra.mrb[0].mxu0 %v8284_v55  ;;  %7683 = vmatmul.mubr.bf16.vlgmr.msra.gmra.mrb[0].mxu1 %v8284_v55  ;;  %v10476_v55 = vld [vmem:[%s14577_s1 + $0x11e4] ss:$16 sps:$4 sm:$0xff]  }
 0x203   :  { %6886 = vmatpush1.bf16.msra.mxu0 %v10382_v56  ;;  %7702 = vmatpush1.bf16.msra.mxu1 %v10385_v57  ;;  %v10479_v56 = vld [vmem:[%s14577_s1 + $0x11ec] ss:$16 sps:$4 sm:$0xff]   ;;  %v10474_v57 = vld [vmem:[%s14577_s1 + $0x11e0] ss:$16 sps:$4 sm:$0xff]  }
 0x204   :  { %6887 = vmatprep.subr.bf16.mxu0 %v10390_v60  ;;  %7703 = vmatprep.subr.bf16.mxu1 %v10393_v58  ;;  %v10477_v60 = vld [vmem:[%s14577_s1 + $0x11e8] ss:$16 sps:$4 sm:$0xff]   ;;  %v10482_v58 = vld [vmem:[%s14577_s1 + $0x1204] ss:$16 sps:$4 sm:$0xff]  }
 0x205   :  { %6876 = vmatprep.mubr.bf16.mxu0 %v8317_v62  ;;  %7692 = vmatprep.mubr.bf16.mxu1 %v8317_v62  ;;  %v8286_v62 = vcombine.low %v12886_v1, %v12891_v2  ;;  %v10491_v1 = vld [vmem:[%s14577_s1 + $0x122c] ss:$16 sps:$4 sm:$0xff]   ;;  %v10486_v2 = vld [vmem:[%s14577_s1 + $0x1220] ss:$16 sps:$4 sm:$0xff]  }
 0x207   :  { %6888 = vmatpush1.bf16.msra.mxu0 %v10388_v59  ;;  %7704 = vmatpush1.bf16.msra.mxu1 %v10391_v61  ;;  %v10485_v59 = vld [vmem:[%s14577_s1 + $0x120c] ss:$16 sps:$4 sm:$0xff]   ;;  %v53_v61 = vld [vmem:[%s14578_s0 + $0x140] sm:$0xff] }
 0x208   :  { %6889 = vmatprep.subr.bf16.mxu0 %v10396_v63  ;;  %7705 = vmatprep.subr.bf16.mxu1 %v10399_v0  ;;  %v10480_v63 = vld [vmem:[%s14577_s1 + $0x1200] ss:$16 sps:$4 sm:$0xff]   ;;  %v10483_v0 = vld [vmem:[%s14577_s1 + $0x1208] ss:$16 sps:$4 sm:$0xff]  }
 0x20a   :  { %6877 = vmatmul.mubr.bf16.gmra.mrb[4].mxu0 %v8316_v3  ;;  %7693 = vmatmul.mubr.bf16.gmra.mrb[4].mxu1 %v8316_v3  ;;  %v10488_v3 = vld [vmem:[%s14577_s1 + $0x1224] ss:$16 sps:$4 sm:$0xff]  }
 0x20b   :  { %6890 = vmatpush1.bf16.msra.mxu0 %v10394_v4  ;;  %7706 = vmatpush1.bf16.msra.mxu1 %v10397_v5  ;;  %v10489_v4 = vld [vmem:[%s14577_s1 + $0x1228] ss:$16 sps:$4 sm:$0xff]   ;;  %v8319_v5 = vcombine.high %v53_v61, %v53_v61 }
 0x20c   :  { %6891 = vmatprep.subr.bf16.mxu0 %v10402_v6  ;;  %7707 = vmatprep.subr.bf16.mxu1 %v10405_v7  ;;  %v10494_v6 = vld [vmem:[%s14577_s1 + $0x1244] ss:$16 sps:$4 sm:$0xff]   ;;  %v10497_v7 = vld [vmem:[%s14577_s1 + $0x124c] ss:$16 sps:$4 sm:$0xff]  }
 0x20d   :  { %6917 = vmatprep.mubr.bf16.mxu0 %v8287_v8  ;;  %7733 = vmatprep.mubr.bf16.mxu1 %v8287_v8  ;;  %v13095_v8 = vld [vmem:[%s14578_s0 + $0x48] sm:$0xff] }
 0x20f   :  { %6892 = vmatpush1.bf16.msra.mxu0 %v10400_v9  ;;  %7708 = vmatpush1.bf16.msra.mxu1 %v10403_v10  ;;  %v13100_v9 = vld [vmem:[%s14578_s0 + $0xc8] sm:$0xff]  ;;  %v8318_v10 = vcombine.low %v53_v61, %v53_v61 }
 0x210   :  { %6893 = vmatprep.subr.bf16.mxu0 %v10408_v11  ;;  %7709 = vmatprep.subr.bf16.mxu1 %v10411_v12  ;;  %v10492_v11 = vld [vmem:[%s14577_s1 + $0x1240] ss:$16 sps:$4 sm:$0xff]   ;;  %v10495_v12 = vld [vmem:[%s14577_s1 + $0x1248] ss:$16 sps:$4 sm:$0xff]  }
 0x211   :  { %v10568_v61 = vld [vmem:[%s14577_s1 + $0x13c8] ss:$16 sps:$4 sm:$0xff]  }
 0x213   :  { %6894 = vmatpush1.bf16.msra.mxu0 %v10406_v13  ;;  %7710 = vmatpush1.bf16.msra.mxu1 %v10409_v14  ;;  %v10500_v13 = vld [vmem:[%s14577_s1 + $0x1264] ss:$16 sps:$4 sm:$0xff]   ;;  %v10503_v14 = vld [vmem:[%s14577_s1 + $0x126c] ss:$16 sps:$4 sm:$0xff]  }
 0x214   :  { %6895 = vmatprep.subr.bf16.mxu0 %v10414_v15  ;;  %7711 = vmatprep.subr.bf16.mxu1 %v10417_v16  ;;  %v8289_v15 = vcombine.high %v13095_v8, %v13100_v9  ;;  %v10498_v16 = vld [vmem:[%s14577_s1 + $0x1260] ss:$16 sps:$4 sm:$0xff]  }
 0x217   :  { %6896 = vmatpush1.bf16.msra.mxu0 %v10412_v17  ;;  %7712 = vmatpush1.bf16.msra.mxu1 %v10415_v18  ;;  %v10501_v17 = vld [vmem:[%s14577_s1 + $0x1268] ss:$16 sps:$4 sm:$0xff]   ;;  %v10506_v18 = vld [vmem:[%s14577_s1 + $0x1284] ss:$16 sps:$4 sm:$0xff]  }
 0x218   :  { %6897 = vmatprep.subr.bf16.mxu0 %v10420_v19  ;;  %7713 = vmatprep.subr.bf16.mxu1 %v10423_v20  ;;  %v10509_v19 = vld [vmem:[%s14577_s1 + $0x128c] ss:$16 sps:$4 sm:$0xff]   ;;  %v10504_v20 = vld [vmem:[%s14577_s1 + $0x1280] ss:$16 sps:$4 sm:$0xff]  }
 0x21b   :  { %6898 = vmatpush1.bf16.msra.mxu0 %v10418_v21  ;;  %7714 = vmatpush1.bf16.msra.mxu1 %v10421_v22  ;;  %v10507_v21 = vld [vmem:[%s14577_s1 + $0x1288] ss:$16 sps:$4 sm:$0xff]   ;;  %v10512_v22 = vld [vmem:[%s14577_s1 + $0x12a4] ss:$16 sps:$4 sm:$0xff]  }
 0x21c   :  { %6899 = vmatprep.subr.bf16.mxu0 %v10426_v23  ;;  %7715 = vmatprep.subr.bf16.mxu1 %v10429_v24  ;;  %v10515_v23 = vld [vmem:[%s14577_s1 + $0x12ac] ss:$16 sps:$4 sm:$0xff]   ;;  %v10510_v24 = vld [vmem:[%s14577_s1 + $0x12a0] ss:$16 sps:$4 sm:$0xff]  }
 0x21f   :  { %6900 = vmatpush1.bf16.msra.mxu0 %v10424_v25  ;;  %7716 = vmatpush1.bf16.msra.mxu1 %v10427_v26  ;;  %v10513_v25 = vld [vmem:[%s14577_s1 + $0x12a8] ss:$16 sps:$4 sm:$0xff]   ;;  %v10518_v26 = vld [vmem:[%s14577_s1 + $0x12c4] ss:$16 sps:$4 sm:$0xff]  }
 0x220   :  { %6901 = vmatprep.subr.bf16.mxu0 %v10432_v27  ;;  %7717 = vmatprep.subr.bf16.mxu1 %v10435_v28  ;;  %v10521_v27 = vld [vmem:[%s14577_s1 + $0x12cc] ss:$16 sps:$4 sm:$0xff]   ;;  %v10516_v28 = vld [vmem:[%s14577_s1 + $0x12c0] ss:$16 sps:$4 sm:$0xff]  }
 0x223   :  { %6902 = vmatpush1.bf16.msra.mxu0 %v10430_v29  ;;  %7718 = vmatpush1.bf16.msra.mxu1 %v10433_v30  ;;  %v10519_v29 = vld [vmem:[%s14577_s1 + $0x12c8] ss:$16 sps:$4 sm:$0xff]   ;;  %v10524_v30 = vld [vmem:[%s14577_s1 + $0x12e4] ss:$16 sps:$4 sm:$0xff]  }
 0x224   :  { %6903 = vmatprep.subr.bf16.mxu0 %v10438_v31  ;;  %7719 = vmatprep.subr.bf16.mxu1 %v10441_v32  ;;  %v10527_v31 = vld [vmem:[%s14577_s1 + $0x12ec] ss:$16 sps:$4 sm:$0xff]   ;;  %v10522_v32 = vld [vmem:[%s14577_s1 + $0x12e0] ss:$16 sps:$4 sm:$0xff]  }
 0x227   :  { %6904 = vmatpush1.bf16.msra.mxu0 %v10436_v33  ;;  %7720 = vmatpush1.bf16.msra.mxu1 %v10439_v34  ;;  %v10525_v33 = vld [vmem:[%s14577_s1 + $0x12e8] ss:$16 sps:$4 sm:$0xff]   ;;  %v10530_v34 = vld [vmem:[%s14577_s1 + $0x1304] ss:$16 sps:$4 sm:$0xff]  }
 0x228   :  { %6905 = vmatprep.subr.bf16.mxu0 %v10444_v35  ;;  %7721 = vmatprep.subr.bf16.mxu1 %v10447_v36  ;;  %v10533_v35 = vld [vmem:[%s14577_s1 + $0x130c] ss:$16 sps:$4 sm:$0xff]   ;;  %v10528_v36 = vld [vmem:[%s14577_s1 + $0x1300] ss:$16 sps:$4 sm:$0xff]  }
 0x22b   :  { %6906 = vmatpush1.bf16.msra.mxu0 %v10442_v37  ;;  %7722 = vmatpush1.bf16.msra.mxu1 %v10445_v38  ;;  %v10531_v37 = vld [vmem:[%s14577_s1 + $0x1308] ss:$16 sps:$4 sm:$0xff]   ;;  %v10536_v38 = vld [vmem:[%s14577_s1 + $0x1324] ss:$16 sps:$4 sm:$0xff]  }
 0x22c   :  { %6907 = vmatprep.subr.bf16.mxu0 %v10450_v39  ;;  %7723 = vmatprep.subr.bf16.mxu1 %v10453_v40  ;;  %v10539_v39 = vld [vmem:[%s14577_s1 + $0x132c] ss:$16 sps:$4 sm:$0xff]   ;;  %v10534_v40 = vld [vmem:[%s14577_s1 + $0x1320] ss:$16 sps:$4 sm:$0xff]  }
 0x22f   :  { %6908 = vmatpush1.bf16.msra.mxu0 %v10448_v41  ;;  %7724 = vmatpush1.bf16.msra.mxu1 %v10451_v42  ;;  %v10537_v41 = vld [vmem:[%s14577_s1 + $0x1328] ss:$16 sps:$4 sm:$0xff]   ;;  %v10542_v42 = vld [vmem:[%s14577_s1 + $0x1344] ss:$16 sps:$4 sm:$0xff]  }
 0x230   :  { %6909 = vmatprep.subr.bf16.mxu0 %v10456_v43  ;;  %7725 = vmatprep.subr.bf16.mxu1 %v10459_v46  ;;  %v10545_v43 = vld [vmem:[%s14577_s1 + $0x134c] ss:$16 sps:$4 sm:$0xff]   ;;  %v10540_v46 = vld [vmem:[%s14577_s1 + $0x1340] ss:$16 sps:$4 sm:$0xff]  }
 0x233   :  { %6910 = vmatpush1.bf16.msra.mxu0 %v10454_v44  ;;  %7726 = vmatpush1.bf16.msra.mxu1 %v10457_v45  ;;  %v10543_v44 = vld [vmem:[%s14577_s1 + $0x1348] ss:$16 sps:$4 sm:$0xff]   ;;  %v10548_v45 = vld [vmem:[%s14577_s1 + $0x1364] ss:$16 sps:$4 sm:$0xff]  }
 0x234   :  { %6911 = vmatprep.subr.bf16.mxu0 %v10462_v47  ;;  %7727 = vmatprep.subr.bf16.mxu1 %v10465_v48  ;;  %v10551_v47 = vld [vmem:[%s14577_s1 + $0x136c] ss:$16 sps:$4 sm:$0xff]   ;;  %v10546_v48 = vld [vmem:[%s14577_s1 + $0x1360] ss:$16 sps:$4 sm:$0xff]  }
 0x237   :  { %6912 = vmatpush1.bf16.msra.mxu0 %v10460_v49  ;;  %7728 = vmatpush1.bf16.msra.mxu1 %v10463_v50  ;;  %v10549_v49 = vld [vmem:[%s14577_s1 + $0x1368] ss:$16 sps:$4 sm:$0xff]   ;;  %v10554_v50 = vld [vmem:[%s14577_s1 + $0x1384] ss:$16 sps:$4 sm:$0xff]  }
 0x238   :  { %6913 = vmatprep.subr.bf16.mxu0 %v10469_v53  ;;  %7729 = vmatprep.subr.bf16.mxu1 %v10472_v51  ;;  %v10557_v53 = vld [vmem:[%s14577_s1 + $0x138c] ss:$16 sps:$4 sm:$0xff]   ;;  %v10552_v51 = vld [vmem:[%s14577_s1 + $0x1380] ss:$16 sps:$4 sm:$0xff]  }
 0x23b   :  { %6914 = vmatpush1.bf16.msra.mxu0 %v10467_v52  ;;  %7730 = vmatpush1.bf16.msra.mxu1 %v10470_v54  ;;  %v10555_v52 = vld [vmem:[%s14577_s1 + $0x1388] ss:$16 sps:$4 sm:$0xff]   ;;  %v10560_v54 = vld [vmem:[%s14577_s1 + $0x13a4] ss:$16 sps:$4 sm:$0xff]  }
 0x23c   :  { %6915 = vmatprep.subr.bf16.mxu0 %v10476_v55  ;;  %7731 = vmatprep.subr.bf16.mxu1 %v10479_v56  ;;  %v10563_v55 = vld [vmem:[%s14577_s1 + $0x13ac] ss:$16 sps:$4 sm:$0xff]   ;;  %v10558_v56 = vld [vmem:[%s14577_s1 + $0x13a0] ss:$16 sps:$4 sm:$0xff]  }
 0x23f   :  { %6916 = vmatpush1.bf16.msra.mxu0 %v10474_v57  ;;  %7732 = vmatpush1.bf16.msra.mxu1 %v10477_v60  ;;  %v10561_v57 = vld [vmem:[%s14577_s1 + $0x13a8] ss:$16 sps:$4 sm:$0xff]   ;;  %v10567_v60 = vld [vmem:[%s14577_s1 + $0x13c4] ss:$16 sps:$4 sm:$0xff]  }
 0x240   :  { %6936 = vmatprep.subr.bf16.mxu0 %v10482_v58  ;;  %7752 = vmatprep.subr.bf16.mxu1 %v10485_v59  ;;  %v10570_v58 = vld [vmem:[%s14577_s1 + $0x13cc] ss:$16 sps:$4 sm:$0xff]   ;;  %v10565_v59 = vld [vmem:[%s14577_s1 + $0x13c0] ss:$16 sps:$4 sm:$0xff]  }
 0x242   :  { %6918 = vmatmul.mubr.bf16.vlgmr.msra.gmra.mrb[0].mxu0 %v8286_v62  ;;  %7734 = vmatmul.mubr.bf16.vlgmr.msra.gmra.mrb[0].mxu1 %v8286_v62  ;;  %v10574_v62 = vld [vmem:[%s14577_s1 + $0x13e4] ss:$16 sps:$4 sm:$0xff]  }
 0x243   :  { %6937 = vmatpush1.bf16.msra.mxu0 %v10480_v63  ;;  %7753 = vmatpush1.bf16.msra.mxu1 %v10483_v0  ;;  %v10577_v63 = vld [vmem:[%s14577_s1 + $0x13ec] ss:$16 sps:$4 sm:$0xff]   ;;  %v10572_v0 = vld [vmem:[%s14577_s1 + $0x13e0] ss:$16 sps:$4 sm:$0xff]  }
 0x244   :  { %6938 = vmatprep.subr.bf16.mxu0 %v10488_v3  ;;  %7754 = vmatprep.subr.bf16.mxu1 %v10491_v1  ;;  %v10575_v3 = vld [vmem:[%s14577_s1 + $0x13e8] ss:$16 sps:$4 sm:$0xff]   ;;  %v10580_v1 = vld [vmem:[%s14577_s1 + $0x1404] ss:$16 sps:$4 sm:$0xff]  }
 0x245   :  { %6927 = vmatprep.mubr.bf16.mxu0 %v8319_v5  ;;  %7743 = vmatprep.mubr.bf16.mxu1 %v8319_v5  ;;  %v54_v5 = vld [vmem:[%s14578_s0 + $0x148] sm:$0xff] }
 0x247   :  { %6939 = vmatpush1.bf16.msra.mxu0 %v10486_v2  ;;  %7755 = vmatpush1.bf16.msra.mxu1 %v10489_v4  ;;  %v10583_v2 = vld [vmem:[%s14577_s1 + $0x140c] ss:$16 sps:$4 sm:$0xff]   ;;  %v8288_v4 = vcombine.low %v13095_v8, %v13100_v9  ;;  %v10586_v8 = vld [vmem:[%s14577_s1 + $0x1424] ss:$16 sps:$4 sm:$0xff]  }
 0x248   :  { %6940 = vmatprep.subr.bf16.mxu0 %v10494_v6  ;;  %7756 = vmatprep.subr.bf16.mxu1 %v10497_v7  ;;  %v10578_v6 = vld [vmem:[%s14577_s1 + $0x1400] ss:$16 sps:$4 sm:$0xff]   ;;  %v10581_v7 = vld [vmem:[%s14577_s1 + $0x1408] ss:$16 sps:$4 sm:$0xff]   ;;  %v10589_v9 = vld [vmem:[%s14577_s1 + $0x142c] ss:$16 sps:$4 sm:$0xff]  }
 0x24a   :  { %6928 = vmatmul.mubr.bf16.gmra.mrb[4].mxu0 %v8318_v10  ;;  %7744 = vmatmul.mubr.bf16.gmra.mrb[4].mxu1 %v8318_v10  ;;  %v8321_v10 = vcombine.high %v54_v5, %v54_v5 }
 0x24b   :  { %6941 = vmatpush1.bf16.msra.mxu0 %v10492_v11  ;;  %7757 = vmatpush1.bf16.msra.mxu1 %v10495_v12  ;;  %v10584_v11 = vld [vmem:[%s14577_s1 + $0x1420] ss:$16 sps:$4 sm:$0xff]   ;;  %v10587_v12 = vld [vmem:[%s14577_s1 + $0x1428] ss:$16 sps:$4 sm:$0xff]  }
 0x24c   :  { %6942 = vmatprep.subr.bf16.mxu0 %v10500_v13  ;;  %7758 = vmatprep.subr.bf16.mxu1 %v10503_v14  ;;  %v10592_v13 = vld [vmem:[%s14577_s1 + $0x1444] ss:$16 sps:$4 sm:$0xff]   ;;  %v10595_v14 = vld [vmem:[%s14577_s1 + $0x144c] ss:$16 sps:$4 sm:$0xff]  }
 0x24d   :  { %6968 = vmatprep.mubr.bf16.mxu0 %v8289_v15  ;;  %7784 = vmatprep.mubr.bf16.mxu1 %v8289_v15  ;;  %v8320_v15 = vcombine.low %v54_v5, %v54_v5  ;;  %v10672_v5 = vld [vmem:[%s14577_s1 + $0x15e4] ss:$16 sps:$4 sm:$0xff]  }
 0x24f   :  { %6943 = vmatpush1.bf16.msra.mxu0 %v10498_v16  ;;  %7759 = vmatpush1.bf16.msra.mxu1 %v10501_v17  ;;  %v13304_v16 = vld [vmem:[%s14578_s0 + $0x50] sm:$0xff] }
 0x250   :  { %6944 = vmatprep.subr.bf16.mxu0 %v10506_v18  ;;  %7760 = vmatprep.subr.bf16.mxu1 %v10509_v19  ;;  %v13309_v17 = vld [vmem:[%s14578_s0 + $0xd0] sm:$0xff]  ;;  %v10593_v19 = vld [vmem:[%s14577_s1 + $0x1448] ss:$16 sps:$4 sm:$0xff]  }
 0x251   :  { %v10590_v18 = vld [vmem:[%s14577_s1 + $0x1440] ss:$16 sps:$4 sm:$0xff]  }
 0x253   :  { %6945 = vmatpush1.bf16.msra.mxu0 %v10504_v20  ;;  %7761 = vmatpush1.bf16.msra.mxu1 %v10507_v21  ;;  %v10598_v20 = vld [vmem:[%s14577_s1 + $0x1464] ss:$16 sps:$4 sm:$0xff]   ;;  %v10601_v21 = vld [vmem:[%s14577_s1 + $0x146c] ss:$16 sps:$4 sm:$0xff]  }
 0x254   :  { %6946 = vmatprep.subr.bf16.mxu0 %v10512_v22  ;;  %7762 = vmatprep.subr.bf16.mxu1 %v10515_v23  ;;  %v8291_v22 = vcombine.high %v13304_v16, %v13309_v17  ;;  %v10596_v23 = vld [vmem:[%s14577_s1 + $0x1460] ss:$16 sps:$4 sm:$0xff]  }
 0x257   :  { %6947 = vmatpush1.bf16.msra.mxu0 %v10510_v24  ;;  %7763 = vmatpush1.bf16.msra.mxu1 %v10513_v25  ;;  %v10599_v24 = vld [vmem:[%s14577_s1 + $0x1468] ss:$16 sps:$4 sm:$0xff]   ;;  %v10604_v25 = vld [vmem:[%s14577_s1 + $0x1484] ss:$16 sps:$4 sm:$0xff]  }
 0x258   :  { %6948 = vmatprep.subr.bf16.mxu0 %v10518_v26  ;;  %7764 = vmatprep.subr.bf16.mxu1 %v10521_v27  ;;  %v10607_v26 = vld [vmem:[%s14577_s1 + $0x148c] ss:$16 sps:$4 sm:$0xff]   ;;  %v10602_v27 = vld [vmem:[%s14577_s1 + $0x1480] ss:$16 sps:$4 sm:$0xff]  }
 0x25b   :  { %6949 = vmatpush1.bf16.msra.mxu0 %v10516_v28  ;;  %7765 = vmatpush1.bf16.msra.mxu1 %v10519_v29  ;;  %v10605_v28 = vld [vmem:[%s14577_s1 + $0x1488] ss:$16 sps:$4 sm:$0xff]   ;;  %v10610_v29 = vld [vmem:[%s14577_s1 + $0x14a4] ss:$16 sps:$4 sm:$0xff]  }
 0x25c   :  { %6950 = vmatprep.subr.bf16.mxu0 %v10524_v30  ;;  %7766 = vmatprep.subr.bf16.mxu1 %v10527_v31  ;;  %v10613_v30 = vld [vmem:[%s14577_s1 + $0x14ac] ss:$16 sps:$4 sm:$0xff]   ;;  %v10608_v31 = vld [vmem:[%s14577_s1 + $0x14a0] ss:$16 sps:$4 sm:$0xff]  }
 0x25f   :  { %6951 = vmatpush1.bf16.msra.mxu0 %v10522_v32  ;;  %7767 = vmatpush1.bf16.msra.mxu1 %v10525_v33  ;;  %v10611_v32 = vld [vmem:[%s14577_s1 + $0x14a8] ss:$16 sps:$4 sm:$0xff]   ;;  %v10616_v33 = vld [vmem:[%s14577_s1 + $0x14c4] ss:$16 sps:$4 sm:$0xff]  }
 0x260   :  { %6952 = vmatprep.subr.bf16.mxu0 %v10530_v34  ;;  %7768 = vmatprep.subr.bf16.mxu1 %v10533_v35  ;;  %v10619_v34 = vld [vmem:[%s14577_s1 + $0x14cc] ss:$16 sps:$4 sm:$0xff]   ;;  %v10614_v35 = vld [vmem:[%s14577_s1 + $0x14c0] ss:$16 sps:$4 sm:$0xff]  }
 0x263   :  { %6953 = vmatpush1.bf16.msra.mxu0 %v10528_v36  ;;  %7769 = vmatpush1.bf16.msra.mxu1 %v10531_v37  ;;  %v10617_v36 = vld [vmem:[%s14577_s1 + $0x14c8] ss:$16 sps:$4 sm:$0xff]   ;;  %v10622_v37 = vld [vmem:[%s14577_s1 + $0x14e4] ss:$16 sps:$4 sm:$0xff]  }
 0x264   :  { %6954 = vmatprep.subr.bf16.mxu0 %v10536_v38  ;;  %7770 = vmatprep.subr.bf16.mxu1 %v10539_v39  ;;  %v10625_v38 = vld [vmem:[%s14577_s1 + $0x14ec] ss:$16 sps:$4 sm:$0xff]   ;;  %v10620_v39 = vld [vmem:[%s14577_s1 + $0x14e0] ss:$16 sps:$4 sm:$0xff]  }
 0x267   :  { %6955 = vmatpush1.bf16.msra.mxu0 %v10534_v40  ;;  %7771 = vmatpush1.bf16.msra.mxu1 %v10537_v41  ;;  %v10623_v40 = vld [vmem:[%s14577_s1 + $0x14e8] ss:$16 sps:$4 sm:$0xff]   ;;  %v10628_v41 = vld [vmem:[%s14577_s1 + $0x1504] ss:$16 sps:$4 sm:$0xff]  }
 0x268   :  { %6956 = vmatprep.subr.bf16.mxu0 %v10542_v42  ;;  %7772 = vmatprep.subr.bf16.mxu1 %v10545_v43  ;;  %v10631_v42 = vld [vmem:[%s14577_s1 + $0x150c] ss:$16 sps:$4 sm:$0xff]   ;;  %v10626_v43 = vld [vmem:[%s14577_s1 + $0x1500] ss:$16 sps:$4 sm:$0xff]  }
 0x26b   :  { %6957 = vmatpush1.bf16.msra.mxu0 %v10540_v46  ;;  %7773 = vmatpush1.bf16.msra.mxu1 %v10543_v44  ;;  %v10629_v46 = vld [vmem:[%s14577_s1 + $0x1508] ss:$16 sps:$4 sm:$0xff]   ;;  %v10634_v44 = vld [vmem:[%s14577_s1 + $0x1524] ss:$16 sps:$4 sm:$0xff]  }
 0x26c   :  { %6958 = vmatprep.subr.bf16.mxu0 %v10548_v45  ;;  %7774 = vmatprep.subr.bf16.mxu1 %v10551_v47  ;;  %v10637_v45 = vld [vmem:[%s14577_s1 + $0x152c] ss:$16 sps:$4 sm:$0xff]   ;;  %v10632_v47 = vld [vmem:[%s14577_s1 + $0x1520] ss:$16 sps:$4 sm:$0xff]  }
 0x26f   :  { %6959 = vmatpush1.bf16.msra.mxu0 %v10546_v48  ;;  %7775 = vmatpush1.bf16.msra.mxu1 %v10549_v49  ;;  %v10635_v48 = vld [vmem:[%s14577_s1 + $0x1528] ss:$16 sps:$4 sm:$0xff]   ;;  %v10640_v49 = vld [vmem:[%s14577_s1 + $0x1544] ss:$16 sps:$4 sm:$0xff]  }
 0x270   :  { %6960 = vmatprep.subr.bf16.mxu0 %v10554_v50  ;;  %7776 = vmatprep.subr.bf16.mxu1 %v10557_v53  ;;  %v10643_v50 = vld [vmem:[%s14577_s1 + $0x154c] ss:$16 sps:$4 sm:$0xff]   ;;  %v10638_v53 = vld [vmem:[%s14577_s1 + $0x1540] ss:$16 sps:$4 sm:$0xff]  }
 0x273   :  { %6961 = vmatpush1.bf16.msra.mxu0 %v10552_v51  ;;  %7777 = vmatpush1.bf16.msra.mxu1 %v10555_v52  ;;  %v10641_v51 = vld [vmem:[%s14577_s1 + $0x1548] ss:$16 sps:$4 sm:$0xff]   ;;  %v10646_v52 = vld [vmem:[%s14577_s1 + $0x1564] ss:$16 sps:$4 sm:$0xff]  }
 0x274   :  { %6962 = vmatprep.subr.bf16.mxu0 %v10560_v54  ;;  %7778 = vmatprep.subr.bf16.mxu1 %v10563_v55  ;;  %v10649_v54 = vld [vmem:[%s14577_s1 + $0x156c] ss:$16 sps:$4 sm:$0xff]   ;;  %v10644_v55 = vld [vmem:[%s14577_s1 + $0x1560] ss:$16 sps:$4 sm:$0xff]  }
 0x277   :  { %6963 = vmatpush1.bf16.msra.mxu0 %v10558_v56  ;;  %7779 = vmatpush1.bf16.msra.mxu1 %v10561_v57  ;;  %v10647_v56 = vld [vmem:[%s14577_s1 + $0x1568] ss:$16 sps:$4 sm:$0xff]   ;;  %v10652_v57 = vld [vmem:[%s14577_s1 + $0x1584] ss:$16 sps:$4 sm:$0xff]  }
 0x278   :  { %6964 = vmatprep.subr.bf16.mxu0 %v10567_v60  ;;  %7780 = vmatprep.subr.bf16.mxu1 %v10570_v58  ;;  %v10655_v60 = vld [vmem:[%s14577_s1 + $0x158c] ss:$16 sps:$4 sm:$0xff]   ;;  %v10650_v58 = vld [vmem:[%s14577_s1 + $0x1580] ss:$16 sps:$4 sm:$0xff]  }
 0x27b   :  { %6965 = vmatpush1.bf16.msra.mxu0 %v10565_v59  ;;  %7781 = vmatpush1.bf16.msra.mxu1 %v10568_v61  ;;  %v10653_v59 = vld [vmem:[%s14577_s1 + $0x1588] ss:$16 sps:$4 sm:$0xff]   ;;  %v10658_v61 = vld [vmem:[%s14577_s1 + $0x15a4] ss:$16 sps:$4 sm:$0xff]  }
 0x27c   :  { %6966 = vmatprep.subr.bf16.mxu0 %v10574_v62  ;;  %7782 = vmatprep.subr.bf16.mxu1 %v10577_v63  ;;  %v10661_v62 = vld [vmem:[%s14577_s1 + $0x15ac] ss:$16 sps:$4 sm:$0xff]   ;;  %v10656_v63 = vld [vmem:[%s14577_s1 + $0x15a0] ss:$16 sps:$4 sm:$0xff]  }
 0x27f   :  { %6967 = vmatpush1.bf16.msra.mxu0 %v10572_v0  ;;  %7783 = vmatpush1.bf16.msra.mxu1 %v10575_v3  ;;  %v10659_v0 = vld [vmem:[%s14577_s1 + $0x15a8] ss:$16 sps:$4 sm:$0xff]   ;;  %v10665_v3 = vld [vmem:[%s14577_s1 + $0x15c4] ss:$16 sps:$4 sm:$0xff]  }
 0x280   :  { %6987 = vmatprep.subr.bf16.mxu0 %v10580_v1  ;;  %7803 = vmatprep.subr.bf16.mxu1 %v10583_v2  ;;  %v10668_v1 = vld [vmem:[%s14577_s1 + $0x15cc] ss:$16 sps:$4 sm:$0xff]   ;;  %v10663_v2 = vld [vmem:[%s14577_s1 + $0x15c0] ss:$16 sps:$4 sm:$0xff]  }
 0x282   :  { %6969 = vmatmul.mubr.bf16.vlgmr.msra.gmra.mrb[0].mxu0 %v8288_v4  ;;  %7785 = vmatmul.mubr.bf16.vlgmr.msra.gmra.mrb[0].mxu1 %v8288_v4  ;;  %v10666_v4 = vld [vmem:[%s14577_s1 + $0x15c8] ss:$16 sps:$4 sm:$0xff]  }
 0x283   :  { %6988 = vmatpush1.bf16.msra.mxu0 %v10578_v6  ;;  %7804 = vmatpush1.bf16.msra.mxu1 %v10581_v7  ;;  %v10675_v6 = vld [vmem:[%s14577_s1 + $0x15ec] ss:$16 sps:$4 sm:$0xff]   ;;  %v10670_v7 = vld [vmem:[%s14577_s1 + $0x15e0] ss:$16 sps:$4 sm:$0xff]  }
 0x284   :  { %6989 = vmatprep.subr.bf16.mxu0 %v10586_v8  ;;  %7805 = vmatprep.subr.bf16.mxu1 %v10589_v9  ;;  %v10673_v8 = vld [vmem:[%s14577_s1 + $0x15e8] ss:$16 sps:$4 sm:$0xff]   ;;  %v10678_v9 = vld [vmem:[%s14577_s1 + $0x1604] ss:$16 sps:$4 sm:$0xff]  }
 0x285   :  { %6978 = vmatprep.mubr.bf16.mxu0 %v8321_v10  ;;  %7794 = vmatprep.mubr.bf16.mxu1 %v8321_v10  ;;  %v10681_v10 = vld [vmem:[%s14577_s1 + $0x160c] ss:$16 sps:$4 sm:$0xff]  }
 0x287   :  { %6990 = vmatpush1.bf16.msra.mxu0 %v10584_v11  ;;  %7806 = vmatpush1.bf16.msra.mxu1 %v10587_v12  ;;  %v8290_v11 = vcombine.low %v13304_v16, %v13309_v17  ;;  %v55_v12 = vld [vmem:[%s14578_s0 + $0x150] sm:$0xff]  ;;  %v10687_v16 = vld [vmem:[%s14577_s1 + $0x162c] ss:$16 sps:$4 sm:$0xff]  }
 0x288   :  { %6991 = vmatprep.subr.bf16.mxu0 %v10592_v13  ;;  %7807 = vmatprep.subr.bf16.mxu1 %v10595_v14  ;;  %v10676_v13 = vld [vmem:[%s14577_s1 + $0x1600] ss:$16 sps:$4 sm:$0xff]   ;;  %v10679_v14 = vld [vmem:[%s14577_s1 + $0x1608] ss:$16 sps:$4 sm:$0xff]   ;;  %v8323_v17 = vcombine.high %v55_v12, %v55_v12 }
 0x28a   :  { %6979 = vmatmul.mubr.bf16.gmra.mrb[4].mxu0 %v8320_v15  ;;  %7795 = vmatmul.mubr.bf16.gmra.mrb[4].mxu1 %v8320_v15  ;;  %v10684_v15 = vld [vmem:[%s14577_s1 + $0x1624] ss:$16 sps:$4 sm:$0xff]  }
 0x28b   :  { %6992 = vmatpush1.bf16.msra.mxu0 %v10590_v18  ;;  %7808 = vmatpush1.bf16.msra.mxu1 %v10593_v19  ;;  %v10682_v18 = vld [vmem:[%s14577_s1 + $0x1620] ss:$16 sps:$4 sm:$0xff]   ;;  %v10685_v19 = vld [vmem:[%s14577_s1 + $0x1628] ss:$16 sps:$4 sm:$0xff]  }
 0x28c   :  { %6993 = vmatprep.subr.bf16.mxu0 %v10598_v20  ;;  %7809 = vmatprep.subr.bf16.mxu1 %v10601_v21  ;;  %v10690_v20 = vld [vmem:[%s14577_s1 + $0x1644] ss:$16 sps:$4 sm:$0xff]   ;;  %v10693_v21 = vld [vmem:[%s14577_s1 + $0x164c] ss:$16 sps:$4 sm:$0xff]  }
 0x28d   :  { %7019 = vmatprep.mubr.bf16.mxu0 %v8291_v22  ;;  %7835 = vmatprep.mubr.bf16.mxu1 %v8291_v22  ;;  %v8322_v22 = vcombine.low %v55_v12, %v55_v12  ;;  %v10770_v12 = vld [vmem:[%s14577_s1 + $0x17e4] ss:$16 sps:$4 sm:$0xff]  }
 0x28f   :  { %6994 = vmatpush1.bf16.msra.mxu0 %v10596_v23  ;;  %7810 = vmatpush1.bf16.msra.mxu1 %v10599_v24  ;;  %v13513_v23 = vld [vmem:[%s14578_s0 + $0x58] sm:$0xff] }
 0x290   :  { %6995 = vmatprep.subr.bf16.mxu0 %v10604_v25  ;;  %7811 = vmatprep.subr.bf16.mxu1 %v10607_v26  ;;  %v13518_v24 = vld [vmem:[%s14578_s0 + $0xd8] sm:$0xff]  ;;  %v10688_v25 = vld [vmem:[%s14577_s1 + $0x1640] ss:$16 sps:$4 sm:$0xff]  }
 0x291   :  { %v10691_v26 = vld [vmem:[%s14577_s1 + $0x1648] ss:$16 sps:$4 sm:$0xff]  }
 0x293   :  { %6996 = vmatpush1.bf16.msra.mxu0 %v10602_v27  ;;  %7812 = vmatpush1.bf16.msra.mxu1 %v10605_v28  ;;  %v10696_v27 = vld [vmem:[%s14577_s1 + $0x1664] ss:$16 sps:$4 sm:$0xff]   ;;  %v10699_v28 = vld [vmem:[%s14577_s1 + $0x166c] ss:$16 sps:$4 sm:$0xff]  }
 0x294   :  { %6997 = vmatprep.subr.bf16.mxu0 %v10610_v29  ;;  %7813 = vmatprep.subr.bf16.mxu1 %v10613_v30  ;;  %v8293_v29 = vcombine.high %v13513_v23, %v13518_v24  ;;  %v10694_v30 = vld [vmem:[%s14577_s1 + $0x1660] ss:$16 sps:$4 sm:$0xff]  }
 0x297   :  { %6998 = vmatpush1.bf16.msra.mxu0 %v10608_v31  ;;  %7814 = vmatpush1.bf16.msra.mxu1 %v10611_v32  ;;  %v10697_v31 = vld [vmem:[%s14577_s1 + $0x1668] ss:$16 sps:$4 sm:$0xff]   ;;  %v10702_v32 = vld [vmem:[%s14577_s1 + $0x1684] ss:$16 sps:$4 sm:$0xff]  }
 0x298   :  { %6999 = vmatprep.subr.bf16.mxu0 %v10616_v33  ;;  %7815 = vmatprep.subr.bf16.mxu1 %v10619_v34  ;;  %v10705_v33 = vld [vmem:[%s14577_s1 + $0x168c] ss:$16 sps:$4 sm:$0xff]   ;;  %v10700_v34 = vld [vmem:[%s14577_s1 + $0x1680] ss:$16 sps:$4 sm:$0xff]  }
 0x29b   :  { %7000 = vmatpush1.bf16.msra.mxu0 %v10614_v35  ;;  %7816 = vmatpush1.bf16.msra.mxu1 %v10617_v36  ;;  %v10703_v35 = vld [vmem:[%s14577_s1 + $0x1688] ss:$16 sps:$4 sm:$0xff]   ;;  %v10708_v36 = vld [vmem:[%s14577_s1 + $0x16a4] ss:$16 sps:$4 sm:$0xff]  }
 0x29c   :  { %7001 = vmatprep.subr.bf16.mxu0 %v10622_v37  ;;  %7817 = vmatprep.subr.bf16.mxu1 %v10625_v38  ;;  %v10711_v37 = vld [vmem:[%s14577_s1 + $0x16ac] ss:$16 sps:$4 sm:$0xff]   ;;  %v10706_v38 = vld [vmem:[%s14577_s1 + $0x16a0] ss:$16 sps:$4 sm:$0xff]  }
 0x29f   :  { %7002 = vmatpush1.bf16.msra.mxu0 %v10620_v39  ;;  %7818 = vmatpush1.bf16.msra.mxu1 %v10623_v40  ;;  %v10709_v39 = vld [vmem:[%s14577_s1 + $0x16a8] ss:$16 sps:$4 sm:$0xff]   ;;  %v10714_v40 = vld [vmem:[%s14577_s1 + $0x16c4] ss:$16 sps:$4 sm:$0xff]  }
 0x2a0   :  { %7003 = vmatprep.subr.bf16.mxu0 %v10628_v41  ;;  %7819 = vmatprep.subr.bf16.mxu1 %v10631_v42  ;;  %v10717_v41 = vld [vmem:[%s14577_s1 + $0x16cc] ss:$16 sps:$4 sm:$0xff]   ;;  %v10712_v42 = vld [vmem:[%s14577_s1 + $0x16c0] ss:$16 sps:$4 sm:$0xff]  }
 0x2a3   :  { %7004 = vmatpush1.bf16.msra.mxu0 %v10626_v43  ;;  %7820 = vmatpush1.bf16.msra.mxu1 %v10629_v46  ;;  %v10715_v43 = vld [vmem:[%s14577_s1 + $0x16c8] ss:$16 sps:$4 sm:$0xff]   ;;  %v10720_v46 = vld [vmem:[%s14577_s1 + $0x16e4] ss:$16 sps:$4 sm:$0xff]  }
 0x2a4   :  { %7005 = vmatprep.subr.bf16.mxu0 %v10634_v44  ;;  %7821 = vmatprep.subr.bf16.mxu1 %v10637_v45  ;;  %v10723_v44 = vld [vmem:[%s14577_s1 + $0x16ec] ss:$16 sps:$4 sm:$0xff]   ;;  %v10718_v45 = vld [vmem:[%s14577_s1 + $0x16e0] ss:$16 sps:$4 sm:$0xff]  }
 0x2a7   :  { %7006 = vmatpush1.bf16.msra.mxu0 %v10632_v47  ;;  %7822 = vmatpush1.bf16.msra.mxu1 %v10635_v48  ;;  %v10721_v47 = vld [vmem:[%s14577_s1 + $0x16e8] ss:$16 sps:$4 sm:$0xff]   ;;  %v10726_v48 = vld [vmem:[%s14577_s1 + $0x1704] ss:$16 sps:$4 sm:$0xff]  }
 0x2a8   :  { %7007 = vmatprep.subr.bf16.mxu0 %v10640_v49  ;;  %7823 = vmatprep.subr.bf16.mxu1 %v10643_v50  ;;  %v10729_v49 = vld [vmem:[%s14577_s1 + $0x170c] ss:$16 sps:$4 sm:$0xff]   ;;  %v10724_v50 = vld [vmem:[%s14577_s1 + $0x1700] ss:$16 sps:$4 sm:$0xff]  }
 0x2ab   :  { %7008 = vmatpush1.bf16.msra.mxu0 %v10638_v53  ;;  %7824 = vmatpush1.bf16.msra.mxu1 %v10641_v51  ;;  %v10727_v53 = vld [vmem:[%s14577_s1 + $0x1708] ss:$16 sps:$4 sm:$0xff]   ;;  %v10732_v51 = vld [vmem:[%s14577_s1 + $0x1724] ss:$16 sps:$4 sm:$0xff]  }
 0x2ac   :  { %7009 = vmatprep.subr.bf16.mxu0 %v10646_v52  ;;  %7825 = vmatprep.subr.bf16.mxu1 %v10649_v54  ;;  %v10735_v52 = vld [vmem:[%s14577_s1 + $0x172c] ss:$16 sps:$4 sm:$0xff]   ;;  %v10730_v54 = vld [vmem:[%s14577_s1 + $0x1720] ss:$16 sps:$4 sm:$0xff]  }
 0x2af   :  { %7010 = vmatpush1.bf16.msra.mxu0 %v10644_v55  ;;  %7826 = vmatpush1.bf16.msra.mxu1 %v10647_v56  ;;  %v10733_v55 = vld [vmem:[%s14577_s1 + $0x1728] ss:$16 sps:$4 sm:$0xff]   ;;  %v10738_v56 = vld [vmem:[%s14577_s1 + $0x1744] ss:$16 sps:$4 sm:$0xff]  }
 0x2b0   :  { %7011 = vmatprep.subr.bf16.mxu0 %v10652_v57  ;;  %7827 = vmatprep.subr.bf16.mxu1 %v10655_v60  ;;  %v10741_v57 = vld [vmem:[%s14577_s1 + $0x174c] ss:$16 sps:$4 sm:$0xff]   ;;  %v10736_v60 = vld [vmem:[%s14577_s1 + $0x1740] ss:$16 sps:$4 sm:$0xff]  }
 0x2b3   :  { %7012 = vmatpush1.bf16.msra.mxu0 %v10650_v58  ;;  %7828 = vmatpush1.bf16.msra.mxu1 %v10653_v59  ;;  %v10739_v58 = vld [vmem:[%s14577_s1 + $0x1748] ss:$16 sps:$4 sm:$0xff]   ;;  %v10744_v59 = vld [vmem:[%s14577_s1 + $0x1764] ss:$16 sps:$4 sm:$0xff]  }
 0x2b4   :  { %7013 = vmatprep.subr.bf16.mxu0 %v10658_v61  ;;  %7829 = vmatprep.subr.bf16.mxu1 %v10661_v62  ;;  %v10747_v61 = vld [vmem:[%s14577_s1 + $0x176c] ss:$16 sps:$4 sm:$0xff]   ;;  %v10742_v62 = vld [vmem:[%s14577_s1 + $0x1760] ss:$16 sps:$4 sm:$0xff]  }
 0x2b7   :  { %7014 = vmatpush1.bf16.msra.mxu0 %v10656_v63  ;;  %7830 = vmatpush1.bf16.msra.mxu1 %v10659_v0  ;;  %v10745_v63 = vld [vmem:[%s14577_s1 + $0x1768] ss:$16 sps:$4 sm:$0xff]   ;;  %v10750_v0 = vld [vmem:[%s14577_s1 + $0x1784] ss:$16 sps:$4 sm:$0xff]  }
 0x2b8   :  { %7015 = vmatprep.subr.bf16.mxu0 %v10665_v3  ;;  %7831 = vmatprep.subr.bf16.mxu1 %v10668_v1  ;;  %v10753_v3 = vld [vmem:[%s14577_s1 + $0x178c] ss:$16 sps:$4 sm:$0xff]   ;;  %v10748_v1 = vld [vmem:[%s14577_s1 + $0x1780] ss:$16 sps:$4 sm:$0xff]  }
 0x2bb   :  { %7016 = vmatpush1.bf16.msra.mxu0 %v10663_v2  ;;  %7832 = vmatpush1.bf16.msra.mxu1 %v10666_v4  ;;  %v10751_v2 = vld [vmem:[%s14577_s1 + $0x1788] ss:$16 sps:$4 sm:$0xff]   ;;  %v10756_v4 = vld [vmem:[%s14577_s1 + $0x17a4] ss:$16 sps:$4 sm:$0xff]  }
 0x2bc   :  { %7017 = vmatprep.subr.bf16.mxu0 %v10672_v5  ;;  %7833 = vmatprep.subr.bf16.mxu1 %v10675_v6  ;;  %v10759_v5 = vld [vmem:[%s14577_s1 + $0x17ac] ss:$16 sps:$4 sm:$0xff]   ;;  %v10754_v6 = vld [vmem:[%s14577_s1 + $0x17a0] ss:$16 sps:$4 sm:$0xff]  }
 0x2bf   :  { %7018 = vmatpush1.bf16.msra.mxu0 %v10670_v7  ;;  %7834 = vmatpush1.bf16.msra.mxu1 %v10673_v8  ;;  %v10757_v7 = vld [vmem:[%s14577_s1 + $0x17a8] ss:$16 sps:$4 sm:$0xff]   ;;  %v10763_v8 = vld [vmem:[%s14577_s1 + $0x17c4] ss:$16 sps:$4 sm:$0xff]  }
 0x2c0   :  { %7038 = vmatprep.subr.bf16.mxu0 %v10678_v9  ;;  %7854 = vmatprep.subr.bf16.mxu1 %v10681_v10  ;;  %v10766_v9 = vld [vmem:[%s14577_s1 + $0x17cc] ss:$16 sps:$4 sm:$0xff]   ;;  %v10761_v10 = vld [vmem:[%s14577_s1 + $0x17c0] ss:$16 sps:$4 sm:$0xff]  }
 0x2c2   :  { %7020 = vmatmul.mubr.bf16.vlgmr.msra.gmra.mrb[0].mxu0 %v8290_v11  ;;  %7836 = vmatmul.mubr.bf16.vlgmr.msra.gmra.mrb[0].mxu1 %v8290_v11  ;;  %v10764_v11 = vld [vmem:[%s14577_s1 + $0x17c8] ss:$16 sps:$4 sm:$0xff]  }
 0x2c3   :  { %7039 = vmatpush1.bf16.msra.mxu0 %v10676_v13  ;;  %7855 = vmatpush1.bf16.msra.mxu1 %v10679_v14  ;;  %v10773_v13 = vld [vmem:[%s14577_s1 + $0x17ec] ss:$16 sps:$4 sm:$0xff]   ;;  %v10768_v14 = vld [vmem:[%s14577_s1 + $0x17e0] ss:$16 sps:$4 sm:$0xff]  }
 0x2c4   :  { %7040 = vmatprep.subr.bf16.mxu0 %v10684_v15  ;;  %7856 = vmatprep.subr.bf16.mxu1 %v10687_v16  ;;  %v10771_v15 = vld [vmem:[%s14577_s1 + $0x17e8] ss:$16 sps:$4 sm:$0xff]   ;;  %v10776_v16 = vld [vmem:[%s14577_s1 + $0x1804] ss:$16 sps:$4 sm:$0xff]  }
 0x2c5   :  { %7029 = vmatprep.mubr.bf16.mxu0 %v8323_v17  ;;  %7845 = vmatprep.mubr.bf16.mxu1 %v8323_v17  ;;  %v10779_v17 = vld [vmem:[%s14577_s1 + $0x180c] ss:$16 sps:$4 sm:$0xff]  }
 0x2c7   :  { %7041 = vmatpush1.bf16.msra.mxu0 %v10682_v18  ;;  %7857 = vmatpush1.bf16.msra.mxu1 %v10685_v19  ;;  %v8292_v18 = vcombine.low %v13513_v23, %v13518_v24  ;;  %v56_v19 = vld [vmem:[%s14578_s0 + $0x158] sm:$0xff] }
 0x2c8   :  { %7042 = vmatprep.subr.bf16.mxu0 %v10690_v20  ;;  %7858 = vmatprep.subr.bf16.mxu1 %v10693_v21  ;;  %v10774_v20 = vld [vmem:[%s14577_s1 + $0x1800] ss:$16 sps:$4 sm:$0xff]   ;;  %v10777_v21 = vld [vmem:[%s14577_s1 + $0x1808] ss:$16 sps:$4 sm:$0xff]   ;;  %v10785_v23 = vld [vmem:[%s14577_s1 + $0x182c] ss:$16 sps:$4 sm:$0xff]   ;;  %v8325_v24 = vcombine.high %v56_v19, %v56_v19 }
 0x2ca   :  { %7030 = vmatmul.mubr.bf16.gmra.mrb[4].mxu0 %v8322_v22  ;;  %7846 = vmatmul.mubr.bf16.gmra.mrb[4].mxu1 %v8322_v22  ;;  %v10782_v22 = vld [vmem:[%s14577_s1 + $0x1824] ss:$16 sps:$4 sm:$0xff]  }
 0x2cb   :  { %7043 = vmatpush1.bf16.msra.mxu0 %v10688_v25  ;;  %7859 = vmatpush1.bf16.msra.mxu1 %v10691_v26  ;;  %v10780_v25 = vld [vmem:[%s14577_s1 + $0x1820] ss:$16 sps:$4 sm:$0xff]   ;;  %v10783_v26 = vld [vmem:[%s14577_s1 + $0x1828] ss:$16 sps:$4 sm:$0xff]  }
 0x2cc   :  { %7044 = vmatprep.subr.bf16.mxu0 %v10696_v27  ;;  %7860 = vmatprep.subr.bf16.mxu1 %v10699_v28  ;;  %v10788_v27 = vld [vmem:[%s14577_s1 + $0x1844] ss:$16 sps:$4 sm:$0xff]   ;;  %v10791_v28 = vld [vmem:[%s14577_s1 + $0x184c] ss:$16 sps:$4 sm:$0xff]  }
 0x2cd   :  { %7070 = vmatprep.mubr.bf16.mxu0 %v8293_v29  ;;  %7886 = vmatprep.mubr.bf16.mxu1 %v8293_v29  ;;  %v8324_v29 = vcombine.low %v56_v19, %v56_v19  ;;  %v10868_v19 = vld [vmem:[%s14577_s1 + $0x19e4] ss:$16 sps:$4 sm:$0xff]  }
 0x2cf   :  { %7045 = vmatpush1.bf16.msra.mxu0 %v10694_v30  ;;  %7861 = vmatpush1.bf16.msra.mxu1 %v10697_v31  ;;  %v13722_v30 = vld [vmem:[%s14578_s0 + $0x60] sm:$0xff] }
 0x2d0   :  { %7046 = vmatprep.subr.bf16.mxu0 %v10702_v32  ;;  %7862 = vmatprep.subr.bf16.mxu1 %v10705_v33  ;;  %v13727_v31 = vld [vmem:[%s14578_s0 + $0xe0] sm:$0xff]  ;;  %v10789_v33 = vld [vmem:[%s14577_s1 + $0x1848] ss:$16 sps:$4 sm:$0xff]  }
 0x2d1   :  { %v10786_v32 = vld [vmem:[%s14577_s1 + $0x1840] ss:$16 sps:$4 sm:$0xff]  }
 0x2d3   :  { %7047 = vmatpush1.bf16.msra.mxu0 %v10700_v34  ;;  %7863 = vmatpush1.bf16.msra.mxu1 %v10703_v35  ;;  %v10794_v34 = vld [vmem:[%s14577_s1 + $0x1864] ss:$16 sps:$4 sm:$0xff]   ;;  %v10797_v35 = vld [vmem:[%s14577_s1 + $0x186c] ss:$16 sps:$4 sm:$0xff]  }
 0x2d4   :  { %7048 = vmatprep.subr.bf16.mxu0 %v10708_v36  ;;  %7864 = vmatprep.subr.bf16.mxu1 %v10711_v37  ;;  %v8295_v36 = vcombine.high %v13722_v30, %v13727_v31  ;;  %v10792_v37 = vld [vmem:[%s14577_s1 + $0x1860] ss:$16 sps:$4 sm:$0xff]  }
 0x2d7   :  { %7049 = vmatpush1.bf16.msra.mxu0 %v10706_v38  ;;  %7865 = vmatpush1.bf16.msra.mxu1 %v10709_v39  ;;  %v10795_v38 = vld [vmem:[%s14577_s1 + $0x1868] ss:$16 sps:$4 sm:$0xff]   ;;  %v10800_v39 = vld [vmem:[%s14577_s1 + $0x1884] ss:$16 sps:$4 sm:$0xff]  }
 0x2d8   :  { %7050 = vmatprep.subr.bf16.mxu0 %v10714_v40  ;;  %7866 = vmatprep.subr.bf16.mxu1 %v10717_v41  ;;  %v10803_v40 = vld [vmem:[%s14577_s1 + $0x188c] ss:$16 sps:$4 sm:$0xff]   ;;  %v10798_v41 = vld [vmem:[%s14577_s1 + $0x1880] ss:$16 sps:$4 sm:$0xff]  }
 0x2db   :  { %7051 = vmatpush1.bf16.msra.mxu0 %v10712_v42  ;;  %7867 = vmatpush1.bf16.msra.mxu1 %v10715_v43  ;;  %v10801_v42 = vld [vmem:[%s14577_s1 + $0x1888] ss:$16 sps:$4 sm:$0xff]   ;;  %v10806_v43 = vld [vmem:[%s14577_s1 + $0x18a4] ss:$16 sps:$4 sm:$0xff]  }
 0x2dc   :  { %7052 = vmatprep.subr.bf16.mxu0 %v10720_v46  ;;  %7868 = vmatprep.subr.bf16.mxu1 %v10723_v44  ;;  %v10809_v46 = vld [vmem:[%s14577_s1 + $0x18ac] ss:$16 sps:$4 sm:$0xff]   ;;  %v10804_v44 = vld [vmem:[%s14577_s1 + $0x18a0] ss:$16 sps:$4 sm:$0xff]  }
 0x2df   :  { %7053 = vmatpush1.bf16.msra.mxu0 %v10718_v45  ;;  %7869 = vmatpush1.bf16.msra.mxu1 %v10721_v47  ;;  %v10807_v45 = vld [vmem:[%s14577_s1 + $0x18a8] ss:$16 sps:$4 sm:$0xff]   ;;  %v10812_v47 = vld [vmem:[%s14577_s1 + $0x18c4] ss:$16 sps:$4 sm:$0xff]  }
 0x2e0   :  { %7054 = vmatprep.subr.bf16.mxu0 %v10726_v48  ;;  %7870 = vmatprep.subr.bf16.mxu1 %v10729_v49  ;;  %v10815_v48 = vld [vmem:[%s14577_s1 + $0x18cc] ss:$16 sps:$4 sm:$0xff]   ;;  %v10810_v49 = vld [vmem:[%s14577_s1 + $0x18c0] ss:$16 sps:$4 sm:$0xff]  }
 0x2e3   :  { %7055 = vmatpush1.bf16.msra.mxu0 %v10724_v50  ;;  %7871 = vmatpush1.bf16.msra.mxu1 %v10727_v53  ;;  %v10813_v50 = vld [vmem:[%s14577_s1 + $0x18c8] ss:$16 sps:$4 sm:$0xff]   ;;  %v10818_v53 = vld [vmem:[%s14577_s1 + $0x18e4] ss:$16 sps:$4 sm:$0xff]  }
 0x2e4   :  { %7056 = vmatprep.subr.bf16.mxu0 %v10732_v51  ;;  %7872 = vmatprep.subr.bf16.mxu1 %v10735_v52  ;;  %v10821_v51 = vld [vmem:[%s14577_s1 + $0x18ec] ss:$16 sps:$4 sm:$0xff]   ;;  %v10816_v52 = vld [vmem:[%s14577_s1 + $0x18e0] ss:$16 sps:$4 sm:$0xff]  }
 0x2e7   :  { %7057 = vmatpush1.bf16.msra.mxu0 %v10730_v54  ;;  %7873 = vmatpush1.bf16.msra.mxu1 %v10733_v55  ;;  %v10819_v54 = vld [vmem:[%s14577_s1 + $0x18e8] ss:$16 sps:$4 sm:$0xff]   ;;  %v10824_v55 = vld [vmem:[%s14577_s1 + $0x1904] ss:$16 sps:$4 sm:$0xff]  }
 0x2e8   :  { %7058 = vmatprep.subr.bf16.mxu0 %v10738_v56  ;;  %7874 = vmatprep.subr.bf16.mxu1 %v10741_v57  ;;  %v10827_v56 = vld [vmem:[%s14577_s1 + $0x190c] ss:$16 sps:$4 sm:$0xff]   ;;  %v10822_v57 = vld [vmem:[%s14577_s1 + $0x1900] ss:$16 sps:$4 sm:$0xff]  }
 0x2eb   :  { %7059 = vmatpush1.bf16.msra.mxu0 %v10736_v60  ;;  %7875 = vmatpush1.bf16.msra.mxu1 %v10739_v58  ;;  %v10825_v60 = vld [vmem:[%s14577_s1 + $0x1908] ss:$16 sps:$4 sm:$0xff]   ;;  %v10830_v58 = vld [vmem:[%s14577_s1 + $0x1924] ss:$16 sps:$4 sm:$0xff]  }
 0x2ec   :  { %7060 = vmatprep.subr.bf16.mxu0 %v10744_v59  ;;  %7876 = vmatprep.subr.bf16.mxu1 %v10747_v61  ;;  %v10833_v59 = vld [vmem:[%s14577_s1 + $0x192c] ss:$16 sps:$4 sm:$0xff]   ;;  %v10828_v61 = vld [vmem:[%s14577_s1 + $0x1920] ss:$16 sps:$4 sm:$0xff]  }
 0x2ef   :  { %7061 = vmatpush1.bf16.msra.mxu0 %v10742_v62  ;;  %7877 = vmatpush1.bf16.msra.mxu1 %v10745_v63  ;;  %v10831_v62 = vld [vmem:[%s14577_s1 + $0x1928] ss:$16 sps:$4 sm:$0xff]   ;;  %v10836_v63 = vld [vmem:[%s14577_s1 + $0x1944] ss:$16 sps:$4 sm:$0xff]  }
 0x2f0   :  { %7062 = vmatprep.subr.bf16.mxu0 %v10750_v0  ;;  %7878 = vmatprep.subr.bf16.mxu1 %v10753_v3  ;;  %v10839_v0 = vld [vmem:[%s14577_s1 + $0x194c] ss:$16 sps:$4 sm:$0xff]   ;;  %v10834_v3 = vld [vmem:[%s14577_s1 + $0x1940] ss:$16 sps:$4 sm:$0xff]  }
 0x2f3   :  { %7063 = vmatpush1.bf16.msra.mxu0 %v10748_v1  ;;  %7879 = vmatpush1.bf16.msra.mxu1 %v10751_v2  ;;  %v10837_v1 = vld [vmem:[%s14577_s1 + $0x1948] ss:$16 sps:$4 sm:$0xff]   ;;  %v10842_v2 = vld [vmem:[%s14577_s1 + $0x1964] ss:$16 sps:$4 sm:$0xff]  }
 0x2f4   :  { %7064 = vmatprep.subr.bf16.mxu0 %v10756_v4  ;;  %7880 = vmatprep.subr.bf16.mxu1 %v10759_v5  ;;  %v10845_v4 = vld [vmem:[%s14577_s1 + $0x196c] ss:$16 sps:$4 sm:$0xff]   ;;  %v10840_v5 = vld [vmem:[%s14577_s1 + $0x1960] ss:$16 sps:$4 sm:$0xff]  }
 0x2f7   :  { %7065 = vmatpush1.bf16.msra.mxu0 %v10754_v6  ;;  %7881 = vmatpush1.bf16.msra.mxu1 %v10757_v7  ;;  %v10843_v6 = vld [vmem:[%s14577_s1 + $0x1968] ss:$16 sps:$4 sm:$0xff]   ;;  %v10848_v7 = vld [vmem:[%s14577_s1 + $0x1984] ss:$16 sps:$4 sm:$0xff]  }
 0x2f8   :  { %7066 = vmatprep.subr.bf16.mxu0 %v10763_v8  ;;  %7882 = vmatprep.subr.bf16.mxu1 %v10766_v9  ;;  %v10851_v8 = vld [vmem:[%s14577_s1 + $0x198c] ss:$16 sps:$4 sm:$0xff]   ;;  %v10846_v9 = vld [vmem:[%s14577_s1 + $0x1980] ss:$16 sps:$4 sm:$0xff]  }
 0x2fb   :  { %7067 = vmatpush1.bf16.msra.mxu0 %v10761_v10  ;;  %7883 = vmatpush1.bf16.msra.mxu1 %v10764_v11  ;;  %v10849_v10 = vld [vmem:[%s14577_s1 + $0x1988] ss:$16 sps:$4 sm:$0xff]   ;;  %v10854_v11 = vld [vmem:[%s14577_s1 + $0x19a4] ss:$16 sps:$4 sm:$0xff]  }
 0x2fc   :  { %7068 = vmatprep.subr.bf16.mxu0 %v10770_v12  ;;  %7884 = vmatprep.subr.bf16.mxu1 %v10773_v13  ;;  %v10857_v12 = vld [vmem:[%s14577_s1 + $0x19ac] ss:$16 sps:$4 sm:$0xff]   ;;  %v10852_v13 = vld [vmem:[%s14577_s1 + $0x19a0] ss:$16 sps:$4 sm:$0xff]  }
 0x2ff   :  { %7069 = vmatpush1.bf16.msra.mxu0 %v10768_v14  ;;  %7885 = vmatpush1.bf16.msra.mxu1 %v10771_v15  ;;  %v10855_v14 = vld [vmem:[%s14577_s1 + $0x19a8] ss:$16 sps:$4 sm:$0xff]   ;;  %v10861_v15 = vld [vmem:[%s14577_s1 + $0x19c4] ss:$16 sps:$4 sm:$0xff]  }
 0x300   :  { %7089 = vmatprep.subr.bf16.mxu0 %v10776_v16  ;;  %7905 = vmatprep.subr.bf16.mxu1 %v10779_v17  ;;  %v10864_v16 = vld [vmem:[%s14577_s1 + $0x19cc] ss:$16 sps:$4 sm:$0xff]   ;;  %v10859_v17 = vld [vmem:[%s14577_s1 + $0x19c0] ss:$16 sps:$4 sm:$0xff]  }
 0x302   :  { %7071 = vmatmul.mubr.bf16.vlgmr.msra.gmra.mrb[0].mxu0 %v8292_v18  ;;  %7887 = vmatmul.mubr.bf16.vlgmr.msra.gmra.mrb[0].mxu1 %v8292_v18  ;;  %v10862_v18 = vld [vmem:[%s14577_s1 + $0x19c8] ss:$16 sps:$4 sm:$0xff]  }
 0x303   :  { %7090 = vmatpush1.bf16.msra.mxu0 %v10774_v20  ;;  %7906 = vmatpush1.bf16.msra.mxu1 %v10777_v21  ;;  %v10871_v20 = vld [vmem:[%s14577_s1 + $0x19ec] ss:$16 sps:$4 sm:$0xff]   ;;  %v10866_v21 = vld [vmem:[%s14577_s1 + $0x19e0] ss:$16 sps:$4 sm:$0xff]  }
 0x304   :  { %7091 = vmatprep.subr.bf16.mxu0 %v10782_v22  ;;  %7907 = vmatprep.subr.bf16.mxu1 %v10785_v23  ;;  %v10869_v22 = vld [vmem:[%s14577_s1 + $0x19e8] ss:$16 sps:$4 sm:$0xff]   ;;  %v10874_v23 = vld [vmem:[%s14577_s1 + $0x1a04] ss:$16 sps:$4 sm:$0xff]  }
 0x305   :  { %7080 = vmatprep.mubr.bf16.mxu0 %v8325_v24  ;;  %7896 = vmatprep.mubr.bf16.mxu1 %v8325_v24  ;;  %v10877_v24 = vld [vmem:[%s14577_s1 + $0x1a0c] ss:$16 sps:$4 sm:$0xff]  }
 0x307   :  { %7092 = vmatpush1.bf16.msra.mxu0 %v10780_v25  ;;  %7908 = vmatpush1.bf16.msra.mxu1 %v10783_v26  ;;  %v8294_v25 = vcombine.low %v13722_v30, %v13727_v31  ;;  %v57_v26 = vld [vmem:[%s14578_s0 + $0x160] sm:$0xff]  ;;  %v10883_v30 = vld [vmem:[%s14577_s1 + $0x1a2c] ss:$16 sps:$4 sm:$0xff]  }
 0x308   :  { %7093 = vmatprep.subr.bf16.mxu0 %v10788_v27  ;;  %7909 = vmatprep.subr.bf16.mxu1 %v10791_v28  ;;  %v10872_v27 = vld [vmem:[%s14577_s1 + $0x1a00] ss:$16 sps:$4 sm:$0xff]   ;;  %v10875_v28 = vld [vmem:[%s14577_s1 + $0x1a08] ss:$16 sps:$4 sm:$0xff]   ;;  %v8327_v31 = vcombine.high %v57_v26, %v57_v26 }
 0x30a   :  { %7081 = vmatmul.mubr.bf16.gmra.mrb[4].mxu0 %v8324_v29  ;;  %7897 = vmatmul.mubr.bf16.gmra.mrb[4].mxu1 %v8324_v29  ;;  %v10880_v29 = vld [vmem:[%s14577_s1 + $0x1a24] ss:$16 sps:$4 sm:$0xff]  }
 0x30b   :  { %7094 = vmatpush1.bf16.msra.mxu0 %v10786_v32  ;;  %7910 = vmatpush1.bf16.msra.mxu1 %v10789_v33  ;;  %v10878_v32 = vld [vmem:[%s14577_s1 + $0x1a20] ss:$16 sps:$4 sm:$0xff]   ;;  %v10881_v33 = vld [vmem:[%s14577_s1 + $0x1a28] ss:$16 sps:$4 sm:$0xff]  }
 0x30c   :  { %7095 = vmatprep.subr.bf16.mxu0 %v10794_v34  ;;  %7911 = vmatprep.subr.bf16.mxu1 %v10797_v35  ;;  %v10886_v34 = vld [vmem:[%s14577_s1 + $0x1a44] ss:$16 sps:$4 sm:$0xff]   ;;  %v10889_v35 = vld [vmem:[%s14577_s1 + $0x1a4c] ss:$16 sps:$4 sm:$0xff]  }
 0x30d   :  { %7121 = vmatprep.mubr.bf16.mxu0 %v8295_v36  ;;  %7937 = vmatprep.mubr.bf16.mxu1 %v8295_v36  ;;  %v8326_v36 = vcombine.low %v57_v26, %v57_v26  ;;  %v10966_v26 = vld [vmem:[%s14577_s1 + $0x1be4] ss:$16 sps:$4 sm:$0xff]  }
 0x30f   :  { %7096 = vmatpush1.bf16.msra.mxu0 %v10792_v37  ;;  %7912 = vmatpush1.bf16.msra.mxu1 %v10795_v38  ;;  %v13931_v37 = vld [vmem:[%s14578_s0 + $0x68] sm:$0xff] }
 0x310   :  { %7097 = vmatprep.subr.bf16.mxu0 %v10800_v39  ;;  %7913 = vmatprep.subr.bf16.mxu1 %v10803_v40  ;;  %v13936_v38 = vld [vmem:[%s14578_s0 + $0xe8] sm:$0xff]  ;;  %v10884_v39 = vld [vmem:[%s14577_s1 + $0x1a40] ss:$16 sps:$4 sm:$0xff]  }
 0x311   :  { %v10887_v40 = vld [vmem:[%s14577_s1 + $0x1a48] ss:$16 sps:$4 sm:$0xff]  }
 0x313   :  { %7098 = vmatpush1.bf16.msra.mxu0 %v10798_v41  ;;  %7914 = vmatpush1.bf16.msra.mxu1 %v10801_v42  ;;  %v10892_v41 = vld [vmem:[%s14577_s1 + $0x1a64] ss:$16 sps:$4 sm:$0xff]   ;;  %v10895_v42 = vld [vmem:[%s14577_s1 + $0x1a6c] ss:$16 sps:$4 sm:$0xff]  }
 0x314   :  { %7099 = vmatprep.subr.bf16.mxu0 %v10806_v43  ;;  %7915 = vmatprep.subr.bf16.mxu1 %v10809_v46  ;;  %v8297_v43 = vcombine.high %v13931_v37, %v13936_v38  ;;  %v10890_v46 = vld [vmem:[%s14577_s1 + $0x1a60] ss:$16 sps:$4 sm:$0xff]  }
 0x317   :  { %7100 = vmatpush1.bf16.msra.mxu0 %v10804_v44  ;;  %7916 = vmatpush1.bf16.msra.mxu1 %v10807_v45  ;;  %v10893_v44 = vld [vmem:[%s14577_s1 + $0x1a68] ss:$16 sps:$4 sm:$0xff]   ;;  %v10898_v45 = vld [vmem:[%s14577_s1 + $0x1a84] ss:$16 sps:$4 sm:$0xff]  }
 0x318   :  { %7101 = vmatprep.subr.bf16.mxu0 %v10812_v47  ;;  %7917 = vmatprep.subr.bf16.mxu1 %v10815_v48  ;;  %v10901_v47 = vld [vmem:[%s14577_s1 + $0x1a8c] ss:$16 sps:$4 sm:$0xff]   ;;  %v10896_v48 = vld [vmem:[%s14577_s1 + $0x1a80] ss:$16 sps:$4 sm:$0xff]  }
 0x31b   :  { %7102 = vmatpush1.bf16.msra.mxu0 %v10810_v49  ;;  %7918 = vmatpush1.bf16.msra.mxu1 %v10813_v50  ;;  %v10899_v49 = vld [vmem:[%s14577_s1 + $0x1a88] ss:$16 sps:$4 sm:$0xff]   ;;  %v10904_v50 = vld [vmem:[%s14577_s1 + $0x1aa4] ss:$16 sps:$4 sm:$0xff]  }
 0x31c   :  { %7103 = vmatprep.subr.bf16.mxu0 %v10818_v53  ;;  %7919 = vmatprep.subr.bf16.mxu1 %v10821_v51  ;;  %v10907_v53 = vld [vmem:[%s14577_s1 + $0x1aac] ss:$16 sps:$4 sm:$0xff]   ;;  %v10902_v51 = vld [vmem:[%s14577_s1 + $0x1aa0] ss:$16 sps:$4 sm:$0xff]  }
 0x31f   :  { %7104 = vmatpush1.bf16.msra.mxu0 %v10816_v52  ;;  %7920 = vmatpush1.bf16.msra.mxu1 %v10819_v54  ;;  %v10905_v52 = vld [vmem:[%s14577_s1 + $0x1aa8] ss:$16 sps:$4 sm:$0xff]   ;;  %v10910_v54 = vld [vmem:[%s14577_s1 + $0x1ac4] ss:$16 sps:$4 sm:$0xff]  }
 0x320   :  { %7105 = vmatprep.subr.bf16.mxu0 %v10824_v55  ;;  %7921 = vmatprep.subr.bf16.mxu1 %v10827_v56  ;;  %v10913_v55 = vld [vmem:[%s14577_s1 + $0x1acc] ss:$16 sps:$4 sm:$0xff]   ;;  %v10908_v56 = vld [vmem:[%s14577_s1 + $0x1ac0] ss:$16 sps:$4 sm:$0xff]  }
 0x323   :  { %7106 = vmatpush1.bf16.msra.mxu0 %v10822_v57  ;;  %7922 = vmatpush1.bf16.msra.mxu1 %v10825_v60  ;;  %v10911_v57 = vld [vmem:[%s14577_s1 + $0x1ac8] ss:$16 sps:$4 sm:$0xff]   ;;  %v10916_v60 = vld [vmem:[%s14577_s1 + $0x1ae4] ss:$16 sps:$4 sm:$0xff]  }
 0x324   :  { %7107 = vmatprep.subr.bf16.mxu0 %v10830_v58  ;;  %7923 = vmatprep.subr.bf16.mxu1 %v10833_v59  ;;  %v10919_v58 = vld [vmem:[%s14577_s1 + $0x1aec] ss:$16 sps:$4 sm:$0xff]   ;;  %v10914_v59 = vld [vmem:[%s14577_s1 + $0x1ae0] ss:$16 sps:$4 sm:$0xff]  }
 0x327   :  { %7108 = vmatpush1.bf16.msra.mxu0 %v10828_v61  ;;  %7924 = vmatpush1.bf16.msra.mxu1 %v10831_v62  ;;  %v10917_v61 = vld [vmem:[%s14577_s1 + $0x1ae8] ss:$16 sps:$4 sm:$0xff]   ;;  %v10922_v62 = vld [vmem:[%s14577_s1 + $0x1b04] ss:$16 sps:$4 sm:$0xff]  }
 0x328   :  { %7109 = vmatprep.subr.bf16.mxu0 %v10836_v63  ;;  %7925 = vmatprep.subr.bf16.mxu1 %v10839_v0  ;;  %v10925_v63 = vld [vmem:[%s14577_s1 + $0x1b0c] ss:$16 sps:$4 sm:$0xff]   ;;  %v10920_v0 = vld [vmem:[%s14577_s1 + $0x1b00] ss:$16 sps:$4 sm:$0xff]  }
 0x32b   :  { %7110 = vmatpush1.bf16.msra.mxu0 %v10834_v3  ;;  %7926 = vmatpush1.bf16.msra.mxu1 %v10837_v1  ;;  %v10923_v3 = vld [vmem:[%s14577_s1 + $0x1b08] ss:$16 sps:$4 sm:$0xff]   ;;  %v10928_v1 = vld [vmem:[%s14577_s1 + $0x1b24] ss:$16 sps:$4 sm:$0xff]  }
 0x32c   :  { %7111 = vmatprep.subr.bf16.mxu0 %v10842_v2  ;;  %7927 = vmatprep.subr.bf16.mxu1 %v10845_v4  ;;  %v10931_v2 = vld [vmem:[%s14577_s1 + $0x1b2c] ss:$16 sps:$4 sm:$0xff]   ;;  %v10926_v4 = vld [vmem:[%s14577_s1 + $0x1b20] ss:$16 sps:$4 sm:$0xff]  }
 0x32f   :  { %7112 = vmatpush1.bf16.msra.mxu0 %v10840_v5  ;;  %7928 = vmatpush1.bf16.msra.mxu1 %v10843_v6  ;;  %v10929_v5 = vld [vmem:[%s14577_s1 + $0x1b28] ss:$16 sps:$4 sm:$0xff]   ;;  %v10934_v6 = vld [vmem:[%s14577_s1 + $0x1b44] ss:$16 sps:$4 sm:$0xff]  }
 0x330   :  { %7113 = vmatprep.subr.bf16.mxu0 %v10848_v7  ;;  %7929 = vmatprep.subr.bf16.mxu1 %v10851_v8  ;;  %v10937_v7 = vld [vmem:[%s14577_s1 + $0x1b4c] ss:$16 sps:$4 sm:$0xff]   ;;  %v10932_v8 = vld [vmem:[%s14577_s1 + $0x1b40] ss:$16 sps:$4 sm:$0xff]  }
 0x333   :  { %7114 = vmatpush1.bf16.msra.mxu0 %v10846_v9  ;;  %7930 = vmatpush1.bf16.msra.mxu1 %v10849_v10  ;;  %v10935_v9 = vld [vmem:[%s14577_s1 + $0x1b48] ss:$16 sps:$4 sm:$0xff]   ;;  %v10940_v10 = vld [vmem:[%s14577_s1 + $0x1b64] ss:$16 sps:$4 sm:$0xff]  }
 0x334   :  { %7115 = vmatprep.subr.bf16.mxu0 %v10854_v11  ;;  %7931 = vmatprep.subr.bf16.mxu1 %v10857_v12  ;;  %v10943_v11 = vld [vmem:[%s14577_s1 + $0x1b6c] ss:$16 sps:$4 sm:$0xff]   ;;  %v10938_v12 = vld [vmem:[%s14577_s1 + $0x1b60] ss:$16 sps:$4 sm:$0xff]  }
 0x337   :  { %7116 = vmatpush1.bf16.msra.mxu0 %v10852_v13  ;;  %7932 = vmatpush1.bf16.msra.mxu1 %v10855_v14  ;;  %v10941_v13 = vld [vmem:[%s14577_s1 + $0x1b68] ss:$16 sps:$4 sm:$0xff]   ;;  %v10946_v14 = vld [vmem:[%s14577_s1 + $0x1b84] ss:$16 sps:$4 sm:$0xff]  }
 0x338   :  { %7117 = vmatprep.subr.bf16.mxu0 %v10861_v15  ;;  %7933 = vmatprep.subr.bf16.mxu1 %v10864_v16  ;;  %v10949_v15 = vld [vmem:[%s14577_s1 + $0x1b8c] ss:$16 sps:$4 sm:$0xff]   ;;  %v10944_v16 = vld [vmem:[%s14577_s1 + $0x1b80] ss:$16 sps:$4 sm:$0xff]  }
 0x33b   :  { %7118 = vmatpush1.bf16.msra.mxu0 %v10859_v17  ;;  %7934 = vmatpush1.bf16.msra.mxu1 %v10862_v18  ;;  %v10947_v17 = vld [vmem:[%s14577_s1 + $0x1b88] ss:$16 sps:$4 sm:$0xff]   ;;  %v10952_v18 = vld [vmem:[%s14577_s1 + $0x1ba4] ss:$16 sps:$4 sm:$0xff]  }
 0x33c   :  { %7119 = vmatprep.subr.bf16.mxu0 %v10868_v19  ;;  %7935 = vmatprep.subr.bf16.mxu1 %v10871_v20  ;;  %v10955_v19 = vld [vmem:[%s14577_s1 + $0x1bac] ss:$16 sps:$4 sm:$0xff]   ;;  %v10950_v20 = vld [vmem:[%s14577_s1 + $0x1ba0] ss:$16 sps:$4 sm:$0xff]  }
 0x33f   :  { %7120 = vmatpush1.bf16.msra.mxu0 %v10866_v21  ;;  %7936 = vmatpush1.bf16.msra.mxu1 %v10869_v22  ;;  %v10953_v21 = vld [vmem:[%s14577_s1 + $0x1ba8] ss:$16 sps:$4 sm:$0xff]   ;;  %v10959_v22 = vld [vmem:[%s14577_s1 + $0x1bc4] ss:$16 sps:$4 sm:$0xff]  }
 0x340   :  { %7140 = vmatprep.subr.bf16.mxu0 %v10874_v23  ;;  %7956 = vmatprep.subr.bf16.mxu1 %v10877_v24  ;;  %v10962_v23 = vld [vmem:[%s14577_s1 + $0x1bcc] ss:$16 sps:$4 sm:$0xff]   ;;  %v10957_v24 = vld [vmem:[%s14577_s1 + $0x1bc0] ss:$16 sps:$4 sm:$0xff]  }
 0x342   :  { %7122 = vmatmul.mubr.bf16.vlgmr.msra.gmra.mrb[0].mxu0 %v8294_v25  ;;  %7938 = vmatmul.mubr.bf16.vlgmr.msra.gmra.mrb[0].mxu1 %v8294_v25  ;;  %v10960_v25 = vld [vmem:[%s14577_s1 + $0x1bc8] ss:$16 sps:$4 sm:$0xff]  }
 0x343   :  { %7141 = vmatpush1.bf16.msra.mxu0 %v10872_v27  ;;  %7957 = vmatpush1.bf16.msra.mxu1 %v10875_v28  ;;  %v10969_v27 = vld [vmem:[%s14577_s1 + $0x1bec] ss:$16 sps:$4 sm:$0xff]   ;;  %v10964_v28 = vld [vmem:[%s14577_s1 + $0x1be0] ss:$16 sps:$4 sm:$0xff]  }
 0x344   :  { %7142 = vmatprep.subr.bf16.mxu0 %v10880_v29  ;;  %7958 = vmatprep.subr.bf16.mxu1 %v10883_v30  ;;  %v10967_v29 = vld [vmem:[%s14577_s1 + $0x1be8] ss:$16 sps:$4 sm:$0xff]   ;;  %v10972_v30 = vld [vmem:[%s14577_s1 + $0x1c04] ss:$16 sps:$4 sm:$0xff]  }
 0x345   :  { %7131 = vmatprep.mubr.bf16.mxu0 %v8327_v31  ;;  %7947 = vmatprep.mubr.bf16.mxu1 %v8327_v31  ;;  %v10975_v31 = vld [vmem:[%s14577_s1 + $0x1c0c] ss:$16 sps:$4 sm:$0xff]  }
 0x347   :  { %7143 = vmatpush1.bf16.msra.mxu0 %v10878_v32  ;;  %7959 = vmatpush1.bf16.msra.mxu1 %v10881_v33  ;;  %v8296_v32 = vcombine.low %v13931_v37, %v13936_v38  ;;  %v58_v33 = vld [vmem:[%s14578_s0 + $0x168] sm:$0xff] }
 0x348   :  { %7144 = vmatprep.subr.bf16.mxu0 %v10886_v34  ;;  %7960 = vmatprep.subr.bf16.mxu1 %v10889_v35  ;;  %v10970_v34 = vld [vmem:[%s14577_s1 + $0x1c00] ss:$16 sps:$4 sm:$0xff]   ;;  %v10973_v35 = vld [vmem:[%s14577_s1 + $0x1c08] ss:$16 sps:$4 sm:$0xff]   ;;  %v10981_v37 = vld [vmem:[%s14577_s1 + $0x1c2c] ss:$16 sps:$4 sm:$0xff]   ;;  %v8329_v38 = vcombine.high %v58_v33, %v58_v33 }
 0x34a   :  { %7132 = vmatmul.mubr.bf16.gmra.mrb[4].mxu0 %v8326_v36  ;;  %7948 = vmatmul.mubr.bf16.gmra.mrb[4].mxu1 %v8326_v36  ;;  %v10978_v36 = vld [vmem:[%s14577_s1 + $0x1c24] ss:$16 sps:$4 sm:$0xff]  }
 0x34b   :  { %7145 = vmatpush1.bf16.msra.mxu0 %v10884_v39  ;;  %7961 = vmatpush1.bf16.msra.mxu1 %v10887_v40  ;;  %v10976_v39 = vld [vmem:[%s14577_s1 + $0x1c20] ss:$16 sps:$4 sm:$0xff]   ;;  %v10979_v40 = vld [vmem:[%s14577_s1 + $0x1c28] ss:$16 sps:$4 sm:$0xff]  }
 0x34c   :  { %7146 = vmatprep.subr.bf16.mxu0 %v10892_v41  ;;  %7962 = vmatprep.subr.bf16.mxu1 %v10895_v42  ;;  %v10984_v41 = vld [vmem:[%s14577_s1 + $0x1c44] ss:$16 sps:$4 sm:$0xff]   ;;  %v10987_v42 = vld [vmem:[%s14577_s1 + $0x1c4c] ss:$16 sps:$4 sm:$0xff]  }
 0x34d   :  { %7172 = vmatprep.mubr.bf16.mxu0 %v8297_v43  ;;  %7988 = vmatprep.mubr.bf16.mxu1 %v8297_v43  ;;  %v8328_v43 = vcombine.low %v58_v33, %v58_v33  ;;  %v11064_v33 = vld [vmem:[%s14577_s1 + $0x1de4] ss:$16 sps:$4 sm:$0xff]  }
 0x34f   :  { %7147 = vmatpush1.bf16.msra.mxu0 %v10890_v46  ;;  %7963 = vmatpush1.bf16.msra.mxu1 %v10893_v44  ;;  %v14140_v46 = vld [vmem:[%s14578_s0 + $0x70] sm:$0xff] }
 0x350   :  { %7148 = vmatprep.subr.bf16.mxu0 %v10898_v45  ;;  %7964 = vmatprep.subr.bf16.mxu1 %v10901_v47  ;;  %v14145_v44 = vld [vmem:[%s14578_s0 + $0xf0] sm:$0xff]  ;;  %v10985_v47 = vld [vmem:[%s14577_s1 + $0x1c48] ss:$16 sps:$4 sm:$0xff]  }
 0x351   :  { %v10982_v45 = vld [vmem:[%s14577_s1 + $0x1c40] ss:$16 sps:$4 sm:$0xff]  }
 0x353   :  { %7149 = vmatpush1.bf16.msra.mxu0 %v10896_v48  ;;  %7965 = vmatpush1.bf16.msra.mxu1 %v10899_v49  ;;  %v10990_v48 = vld [vmem:[%s14577_s1 + $0x1c64] ss:$16 sps:$4 sm:$0xff]   ;;  %v10993_v49 = vld [vmem:[%s14577_s1 + $0x1c6c] ss:$16 sps:$4 sm:$0xff]  }
 0x354   :  { %7150 = vmatprep.subr.bf16.mxu0 %v10904_v50  ;;  %7966 = vmatprep.subr.bf16.mxu1 %v10907_v53  ;;  %v8299_v50 = vcombine.high %v14140_v46, %v14145_v44  ;;  %v10988_v53 = vld [vmem:[%s14577_s1 + $0x1c60] ss:$16 sps:$4 sm:$0xff]  }
 0x357   :  { %7151 = vmatpush1.bf16.msra.mxu0 %v10902_v51  ;;  %7967 = vmatpush1.bf16.msra.mxu1 %v10905_v52  ;;  %v10991_v51 = vld [vmem:[%s14577_s1 + $0x1c68] ss:$16 sps:$4 sm:$0xff]   ;;  %v10996_v52 = vld [vmem:[%s14577_s1 + $0x1c84] ss:$16 sps:$4 sm:$0xff]  }
 0x358   :  { %7152 = vmatprep.subr.bf16.mxu0 %v10910_v54  ;;  %7968 = vmatprep.subr.bf16.mxu1 %v10913_v55  ;;  %v10999_v54 = vld [vmem:[%s14577_s1 + $0x1c8c] ss:$16 sps:$4 sm:$0xff]   ;;  %v10994_v55 = vld [vmem:[%s14577_s1 + $0x1c80] ss:$16 sps:$4 sm:$0xff]  }
 0x35b   :  { %7153 = vmatpush1.bf16.msra.mxu0 %v10908_v56  ;;  %7969 = vmatpush1.bf16.msra.mxu1 %v10911_v57  ;;  %v10997_v56 = vld [vmem:[%s14577_s1 + $0x1c88] ss:$16 sps:$4 sm:$0xff]   ;;  %v11002_v57 = vld [vmem:[%s14577_s1 + $0x1ca4] ss:$16 sps:$4 sm:$0xff]  }
 0x35c   :  { %7154 = vmatprep.subr.bf16.mxu0 %v10916_v60  ;;  %7970 = vmatprep.subr.bf16.mxu1 %v10919_v58  ;;  %v11005_v60 = vld [vmem:[%s14577_s1 + $0x1cac] ss:$16 sps:$4 sm:$0xff]   ;;  %v11000_v58 = vld [vmem:[%s14577_s1 + $0x1ca0] ss:$16 sps:$4 sm:$0xff]  }
 0x35f   :  { %7155 = vmatpush1.bf16.msra.mxu0 %v10914_v59  ;;  %7971 = vmatpush1.bf16.msra.mxu1 %v10917_v61  ;;  %v11003_v59 = vld [vmem:[%s14577_s1 + $0x1ca8] ss:$16 sps:$4 sm:$0xff]   ;;  %v11008_v61 = vld [vmem:[%s14577_s1 + $0x1cc4] ss:$16 sps:$4 sm:$0xff]  }
 0x360   :  { %7156 = vmatprep.subr.bf16.mxu0 %v10922_v62  ;;  %7972 = vmatprep.subr.bf16.mxu1 %v10925_v63  ;;  %v11011_v62 = vld [vmem:[%s14577_s1 + $0x1ccc] ss:$16 sps:$4 sm:$0xff]   ;;  %v11006_v63 = vld [vmem:[%s14577_s1 + $0x1cc0] ss:$16 sps:$4 sm:$0xff]  }
 0x363   :  { %7157 = vmatpush1.bf16.msra.mxu0 %v10920_v0  ;;  %7973 = vmatpush1.bf16.msra.mxu1 %v10923_v3  ;;  %v11009_v0 = vld [vmem:[%s14577_s1 + $0x1cc8] ss:$16 sps:$4 sm:$0xff]   ;;  %v11014_v3 = vld [vmem:[%s14577_s1 + $0x1ce4] ss:$16 sps:$4 sm:$0xff]  }
 0x364   :  { %7158 = vmatprep.subr.bf16.mxu0 %v10928_v1  ;;  %7974 = vmatprep.subr.bf16.mxu1 %v10931_v2  ;;  %v11017_v1 = vld [vmem:[%s14577_s1 + $0x1cec] ss:$16 sps:$4 sm:$0xff]   ;;  %v11012_v2 = vld [vmem:[%s14577_s1 + $0x1ce0] ss:$16 sps:$4 sm:$0xff]  }
 0x367   :  { %7159 = vmatpush1.bf16.msra.mxu0 %v10926_v4  ;;  %7975 = vmatpush1.bf16.msra.mxu1 %v10929_v5  ;;  %v11015_v4 = vld [vmem:[%s14577_s1 + $0x1ce8] ss:$16 sps:$4 sm:$0xff]   ;;  %v11020_v5 = vld [vmem:[%s14577_s1 + $0x1d04] ss:$16 sps:$4 sm:$0xff]  }
 0x368   :  { %7160 = vmatprep.subr.bf16.mxu0 %v10934_v6  ;;  %7976 = vmatprep.subr.bf16.mxu1 %v10937_v7  ;;  %v11023_v6 = vld [vmem:[%s14577_s1 + $0x1d0c] ss:$16 sps:$4 sm:$0xff]   ;;  %v11018_v7 = vld [vmem:[%s14577_s1 + $0x1d00] ss:$16 sps:$4 sm:$0xff]  }
 0x36b   :  { %7161 = vmatpush1.bf16.msra.mxu0 %v10932_v8  ;;  %7977 = vmatpush1.bf16.msra.mxu1 %v10935_v9  ;;  %v11021_v8 = vld [vmem:[%s14577_s1 + $0x1d08] ss:$16 sps:$4 sm:$0xff]   ;;  %v11026_v9 = vld [vmem:[%s14577_s1 + $0x1d24] ss:$16 sps:$4 sm:$0xff]  }
 0x36c   :  { %7162 = vmatprep.subr.bf16.mxu0 %v10940_v10  ;;  %7978 = vmatprep.subr.bf16.mxu1 %v10943_v11  ;;  %v11029_v10 = vld [vmem:[%s14577_s1 + $0x1d2c] ss:$16 sps:$4 sm:$0xff]   ;;  %v11024_v11 = vld [vmem:[%s14577_s1 + $0x1d20] ss:$16 sps:$4 sm:$0xff]  }
 0x36f   :  { %7163 = vmatpush1.bf16.msra.mxu0 %v10938_v12  ;;  %7979 = vmatpush1.bf16.msra.mxu1 %v10941_v13  ;;  %v11027_v12 = vld [vmem:[%s14577_s1 + $0x1d28] ss:$16 sps:$4 sm:$0xff]   ;;  %v11032_v13 = vld [vmem:[%s14577_s1 + $0x1d44] ss:$16 sps:$4 sm:$0xff]  }
 0x370   :  { %7164 = vmatprep.subr.bf16.mxu0 %v10946_v14  ;;  %7980 = vmatprep.subr.bf16.mxu1 %v10949_v15  ;;  %v11035_v14 = vld [vmem:[%s14577_s1 + $0x1d4c] ss:$16 sps:$4 sm:$0xff]   ;;  %v11030_v15 = vld [vmem:[%s14577_s1 + $0x1d40] ss:$16 sps:$4 sm:$0xff]  }
 0x373   :  { %7165 = vmatpush1.bf16.msra.mxu0 %v10944_v16  ;;  %7981 = vmatpush1.bf16.msra.mxu1 %v10947_v17  ;;  %v11033_v16 = vld [vmem:[%s14577_s1 + $0x1d48] ss:$16 sps:$4 sm:$0xff]   ;;  %v11038_v17 = vld [vmem:[%s14577_s1 + $0x1d64] ss:$16 sps:$4 sm:$0xff]  }
 0x374   :  { %7166 = vmatprep.subr.bf16.mxu0 %v10952_v18  ;;  %7982 = vmatprep.subr.bf16.mxu1 %v10955_v19  ;;  %v11041_v18 = vld [vmem:[%s14577_s1 + $0x1d6c] ss:$16 sps:$4 sm:$0xff]   ;;  %v11036_v19 = vld [vmem:[%s14577_s1 + $0x1d60] ss:$16 sps:$4 sm:$0xff]  }
 0x377   :  { %7167 = vmatpush1.bf16.msra.mxu0 %v10950_v20  ;;  %7983 = vmatpush1.bf16.msra.mxu1 %v10953_v21  ;;  %v11039_v20 = vld [vmem:[%s14577_s1 + $0x1d68] ss:$16 sps:$4 sm:$0xff]   ;;  %v11044_v21 = vld [vmem:[%s14577_s1 + $0x1d84] ss:$16 sps:$4 sm:$0xff]  }
 0x378   :  { %7168 = vmatprep.subr.bf16.mxu0 %v10959_v22  ;;  %7984 = vmatprep.subr.bf16.mxu1 %v10962_v23  ;;  %v11047_v22 = vld [vmem:[%s14577_s1 + $0x1d8c] ss:$16 sps:$4 sm:$0xff]   ;;  %v11042_v23 = vld [vmem:[%s14577_s1 + $0x1d80] ss:$16 sps:$4 sm:$0xff]  }
 0x37b   :  { %7169 = vmatpush1.bf16.msra.mxu0 %v10957_v24  ;;  %7985 = vmatpush1.bf16.msra.mxu1 %v10960_v25  ;;  %v11045_v24 = vld [vmem:[%s14577_s1 + $0x1d88] ss:$16 sps:$4 sm:$0xff]   ;;  %v11050_v25 = vld [vmem:[%s14577_s1 + $0x1da4] ss:$16 sps:$4 sm:$0xff]  }
 0x37c   :  { %7170 = vmatprep.subr.bf16.mxu0 %v10966_v26  ;;  %7986 = vmatprep.subr.bf16.mxu1 %v10969_v27  ;;  %v11053_v26 = vld [vmem:[%s14577_s1 + $0x1dac] ss:$16 sps:$4 sm:$0xff]   ;;  %v11048_v27 = vld [vmem:[%s14577_s1 + $0x1da0] ss:$16 sps:$4 sm:$0xff]  }
 0x37f   :  { %7171 = vmatpush1.bf16.msra.mxu0 %v10964_v28  ;;  %7987 = vmatpush1.bf16.msra.mxu1 %v10967_v29  ;;  %v11051_v28 = vld [vmem:[%s14577_s1 + $0x1da8] ss:$16 sps:$4 sm:$0xff]   ;;  %v11057_v29 = vld [vmem:[%s14577_s1 + $0x1dc4] ss:$16 sps:$4 sm:$0xff]  }
 0x380   :  { %7191 = vmatprep.subr.bf16.mxu0 %v10972_v30  ;;  %8007 = vmatprep.subr.bf16.mxu1 %v10975_v31  ;;  %v11060_v30 = vld [vmem:[%s14577_s1 + $0x1dcc] ss:$16 sps:$4 sm:$0xff]   ;;  %v11055_v31 = vld [vmem:[%s14577_s1 + $0x1dc0] ss:$16 sps:$4 sm:$0xff]  }
 0x382   :  { %7173 = vmatmul.mubr.bf16.vlgmr.msra.gmra.mrb[0].mxu0 %v8296_v32  ;;  %7989 = vmatmul.mubr.bf16.vlgmr.msra.gmra.mrb[0].mxu1 %v8296_v32  ;;  %v11058_v32 = vld [vmem:[%s14577_s1 + $0x1dc8] ss:$16 sps:$4 sm:$0xff]  }
 0x383   :  { %7192 = vmatpush1.bf16.msra.mxu0 %v10970_v34  ;;  %8008 = vmatpush1.bf16.msra.mxu1 %v10973_v35  ;;  %v11067_v34 = vld [vmem:[%s14577_s1 + $0x1dec] ss:$16 sps:$4 sm:$0xff]   ;;  %v11062_v35 = vld [vmem:[%s14577_s1 + $0x1de0] ss:$16 sps:$4 sm:$0xff]  }
 0x384   :  { %7193 = vmatprep.subr.bf16.mxu0 %v10978_v36  ;;  %8009 = vmatprep.subr.bf16.mxu1 %v10981_v37  ;;  %v11065_v36 = vld [vmem:[%s14577_s1 + $0x1de8] ss:$16 sps:$4 sm:$0xff]   ;;  %v11070_v37 = vld [vmem:[%s14577_s1 + $0x1e04] ss:$16 sps:$4 sm:$0xff]  }
 0x385   :  { %7182 = vmatprep.mubr.bf16.mxu0 %v8329_v38  ;;  %7998 = vmatprep.mubr.bf16.mxu1 %v8329_v38  ;;  %v11073_v38 = vld [vmem:[%s14577_s1 + $0x1e0c] ss:$16 sps:$4 sm:$0xff]  }
 0x387   :  { %7194 = vmatpush1.bf16.msra.mxu0 %v10976_v39  ;;  %8010 = vmatpush1.bf16.msra.mxu1 %v10979_v40  ;;  %v8298_v39 = vcombine.low %v14140_v46, %v14145_v44  ;;  %v59_v40 = vld [vmem:[%s14578_s0 + $0x170] sm:$0xff]  ;;  %v11079_v46 = vld [vmem:[%s14577_s1 + $0x1e2c] ss:$16 sps:$4 sm:$0xff]  }
 0x388   :  { %7195 = vmatprep.subr.bf16.mxu0 %v10984_v41  ;;  %8011 = vmatprep.subr.bf16.mxu1 %v10987_v42  ;;  %v11068_v41 = vld [vmem:[%s14577_s1 + $0x1e00] ss:$16 sps:$4 sm:$0xff]   ;;  %v11071_v42 = vld [vmem:[%s14577_s1 + $0x1e08] ss:$16 sps:$4 sm:$0xff]   ;;  %v8331_v44 = vcombine.high %v59_v40, %v59_v40 }
 0x38a   :  { %7183 = vmatmul.mubr.bf16.gmra.mrb[4].mxu0 %v8328_v43  ;;  %7999 = vmatmul.mubr.bf16.gmra.mrb[4].mxu1 %v8328_v43  ;;  %v11076_v43 = vld [vmem:[%s14577_s1 + $0x1e24] ss:$16 sps:$4 sm:$0xff]  }
 0x38b   :  { %7196 = vmatpush1.bf16.msra.mxu0 %v10982_v45  ;;  %8012 = vmatpush1.bf16.msra.mxu1 %v10985_v47  ;;  %v11074_v45 = vld [vmem:[%s14577_s1 + $0x1e20] ss:$16 sps:$4 sm:$0xff]   ;;  %v11077_v47 = vld [vmem:[%s14577_s1 + $0x1e28] ss:$16 sps:$4 sm:$0xff]  }
 0x38c   :  { %7197 = vmatprep.subr.bf16.mxu0 %v10990_v48  ;;  %8013 = vmatprep.subr.bf16.mxu1 %v10993_v49  ;;  %v11082_v48 = vld [vmem:[%s14577_s1 + $0x1e44] ss:$16 sps:$4 sm:$0xff]   ;;  %v11085_v49 = vld [vmem:[%s14577_s1 + $0x1e4c] ss:$16 sps:$4 sm:$0xff]  }
 0x38d   :  { %7223 = vmatprep.mubr.bf16.mxu0 %v8299_v50  ;;  %8039 = vmatprep.mubr.bf16.mxu1 %v8299_v50  ;;  %v8330_v50 = vcombine.low %v59_v40, %v59_v40  ;;  %v11162_v40 = vld [vmem:[%s14577_s1 + $0x1fe4] ss:$16 sps:$4 sm:$0xff]  }
 0x38f   :  { %7198 = vmatpush1.bf16.msra.mxu0 %v10988_v53  ;;  %8014 = vmatpush1.bf16.msra.mxu1 %v10991_v51  ;;  %v14349_v53 = vld [vmem:[%s14578_s0 + $0x78] sm:$0xff] }
 0x390   :  { %7199 = vmatprep.subr.bf16.mxu0 %v10996_v52  ;;  %8015 = vmatprep.subr.bf16.mxu1 %v10999_v54  ;;  %v14354_v51 = vld [vmem:[%s14578_s0 + $0xf8] sm:$0xff]  ;;  %v11080_v52 = vld [vmem:[%s14577_s1 + $0x1e40] ss:$16 sps:$4 sm:$0xff]  }
 0x391   :  { %v11083_v54 = vld [vmem:[%s14577_s1 + $0x1e48] ss:$16 sps:$4 sm:$0xff]  }
 0x393   :  { %7200 = vmatpush1.bf16.msra.mxu0 %v10994_v55  ;;  %8016 = vmatpush1.bf16.msra.mxu1 %v10997_v56  ;;  %v11088_v55 = vld [vmem:[%s14577_s1 + $0x1e64] ss:$16 sps:$4 sm:$0xff]   ;;  %v11091_v56 = vld [vmem:[%s14577_s1 + $0x1e6c] ss:$16 sps:$4 sm:$0xff]  }
 0x394   :  { %7201 = vmatprep.subr.bf16.mxu0 %v11002_v57  ;;  %8017 = vmatprep.subr.bf16.mxu1 %v11005_v60  ;;  %v8301_v57 = vcombine.high %v14349_v53, %v14354_v51  ;;  %v11086_v60 = vld [vmem:[%s14577_s1 + $0x1e60] ss:$16 sps:$4 sm:$0xff]  }
 0x397   :  { %7202 = vmatpush1.bf16.msra.mxu0 %v11000_v58  ;;  %8018 = vmatpush1.bf16.msra.mxu1 %v11003_v59  ;;  %v11089_v58 = vld [vmem:[%s14577_s1 + $0x1e68] ss:$16 sps:$4 sm:$0xff]   ;;  %v11094_v59 = vld [vmem:[%s14577_s1 + $0x1e84] ss:$16 sps:$4 sm:$0xff]  }
 0x398   :  { %7203 = vmatprep.subr.bf16.mxu0 %v11008_v61  ;;  %8019 = vmatprep.subr.bf16.mxu1 %v11011_v62  ;;  %v11097_v61 = vld [vmem:[%s14577_s1 + $0x1e8c] ss:$16 sps:$4 sm:$0xff]   ;;  %v11092_v62 = vld [vmem:[%s14577_s1 + $0x1e80] ss:$16 sps:$4 sm:$0xff]  }
 0x39b   :  { %7204 = vmatpush1.bf16.msra.mxu0 %v11006_v63  ;;  %8020 = vmatpush1.bf16.msra.mxu1 %v11009_v0  ;;  %v11095_v63 = vld [vmem:[%s14577_s1 + $0x1e88] ss:$16 sps:$4 sm:$0xff]   ;;  %v11100_v0 = vld [vmem:[%s14577_s1 + $0x1ea4] ss:$16 sps:$4 sm:$0xff]  }
 0x39c   :  { %7205 = vmatprep.subr.bf16.mxu0 %v11014_v3  ;;  %8021 = vmatprep.subr.bf16.mxu1 %v11017_v1  ;;  %v11103_v3 = vld [vmem:[%s14577_s1 + $0x1eac] ss:$16 sps:$4 sm:$0xff]   ;;  %v11098_v1 = vld [vmem:[%s14577_s1 + $0x1ea0] ss:$16 sps:$4 sm:$0xff]  }
 0x39f   :  { %7206 = vmatpush1.bf16.msra.mxu0 %v11012_v2  ;;  %8022 = vmatpush1.bf16.msra.mxu1 %v11015_v4  ;;  %v11101_v2 = vld [vmem:[%s14577_s1 + $0x1ea8] ss:$16 sps:$4 sm:$0xff]   ;;  %v11106_v4 = vld [vmem:[%s14577_s1 + $0x1ec4] ss:$16 sps:$4 sm:$0xff]  }
 0x3a0   :  { %7207 = vmatprep.subr.bf16.mxu0 %v11020_v5  ;;  %8023 = vmatprep.subr.bf16.mxu1 %v11023_v6  ;;  %v11109_v5 = vld [vmem:[%s14577_s1 + $0x1ecc] ss:$16 sps:$4 sm:$0xff]   ;;  %v11104_v6 = vld [vmem:[%s14577_s1 + $0x1ec0] ss:$16 sps:$4 sm:$0xff]  }
 0x3a3   :  { %7208 = vmatpush1.bf16.msra.mxu0 %v11018_v7  ;;  %8024 = vmatpush1.bf16.msra.mxu1 %v11021_v8  ;;  %v11107_v7 = vld [vmem:[%s14577_s1 + $0x1ec8] ss:$16 sps:$4 sm:$0xff]   ;;  %v11112_v8 = vld [vmem:[%s14577_s1 + $0x1ee4] ss:$16 sps:$4 sm:$0xff]  }
 0x3a4   :  { %7209 = vmatprep.subr.bf16.mxu0 %v11026_v9  ;;  %8025 = vmatprep.subr.bf16.mxu1 %v11029_v10  ;;  %v11115_v9 = vld [vmem:[%s14577_s1 + $0x1eec] ss:$16 sps:$4 sm:$0xff]   ;;  %v11110_v10 = vld [vmem:[%s14577_s1 + $0x1ee0] ss:$16 sps:$4 sm:$0xff]  }
 0x3a7   :  { %7210 = vmatpush1.bf16.msra.mxu0 %v11024_v11  ;;  %8026 = vmatpush1.bf16.msra.mxu1 %v11027_v12  ;;  %v11113_v11 = vld [vmem:[%s14577_s1 + $0x1ee8] ss:$16 sps:$4 sm:$0xff]   ;;  %v11118_v12 = vld [vmem:[%s14577_s1 + $0x1f04] ss:$16 sps:$4 sm:$0xff]  }
 0x3a8   :  { %7211 = vmatprep.subr.bf16.mxu0 %v11032_v13  ;;  %8027 = vmatprep.subr.bf16.mxu1 %v11035_v14  ;;  %v11121_v13 = vld [vmem:[%s14577_s1 + $0x1f0c] ss:$16 sps:$4 sm:$0xff]   ;;  %v11116_v14 = vld [vmem:[%s14577_s1 + $0x1f00] ss:$16 sps:$4 sm:$0xff]  }
 0x3ab   :  { %7212 = vmatpush1.bf16.msra.mxu0 %v11030_v15  ;;  %8028 = vmatpush1.bf16.msra.mxu1 %v11033_v16  ;;  %v11119_v15 = vld [vmem:[%s14577_s1 + $0x1f08] ss:$16 sps:$4 sm:$0xff]   ;;  %v11124_v16 = vld [vmem:[%s14577_s1 + $0x1f24] ss:$16 sps:$4 sm:$0xff]  }
 0x3ac   :  { %7213 = vmatprep.subr.bf16.mxu0 %v11038_v17  ;;  %8029 = vmatprep.subr.bf16.mxu1 %v11041_v18  ;;  %v11127_v17 = vld [vmem:[%s14577_s1 + $0x1f2c] ss:$16 sps:$4 sm:$0xff]   ;;  %v11122_v18 = vld [vmem:[%s14577_s1 + $0x1f20] ss:$16 sps:$4 sm:$0xff]  }
 0x3af   :  { %7214 = vmatpush1.bf16.msra.mxu0 %v11036_v19  ;;  %8030 = vmatpush1.bf16.msra.mxu1 %v11039_v20  ;;  %v11125_v19 = vld [vmem:[%s14577_s1 + $0x1f28] ss:$16 sps:$4 sm:$0xff]   ;;  %v11130_v20 = vld [vmem:[%s14577_s1 + $0x1f44] ss:$16 sps:$4 sm:$0xff]  }
 0x3b0   :  { %7215 = vmatprep.subr.bf16.mxu0 %v11044_v21  ;;  %8031 = vmatprep.subr.bf16.mxu1 %v11047_v22  ;;  %v11133_v21 = vld [vmem:[%s14577_s1 + $0x1f4c] ss:$16 sps:$4 sm:$0xff]   ;;  %v11128_v22 = vld [vmem:[%s14577_s1 + $0x1f40] ss:$16 sps:$4 sm:$0xff]  }
 0x3b3   :  { %7216 = vmatpush1.bf16.msra.mxu0 %v11042_v23  ;;  %8032 = vmatpush1.bf16.msra.mxu1 %v11045_v24  ;;  %v11131_v23 = vld [vmem:[%s14577_s1 + $0x1f48] ss:$16 sps:$4 sm:$0xff]   ;;  %v11136_v24 = vld [vmem:[%s14577_s1 + $0x1f64] ss:$16 sps:$4 sm:$0xff]  }
 0x3b4   :  { %7217 = vmatprep.subr.bf16.mxu0 %v11050_v25  ;;  %8033 = vmatprep.subr.bf16.mxu1 %v11053_v26  ;;  %v11139_v25 = vld [vmem:[%s14577_s1 + $0x1f6c] ss:$16 sps:$4 sm:$0xff]   ;;  %v11134_v26 = vld [vmem:[%s14577_s1 + $0x1f60] ss:$16 sps:$4 sm:$0xff]  }
 0x3b7   :  { %7218 = vmatpush1.bf16.msra.mxu0 %v11048_v27  ;;  %8034 = vmatpush1.bf16.msra.mxu1 %v11051_v28  ;;  %v11137_v27 = vld [vmem:[%s14577_s1 + $0x1f68] ss:$16 sps:$4 sm:$0xff]   ;;  %v11142_v28 = vld [vmem:[%s14577_s1 + $0x1f84] ss:$16 sps:$4 sm:$0xff]  }
 0x3b8   :  { %7219 = vmatprep.subr.bf16.mxu0 %v11057_v29  ;;  %8035 = vmatprep.subr.bf16.mxu1 %v11060_v30  ;;  %v11145_v29 = vld [vmem:[%s14577_s1 + $0x1f8c] ss:$16 sps:$4 sm:$0xff]   ;;  %v11140_v30 = vld [vmem:[%s14577_s1 + $0x1f80] ss:$16 sps:$4 sm:$0xff]  }
 0x3bb   :  { %7220 = vmatpush1.bf16.msra.mxu0 %v11055_v31  ;;  %8036 = vmatpush1.bf16.msra.mxu1 %v11058_v32  ;;  %v11143_v31 = vld [vmem:[%s14577_s1 + $0x1f88] ss:$16 sps:$4 sm:$0xff]   ;;  %v11148_v32 = vld [vmem:[%s14577_s1 + $0x1fa4] ss:$16 sps:$4 sm:$0xff]  }
 0x3bc   :  { %7221 = vmatprep.subr.bf16.mxu0 %v11064_v33  ;;  %8037 = vmatprep.subr.bf16.mxu1 %v11067_v34  ;;  %v11151_v33 = vld [vmem:[%s14577_s1 + $0x1fac] ss:$16 sps:$4 sm:$0xff]   ;;  %v11146_v34 = vld [vmem:[%s14577_s1 + $0x1fa0] ss:$16 sps:$4 sm:$0xff]  }
 0x3bf   :  { %7222 = vmatpush1.bf16.msra.mxu0 %v11062_v35  ;;  %8038 = vmatpush1.bf16.msra.mxu1 %v11065_v36  ;;  %v11149_v35 = vld [vmem:[%s14577_s1 + $0x1fa8] ss:$16 sps:$4 sm:$0xff]   ;;  %v11156_v36 = vld [vmem:[%s14577_s1 + $0x1fc4] ss:$16 sps:$4 sm:$0xff]  }
 0x3c0   :  { %7242 = vmatprep.subr.bf16.mxu0 %v11070_v37  ;;  %8058 = vmatprep.subr.bf16.mxu1 %v11073_v38  ;;  %v11159_v37 = vld [vmem:[%s14577_s1 + $0x1fcc] ss:$16 sps:$4 sm:$0xff]   ;;  %v11154_v38 = vld [vmem:[%s14577_s1 + $0x1fc0] ss:$16 sps:$4 sm:$0xff]  }
 0x3c2   :  { %7224 = vmatmul.mubr.bf16.vlgmr.msra.gmra.mrb[0].mxu0 %v8298_v39  ;;  %8040 = vmatmul.mubr.bf16.vlgmr.msra.gmra.mrb[0].mxu1 %v8298_v39  ;;  %v11157_v39 = vld [vmem:[%s14577_s1 + $0x1fc8] ss:$16 sps:$4 sm:$0xff]  }
 0x3c3   :  { %7243 = vmatpush1.bf16.msra.mxu0 %v11068_v41  ;;  %8059 = vmatpush1.bf16.msra.mxu1 %v11071_v42  ;;  %v11165_v41 = vld [vmem:[%s14577_s1 + $0x1fec] ss:$16 sps:$4 sm:$0xff]   ;;  %v11160_v42 = vld [vmem:[%s14577_s1 + $0x1fe0] ss:$16 sps:$4 sm:$0xff]  }
 0x3c4   :  { %7244 = vmatprep.subr.bf16.mxu0 %v11076_v43  ;;  %8060 = vmatprep.subr.bf16.mxu1 %v11079_v46  ;;  %v11163_v43 = vld [vmem:[%s14577_s1 + $0x1fe8] ss:$16 sps:$4 sm:$0xff]  }
 0x3c5   :  { %7233 = vmatprep.mubr.bf16.mxu0 %v8331_v44  ;;  %8049 = vmatprep.mubr.bf16.mxu1 %v8331_v44  ;;  %v60_v46 = vld [vmem:[%s14578_s0 + $0x178] sm:$0xff]  ;;  %v8300_v44 = vcombine.low %v14349_v53, %v14354_v51 }
 0x3c7   :  { %7245 = vmatpush1.bf16.msra.mxu0 %v11074_v45  ;;  %8061 = vmatpush1.bf16.msra.mxu1 %v11077_v47  ;;  %v8333_v45 = vcombine.high %v60_v46, %v60_v46  ;;  %v8332_v47 = vcombine.low %v60_v46, %v60_v46 }
 0x3c8   :  { %7246 = vmatprep.subr.bf16.mxu0 %v11082_v48  ;;  %8062 = vmatprep.subr.bf16.mxu1 %v11085_v49  ;;  %v11168_v48 = vmov 1966171168  }
 0x3c9   :  { %v8160_v49 = vunpack.c.l.s4 %v11168_v48 }
 0x3ca   :  { %7234 = vmatmul.mubr.bf16.gmra.mrb[4].mxu0 %v8330_v50  ;;  %8050 = vmatmul.mubr.bf16.gmra.mrb[4].mxu1 %v8330_v50  ;;  %v8162_v50 = vlaneseq }
 0x3cb   :  { %7247 = vmatpush1.bf16.msra.mxu0 %v11080_v52  ;;  %8063 = vmatpush1.bf16.msra.mxu1 %v11083_v54 }
 0x3cc   :  { %7248 = vmatprep.subr.bf16.mxu0 %v11088_v55  ;;  %8064 = vmatprep.subr.bf16.mxu1 %v11091_v56  ;;  %v8161_v55 = vunpack.c.0.s8 %v8160_v49  ;;  %v8163_v56 = vshrl.u32 %v8162_v50, 7  ;;  %vm8184_vm0 = vcmp.lt.s32.totalorder %v8162_v50, 512 }
 0x3cd   :  { %7274 = vmatprep.mubr.bf16.mxu0 %v8301_v57  ;;  %8090 = vmatprep.mubr.bf16.mxu1 %v8301_v57 }
 0x3cf   :  { %7249 = vmatpush1.bf16.msra.mxu0 %v11086_v60  ;;  %8065 = vmatpush1.bf16.msra.mxu1 %v11089_v58 }
 0x3d0   :  { %7250 = vmatprep.subr.bf16.mxu0 %v11094_v59  ;;  %8066 = vmatprep.subr.bf16.mxu1 %v11097_v61 }
 0x3d3   :  { %7251 = vmatpush1.bf16.msra.mxu0 %v11092_v62  ;;  %8067 = vmatpush1.bf16.msra.mxu1 %v11095_v63 }
 0x3d4   :  { %7252 = vmatprep.subr.bf16.mxu0 %v11100_v0  ;;  %8068 = vmatprep.subr.bf16.mxu1 %v11103_v3 }
 0x3d7   :  { %7253 = vmatpush1.bf16.msra.mxu0 %v11098_v1  ;;  %8069 = vmatpush1.bf16.msra.mxu1 %v11101_v2 }
 0x3d8   :  { %7254 = vmatprep.subr.bf16.mxu0 %v11106_v4  ;;  %8070 = vmatprep.subr.bf16.mxu1 %v11109_v5 }
 0x3db   :  { %7255 = vmatpush1.bf16.msra.mxu0 %v11104_v6  ;;  %8071 = vmatpush1.bf16.msra.mxu1 %v11107_v7 }
 0x3dc   :  { %7256 = vmatprep.subr.bf16.mxu0 %v11112_v8  ;;  %8072 = vmatprep.subr.bf16.mxu1 %v11115_v9 }
 0x3df   :  { %7257 = vmatpush1.bf16.msra.mxu0 %v11110_v10  ;;  %8073 = vmatpush1.bf16.msra.mxu1 %v11113_v11 }
 0x3e0   :  { %7258 = vmatprep.subr.bf16.mxu0 %v11118_v12  ;;  %8074 = vmatprep.subr.bf16.mxu1 %v11121_v13 }
 0x3e3   :  { %7259 = vmatpush1.bf16.msra.mxu0 %v11116_v14  ;;  %8075 = vmatpush1.bf16.msra.mxu1 %v11119_v15  ;;  %v14550_v15 = vsub.s32 %v8161_v55, %v8163_v56 }
 0x3e4   :  { %7260 = vmatprep.subr.bf16.mxu0 %v11124_v16  ;;  %8076 = vmatprep.subr.bf16.mxu1 %v11127_v17 }
 0x3e7   :  { %7261 = vmatpush1.bf16.msra.mxu0 %v11122_v18  ;;  %8077 = vmatpush1.bf16.msra.mxu1 %v11125_v19 }
 0x3e8   :  { %7262 = vmatprep.subr.bf16.mxu0 %v11130_v20  ;;  %8078 = vmatprep.subr.bf16.mxu1 %v11133_v21 }
 0x3eb   :  { %7263 = vmatpush1.bf16.msra.mxu0 %v11128_v22  ;;  %8079 = vmatpush1.bf16.msra.mxu1 %v11131_v23 }
 0x3ec   :  { %7264 = vmatprep.subr.bf16.mxu0 %v11136_v24  ;;  %8080 = vmatprep.subr.bf16.mxu1 %v11139_v25 }
 0x3ef   :  { %7265 = vmatpush1.bf16.msra.mxu0 %v11134_v26  ;;  %8081 = vmatpush1.bf16.msra.mxu1 %v11137_v27 }
 0x3f0   :  { %7266 = vmatprep.subr.bf16.mxu0 %v11142_v28  ;;  %8082 = vmatprep.subr.bf16.mxu1 %v11145_v29 }
 0x3f3   :  { %7267 = vmatpush1.bf16.msra.mxu0 %v11140_v30  ;;  %8083 = vmatpush1.bf16.msra.mxu1 %v11143_v31 }
 0x3f4   :  { %7268 = vmatprep.subr.bf16.mxu0 %v11148_v32  ;;  %8084 = vmatprep.subr.bf16.mxu1 %v11151_v33 }
 0x3f7   :  { %7269 = vmatpush1.bf16.msra.mxu0 %v11146_v34  ;;  %8085 = vmatpush1.bf16.msra.mxu1 %v11149_v35 }
 0x3f8   :  { %7270 = vmatprep.subr.bf16.mxu0 %v11156_v36  ;;  %8086 = vmatprep.subr.bf16.mxu1 %v11159_v37 }
 0x3fb   :  { %7271 = vmatpush1.bf16.msra.mxu0 %v11154_v38  ;;  %8087 = vmatpush1.bf16.msra.mxu1 %v11157_v39 }
 0x3fc   :  { %7272 = vmatprep.subr.bf16.mxu0 %v11162_v40  ;;  %8088 = vmatprep.subr.bf16.mxu1 %v11165_v41 }
 0x3ff   :  { %7273 = vmatpush1.bf16.msra.mxu0 %v11160_v42  ;;  %8089 = vmatpush1.bf16.msra.mxu1 %v11163_v43 }
 0x402   :  { %7275 = vmatmul.mubr.bf16.vlgmr.msra.gmra.mrb[0].mxu0 %v8300_v44  ;;  %8091 = vmatmul.mubr.bf16.vlgmr.msra.gmra.mrb[0].mxu1 %v8300_v44 }
 0x403   :  { %7284 = vmatprep.mubr.bf16.mxu0 %v8333_v45  ;;  %8100 = vmatprep.mubr.bf16.mxu1 %v8333_v45 }
 0x40a   :  { %7285 = vmatmul.mubr.bf16.gmra.mrb[4].mxu0 %v8332_v47  ;;  %8101 = vmatmul.mubr.bf16.gmra.mrb[4].mxu1 %v8332_v47 }
 0x4d5   :  { %v7276_v52 = vpop.f32.mrb[0].mxu0  ;;  %v8092_v54 = vpop.f32.mrb[0].mxu1 }
 0x4d6   :  { %8109 = vst [vmem:[%s14579_s2] sm:$0xff] %v7276_v52  ;;  %8111 = vst [vmem:[%s14579_s2 + $0x10] sm:$0xff] %v8092_v54  ;;  %v7278_v53 = vpop.f32.mrb[1].mxu0  ;;  %v8094_v51 = vpop.f32.mrb[1].mxu1  ;;  %v8187_v57 = vmul.f32 %v7276_v52, %v7276_v52  ;;  %v8189_v60 = vmul.f32 %v8092_v54, %v8092_v54 }
 0x4d7   :  { %8110 = vst [vmem:[%s14579_s2 + $0x8] sm:$0xff] %v7278_v53  ;;  %v8188_v58 = vmul.f32 %v7278_v53, %v7278_v53  ;;  %8112 = vst [vmem:[%s14579_s2 + $0x18] sm:$0xff] %v8094_v51  ;;  %v8190_v59 = vmul.f32 %v8094_v51, %v8094_v51  ;;  %v7280_v61 = vpop.f32.mrb[2].mxu0  ;;  %v8096_v62 = vpop.f32.mrb[2].mxu1 }
 0x4d8   :  { %8113 = vst [vmem:[%s14579_s2 + $0x20] sm:$0xff] %v7280_v61  ;;  %v8121_v63 = vadd.f32 %v7280_v61, %v7276_v52  ;;  %v8191_v0 = vmul.f32 %v7280_v61, %v7280_v61  ;;  %8115 = vst [vmem:[%s14579_s2 + $0x30] sm:$0xff] %v8096_v62  ;;  %v8137_v3 = vadd.f32 %v8096_v62, %v8092_v54  ;;  %v7282_v2 = vpop.f32.mrb[3].mxu0  ;;  %v8098_v4 = vpop.f32.mrb[3].mxu1 }
 0x4d9   :  { %v8193_v1 = vmul.f32 %v8096_v62, %v8096_v62  ;;  %8114 = vst [vmem:[%s14579_s2 + $0x28] sm:$0xff] %v7282_v2  ;;  %v8129_v5 = vadd.f32 %v7282_v2, %v7278_v53  ;;  %v8192_v6 = vmul.f32 %v7282_v2, %v7282_v2  ;;  %8116 = vst [vmem:[%s14579_s2 + $0x38] sm:$0xff] %v8098_v4 }
 0x4da   :  { %v8145_v7 = vadd.f32 %v8098_v4, %v8094_v51  ;;  %v8194_v8 = vmul.f32 %v8098_v4, %v8098_v4  ;;  %v8199_v9 = vadd.f32 %v8191_v0, %v8187_v57 }
 0x4db   :  { %v8215_v10 = vadd.f32 %v8193_v1, %v8189_v60  ;;  %v8207_v11 = vadd.f32 %v8192_v6, %v8188_v58 }
 0x4dc   :  { %v8223_v12 = vadd.f32 %v8194_v8, %v8190_v59 }
 0x4dd   :  { %v7286_v13 = vpop.f32.mrb[4].mxu0  ;;  %v8102_v14 = vpop.f32.mrb[4].mxu1 }
 0x4de   :  { %8117 = vst [vmem:[%s14579_s2 + $0x40] sm:$0xff] %v7286_v13  ;;  %v8122_v16 = vadd.f32 %v8121_v63, %v7286_v13  ;;  %v8195_v17 = vmul.f32 %v7286_v13, %v7286_v13  ;;  %8119 = vst [vmem:[%s14579_s2 + $0x50] sm:$0xff] %v8102_v14  ;;  %v8138_v18 = vadd.f32 %v8137_v3, %v8102_v14  ;;  %v7288_v20 = vpop.f32.mrb[5].mxu0  ;;  %v8104_v21 = vpop.f32.mrb[5].mxu1 }
 0x4df   :  { %v8197_v19 = vmul.f32 %v8102_v14, %v8102_v14  ;;  %8118 = vst [vmem:[%s14579_s2 + $0x48] sm:$0xff] %v7288_v20  ;;  %v8130_v22 = vadd.f32 %v8129_v5, %v7288_v20  ;;  %v8196_v23 = vmul.f32 %v7288_v20, %v7288_v20  ;;  %8120 = vst [vmem:[%s14579_s2 + $0x58] sm:$0xff] %v8104_v21  ;;  %v7290_v26 = vpop.f32.mrb[6].mxu0  ;;  %v8106_v27 = vpop.f32.mrb[6].mxu1 }
 0x4e0   :  { %v8146_v24 = vadd.f32 %v8145_v7, %v8104_v21  ;;  %v8198_v25 = vmul.f32 %v8104_v21, %v8104_v21  ;;  %v8123_v28 = vrot.slane %v8122_v16, 4  ;;  %v8200_v29 = vadd.f32 %v8199_v9, %v8195_v17  ;;  %v7291_v32 = vpop.f32.mrb[7].mxu0  ;;  %v8107_v33 = vpop.f32.mrb[7].mxu1 }
 0x4e1   :  { %v8139_v30 = vrot.slane %v8138_v18, 4  ;;  %v8216_v31 = vadd.f32 %v8215_v10, %v8197_v19  ;;  %v8131_v34 = vrot.slane %v8130_v22, 4  ;;  %v8208_v35 = vadd.f32 %v8207_v11, %v8196_v23 }
 0x4e2   :  { %v8147_v36 = vrot.slane %v8146_v24, 4  ;;  %v8224_v37 = vadd.f32 %v8223_v12, %v8198_v25  ;;  %v8124_v38 = vadd.f32 %v8123_v28, %v8122_v16  ;;  %v8201_v39 = vrot.slane %v8200_v29, 4 }
 0x4e3   :  { %v8140_v40 = vadd.f32 %v8139_v30, %v8138_v18  ;;  %v8217_v41 = vrot.slane %v8216_v31, 4  ;;  %v8132_v42 = vadd.f32 %v8131_v34, %v8130_v22  ;;  %v8209_v43 = vrot.slane %v8208_v35, 4 }
 0x4e4   :  { %v8148_v46 = vadd.f32 %v8147_v36, %v8146_v24  ;;  %v8225_v44 = vrot.slane %v8224_v37, 4  ;;  %v8125_v45 = vrot.slane %v8124_v38, 2  ;;  %v8202_v47 = vadd.f32 %v8201_v39, %v8200_v29 }
 0x4e5   :  { %v8141_v48 = vrot.slane %v8140_v40, 2  ;;  %v8218_v49 = vadd.f32 %v8217_v41, %v8216_v31  ;;  %v8133_v52 = vrot.slane %v8132_v42, 2  ;;  %v8210_v54 = vadd.f32 %v8209_v43, %v8208_v35 }
 0x4e6   :  { %v8149_v53 = vrot.slane %v8148_v46, 2  ;;  %v8226_v51 = vadd.f32 %v8225_v44, %v8224_v37  ;;  %v8126_v55 = vadd.f32 %v8125_v45, %v8124_v38  ;;  %v8203_v56 = vrot.slane %v8202_v47, 2 }
 0x4e7   :  { %v8142_v57 = vadd.f32 %v8141_v48, %v8140_v40  ;;  %v8219_v60 = vrot.slane %v8218_v49, 2  ;;  %v8134_v58 = vadd.f32 %v8133_v52, %v8132_v42  ;;  %v8211_v59 = vrot.slane %v8210_v54, 2 }
 0x4e8   :  { %v8150_v61 = vadd.f32 %v8149_v53, %v8148_v46  ;;  %v8227_v62 = vrot.slane %v8226_v51, 2  ;;  %v8127_v63 = vrot.slane %v8126_v55, 1  ;;  %v8204_v0 = vadd.f32 %v8203_v56, %v8202_v47 }
 0x4e9   :  { %v8143_v3 = vrot.slane %v8142_v57, 1  ;;  %v8220_v1 = vadd.f32 %v8219_v60, %v8218_v49  ;;  %v8135_v2 = vrot.slane %v8134_v58, 1  ;;  %v8212_v4 = vadd.f32 %v8211_v59, %v8210_v54 }
 0x4ea   :  { %v8151_v5 = vrot.slane %v8150_v61, 1  ;;  %v8228_v6 = vadd.f32 %v8227_v62, %v8226_v51  ;;  %v8128_v7 = vadd.f32 %v8127_v63, %v8126_v55  ;;  %v8205_v8 = vrot.slane %v8204_v0, 1 }
 0x4eb   :  { %v8144_v9 = vadd.f32 %v8143_v3, %v8142_v57  ;;  %v8221_v10 = vrot.slane %v8220_v1, 1  ;;  %v8136_v11 = vadd.f32 %v8135_v2, %v8134_v58  ;;  %v8213_v12 = vrot.slane %v8212_v4, 1 }
 0x4ec   :  { %v8152_v13 = vadd.f32 %v8151_v5, %v8150_v61  ;;  %v8229_v14 = vrot.slane %v8228_v6, 1  ;;  %v8206_v16 = vadd.f32 %v8205_v8, %v8204_v0 }
 0x4ed   :  { %v8222_v17 = vadd.f32 %v8221_v10, %v8220_v1  ;;  %v8157_v18 = vcombine.low %v8128_v7, %v8136_v11  ;;  %v8214_v19 = vadd.f32 %v8213_v12, %v8212_v4 }
 0x4ee   :  { %v8158_v20 = vcombine.low %v8144_v9, %v8152_v13  ;;  %v8230_v21 = vadd.f32 %v8229_v14, %v8228_v6 }
 0x4ef   :  { %v8165_v22 = vrot.slane %v8157_v18, %v14550_v15  ;;  %v8235_v23 = vcombine.low %v8206_v16, %v8214_v19 }
 0x4f0   :  { %v8172_v24 = vrot.slane %v8158_v20, %v14550_v15  ;;  %v8236_v25 = vcombine.low %v8222_v17, %v8230_v21 }
 0x4f1   :  { %v8243_v26 = vrot.slane %v8235_v23, %v14550_v15 }
 0x4f2   :  { %v8173_v27 = vcombine.low %v8165_v22, %v8172_v24  ;;  %v8250_v28 = vrot.slane %v8236_v25, %v14550_v15 }
 0x4f4   :  { %v8180_v29 = vrot.slane %v8173_v27, %v14550_v15  ;;  %v8251_v30 = vcombine.low %v8243_v26, %v8250_v28 }
 0x4f6   :  { %8186 = vst.msk [vmem:[%s14580_s3] ss:$2 sm:$0xf] %vm8184_vm0, %v8180_v29  ;;  %v8258_v31 = vrot.slane %v8251_v30, %v14550_v15 }
 0x4f8   :  { %9358 = vst.msk [vmem:[%s14580_s3 + $0x1] ss:$2 sm:$0xf] %vm8184_vm0, %v8258_v31 }

</bundles_post_ra>
